<compile_context>
chip_gen: v6e
topology: v6e:2x2x1
jax: 0.10.0
libtpu: 0.0.40
codegen_flags: <defaults>
</compile_context>

<pallas_src>
import copy
import functools
import math
from collections import defaultdict
from types import SimpleNamespace

import numpy as np

import jax
import jax.numpy as jnp
from jax import lax
from jax.experimental import pallas as pl
from jax.experimental.pallas import tpu as pltpu


# Portable scoped-VMEM limit (> default 16/32 MiB, < v7x's 64 MiB physical).
# TODO(synk): tune per generation (~100 MiB on v5e/v6e, ~48-56 MiB on v7x).
_VMEM_LIMIT = 48 * 1024 * 1024


# ----------------------------------------------------------------------------
# small helpers
# ----------------------------------------------------------------------------

def _layer_norm(x, g, b, eps=1e-12):
    mu = jnp.mean(x, axis=-1, keepdims=True)
    var = jnp.mean((x - mu) ** 2, axis=-1, keepdims=True)
    return (x - mu) * lax.rsqrt(var + eps) * g + b


def _const_spec(shape, single_buffer):
    """BlockSpec for a weight that is identical at every grid step."""
    nd = len(shape)
    if single_buffer:
        return pl.BlockSpec(shape, lambda *args: (0,) * nd,
                            pipeline_mode=pl.Buffered(1))
    return pl.BlockSpec(shape, lambda *args: (0,) * nd)


# ----------------------------------------------------------------------------
# Pallas kernels
# ----------------------------------------------------------------------------

def _sca_layers_kernel(x_ref, mask_ref,
                       wq_ref, bq_ref, wk_ref, bk_ref, wv_ref, bv_ref,
                       wo_ref, bo_ref, ln1g_ref, ln1b_ref,
                       w1_ref, b1_ref, w2_ref, b2_ref, ln2g_ref, ln2b_ref,
                       out_ref, *, num_heads, num_layers):
    """Both SCALayers (post-LN MHA transformer blocks) fused, one batch row.

    Weights arrive bf16 (stored bf16 host-side); activations stay f32 outside
    the MXU, matmuls are bf16 x bf16 with f32 accumulation.
    """
    x = x_ref[0].astype(jnp.float32)                       # (L, D)
    L, D = x.shape
    hd = D // num_heads
    scale = 1.0 / math.sqrt(hd)
    # additive attention-mask bias: 0 for valid tokens, -1e9 for padding
    mask_bias = (mask_ref[...].astype(jnp.float32) - 1.0) * 1e9   # (1, 1, L)

    for layer in range(num_layers):                        # static: layers fused in one launch
        xb = x.astype(jnp.bfloat16)
        q = jnp.dot(xb, wq_ref[layer], preferred_element_type=jnp.float32) + bq_ref[layer]
        k = jnp.dot(xb, wk_ref[layer], preferred_element_type=jnp.float32) + bk_ref[layer]
        v = jnp.dot(xb, wv_ref[layer], preferred_element_type=jnp.float32) + bv_ref[layer]

        # batched per-head contraction instead of H narrow-K dots + concat
        q3 = q.reshape(L, num_heads, hd).astype(jnp.bfloat16)
        k3 = k.reshape(L, num_heads, hd).astype(jnp.bfloat16)
        v3 = v.reshape(L, num_heads, hd).astype(jnp.bfloat16)
        s = jnp.einsum('qhd,khd->hqk', q3, k3,
                       preferred_element_type=jnp.float32) * scale         # (H, L, L)
        s = s + mask_bias
        s = s - jnp.max(s, axis=-1, keepdims=True)
        e = jnp.exp(s)
        inv = pl.reciprocal(jnp.sum(e, axis=-1, keepdims=True), approx=True)
        p = (e * inv).astype(jnp.bfloat16)
        ctx = jnp.einsum('hqk,khd->qhd', p, v3,
                         preferred_element_type=jnp.float32)               # (L, H, hd)
        ctx = ctx.reshape(L, D).astype(jnp.bfloat16)
        attn_out = jnp.dot(ctx, wo_ref[layer],
                           preferred_element_type=jnp.float32) + bo_ref[layer]

        h1 = _layer_norm(x + attn_out, ln1g_ref[layer], ln1b_ref[layer])
        ff = jax.nn.gelu(jnp.dot(h1.astype(jnp.bfloat16), w1_ref[layer],
                                 preferred_element_type=jnp.float32) + b1_ref[layer])
        ff = jnp.dot(ff.astype(jnp.bfloat16), w2_ref[layer],
                     preferred_element_type=jnp.float32) + b2_ref[layer]
        x = _layer_norm(h1 + ff, ln2g_ref[layer], ln2b_ref[layer])
        # TODO(synk): for L >= ~1024 tile the attention over KV blocks (online
        # softmax) and the FFN over L-row chunks to fit v7x's 64 MiB VMEM.

    out_ref[0] = x


def _sca_pointer_kernel(x_ref, wq_ref, bq_ref, wk_ref, bk_ref, out_ref,
                        *, total_heads, head_dim):
    """All three GlobalPointer-style heads fused (concatenated bf16 projections)."""
    x = x_ref[0].astype(jnp.bfloat16)                      # (L, D)
    L = x.shape[0]
    q = jnp.dot(x, wq_ref[...], preferred_element_type=jnp.float32) + bq_ref[...]
    k = jnp.dot(x, wk_ref[...], preferred_element_type=jnp.float32) + bk_ref[...]
    q3 = q.reshape(L, total_heads, head_dim).astype(jnp.bfloat16)
    k3 = k.reshape(L, total_heads, head_dim).astype(jnp.bfloat16)
    scale = 1.0 / math.sqrt(head_dim)
    s = jnp.einsum('qhd,khd->hqk', q3, k3,
                   preferred_element_type=jnp.float32) * scale             # (TH, L, L)
    out_ref[0] = s
    # TODO(synk): at realistic L, emit a lane-dense (multiple of 128) last dim;
    # at toy L=16 the output stores are necessarily masked.


def _gp_loss_kernel(idx_ref, logits_ref, out_ref, *, P, NH, num_half):
    """GPLinker sparse multilabel CE (mask_zero=True), one (batch, head) per step.

    idx_ref   : SMEM (B*NH*P*2,) scalar-prefetched (i, j) positive index pairs
                (pair (0,0) = padding, per mask_zero convention).
    logits_ref: VMEM (1, 1, L, L) block for this (batch, head).
    out_ref   : (1, 1) accumulator over the head axis of weighted
                (pos_loss + neg_loss); heads < num_half get weight 0.5
                (s_o_head / s_o_tail), the rest weight 1.0 (tail_to_head).
    """
    BIG = 1e12
    b = pl.program_id(0)
    h = pl.program_id(1)
    L = logits_ref.shape[2]
    lg = logits_ref[0, 0]                                  # (L, L)
    riota = lax.broadcasted_iota(jnp.int32, (L, L), 0)
    ciota = lax.broadcasted_iota(jnp.int32, (L, L), 1)
    lane = lax.broadcasted_iota(jnp.int32, (1, L), 1)

    # all_loss = logsumexp([logits with flat index 0 masked, 0.0])
    masked = jnp.where(jnp.logical_and(riota == 0, ciota == 0), -BIG, lg)
    m_all = jnp.max(masked, axis=1, keepdims=True)                         # (L, 1)
    m_all = jnp.maximum(jnp.max(m_all, axis=0, keepdims=True), 0.0)        # (1, 1)
    s_all = jnp.sum(jnp.exp(masked - m_all), axis=1, keepdims=True)        # (L, 1)
    s_all = jnp.sum(s_all, axis=0, keepdims=True) + jnp.exp(-m_all)        # (1, 1)
    all_loss = m_all + jnp.log(s_all)

    base_h = (b * NH + h) * (P * 2)

    # online logsumexp over the P positive entries (SMEM indices + dynamic
    # row loads; no (B,H,P,N) one-hot).  Unrolled so the LLO scheduler can
    # interleave the scalar index reads with the row loads.
    def body(p_i, carry):
        m_neg, s_neg, m_g, s_g = carry
        i0 = idx_ref[base_h + 2 * p_i]
        i1 = idx_ref[base_h + 2 * p_i + 1]
        row = logits_ref[0, 0, pl.ds(i0, 1), :]                            # (1, L)
        val = jnp.sum(jnp.where(lane == i1, row, 0.0), axis=1, keepdims=True)
        valid = jnp.logical_not(jnp.logical_and(i0 == 0, i1 == 0))

        xn = -val                                                          # pos_loss branch
        m_n2 = jnp.maximum(m_neg, xn)
        s_n2 = s_neg * jnp.exp(m_neg - m_n2) + jnp.exp(xn - m_n2)
        m_g2 = jnp.maximum(m_g, val)                                       # aux branch
        s_g2 = s_g * jnp.exp(m_g - m_g2) + jnp.exp(val - m_g2)

        m_neg = jnp.where(valid, m_n2, m_neg)
        s_neg = jnp.where(valid, s_n2, s_neg)
        m_g = jnp.where(valid, m_g2, m_g)
        s_g = jnp.where(valid, s_g2, s_g)
        return m_neg, s_neg, m_g, s_g

    init = (jnp.zeros((1, 1), jnp.float32),                # appended 0 for pos_loss
            jnp.ones((1, 1), jnp.float32),
            jnp.full((1, 1), -BIG, jnp.float32),           # empty positives for aux
            jnp.zeros((1, 1), jnp.float32))
    m_neg, s_neg, m_g, s_g = lax.fori_loop(0, P, body, init, unroll=True)

    pos_loss = m_neg + jnp.log(s_neg)
    ratio = s_g * jnp.exp(m_g - all_loss)                  # = exp(lse(pos) - all_loss)
    aux = jnp.clip(1.0 - ratio, 1e-10, 1.0)
    neg_loss = all_loss + jnp.log(aux)

    w = jnp.where(h < num_half, jnp.float32(0.5), jnp.float32(1.0))
    contrib = w * (pos_loss + neg_loss)

    @pl.when(h == 0)
    def _():
        out_ref[...] = contrib

    @pl.when(h > 0)
    def _():
        out_ref[...] = out_ref[...] + contrib
    # TODO(synk): on v7x, emit per-head outputs instead of accumulating so the
    # head axis can also be "parallel" across the two TensorCores.


# ----------------------------------------------------------------------------
# Pallas wrappers
# ----------------------------------------------------------------------------

def sca_layers_forward(x, p, attention_mask, num_heads):
    B, L, D = x.shape
    NL = p['wq'].shape[0]
    F = p['w1'].shape[2]
    kernel = functools.partial(_sca_layers_kernel, num_heads=num_heads, num_layers=NL)

    flops = int(B * NL * (8 * L * D * D + 4 * L * L * D + 4 * L * D * F))
    trans = int(B * NL * (num_heads * L * L + L * F))
    bytes_acc = int(2 * B * L * D * 4
                    + NL * (4 * D * D + 2 * D * F) * 2        # bf16 weights
                    + NL * (8 * D + 2 * F) * 4)               # f32 biases / ln
    cost = pl.CostEstimate(flops=flops, transcendentals=trans, bytes_accessed=bytes_acc)

    def run(single_buffer):
        w = lambda shape: _const_spec(shape, single_buffer)
        return pl.pallas_call(
            kernel,
            out_shape=jax.ShapeDtypeStruct((B, L, D), jnp.float32),
            grid=(B,),
            in_specs=[
                pl.BlockSpec((1, L, D), lambda b: (b, 0, 0)),
                pl.BlockSpec((1, 1, L), lambda b: (b, 0, 0)),
                w((NL, D, D)), w((NL, 1, D)),
                w((NL, D, D)), w((NL, 1, D)),
                w((NL, D, D)), w((NL, 1, D)),
                w((NL, D, D)), w((NL, 1, D)),
                w((NL, 1, D)), w((NL, 1, D)),
                w((NL, D, F)), w((NL, 1, F)),
                w((NL, F, D)), w((NL, 1, D)),
                w((NL, 1, D)), w((NL, 1, D)),
            ],
            out_specs=pl.BlockSpec((1, L, D), lambda b: (b, 0, 0)),
            compiler_params=pltpu.CompilerParams(
                dimension_semantics=("parallel",),
                vmem_limit_bytes=_VMEM_LIMIT),
            cost_estimate=cost,
        )(x, attention_mask,
          p['wq'], p['bq'], p['wk'], p['bk'], p['wv'], p['bv'],
          p['wo'], p['bo'], p['ln1_g'], p['ln1_b'],
          p['w1'], p['b1'], p['w2'], p['b2'], p['ln2_g'], p['ln2_b'])

    try:
        return run(True)
    except Exception:
        # Fallback if this jax build rejects pl.Buffered(1) single-buffering.
        return run(False)


def sca_pointer_forward(x, p, total_heads, head_dim):
    B, L, D = x.shape
    HD = total_heads * head_dim
    kernel = functools.partial(_sca_pointer_kernel,
                               total_heads=total_heads, head_dim=head_dim)

    flops = int(B * (4 * L * D * HD + 2 * total_heads * L * L * head_dim))
    bytes_acc = int(B * L * D * 4 + 2 * D * HD * 2 + 2 * HD * 4
                    + B * total_heads * L * L * 4)
    cost = pl.CostEstimate(flops=flops, transcendentals=0, bytes_accessed=bytes_acc)

    def run(single_buffer):
        w = lambda shape: _const_spec(shape, single_buffer)
        return pl.pallas_call(
            kernel,
            out_shape=jax.ShapeDtypeStruct((B, total_heads, L, L), jnp.float32),
            grid=(B,),
            in_specs=[
                pl.BlockSpec((1, L, D), lambda b: (b, 0, 0)),
                w((D, HD)), w((1, HD)),
                w((D, HD)), w((1, HD)),
            ],
            out_specs=pl.BlockSpec((1, total_heads, L, L), lambda b: (b, 0, 0, 0)),
            compiler_params=pltpu.CompilerParams(
                dimension_semantics=("parallel",),
                vmem_limit_bytes=_VMEM_LIMIT),
            cost_estimate=cost,
        )(x, p['wq'], p['bq'], p['wk'], p['bk'])

    try:
        return run(True)
    except Exception:
        return run(False)


def gp_multilabel_loss_fused(scores, gt_all, link_heads):
    """Fused multilabel_categorical_crossentropy_v2 over all 3*link_heads heads.

    Computes mean_b [ 0.5*(L_head + L_tail) + L_t2h ] directly from the
    un-sliced (B, 3*lh, L, L) score tensor (no intermediate HBM slices).
    """
    B, NH, L, _ = scores.shape
    P = gt_all.shape[2]
    idx = jnp.asarray(np.asarray(gt_all, dtype=np.int32).reshape(-1))
    kernel = functools.partial(_gp_loss_kernel, P=P, NH=NH, num_half=2 * link_heads)
    per_b = pl.pallas_call(
        kernel,
        out_shape=jax.ShapeDtypeStruct((B, 1), jnp.float32),
        grid_spec=pltpu.PrefetchScalarGridSpec(
            num_scalar_prefetch=1,
            grid=(B, NH),
            in_specs=[pl.BlockSpec((1, 1, L, L), lambda b, h, idx_ref: (b, h, 0, 0))],
            out_specs=pl.BlockSpec((1, 1), lambda b, h, idx_ref: (b, 0)),
        ),
        compiler_params=pltpu.CompilerParams(
            dimension_semantics=("parallel", "arbitrary"),
            vmem_limit_bytes=_VMEM_LIMIT),
    )(idx, scores)
    return jnp.mean(per_b)


# ----------------------------------------------------------------------------
# Host-side relation building / decoding (direct numpy port of the reference)
# ----------------------------------------------------------------------------

def build_relation(relations, entities, link_heads):
    batch_size = len(relations)
    max_num_pos = 0
    gt_head_ = [[] for _ in range(batch_size)]
    gt_tail_ = [[] for _ in range(batch_size)]
    batch_all_relations = [[] for _ in range(batch_size)]
    for b in range(batch_size):
        if len(entities[b]['start']) <= 2:
            entities[b] = {'end': [1, 1], 'label': [0, 0], 'start': [0, 0]}
        es = np.array(entities[b]['start'])
        ee = np.array(entities[b]['end']) - 1
        all_possible = set((i, j)
                           for i in range(len(entities[b]['label']))
                           for j in range(len(entities[b]['label']))
                           if entities[b]['label'][i] == 1 and entities[b]['label'][j] == 2)
        if len(all_possible) == 0:
            all_possible = {(0, 1)}
        positive = set()
        pos2types = defaultdict(list)
        for i, rel in enumerate(relations[b]['type']):
            if rel in [2, 3]:
                positive.add((relations[b]['head'][i], relations[b]['tail'][i]))
                pos2types[(relations[b]['head'][i], relations[b]['tail'][i])].append(rel)
        negative = all_possible - positive
        positive = set(i for i in positive if i in all_possible)
        reordered = list(positive) + list(negative)
        heads = np.array([r[0] for r in reordered])
        tails = np.array([r[1] for r in reordered])
        f_s, t_s = es[heads], es[tails]
        f_e, t_e = ee[heads], ee[tails]
        from_to_start = np.stack([f_s, t_s], axis=1)
        from_to_end = np.stack([f_e, t_e], axis=1)
        gt_head_[b] = [[]]
        gt_tail_[b] = [[]]
        positive = list(positive)
        for i in range(len(positive)):
            for rt in pos2types[positive[i]]:
                if rt == 2:
                    gt_head_[b][0].append(from_to_start[i])
                elif rt == 3:
                    gt_tail_[b][0].append(from_to_end[i])
        gt_head_[b][0] = (np.stack(gt_head_[b][0], 0) if len(gt_head_[b][0]) > 0
                          else np.array([[0, 0]]))
        gt_tail_[b][0] = (np.stack(gt_tail_[b][0], 0) if len(gt_tail_[b][0]) > 0
                          else np.array([[0, 0]]))
        max_num_pos = max(max_num_pos, len(positive), len(negative))
        batch_all_relations[b] = np.concatenate([from_to_start, from_to_end], axis=1)
    gt_head = np.zeros((batch_size, link_heads, max_num_pos, 2), dtype=np.int32)
    gt_tail = np.zeros((batch_size, link_heads, max_num_pos, 2), dtype=np.int32)
    for b in range(batch_size):
        for c in range(link_heads):
            gt_head[b, c, :len(gt_head_[b][c]), :] = gt_head_[b][c]
            gt_tail[b, c, :len(gt_tail_[b][c]), :] = gt_tail_[b][c]
    return gt_head, gt_tail, batch_all_relations


def build_ml_relation(relations, entities, link_heads):
    batch_size = len(relations)
    max_num_pos = 0
    gt_t2h_ = [[] for _ in range(batch_size)]
    batch_all_relations = [[] for _ in range(batch_size)]
    for b in range(batch_size):
        if len(entities[b]['start']) <= 2:
            entities[b] = {'end': [1, 1], 'label': [0, 0], 'start': [0, 0]}
        es = np.array(entities[b]['start'])
        ee = np.array(entities[b]['end']) - 1
        all_possible = set((i, j)
                           for i in range(len(entities[b]['label']))
                           for j in range(len(entities[b]['label']))
                           if entities[b]['label'][i] == entities[b]['label'][j] and i != j)
        if len(all_possible) == 0:
            all_possible = {(0, 1)}
        positive = set()
        for i, rel in enumerate(relations[b]['type']):
            if rel == 1:
                positive.add((relations[b]['head'][i], relations[b]['tail'][i]))
        negative = all_possible - positive
        positive = set(i for i in positive if i in all_possible)
        reordered = list(positive) + list(negative)
        heads = np.array([r[0] for r in reordered])
        tails = np.array([r[1] for r in reordered])
        f_s, t_s = es[heads], es[tails]
        f_e, t_e = ee[heads], ee[tails]
        from_end_to_start = np.stack([f_e, t_s], axis=1)
        gt_t2h_[b] = [from_end_to_start[:len(positive)]]
        max_num_pos = max(max_num_pos, len(positive), len(negative))
        batch_all_relations[b] = np.stack([f_s, t_s, f_e, t_e], axis=1)
    gt_t2h = np.zeros((batch_size, link_heads, max_num_pos, 2), dtype=np.int32)
    for b in range(batch_size):
        for c in range(link_heads):
            gt_t2h[b, c, :len(gt_t2h_[b][c]), :] = gt_t2h_[b][c]
    return gt_t2h, batch_all_relations


def get_predicted_relations(labels_all, batch_all_relations,
                            so_head_outputs, so_tail_outputs, threshold=0):
    so_head_outputs = np.asarray(so_head_outputs)
    so_tail_outputs = np.asarray(so_tail_outputs)
    pred_relations = []
    for b, each_relations in enumerate(batch_all_relations):
        if len(each_relations) < 1:
            continue
        each_relations = np.asarray(each_relations)
        batch_pred_result = []
        sh_indices = each_relations[:, 0]
        oh_indices = each_relations[:, 1]
        st_indices = each_relations[:, 2]
        ot_indices = each_relations[:, 3]
        p1s = zip(*np.where(so_head_outputs[b, :, sh_indices, oh_indices] > threshold))
        p2s = zip(*np.where(so_tail_outputs[b, :, st_indices, ot_indices] > threshold))
        for p_type in [2, 3]:
            ps = set(p1s) if p_type == 2 else set(p2s)
            for ind, p in ps:
                sh, oh = sh_indices[ind], oh_indices[ind]
                st, ot = st_indices[ind], ot_indices[ind]
                rel = {'head': (int(sh), int(st) + 1),
                       'head_type': int(labels_all[b, sh]),
                       'tail': (int(oh), int(ot) + 1),
                       'tail_type': int(labels_all[b, oh]),
                       'type': p_type}
                batch_pred_result.append(rel)
        pred_relations.append(batch_pred_result)
    return pred_relations


def get_predicted_ml_relations(labels_all, batch_all_relations,
                               tail_to_head_outputs, threshold=0):
    ttho = np.asarray(tail_to_head_outputs).copy()
    ttho[..., 0] = 0
    ttho = ttho.argmax(axis=-1)
    pred_relations = []
    for b, each_relations in enumerate(batch_all_relations):
        if len(each_relations) < 1:
            continue
        each_relations = np.asarray(each_relations)
        batch_pred_result = []
        sh_indices = each_relations[:, 0]
        oh_indices = each_relations[:, 1]
        st_indices = each_relations[:, 2]
        ot_indices = each_relations[:, 3]
        p1s = zip(*np.where(ttho[b, 0, st_indices] == oh_indices))
        ps = set(p1s)
        for (ind,) in ps:
            sh, oh = sh_indices[ind], oh_indices[ind]
            st, ot = st_indices[ind], ot_indices[ind]
            rel = {'head': (int(sh), int(st) + 1),
                   'head_type': int(labels_all[b, sh]),
                   'tail': (int(oh), int(ot) + 1),
                   'tail_type': int(labels_all[b, oh]),
                   'type': 1}
            batch_pred_result.append(rel)
        pred_relations.append(batch_pred_result)
    return pred_relations


# ----------------------------------------------------------------------------
# Model
# ----------------------------------------------------------------------------

class SCAMLREDecoderPallas:
    def __init__(self, config, key):
        config = copy.deepcopy(config)
        config.hidden_size += config.label_emb_size
        self.config = config
        self.link_heads = config.pointer_link_heads
        self.head_dim = config.hidden_size // config.num_attention_heads
        D, F = config.hidden_size, config.intermediate_size
        std = config.initializer_range

        def nrm(k, shape, dtype=jnp.float32):
            return (jax.random.normal(k, shape, jnp.float32) * std).astype(dtype)

        keys = iter(jax.random.split(key, 64))
        self.params = {}
        if config.label_emb_size > 0:
            self.params['entity_emb'] = nrm(next(keys), (3, config.label_emb_size))

        per_layer = []
        for _ in range(2):
            per_layer.append({
                # matmul weights stored bf16 (MXU operands); biases / LN stay f32
                'wq': nrm(next(keys), (D, D), jnp.bfloat16), 'bq': jnp.zeros((1, D), jnp.float32),
                'wk': nrm(next(keys), (D, D), jnp.bfloat16), 'bk': jnp.zeros((1, D), jnp.float32),
                'wv': nrm(next(keys), (D, D), jnp.bfloat16), 'bv': jnp.zeros((1, D), jnp.float32),
                'wo': nrm(next(keys), (D, D), jnp.bfloat16), 'bo': jnp.zeros((1, D), jnp.float32),
                'ln1_g': jnp.ones((1, D), jnp.float32), 'ln1_b': jnp.zeros((1, D), jnp.float32),
                'w1': nrm(next(keys), (D, F), jnp.bfloat16), 'b1': jnp.zeros((1, F), jnp.float32),
                'w2': nrm(next(keys), (F, D), jnp.bfloat16), 'b2': jnp.zeros((1, D), jnp.float32),
                'ln2_g': jnp.ones((1, D), jnp.float32), 'ln2_b': jnp.zeros((1, D), jnp.float32),
            })
        # stack the two SCALayers so a single kernel keeps x resident in VMEM
        self.params['layers'] = {k: jnp.stack([lp[k] for lp in per_layer], axis=0)
                                 for k in per_layer[0]}
        # TODO(synk): on v7x with very large D/F, stream one layer's weights at a
        # time (layer grid axis or inner emit_pipeline) instead of both resident.

        HD = self.link_heads * self.head_dim
        heads = {}
        for name in ('s_o_head', 's_o_tail', 'tail_to_head'):
            heads[name] = {
                'wq': nrm(next(keys), (D, HD), jnp.bfloat16), 'bq': jnp.zeros((1, HD), jnp.float32),
                'wk': nrm(next(keys), (D, HD), jnp.bfloat16), 'bk': jnp.zeros((1, HD), jnp.float32),
            }
        order = ('s_o_head', 's_o_tail', 'tail_to_head')
        # pre-fused (D, 3*HD) projections: one pointer kernel launch, wider MXU N
        self.params['pointer_fused'] = {
            k: jnp.concatenate([heads[n][k] for n in order], axis=-1)
            for k in ('wq', 'bq', 'wk', 'bk')
        }
        # TODO(synk): sca_rope==2 learnable rotary indices and sca_add_slm gating
        # (get_local_attention_mask) are not instantiated (config disables them).

    def forward(self, hidden_states, entities, relations, attention_mask=None, bbox=None):
        B, L, _ = hidden_states.shape
        if self.config.label_emb_size > 0:
            ent_labels = np.zeros((B, L), dtype=np.int32)
            for b in range(B):
                for i in range(len(entities[b]['start'])):
                    ent_labels[b, entities[b]['start'][i]:entities[b]['end'][i]] = \
                        entities[b]['label'][i]
            lab_emb = jnp.take(self.params['entity_emb'], jnp.asarray(ent_labels), axis=0)
            hidden_states = jnp.concatenate([hidden_states, lab_emb], axis=-1)

        if attention_mask is None:
            mask = jnp.ones((B, 1, L), jnp.float32)
        else:
            mask = jnp.asarray(attention_mask, jnp.float32).reshape(B, 1, L)

        # TODO(synk): sca_add_slm local attention bias (alpha) disabled by config.

        hidden_states = sca_layers_forward(hidden_states, self.params['layers'],
                                           mask, self.config.num_attention_heads)

        gt_head, gt_tail, batch_all_relations = build_relation(
            relations, entities, self.link_heads)
        gt_t2h, batch_ml_all_relations = build_ml_relation(
            relations, entities, self.link_heads)

        lh = self.link_heads
        scores = sca_pointer_forward(hidden_states, self.params['pointer_fused'],
                                     3 * lh, self.head_dim)

        # fused loss over all 3*lh heads, fed from the un-sliced score tensor
        P = max(gt_head.shape[2], gt_tail.shape[2], gt_t2h.shape[2])

        def _pad(g):
            out = np.zeros((B, lh, P, 2), dtype=np.int32)
            out[:, :, :g.shape[2], :] = g
            return out

        gt_all = np.concatenate([_pad(gt_head), _pad(gt_tail), _pad(gt_t2h)], axis=1)
        loss = gp_multilabel_loss_fused(scores, gt_all, lh)

        labels_all = np.zeros((B, L), dtype=np.int64)
        for b in range(B):
            starts = np.array(entities[b]['start'])
            ends = np.array(entities[b]['end']) - 1
            labs = np.array(entities[b]['label'])
            labels_all[b, starts] = labs
            labels_all[b, ends] = labs

        # host-side decoding uses a single device_get + numpy slices (no extra
        # device-side slicing of the score tensor)
        scores_np = np.asarray(jax.device_get(scores))
        so_head_np = scores_np[:, 0 * lh:1 * lh]
        so_tail_np = scores_np[:, 1 * lh:2 * lh]
        t2h_np = scores_np[:, 2 * lh:3 * lh]

        pred_relations = get_predicted_relations(labels_all, batch_all_relations,
                                                 so_head_np, so_tail_np)
        pred_ml = get_predicted_ml_relations(labels_all, batch_ml_all_relations, t2h_np)
        for i in range(len(pred_relations)):
            pred_relations[i] += pred_ml[i]

        so_head_outputs = scores[:, 0 * lh:1 * lh]
        return loss, so_head_outputs, pred_relations


# ----------------------------------------------------------------------------
# Main
# ----------------------------------------------------------------------------

if __name__ == "__main__":
    cfg = SimpleNamespace(
        hidden_size=24, label_emb_size=8, num_attention_heads=4,
        intermediate_size=64, pointer_link_heads=1,
        sca_rope=0, sca_add_slm=False, initializer_range=0.02,
    )
    B, L = 2, 16
    key = jax.random.PRNGKey(0)
    k_in, k_par = jax.random.split(key)
    hidden_states = jax.random.normal(k_in, (B, L, cfg.hidden_size), jnp.float32)

    entities = [
        {'start': [0, 3, 6, 9], 'end': [3, 6, 9, 12], 'label': [1, 2, 1, 2]},
        {'start': [1, 5, 8, 11, 13], 'end': [4, 8, 11, 13, 15], 'label': [1, 2, 2, 1, 2]},
    ]
    relations = [
        {'head': [0, 2, 0], 'tail': [1, 3, 2], 'type': [2, 3, 1]},
        {'head': [0, 3, 1], 'tail': [1, 4, 2], 'type': [2, 2, 1]},
    ]

    model = SCAMLREDecoderPallas(cfg, k_par)
    loss, so_head_outputs, pred_relations = model.forward(
        hidden_states, entities, relations, attention_mask=None, bbox=None)

    loss = jax.block_until_ready(loss)
    so_head_outputs = jax.block_until_ready(so_head_outputs)
    assert np.isfinite(float(loss))
    assert so_head_outputs.shape == (B, cfg.pointer_link_heads, L, L)
    assert isinstance(pred_relations, list) and len(pred_relations) == B
    print("KERNEL_OK")
</pallas_src>

<mosaic_0001>
module attributes {stable_mosaic.version = 11 : i64} {
  func.func @_sca_layers_kernel(%arg0: i32, %arg1: memref<1x16x32xf32, #tpu.memory_space<vmem>>, %arg2: memref<1x1x16xf32, #tpu.memory_space<vmem>>, %arg3: memref<2x32x32xbf16, #tpu.memory_space<vmem>>, %arg4: memref<2x1x32xf32, #tpu.memory_space<vmem>>, %arg5: memref<2x32x32xbf16, #tpu.memory_space<vmem>>, %arg6: memref<2x1x32xf32, #tpu.memory_space<vmem>>, %arg7: memref<2x32x32xbf16, #tpu.memory_space<vmem>>, %arg8: memref<2x1x32xf32, #tpu.memory_space<vmem>>, %arg9: memref<2x32x32xbf16, #tpu.memory_space<vmem>>, %arg10: memref<2x1x32xf32, #tpu.memory_space<vmem>>, %arg11: memref<2x1x32xf32, #tpu.memory_space<vmem>>, %arg12: memref<2x1x32xf32, #tpu.memory_space<vmem>>, %arg13: memref<2x32x64xbf16, #tpu.memory_space<vmem>>, %arg14: memref<2x1x64xf32, #tpu.memory_space<vmem>>, %arg15: memref<2x64x32xbf16, #tpu.memory_space<vmem>>, %arg16: memref<2x1x32xf32, #tpu.memory_space<vmem>>, %arg17: memref<2x1x32xf32, #tpu.memory_space<vmem>>, %arg18: memref<2x1x32xf32, #tpu.memory_space<vmem>>, %arg19: memref<1x16x32xf32, #tpu.memory_space<vmem>>) attributes {dimension_semantics = [#tpu.dimension_semantics<parallel>], iteration_bounds = array<i64: 2>, scalar_prefetch = 0 : i64, scratch_operands = 0 : i64, tpu.core_type = #tpu.core_type<tc>, window_params = [{transform_indices = @transform_0, window_bounds = array<i64: 1, 16, 32>}, {transform_indices = @transform_1, window_bounds = array<i64: 1, 1, 16>}, {pipeline_mode = #tpu.pipeline_mode<synchronous>, transform_indices = @transform_2, window_bounds = array<i64: 2, 32, 32>}, {pipeline_mode = #tpu.pipeline_mode<synchronous>, transform_indices = @transform_3, window_bounds = array<i64: 2, 1, 32>}, {pipeline_mode = #tpu.pipeline_mode<synchronous>, transform_indices = @transform_4, window_bounds = array<i64: 2, 32, 32>}, {pipeline_mode = #tpu.pipeline_mode<synchronous>, transform_indices = @transform_5, window_bounds = array<i64: 2, 1, 32>}, {pipeline_mode = #tpu.pipeline_mode<synchronous>, transform_indices = @transform_6, window_bounds = array<i64: 2, 32, 32>}, {pipeline_mode = #tpu.pipeline_mode<synchronous>, transform_indices = @transform_7, window_bounds = array<i64: 2, 1, 32>}, {pipeline_mode = #tpu.pipeline_mode<synchronous>, transform_indices = @transform_8, window_bounds = array<i64: 2, 32, 32>}, {pipeline_mode = #tpu.pipeline_mode<synchronous>, transform_indices = @transform_9, window_bounds = array<i64: 2, 1, 32>}, {pipeline_mode = #tpu.pipeline_mode<synchronous>, transform_indices = @transform_10, window_bounds = array<i64: 2, 1, 32>}, {pipeline_mode = #tpu.pipeline_mode<synchronous>, transform_indices = @transform_11, window_bounds = array<i64: 2, 1, 32>}, {pipeline_mode = #tpu.pipeline_mode<synchronous>, transform_indices = @transform_12, window_bounds = array<i64: 2, 32, 64>}, {pipeline_mode = #tpu.pipeline_mode<synchronous>, transform_indices = @transform_13, window_bounds = array<i64: 2, 1, 64>}, {pipeline_mode = #tpu.pipeline_mode<synchronous>, transform_indices = @transform_14, window_bounds = array<i64: 2, 64, 32>}, {pipeline_mode = #tpu.pipeline_mode<synchronous>, transform_indices = @transform_15, window_bounds = array<i64: 2, 1, 32>}, {pipeline_mode = #tpu.pipeline_mode<synchronous>, transform_indices = @transform_16, window_bounds = array<i64: 2, 1, 32>}, {pipeline_mode = #tpu.pipeline_mode<synchronous>, transform_indices = @transform_17, window_bounds = array<i64: 2, 1, 32>}, {transform_indices = @transform_18, window_bounds = array<i64: 1, 16, 32>}]} {
    %c0 = arith.constant 0 : index
    %c0_0 = arith.constant 0 : index
    %c0_1 = arith.constant 0 : index
    %0 = vector.load %arg1[%c0, %c0_0, %c0_1] : memref<1x16x32xf32, #tpu.memory_space<vmem>>, vector<1x16x32xf32>
    %1 = vector.shape_cast %0 : vector<1x16x32xf32> to vector<16x32xf32>
    %c0_2 = arith.constant 0 : index
    %c0_3 = arith.constant 0 : index
    %c0_4 = arith.constant 0 : index
    %2 = vector.load %arg2[%c0_2, %c0_3, %c0_4] : memref<1x1x16xf32, #tpu.memory_space<vmem>>, vector<1x1x16xf32>
    %cst = arith.constant 1.000000e+00 : f32
    %3 = vector.broadcast %cst : f32 to vector<1x1x16xf32>
    %4 = arith.subf %2, %3 : vector<1x1x16xf32>
    %cst_5 = arith.constant 1.000000e+09 : f32
    %5 = vector.broadcast %cst_5 : f32 to vector<1x1x16xf32>
    %6 = arith.mulf %4, %5 : vector<1x1x16xf32>
    %7 = arith.truncf %1 : vector<16x32xf32> to vector<16x32xbf16>
    %c0_6 = arith.constant 0 : index
    %c0_7 = arith.constant 0 : index
    %c0_8 = arith.constant 0 : index
    %8 = vector.load %arg3[%c0_6, %c0_7, %c0_8] : memref<2x32x32xbf16, #tpu.memory_space<vmem>>, vector<1x32x32xbf16>
    %9 = vector.shape_cast %8 : vector<1x32x32xbf16> to vector<32x32xbf16>
    %cst_9 = arith.constant dense<0.000000e+00> : vector<16x32xf32>
    %10 = tpu.matmul %7, %9, %cst_9 {dimension_numbers = #tpu.dot_dimension_numbers<[1], [0], [0], [1], [0, 0, 1, 1], [], []>} : vector<16x32xbf16>, vector<32x32xbf16>, vector<16x32xf32> -> vector<16x32xf32>
    %c0_10 = arith.constant 0 : index
    %c0_11 = arith.constant 0 : index
    %c0_12 = arith.constant 0 : index
    %11 = vector.load %arg4[%c0_10, %c0_11, %c0_12] : memref<2x1x32xf32, #tpu.memory_space<vmem>>, vector<1x1x32xf32>
    %12 = vector.shape_cast %11 : vector<1x1x32xf32> to vector<1x32xf32>
    %13 = vector.broadcast %12 : vector<1x32xf32> to vector<16x32xf32>
    %14 = arith.addf %10, %13 : vector<16x32xf32>
    %c0_13 = arith.constant 0 : index
    %c0_14 = arith.constant 0 : index
    %c0_15 = arith.constant 0 : index
    %15 = vector.load %arg5[%c0_13, %c0_14, %c0_15] : memref<2x32x32xbf16, #tpu.memory_space<vmem>>, vector<1x32x32xbf16>
    %16 = vector.shape_cast %15 : vector<1x32x32xbf16> to vector<32x32xbf16>
    %cst_16 = arith.constant dense<0.000000e+00> : vector<16x32xf32>
    %17 = tpu.matmul %7, %16, %cst_16 {dimension_numbers = #tpu.dot_dimension_numbers<[1], [0], [0], [1], [0, 0, 1, 1], [], []>} : vector<16x32xbf16>, vector<32x32xbf16>, vector<16x32xf32> -> vector<16x32xf32>
    %c0_17 = arith.constant 0 : index
    %c0_18 = arith.constant 0 : index
    %c0_19 = arith.constant 0 : index
    %18 = vector.load %arg6[%c0_17, %c0_18, %c0_19] : memref<2x1x32xf32, #tpu.memory_space<vmem>>, vector<1x1x32xf32>
    %19 = vector.shape_cast %18 : vector<1x1x32xf32> to vector<1x32xf32>
    %20 = vector.broadcast %19 : vector<1x32xf32> to vector<16x32xf32>
    %21 = arith.addf %17, %20 : vector<16x32xf32>
    %c0_20 = arith.constant 0 : index
    %c0_21 = arith.constant 0 : index
    %c0_22 = arith.constant 0 : index
    %22 = vector.load %arg7[%c0_20, %c0_21, %c0_22] : memref<2x32x32xbf16, #tpu.memory_space<vmem>>, vector<1x32x32xbf16>
    %23 = vector.shape_cast %22 : vector<1x32x32xbf16> to vector<32x32xbf16>
    %cst_23 = arith.constant dense<0.000000e+00> : vector<16x32xf32>
    %24 = tpu.matmul %7, %23, %cst_23 {dimension_numbers = #tpu.dot_dimension_numbers<[1], [0], [0], [1], [0, 0, 1, 1], [], []>} : vector<16x32xbf16>, vector<32x32xbf16>, vector<16x32xf32> -> vector<16x32xf32>
    %c0_24 = arith.constant 0 : index
    %c0_25 = arith.constant 0 : index
    %c0_26 = arith.constant 0 : index
    %25 = vector.load %arg8[%c0_24, %c0_25, %c0_26] : memref<2x1x32xf32, #tpu.memory_space<vmem>>, vector<1x1x32xf32>
    %26 = vector.shape_cast %25 : vector<1x1x32xf32> to vector<1x32xf32>
    %27 = vector.broadcast %26 : vector<1x32xf32> to vector<16x32xf32>
    %28 = arith.addf %24, %27 : vector<16x32xf32>
    %29 = vector.shape_cast %14 : vector<16x32xf32> to vector<16x4x8xf32>
    %30 = arith.truncf %29 : vector<16x4x8xf32> to vector<16x4x8xbf16>
    %31 = vector.shape_cast %21 : vector<16x32xf32> to vector<16x4x8xf32>
    %32 = arith.truncf %31 : vector<16x4x8xf32> to vector<16x4x8xbf16>
    %33 = vector.shape_cast %28 : vector<16x32xf32> to vector<16x4x8xf32>
    %34 = arith.truncf %33 : vector<16x4x8xf32> to vector<16x4x8xbf16>
    "tpu.trace_start"() <{level = 10 : i32, message = "qhd,khd->hqk"}> : () -> ()
    %cst_27 = arith.constant dense<0.000000e+00> : vector<4x16x16xf32>
    %35 = tpu.matmul %30, %32, %cst_27 {dimension_numbers = #tpu.dot_dimension_numbers<[2], [2], [0], [0], [0, 1, 0, 0, 1, 0], [1], [1]>} : vector<16x4x8xbf16>, vector<16x4x8xbf16>, vector<4x16x16xf32> -> vector<4x16x16xf32>
    "tpu.trace_stop"() : () -> ()
    %cst_28 = arith.constant 0.353553385 : f32
    %36 = vector.broadcast %cst_28 : f32 to vector<4x16x16xf32>
    %37 = arith.mulf %35, %36 : vector<4x16x16xf32>
    %38 = vector.broadcast %6 : vector<1x1x16xf32> to vector<4x16x16xf32>
    %39 = arith.addf %37, %38 : vector<4x16x16xf32>
    %cst_29 = arith.constant dense<0xFF800000> : vector<4x16xf32>
    %40 = vector.multi_reduction <maximumf>, %39, %cst_29 [2] : vector<4x16x16xf32> to vector<4x16xf32>
    %41 = vector.shape_cast %40 : vector<4x16xf32> to vector<4x16x1xf32>
    %42 = vector.broadcast %41 : vector<4x16x1xf32> to vector<4x16x16xf32>
    %43 = arith.subf %39, %42 : vector<4x16x16xf32>
    %44 = math.exp %43 : vector<4x16x16xf32>
    %cst_30 = arith.constant dense<0.000000e+00> : vector<4x16xf32>
    %45 = vector.multi_reduction <add>, %44, %cst_30 [2] : vector<4x16x16xf32> to vector<4x16xf32>
    %46 = vector.shape_cast %45 : vector<4x16xf32> to vector<4x16x1xf32>
    %47 = tpu.reciprocal %46 {approx = true} : vector<4x16x1xf32> -> vector<4x16x1xf32>
    %48 = vector.broadcast %47 : vector<4x16x1xf32> to vector<4x16x16xf32>
    %49 = arith.mulf %44, %48 : vector<4x16x16xf32>
    %50 = arith.truncf %49 : vector<4x16x16xf32> to vector<4x16x16xbf16>
    "tpu.trace_start"() <{level = 10 : i32, message = "hqk,khd->qhd"}> : () -> ()
    %cst_31 = arith.constant dense<0.000000e+00> : vector<4x8x16xf32>
    %51 = tpu.matmul %34, %50, %cst_31 {dimension_numbers = #tpu.dot_dimension_numbers<[0], [2], [2], [1], [0, 1, 0, 2, 1, 1], [1], [0]>} : vector<16x4x8xbf16>, vector<4x16x16xbf16>, vector<4x8x16xf32> -> vector<4x8x16xf32>
    %52 = tpu.transpose %51, [2, 0, 1] : vector<4x8x16xf32> -> vector<16x4x8xf32>
    "tpu.trace_stop"() : () -> ()
    %53 = vector.shape_cast %52 : vector<16x4x8xf32> to vector<16x32xf32>
    %54 = arith.truncf %53 : vector<16x32xf32> to vector<16x32xbf16>
    %c0_32 = arith.constant 0 : index
    %c0_33 = arith.constant 0 : index
    %c0_34 = arith.constant 0 : index
    %55 = vector.load %arg9[%c0_32, %c0_33, %c0_34] : memref<2x32x32xbf16, #tpu.memory_space<vmem>>, vector<1x32x32xbf16>
    %56 = vector.shape_cast %55 : vector<1x32x32xbf16> to vector<32x32xbf16>
    %cst_35 = arith.constant dense<0.000000e+00> : vector<16x32xf32>
    %57 = tpu.matmul %54, %56, %cst_35 {dimension_numbers = #tpu.dot_dimension_numbers<[1], [0], [0], [1], [0, 0, 1, 1], [], []>} : vector<16x32xbf16>, vector<32x32xbf16>, vector<16x32xf32> -> vector<16x32xf32>
    %c0_36 = arith.constant 0 : index
    %c0_37 = arith.constant 0 : index
    %c0_38 = arith.constant 0 : index
    %58 = vector.load %arg10[%c0_36, %c0_37, %c0_38] : memref<2x1x32xf32, #tpu.memory_space<vmem>>, vector<1x1x32xf32>
    %59 = vector.shape_cast %58 : vector<1x1x32xf32> to vector<1x32xf32>
    %60 = vector.broadcast %59 : vector<1x32xf32> to vector<16x32xf32>
    %61 = arith.addf %57, %60 : vector<16x32xf32>
    %62 = arith.addf %1, %61 : vector<16x32xf32>
    %c0_39 = arith.constant 0 : index
    %c0_40 = arith.constant 0 : index
    %c0_41 = arith.constant 0 : index
    %63 = vector.load %arg11[%c0_39, %c0_40, %c0_41] : memref<2x1x32xf32, #tpu.memory_space<vmem>>, vector<1x1x32xf32>
    %64 = vector.shape_cast %63 : vector<1x1x32xf32> to vector<1x32xf32>
    %c0_42 = arith.constant 0 : index
    %c0_43 = arith.constant 0 : index
    %c0_44 = arith.constant 0 : index
    %65 = vector.load %arg12[%c0_42, %c0_43, %c0_44] : memref<2x1x32xf32, #tpu.memory_space<vmem>>, vector<1x1x32xf32>
    %66 = vector.shape_cast %65 : vector<1x1x32xf32> to vector<1x32xf32>
    %cst_45 = arith.constant dense<0.000000e+00> : vector<16xf32>
    %67 = vector.multi_reduction <add>, %62, %cst_45 [1] : vector<16x32xf32> to vector<16xf32>
    %68 = vector.shape_cast %67 : vector<16xf32> to vector<16x1xf32>
    %cst_46 = arith.constant 3.200000e+01 : f32
    %69 = vector.broadcast %cst_46 : f32 to vector<16x1xf32>
    %70 = arith.divf %68, %69 : vector<16x1xf32>
    %71 = vector.broadcast %70 : vector<16x1xf32> to vector<16x32xf32>
    %72 = arith.subf %62, %71 : vector<16x32xf32>
    %73 = arith.mulf %72, %72 : vector<16x32xf32>
    %cst_47 = arith.constant dense<0.000000e+00> : vector<16xf32>
    %74 = vector.multi_reduction <add>, %73, %cst_47 [1] : vector<16x32xf32> to vector<16xf32>
    %75 = vector.shape_cast %74 : vector<16xf32> to vector<16x1xf32>
    %cst_48 = arith.constant 3.200000e+01 : f32
    %76 = vector.broadcast %cst_48 : f32 to vector<16x1xf32>
    %77 = arith.divf %75, %76 : vector<16x1xf32>
    %78 = vector.broadcast %70 : vector<16x1xf32> to vector<16x32xf32>
    %79 = arith.subf %62, %78 : vector<16x32xf32>
    %cst_49 = arith.constant 9.99999996E-13 : f32
    %80 = vector.broadcast %cst_49 : f32 to vector<16x1xf32>
    %81 = arith.addf %77, %80 : vector<16x1xf32>
    %82 = math.rsqrt %81 : vector<16x1xf32>
    %83 = vector.broadcast %82 : vector<16x1xf32> to vector<16x32xf32>
    %84 = arith.mulf %79, %83 : vector<16x32xf32>
    %85 = vector.broadcast %64 : vector<1x32xf32> to vector<16x32xf32>
    %86 = arith.mulf %84, %85 : vector<16x32xf32>
    %87 = vector.broadcast %66 : vector<1x32xf32> to vector<16x32xf32>
    %88 = arith.addf %86, %87 : vector<16x32xf32>
    %89 = arith.truncf %88 : vector<16x32xf32> to vector<16x32xbf16>
    %c0_50 = arith.constant 0 : index
    %c0_51 = arith.constant 0 : index
    %c0_52 = arith.constant 0 : index
    %90 = vector.load %arg13[%c0_50, %c0_51, %c0_52] : memref<2x32x64xbf16, #tpu.memory_space<vmem>>, vector<1x32x64xbf16>
    %91 = vector.shape_cast %90 : vector<1x32x64xbf16> to vector<32x64xbf16>
    %cst_53 = arith.constant dense<0.000000e+00> : vector<16x64xf32>
    %92 = tpu.matmul %89, %91, %cst_53 {dimension_numbers = #tpu.dot_dimension_numbers<[1], [0], [0], [1], [0, 0, 1, 1], [], []>} : vector<16x32xbf16>, vector<32x64xbf16>, vector<16x64xf32> -> vector<16x64xf32>
    %c0_54 = arith.constant 0 : index
    %c0_55 = arith.constant 0 : index
    %c0_56 = arith.constant 0 : index
    %93 = vector.load %arg14[%c0_54, %c0_55, %c0_56] : memref<2x1x64xf32, #tpu.memory_space<vmem>>, vector<1x1x64xf32>
    %94 = vector.shape_cast %93 : vector<1x1x64xf32> to vector<1x64xf32>
    %95 = vector.broadcast %94 : vector<1x64xf32> to vector<16x64xf32>
    %96 = arith.addf %92, %95 : vector<16x64xf32>
    %97 = arith.mulf %96, %96 : vector<16x64xf32>
    %98 = arith.mulf %96, %97 : vector<16x64xf32>
    %cst_57 = arith.constant 4.471500e-02 : f32
    %99 = vector.broadcast %cst_57 : f32 to vector<16x64xf32>
    %100 = arith.mulf %99, %98 : vector<16x64xf32>
    %101 = arith.addf %96, %100 : vector<16x64xf32>
    %cst_58 = arith.constant 0.797884583 : f32
    %102 = vector.broadcast %cst_58 : f32 to vector<16x64xf32>
    %103 = arith.mulf %102, %101 : vector<16x64xf32>
    %104 = math.tanh %103 : vector<16x64xf32>
    %cst_59 = arith.constant 1.000000e+00 : f32
    %105 = vector.broadcast %cst_59 : f32 to vector<16x64xf32>
    %106 = arith.addf %105, %104 : vector<16x64xf32>
    %cst_60 = arith.constant 5.000000e-01 : f32
    %107 = vector.broadcast %cst_60 : f32 to vector<16x64xf32>
    %108 = arith.mulf %107, %106 : vector<16x64xf32>
    %109 = arith.mulf %96, %108 : vector<16x64xf32>
    %110 = arith.truncf %109 : vector<16x64xf32> to vector<16x64xbf16>
    %c0_61 = arith.constant 0 : index
    %c0_62 = arith.constant 0 : index
    %c0_63 = arith.constant 0 : index
    %111 = vector.load %arg15[%c0_61, %c0_62, %c0_63] : memref<2x64x32xbf16, #tpu.memory_space<vmem>>, vector<1x64x32xbf16>
    %112 = vector.shape_cast %111 : vector<1x64x32xbf16> to vector<64x32xbf16>
    %cst_64 = arith.constant dense<0.000000e+00> : vector<16x32xf32>
    %113 = tpu.matmul %110, %112, %cst_64 {dimension_numbers = #tpu.dot_dimension_numbers<[1], [0], [0], [1], [0, 0, 1, 1], [], []>} : vector<16x64xbf16>, vector<64x32xbf16>, vector<16x32xf32> -> vector<16x32xf32>
    %c0_65 = arith.constant 0 : index
    %c0_66 = arith.constant 0 : index
    %c0_67 = arith.constant 0 : index
    %114 = vector.load %arg16[%c0_65, %c0_66, %c0_67] : memref<2x1x32xf32, #tpu.memory_space<vmem>>, vector<1x1x32xf32>
    %115 = vector.shape_cast %114 : vector<1x1x32xf32> to vector<1x32xf32>
    %116 = vector.broadcast %115 : vector<1x32xf32> to vector<16x32xf32>
    %117 = arith.addf %113, %116 : vector<16x32xf32>
    %118 = arith.addf %88, %117 : vector<16x32xf32>
    %c0_68 = arith.constant 0 : index
    %c0_69 = arith.constant 0 : index
    %c0_70 = arith.constant 0 : index
    %119 = vector.load %arg17[%c0_68, %c0_69, %c0_70] : memref<2x1x32xf32, #tpu.memory_space<vmem>>, vector<1x1x32xf32>
    %120 = vector.shape_cast %119 : vector<1x1x32xf32> to vector<1x32xf32>
    %c0_71 = arith.constant 0 : index
    %c0_72 = arith.constant 0 : index
    %c0_73 = arith.constant 0 : index
    %121 = vector.load %arg18[%c0_71, %c0_72, %c0_73] : memref<2x1x32xf32, #tpu.memory_space<vmem>>, vector<1x1x32xf32>
    %122 = vector.shape_cast %121 : vector<1x1x32xf32> to vector<1x32xf32>
    %cst_74 = arith.constant dense<0.000000e+00> : vector<16xf32>
    %123 = vector.multi_reduction <add>, %118, %cst_74 [1] : vector<16x32xf32> to vector<16xf32>
    %124 = vector.shape_cast %123 : vector<16xf32> to vector<16x1xf32>
    %cst_75 = arith.constant 3.200000e+01 : f32
    %125 = vector.broadcast %cst_75 : f32 to vector<16x1xf32>
    %126 = arith.divf %124, %125 : vector<16x1xf32>
    %127 = vector.broadcast %126 : vector<16x1xf32> to vector<16x32xf32>
    %128 = arith.subf %118, %127 : vector<16x32xf32>
    %129 = arith.mulf %128, %128 : vector<16x32xf32>
    %cst_76 = arith.constant dense<0.000000e+00> : vector<16xf32>
    %130 = vector.multi_reduction <add>, %129, %cst_76 [1] : vector<16x32xf32> to vector<16xf32>
    %131 = vector.shape_cast %130 : vector<16xf32> to vector<16x1xf32>
    %cst_77 = arith.constant 3.200000e+01 : f32
    %132 = vector.broadcast %cst_77 : f32 to vector<16x1xf32>
    %133 = arith.divf %131, %132 : vector<16x1xf32>
    %134 = vector.broadcast %126 : vector<16x1xf32> to vector<16x32xf32>
    %135 = arith.subf %118, %134 : vector<16x32xf32>
    %cst_78 = arith.constant 9.99999996E-13 : f32
    %136 = vector.broadcast %cst_78 : f32 to vector<16x1xf32>
    %137 = arith.addf %133, %136 : vector<16x1xf32>
    %138 = math.rsqrt %137 : vector<16x1xf32>
    %139 = vector.broadcast %138 : vector<16x1xf32> to vector<16x32xf32>
    %140 = arith.mulf %135, %139 : vector<16x32xf32>
    %141 = vector.broadcast %120 : vector<1x32xf32> to vector<16x32xf32>
    %142 = arith.mulf %140, %141 : vector<16x32xf32>
    %143 = vector.broadcast %122 : vector<1x32xf32> to vector<16x32xf32>
    %144 = arith.addf %142, %143 : vector<16x32xf32>
    %145 = arith.truncf %144 : vector<16x32xf32> to vector<16x32xbf16>
    %c1 = arith.constant 1 : index
    %c0_79 = arith.constant 0 : index
    %c0_80 = arith.constant 0 : index
    %146 = vector.load %arg3[%c1, %c0_79, %c0_80] : memref<2x32x32xbf16, #tpu.memory_space<vmem>>, vector<1x32x32xbf16>
    %147 = vector.shape_cast %146 : vector<1x32x32xbf16> to vector<32x32xbf16>
    %cst_81 = arith.constant dense<0.000000e+00> : vector<16x32xf32>
    %148 = tpu.matmul %145, %147, %cst_81 {dimension_numbers = #tpu.dot_dimension_numbers<[1], [0], [0], [1], [0, 0, 1, 1], [], []>} : vector<16x32xbf16>, vector<32x32xbf16>, vector<16x32xf32> -> vector<16x32xf32>
    %c1_82 = arith.constant 1 : index
    %c0_83 = arith.constant 0 : index
    %c0_84 = arith.constant 0 : index
    %149 = vector.load %arg4[%c1_82, %c0_83, %c0_84] : memref<2x1x32xf32, #tpu.memory_space<vmem>>, vector<1x1x32xf32>
    %150 = vector.shape_cast %149 : vector<1x1x32xf32> to vector<1x32xf32>
    %151 = vector.broadcast %150 : vector<1x32xf32> to vector<16x32xf32>
    %152 = arith.addf %148, %151 : vector<16x32xf32>
    %c1_85 = arith.constant 1 : index
    %c0_86 = arith.constant 0 : index
    %c0_87 = arith.constant 0 : index
    %153 = vector.load %arg5[%c1_85, %c0_86, %c0_87] : memref<2x32x32xbf16, #tpu.memory_space<vmem>>, vector<1x32x32xbf16>
    %154 = vector.shape_cast %153 : vector<1x32x32xbf16> to vector<32x32xbf16>
    %cst_88 = arith.constant dense<0.000000e+00> : vector<16x32xf32>
    %155 = tpu.matmul %145, %154, %cst_88 {dimension_numbers = #tpu.dot_dimension_numbers<[1], [0], [0], [1], [0, 0, 1, 1], [], []>} : vector<16x32xbf16>, vector<32x32xbf16>, vector<16x32xf32> -> vector<16x32xf32>
    %c1_89 = arith.constant 1 : index
    %c0_90 = arith.constant 0 : index
    %c0_91 = arith.constant 0 : index
    %156 = vector.load %arg6[%c1_89, %c0_90, %c0_91] : memref<2x1x32xf32, #tpu.memory_space<vmem>>, vector<1x1x32xf32>
    %157 = vector.shape_cast %156 : vector<1x1x32xf32> to vector<1x32xf32>
    %158 = vector.broadcast %157 : vector<1x32xf32> to vector<16x32xf32>
    %159 = arith.addf %155, %158 : vector<16x32xf32>
    %c1_92 = arith.constant 1 : index
    %c0_93 = arith.constant 0 : index
    %c0_94 = arith.constant 0 : index
    %160 = vector.load %arg7[%c1_92, %c0_93, %c0_94] : memref<2x32x32xbf16, #tpu.memory_space<vmem>>, vector<1x32x32xbf16>
    %161 = vector.shape_cast %160 : vector<1x32x32xbf16> to vector<32x32xbf16>
    %cst_95 = arith.constant dense<0.000000e+00> : vector<16x32xf32>
    %162 = tpu.matmul %145, %161, %cst_95 {dimension_numbers = #tpu.dot_dimension_numbers<[1], [0], [0], [1], [0, 0, 1, 1], [], []>} : vector<16x32xbf16>, vector<32x32xbf16>, vector<16x32xf32> -> vector<16x32xf32>
    %c1_96 = arith.constant 1 : index
    %c0_97 = arith.constant 0 : index
    %c0_98 = arith.constant 0 : index
    %163 = vector.load %arg8[%c1_96, %c0_97, %c0_98] : memref<2x1x32xf32, #tpu.memory_space<vmem>>, vector<1x1x32xf32>
    %164 = vector.shape_cast %163 : vector<1x1x32xf32> to vector<1x32xf32>
    %165 = vector.broadcast %164 : vector<1x32xf32> to vector<16x32xf32>
    %166 = arith.addf %162, %165 : vector<16x32xf32>
    %167 = vector.shape_cast %152 : vector<16x32xf32> to vector<16x4x8xf32>
    %168 = arith.truncf %167 : vector<16x4x8xf32> to vector<16x4x8xbf16>
    %169 = vector.shape_cast %159 : vector<16x32xf32> to vector<16x4x8xf32>
    %170 = arith.truncf %169 : vector<16x4x8xf32> to vector<16x4x8xbf16>
    %171 = vector.shape_cast %166 : vector<16x32xf32> to vector<16x4x8xf32>
    %172 = arith.truncf %171 : vector<16x4x8xf32> to vector<16x4x8xbf16>
    "tpu.trace_start"() <{level = 10 : i32, message = "qhd,khd->hqk"}> : () -> ()
    %cst_99 = arith.constant dense<0.000000e+00> : vector<4x16x16xf32>
    %173 = tpu.matmul %168, %170, %cst_99 {dimension_numbers = #tpu.dot_dimension_numbers<[2], [2], [0], [0], [0, 1, 0, 0, 1, 0], [1], [1]>} : vector<16x4x8xbf16>, vector<16x4x8xbf16>, vector<4x16x16xf32> -> vector<4x16x16xf32>
    "tpu.trace_stop"() : () -> ()
    %cst_100 = arith.constant 0.353553385 : f32
    %174 = vector.broadcast %cst_100 : f32 to vector<4x16x16xf32>
    %175 = arith.mulf %173, %174 : vector<4x16x16xf32>
    %176 = vector.broadcast %6 : vector<1x1x16xf32> to vector<4x16x16xf32>
    %177 = arith.addf %175, %176 : vector<4x16x16xf32>
    %cst_101 = arith.constant dense<0xFF800000> : vector<4x16xf32>
    %178 = vector.multi_reduction <maximumf>, %177, %cst_101 [2] : vector<4x16x16xf32> to vector<4x16xf32>
    %179 = vector.shape_cast %178 : vector<4x16xf32> to vector<4x16x1xf32>
    %180 = vector.broadcast %179 : vector<4x16x1xf32> to vector<4x16x16xf32>
    %181 = arith.subf %177, %180 : vector<4x16x16xf32>
    %182 = math.exp %181 : vector<4x16x16xf32>
    %cst_102 = arith.constant dense<0.000000e+00> : vector<4x16xf32>
    %183 = vector.multi_reduction <add>, %182, %cst_102 [2] : vector<4x16x16xf32> to vector<4x16xf32>
    %184 = vector.shape_cast %183 : vector<4x16xf32> to vector<4x16x1xf32>
    %185 = tpu.reciprocal %184 {approx = true} : vector<4x16x1xf32> -> vector<4x16x1xf32>
    %186 = vector.broadcast %185 : vector<4x16x1xf32> to vector<4x16x16xf32>
    %187 = arith.mulf %182, %186 : vector<4x16x16xf32>
    %188 = arith.truncf %187 : vector<4x16x16xf32> to vector<4x16x16xbf16>
    "tpu.trace_start"() <{level = 10 : i32, message = "hqk,khd->qhd"}> : () -> ()
    %cst_103 = arith.constant dense<0.000000e+00> : vector<4x8x16xf32>
    %189 = tpu.matmul %172, %188, %cst_103 {dimension_numbers = #tpu.dot_dimension_numbers<[0], [2], [2], [1], [0, 1, 0, 2, 1, 1], [1], [0]>} : vector<16x4x8xbf16>, vector<4x16x16xbf16>, vector<4x8x16xf32> -> vector<4x8x16xf32>
    %190 = tpu.transpose %189, [2, 0, 1] : vector<4x8x16xf32> -> vector<16x4x8xf32>
    "tpu.trace_stop"() : () -> ()
    %191 = vector.shape_cast %190 : vector<16x4x8xf32> to vector<16x32xf32>
    %192 = arith.truncf %191 : vector<16x32xf32> to vector<16x32xbf16>
    %c1_104 = arith.constant 1 : index
    %c0_105 = arith.constant 0 : index
    %c0_106 = arith.constant 0 : index
    %193 = vector.load %arg9[%c1_104, %c0_105, %c0_106] : memref<2x32x32xbf16, #tpu.memory_space<vmem>>, vector<1x32x32xbf16>
    %194 = vector.shape_cast %193 : vector<1x32x32xbf16> to vector<32x32xbf16>
    %cst_107 = arith.constant dense<0.000000e+00> : vector<16x32xf32>
    %195 = tpu.matmul %192, %194, %cst_107 {dimension_numbers = #tpu.dot_dimension_numbers<[1], [0], [0], [1], [0, 0, 1, 1], [], []>} : vector<16x32xbf16>, vector<32x32xbf16>, vector<16x32xf32> -> vector<16x32xf32>
    %c1_108 = arith.constant 1 : index
    %c0_109 = arith.constant 0 : index
    %c0_110 = arith.constant 0 : index
    %196 = vector.load %arg10[%c1_108, %c0_109, %c0_110] : memref<2x1x32xf32, #tpu.memory_space<vmem>>, vector<1x1x32xf32>
    %197 = vector.shape_cast %196 : vector<1x1x32xf32> to vector<1x32xf32>
    %198 = vector.broadcast %197 : vector<1x32xf32> to vector<16x32xf32>
    %199 = arith.addf %195, %198 : vector<16x32xf32>
    %200 = arith.addf %144, %199 : vector<16x32xf32>
    %c1_111 = arith.constant 1 : index
    %c0_112 = arith.constant 0 : index
    %c0_113 = arith.constant 0 : index
    %201 = vector.load %arg11[%c1_111, %c0_112, %c0_113] : memref<2x1x32xf32, #tpu.memory_space<vmem>>, vector<1x1x32xf32>
    %202 = vector.shape_cast %201 : vector<1x1x32xf32> to vector<1x32xf32>
    %c1_114 = arith.constant 1 : index
    %c0_115 = arith.constant 0 : index
    %c0_116 = arith.constant 0 : index
    %203 = vector.load %arg12[%c1_114, %c0_115, %c0_116] : memref<2x1x32xf32, #tpu.memory_space<vmem>>, vector<1x1x32xf32>
    %204 = vector.shape_cast %203 : vector<1x1x32xf32> to vector<1x32xf32>
    %cst_117 = arith.constant dense<0.000000e+00> : vector<16xf32>
    %205 = vector.multi_reduction <add>, %200, %cst_117 [1] : vector<16x32xf32> to vector<16xf32>
    %206 = vector.shape_cast %205 : vector<16xf32> to vector<16x1xf32>
    %cst_118 = arith.constant 3.200000e+01 : f32
    %207 = vector.broadcast %cst_118 : f32 to vector<16x1xf32>
    %208 = arith.divf %206, %207 : vector<16x1xf32>
    %209 = vector.broadcast %208 : vector<16x1xf32> to vector<16x32xf32>
    %210 = arith.subf %200, %209 : vector<16x32xf32>
    %211 = arith.mulf %210, %210 : vector<16x32xf32>
    %cst_119 = arith.constant dense<0.000000e+00> : vector<16xf32>
    %212 = vector.multi_reduction <add>, %211, %cst_119 [1] : vector<16x32xf32> to vector<16xf32>
    %213 = vector.shape_cast %212 : vector<16xf32> to vector<16x1xf32>
    %cst_120 = arith.constant 3.200000e+01 : f32
    %214 = vector.broadcast %cst_120 : f32 to vector<16x1xf32>
    %215 = arith.divf %213, %214 : vector<16x1xf32>
    %216 = vector.broadcast %208 : vector<16x1xf32> to vector<16x32xf32>
    %217 = arith.subf %200, %216 : vector<16x32xf32>
    %cst_121 = arith.constant 9.99999996E-13 : f32
    %218 = vector.broadcast %cst_121 : f32 to vector<16x1xf32>
    %219 = arith.addf %215, %218 : vector<16x1xf32>
    %220 = math.rsqrt %219 : vector<16x1xf32>
    %221 = vector.broadcast %220 : vector<16x1xf32> to vector<16x32xf32>
    %222 = arith.mulf %217, %221 : vector<16x32xf32>
    %223 = vector.broadcast %202 : vector<1x32xf32> to vector<16x32xf32>
    %224 = arith.mulf %222, %223 : vector<16x32xf32>
    %225 = vector.broadcast %204 : vector<1x32xf32> to vector<16x32xf32>
    %226 = arith.addf %224, %225 : vector<16x32xf32>
    %227 = arith.truncf %226 : vector<16x32xf32> to vector<16x32xbf16>
    %c1_122 = arith.constant 1 : index
    %c0_123 = arith.constant 0 : index
    %c0_124 = arith.constant 0 : index
    %228 = vector.load %arg13[%c1_122, %c0_123, %c0_124] : memref<2x32x64xbf16, #tpu.memory_space<vmem>>, vector<1x32x64xbf16>
    %229 = vector.shape_cast %228 : vector<1x32x64xbf16> to vector<32x64xbf16>
    %cst_125 = arith.constant dense<0.000000e+00> : vector<16x64xf32>
    %230 = tpu.matmul %227, %229, %cst_125 {dimension_numbers = #tpu.dot_dimension_numbers<[1], [0], [0], [1], [0, 0, 1, 1], [], []>} : vector<16x32xbf16>, vector<32x64xbf16>, vector<16x64xf32> -> vector<16x64xf32>
    %c1_126 = arith.constant 1 : index
    %c0_127 = arith.constant 0 : index
    %c0_128 = arith.constant 0 : index
    %231 = vector.load %arg14[%c1_126, %c0_127, %c0_128] : memref<2x1x64xf32, #tpu.memory_space<vmem>>, vector<1x1x64xf32>
    %232 = vector.shape_cast %231 : vector<1x1x64xf32> to vector<1x64xf32>
    %233 = vector.broadcast %232 : vector<1x64xf32> to vector<16x64xf32>
    %234 = arith.addf %230, %233 : vector<16x64xf32>
    %235 = arith.mulf %234, %234 : vector<16x64xf32>
    %236 = arith.mulf %234, %235 : vector<16x64xf32>
    %cst_129 = arith.constant 4.471500e-02 : f32
    %237 = vector.broadcast %cst_129 : f32 to vector<16x64xf32>
    %238 = arith.mulf %237, %236 : vector<16x64xf32>
    %239 = arith.addf %234, %238 : vector<16x64xf32>
    %cst_130 = arith.constant 0.797884583 : f32
    %240 = vector.broadcast %cst_130 : f32 to vector<16x64xf32>
    %241 = arith.mulf %240, %239 : vector<16x64xf32>
    %242 = math.tanh %241 : vector<16x64xf32>
    %cst_131 = arith.constant 1.000000e+00 : f32
    %243 = vector.broadcast %cst_131 : f32 to vector<16x64xf32>
    %244 = arith.addf %243, %242 : vector<16x64xf32>
    %cst_132 = arith.constant 5.000000e-01 : f32
    %245 = vector.broadcast %cst_132 : f32 to vector<16x64xf32>
    %246 = arith.mulf %245, %244 : vector<16x64xf32>
    %247 = arith.mulf %234, %246 : vector<16x64xf32>
    %248 = arith.truncf %247 : vector<16x64xf32> to vector<16x64xbf16>
    %c1_133 = arith.constant 1 : index
    %c0_134 = arith.constant 0 : index
    %c0_135 = arith.constant 0 : index
    %249 = vector.load %arg15[%c1_133, %c0_134, %c0_135] : memref<2x64x32xbf16, #tpu.memory_space<vmem>>, vector<1x64x32xbf16>
    %250 = vector.shape_cast %249 : vector<1x64x32xbf16> to vector<64x32xbf16>
    %cst_136 = arith.constant dense<0.000000e+00> : vector<16x32xf32>
    %251 = tpu.matmul %248, %250, %cst_136 {dimension_numbers = #tpu.dot_dimension_numbers<[1], [0], [0], [1], [0, 0, 1, 1], [], []>} : vector<16x64xbf16>, vector<64x32xbf16>, vector<16x32xf32> -> vector<16x32xf32>
    %c1_137 = arith.constant 1 : index
    %c0_138 = arith.constant 0 : index
    %c0_139 = arith.constant 0 : index
    %252 = vector.load %arg16[%c1_137, %c0_138, %c0_139] : memref<2x1x32xf32, #tpu.memory_space<vmem>>, vector<1x1x32xf32>
    %253 = vector.shape_cast %252 : vector<1x1x32xf32> to vector<1x32xf32>
    %254 = vector.broadcast %253 : vector<1x32xf32> to vector<16x32xf32>
    %255 = arith.addf %251, %254 : vector<16x32xf32>
    %256 = arith.addf %226, %255 : vector<16x32xf32>
    %c1_140 = arith.constant 1 : index
    %c0_141 = arith.constant 0 : index
    %c0_142 = arith.constant 0 : index
    %257 = vector.load %arg17[%c1_140, %c0_141, %c0_142] : memref<2x1x32xf32, #tpu.memory_space<vmem>>, vector<1x1x32xf32>
    %258 = vector.shape_cast %257 : vector<1x1x32xf32> to vector<1x32xf32>
    %c1_143 = arith.constant 1 : index
    %c0_144 = arith.constant 0 : index
    %c0_145 = arith.constant 0 : index
    %259 = vector.load %arg18[%c1_143, %c0_144, %c0_145] : memref<2x1x32xf32, #tpu.memory_space<vmem>>, vector<1x1x32xf32>
    %260 = vector.shape_cast %259 : vector<1x1x32xf32> to vector<1x32xf32>
    %cst_146 = arith.constant dense<0.000000e+00> : vector<16xf32>
    %261 = vector.multi_reduction <add>, %256, %cst_146 [1] : vector<16x32xf32> to vector<16xf32>
    %262 = vector.shape_cast %261 : vector<16xf32> to vector<16x1xf32>
    %cst_147 = arith.constant 3.200000e+01 : f32
    %263 = vector.broadcast %cst_147 : f32 to vector<16x1xf32>
    %264 = arith.divf %262, %263 : vector<16x1xf32>
    %265 = vector.broadcast %264 : vector<16x1xf32> to vector<16x32xf32>
    %266 = arith.subf %256, %265 : vector<16x32xf32>
    %267 = arith.mulf %266, %266 : vector<16x32xf32>
    %cst_148 = arith.constant dense<0.000000e+00> : vector<16xf32>
    %268 = vector.multi_reduction <add>, %267, %cst_148 [1] : vector<16x32xf32> to vector<16xf32>
    %269 = vector.shape_cast %268 : vector<16xf32> to vector<16x1xf32>
    %cst_149 = arith.constant 3.200000e+01 : f32
    %270 = vector.broadcast %cst_149 : f32 to vector<16x1xf32>
    %271 = arith.divf %269, %270 : vector<16x1xf32>
    %272 = vector.broadcast %264 : vector<16x1xf32> to vector<16x32xf32>
    %273 = arith.subf %256, %272 : vector<16x32xf32>
    %cst_150 = arith.constant 9.99999996E-13 : f32
    %274 = vector.broadcast %cst_150 : f32 to vector<16x1xf32>
    %275 = arith.addf %271, %274 : vector<16x1xf32>
    %276 = math.rsqrt %275 : vector<16x1xf32>
    %277 = vector.broadcast %276 : vector<16x1xf32> to vector<16x32xf32>
    %278 = arith.mulf %273, %277 : vector<16x32xf32>
    %279 = vector.broadcast %258 : vector<1x32xf32> to vector<16x32xf32>
    %280 = arith.mulf %278, %279 : vector<16x32xf32>
    %281 = vector.broadcast %260 : vector<1x32xf32> to vector<16x32xf32>
    %282 = arith.addf %280, %281 : vector<16x32xf32>
    %c0_151 = arith.constant 0 : index
    %c0_152 = arith.constant 0 : index
    %c0_153 = arith.constant 0 : index
    %283 = vector.load %arg19[%c0_151, %c0_152, %c0_153] : memref<1x16x32xf32, #tpu.memory_space<vmem>>, vector<1x16x32xf32>
    %284 = vector.shape_cast %283 : vector<1x16x32xf32> to vector<16x32xf32>
    %285 = vector.shape_cast %282 : vector<16x32xf32> to vector<1x16x32xf32>
    tpu.vector_store %arg19[%c0_151, %c0_152, %c0_153], %285 {strides = array<i32>} : memref<1x16x32xf32, #tpu.memory_space<vmem>>, vector<1x16x32xf32>,
    return
  }
  func.func @transform_0(%arg0: i32) -> (i32, i32, i32) {
    %c0_i32 = arith.constant 0 : i32
    %c0_i32_0 = arith.constant 0 : i32
    %c0_i32_1 = arith.constant 0 : i32
    return %arg0, %c0_i32, %c0_i32_0 : i32, i32, i32
  }
  func.func @transform_1(%arg0: i32) -> (i32, i32, i32) {
    %c0_i32 = arith.constant 0 : i32
    %c0_i32_0 = arith.constant 0 : i32
    %c0_i32_1 = arith.constant 0 : i32
    return %arg0, %c0_i32, %c0_i32_0 : i32, i32, i32
  }
  func.func @transform_2(%arg0: i32) -> (i32, i32, i32) {
    %c0_i32 = arith.constant 0 : i32
    %c0_i32_0 = arith.constant 0 : i32
    %c0_i32_1 = arith.constant 0 : i32
    %c0_i32_2 = arith.constant 0 : i32
    return %c0_i32, %c0_i32_0, %c0_i32_1 : i32, i32, i32
  }
  func.func @transform_3(%arg0: i32) -> (i32, i32, i32) {
    %c0_i32 = arith.constant 0 : i32
    %c0_i32_0 = arith.constant 0 : i32
    %c0_i32_1 = arith.constant 0 : i32
    %c0_i32_2 = arith.constant 0 : i32
    return %c0_i32, %c0_i32_0, %c0_i32_1 : i32, i32, i32
  }
  func.func @transform_4(%arg0: i32) -> (i32, i32, i32) {
    %c0_i32 = arith.constant 0 : i32
    %c0_i32_0 = arith.constant 0 : i32
    %c0_i32_1 = arith.constant 0 : i32
    %c0_i32_2 = arith.constant 0 : i32
    return %c0_i32, %c0_i32_0, %c0_i32_1 : i32, i32, i32
  }
  func.func @transform_5(%arg0: i32) -> (i32, i32, i32) {
    %c0_i32 = arith.constant 0 : i32
    %c0_i32_0 = arith.constant 0 : i32
    %c0_i32_1 = arith.constant 0 : i32
    %c0_i32_2 = arith.constant 0 : i32
    return %c0_i32, %c0_i32_0, %c0_i32_1 : i32, i32, i32
  }
  func.func @transform_6(%arg0: i32) -> (i32, i32, i32) {
    %c0_i32 = arith.constant 0 : i32
    %c0_i32_0 = arith.constant 0 : i32
    %c0_i32_1 = arith.constant 0 : i32
    %c0_i32_2 = arith.constant 0 : i32
    return %c0_i32, %c0_i32_0, %c0_i32_1 : i32, i32, i32
  }
  func.func @transform_7(%arg0: i32) -> (i32, i32, i32) {
    %c0_i32 = arith.constant 0 : i32
    %c0_i32_0 = arith.constant 0 : i32
    %c0_i32_1 = arith.constant 0 : i32
    %c0_i32_2 = arith.constant 0 : i32
    return %c0_i32, %c0_i32_0, %c0_i32_1 : i32, i32, i32
  }
  func.func @transform_8(%arg0: i32) -> (i32, i32, i32) {
    %c0_i32 = arith.constant 0 : i32
    %c0_i32_0 = arith.constant 0 : i32
    %c0_i32_1 = arith.constant 0 : i32
    %c0_i32_2 = arith.constant 0 : i32
    return %c0_i32, %c0_i32_0, %c0_i32_1 : i32, i32, i32
  }
  func.func @transform_9(%arg0: i32) -> (i32, i32, i32) {
    %c0_i32 = arith.constant 0 : i32
    %c0_i32_0 = arith.constant 0 : i32
    %c0_i32_1 = arith.constant 0 : i32
    %c0_i32_2 = arith.constant 0 : i32
    return %c0_i32, %c0_i32_0, %c0_i32_1 : i32, i32, i32
  }
  func.func @transform_10(%arg0: i32) -> (i32, i32, i32) {
    %c0_i32 = arith.constant 0 : i32
    %c0_i32_0 = arith.constant 0 : i32
    %c0_i32_1 = arith.constant 0 : i32
    %c0_i32_2 = arith.constant 0 : i32
    return %c0_i32, %c0_i32_0, %c0_i32_1 : i32, i32, i32
  }
  func.func @transform_11(%arg0: i32) -> (i32, i32, i32) {
    %c0_i32 = arith.constant 0 : i32
    %c0_i32_0 = arith.constant 0 : i32
    %c0_i32_1 = arith.constant 0 : i32
    %c0_i32_2 = arith.constant 0 : i32
    return %c0_i32, %c0_i32_0, %c0_i32_1 : i32, i32, i32
  }
  func.func @transform_12(%arg0: i32) -> (i32, i32, i32) {
    %c0_i32 = arith.constant 0 : i32
    %c0_i32_0 = arith.constant 0 : i32
    %c0_i32_1 = arith.constant 0 : i32
    %c0_i32_2 = arith.constant 0 : i32
    return %c0_i32, %c0_i32_0, %c0_i32_1 : i32, i32, i32
  }
  func.func @transform_13(%arg0: i32) -> (i32, i32, i32) {
    %c0_i32 = arith.constant 0 : i32
    %c0_i32_0 = arith.constant 0 : i32
    %c0_i32_1 = arith.constant 0 : i32
    %c0_i32_2 = arith.constant 0 : i32
    return %c0_i32, %c0_i32_0, %c0_i32_1 : i32, i32, i32
  }
  func.func @transform_14(%arg0: i32) -> (i32, i32, i32) {
    %c0_i32 = arith.constant 0 : i32
    %c0_i32_0 = arith.constant 0 : i32
    %c0_i32_1 = arith.constant 0 : i32
    %c0_i32_2 = arith.constant 0 : i32
    return %c0_i32, %c0_i32_0, %c0_i32_1 : i32, i32, i32
  }
  func.func @transform_15(%arg0: i32) -> (i32, i32, i32) {
    %c0_i32 = arith.constant 0 : i32
    %c0_i32_0 = arith.constant 0 : i32
    %c0_i32_1 = arith.constant 0 : i32
    %c0_i32_2 = arith.constant 0 : i32
    return %c0_i32, %c0_i32_0, %c0_i32_1 : i32, i32, i32
  }
  func.func @transform_16(%arg0: i32) -> (i32, i32, i32) {
    %c0_i32 = arith.constant 0 : i32
    %c0_i32_0 = arith.constant 0 : i32
    %c0_i32_1 = arith.constant 0 : i32
    %c0_i32_2 = arith.constant 0 : i32
    return %c0_i32, %c0_i32_0, %c0_i32_1 : i32, i32, i32
  }
  func.func @transform_17(%arg0: i32) -> (i32, i32, i32) {
    %c0_i32 = arith.constant 0 : i32
    %c0_i32_0 = arith.constant 0 : i32
    %c0_i32_1 = arith.constant 0 : i32
    %c0_i32_2 = arith.constant 0 : i32
    return %c0_i32, %c0_i32_0, %c0_i32_1 : i32, i32, i32
  }
  func.func @transform_18(%arg0: i32) -> (i32, i32, i32) {
    %c0_i32 = arith.constant 0 : i32
    %c0_i32_0 = arith.constant 0 : i32
    %c0_i32_1 = arith.constant 0 : i32
    return %arg0, %c0_i32, %c0_i32_0 : i32, i32, i32
  }
}

module attributes {stable_mosaic.version = 11 : i64} {
  func.func @_sca_layers_kernel(%arg0: i32, %arg1: memref<1x16x32xf32, #tpu.memory_space<vmem>>, %arg2: memref<1x1x16xf32, #tpu.memory_space<vmem>>, %arg3: memref<2x32x32xbf16, #tpu.memory_space<vmem>>, %arg4: memref<2x1x32xf32, #tpu.memory_space<vmem>>, %arg5: memref<2x32x32xbf16, #tpu.memory_space<vmem>>, %arg6: memref<2x1x32xf32, #tpu.memory_space<vmem>>, %arg7: memref<2x32x32xbf16, #tpu.memory_space<vmem>>, %arg8: memref<2x1x32xf32, #tpu.memory_space<vmem>>, %arg9: memref<2x32x32xbf16, #tpu.memory_space<vmem>>, %arg10: memref<2x1x32xf32, #tpu.memory_space<vmem>>, %arg11: memref<2x1x32xf32, #tpu.memory_space<vmem>>, %arg12: memref<2x1x32xf32, #tpu.memory_space<vmem>>, %arg13: memref<2x32x64xbf16, #tpu.memory_space<vmem>>, %arg14: memref<2x1x64xf32, #tpu.memory_space<vmem>>, %arg15: memref<2x64x32xbf16, #tpu.memory_space<vmem>>, %arg16: memref<2x1x32xf32, #tpu.memory_space<vmem>>, %arg17: memref<2x1x32xf32, #tpu.memory_space<vmem>>, %arg18: memref<2x1x32xf32, #tpu.memory_space<vmem>>, %arg19: memref<1x16x32xf32, #tpu.memory_space<vmem>>) attributes {dimension_semantics = [#tpu.dimension_semantics<parallel>], iteration_bounds = array<i64: 2>, scalar_prefetch = 0 : i64, scratch_operands = 0 : i64, tpu.core_type = #tpu.core_type<tc>, window_params = [{transform_indices = @transform_0, window_bounds = array<i64: 1, 16, 32>}, {transform_indices = @transform_1, window_bounds = array<i64: 1, 1, 16>}, {pipeline_mode = #tpu.pipeline_mode<synchronous>, transform_indices = @transform_2, window_bounds = array<i64: 2, 32, 32>}, {pipeline_mode = #tpu.pipeline_mode<synchronous>, transform_indices = @transform_3, window_bounds = array<i64: 2, 1, 32>}, {pipeline_mode = #tpu.pipeline_mode<synchronous>, transform_indices = @transform_4, window_bounds = array<i64: 2, 32, 32>}, {pipeline_mode = #tpu.pipeline_mode<synchronous>, transform_indices = @transform_5, window_bounds = array<i64: 2, 1, 32>}, {pipeline_mode = #tpu.pipeline_mode<synchronous>, transform_indices = @transform_6, window_bounds = array<i64: 2, 32, 32>}, {pipeline_mode = #tpu.pipeline_mode<synchronous>, transform_indices = @transform_7, window_bounds = array<i64: 2, 1, 32>}, {pipeline_mode = #tpu.pipeline_mode<synchronous>, transform_indices = @transform_8, window_bounds = array<i64: 2, 32, 32>}, {pipeline_mode = #tpu.pipeline_mode<synchronous>, transform_indices = @transform_9, window_bounds = array<i64: 2, 1, 32>}, {pipeline_mode = #tpu.pipeline_mode<synchronous>, transform_indices = @transform_10, window_bounds = array<i64: 2, 1, 32>}, {pipeline_mode = #tpu.pipeline_mode<synchronous>, transform_indices = @transform_11, window_bounds = array<i64: 2, 1, 32>}, {pipeline_mode = #tpu.pipeline_mode<synchronous>, transform_indices = @transform_12, window_bounds = array<i64: 2, 32, 64>}, {pipeline_mode = #tpu.pipeline_mode<synchronous>, transform_indices = @transform_13, window_bounds = array<i64: 2, 1, 64>}, {pipeline_mode = #tpu.pipeline_mode<synchronous>, transform_indices = @transform_14, window_bounds = array<i64: 2, 64, 32>}, {pipeline_mode = #tpu.pipeline_mode<synchronous>, transform_indices = @transform_15, window_bounds = array<i64: 2, 1, 32>}, {pipeline_mode = #tpu.pipeline_mode<synchronous>, transform_indices = @transform_16, window_bounds = array<i64: 2, 1, 32>}, {pipeline_mode = #tpu.pipeline_mode<synchronous>, transform_indices = @transform_17, window_bounds = array<i64: 2, 1, 32>}, {transform_indices = @transform_18, window_bounds = array<i64: 1, 16, 32>}]} {
    %c0 = arith.constant 0 : index
    %c0_0 = arith.constant 0 : index
    %c0_1 = arith.constant 0 : index
    %0 = vector.load %arg1[%c0, %c0_0, %c0_1] : memref<1x16x32xf32, #tpu.memory_space<vmem>>, vector<1x16x32xf32>
    %1 = vector.shape_cast %0 : vector<1x16x32xf32> to vector<16x32xf32>
    %c0_2 = arith.constant 0 : index
    %c0_3 = arith.constant 0 : index
    %c0_4 = arith.constant 0 : index
    %2 = vector.load %arg2[%c0_2, %c0_3, %c0_4] : memref<1x1x16xf32, #tpu.memory_space<vmem>>, vector<1x1x16xf32>
    %cst = arith.constant 1.000000e+00 : f32
    %3 = vector.broadcast %cst : f32 to vector<1x1x16xf32>
    %4 = arith.subf %2, %3 : vector<1x1x16xf32>
    %cst_5 = arith.constant 1.000000e+09 : f32
    %5 = vector.broadcast %cst_5 : f32 to vector<1x1x16xf32>
    %6 = arith.mulf %4, %5 : vector<1x1x16xf32>
    %7 = arith.truncf %1 : vector<16x32xf32> to vector<16x32xbf16>
    %c0_6 = arith.constant 0 : index
    %c0_7 = arith.constant 0 : index
    %c0_8 = arith.constant 0 : index
    %8 = vector.load %arg3[%c0_6, %c0_7, %c0_8] : memref<2x32x32xbf16, #tpu.memory_space<vmem>>, vector<1x32x32xbf16>
    %9 = vector.shape_cast %8 : vector<1x32x32xbf16> to vector<32x32xbf16>
    %cst_9 = arith.constant dense<0.000000e+00> : vector<16x32xf32>
    %10 = tpu.matmul %7, %9, %cst_9 {dimension_numbers = #tpu.dot_dimension_numbers<[1], [0], [0], [1], [0, 0, 1, 1], [], []>} : vector<16x32xbf16>, vector<32x32xbf16>, vector<16x32xf32> -> vector<16x32xf32>
    %c0_10 = arith.constant 0 : index
    %c0_11 = arith.constant 0 : index
    %c0_12 = arith.constant 0 : index
    %11 = vector.load %arg4[%c0_10, %c0_11, %c0_12] : memref<2x1x32xf32, #tpu.memory_space<vmem>>, vector<1x1x32xf32>
    %12 = vector.shape_cast %11 : vector<1x1x32xf32> to vector<1x32xf32>
    %13 = vector.broadcast %12 : vector<1x32xf32> to vector<16x32xf32>
    %14 = arith.addf %10, %13 : vector<16x32xf32>
    %c0_13 = arith.constant 0 : index
    %c0_14 = arith.constant 0 : index
    %c0_15 = arith.constant 0 : index
    %15 = vector.load %arg5[%c0_13, %c0_14, %c0_15] : memref<2x32x32xbf16, #tpu.memory_space<vmem>>, vector<1x32x32xbf16>
    %16 = vector.shape_cast %15 : vector<1x32x32xbf16> to vector<32x32xbf16>
    %cst_16 = arith.constant dense<0.000000e+00> : vector<16x32xf32>
    %17 = tpu.matmul %7, %16, %cst_16 {dimension_numbers = #tpu.dot_dimension_numbers<[1], [0], [0], [1], [0, 0, 1, 1], [], []>} : vector<16x32xbf16>, vector<32x32xbf16>, vector<16x32xf32> -> vector<16x32xf32>
    %c0_17 = arith.constant 0 : index
    %c0_18 = arith.constant 0 : index
    %c0_19 = arith.constant 0 : index
    %18 = vector.load %arg6[%c0_17, %c0_18, %c0_19] : memref<2x1x32xf32, #tpu.memory_space<vmem>>, vector<1x1x32xf32>
    %19 = vector.shape_cast %18 : vector<1x1x32xf32> to vector<1x32xf32>
    %20 = vector.broadcast %19 : vector<1x32xf32> to vector<16x32xf32>
    %21 = arith.addf %17, %20 : vector<16x32xf32>
    %c0_20 = arith.constant 0 : index
    %c0_21 = arith.constant 0 : index
    %c0_22 = arith.constant 0 : index
    %22 = vector.load %arg7[%c0_20, %c0_21, %c0_22] : memref<2x32x32xbf16, #tpu.memory_space<vmem>>, vector<1x32x32xbf16>
    %23 = vector.shape_cast %22 : vector<1x32x32xbf16> to vector<32x32xbf16>
    %cst_23 = arith.constant dense<0.000000e+00> : vector<16x32xf32>
    %24 = tpu.matmul %7, %23, %cst_23 {dimension_numbers = #tpu.dot_dimension_numbers<[1], [0], [0], [1], [0, 0, 1, 1], [], []>} : vector<16x32xbf16>, vector<32x32xbf16>, vector<16x32xf32> -> vector<16x32xf32>
    %c0_24 = arith.constant 0 : index
    %c0_25 = arith.constant 0 : index
    %c0_26 = arith.constant 0 : index
    %25 = vector.load %arg8[%c0_24, %c0_25, %c0_26] : memref<2x1x32xf32, #tpu.memory_space<vmem>>, vector<1x1x32xf32>
    %26 = vector.shape_cast %25 : vector<1x1x32xf32> to vector<1x32xf32>
    %27 = vector.broadcast %26 : vector<1x32xf32> to vector<16x32xf32>
    %28 = arith.addf %24, %27 : vector<16x32xf32>
    %29 = vector.shape_cast %14 : vector<16x32xf32> to vector<16x4x8xf32>
    %30 = arith.truncf %29 : vector<16x4x8xf32> to vector<16x4x8xbf16>
    %31 = vector.shape_cast %21 : vector<16x32xf32> to vector<16x4x8xf32>
    %32 = arith.truncf %31 : vector<16x4x8xf32> to vector<16x4x8xbf16>
    %33 = vector.shape_cast %28 : vector<16x32xf32> to vector<16x4x8xf32>
    %34 = arith.truncf %33 : vector<16x4x8xf32> to vector<16x4x8xbf16>
    "tpu.trace_start"() <{level = 10 : i32, message = "qhd,khd->hqk"}> : () -> ()
    %cst_27 = arith.constant dense<0.000000e+00> : vector<4x16x16xf32>
    %35 = tpu.matmul %30, %32, %cst_27 {dimension_numbers = #tpu.dot_dimension_numbers<[2], [2], [0], [0], [0, 1, 0, 0, 1, 0], [1], [1]>} : vector<16x4x8xbf16>, vector<16x4x8xbf16>, vector<4x16x16xf32> -> vector<4x16x16xf32>
    "tpu.trace_stop"() : () -> ()
    %cst_28 = arith.constant 0.353553385 : f32
    %36 = vector.broadcast %cst_28 : f32 to vector<4x16x16xf32>
    %37 = arith.mulf %35, %36 : vector<4x16x16xf32>
    %38 = vector.broadcast %6 : vector<1x1x16xf32> to vector<4x16x16xf32>
    %39 = arith.addf %37, %38 : vector<4x16x16xf32>
    %cst_29 = arith.constant dense<0xFF800000> : vector<4x16xf32>
    %40 = vector.multi_reduction <maximumf>, %39, %cst_29 [2] : vector<4x16x16xf32> to vector<4x16xf32>
    %41 = vector.shape_cast %40 : vector<4x16xf32> to vector<4x16x1xf32>
    %42 = vector.broadcast %41 : vector<4x16x1xf32> to vector<4x16x16xf32>
    %43 = arith.subf %39, %42 : vector<4x16x16xf32>
    %44 = math.exp %43 : vector<4x16x16xf32>
    %cst_30 = arith.constant dense<0.000000e+00> : vector<4x16xf32>
    %45 = vector.multi_reduction <add>, %44, %cst_30 [2] : vector<4x16x16xf32> to vector<4x16xf32>
    %46 = vector.shape_cast %45 : vector<4x16xf32> to vector<4x16x1xf32>
    %47 = tpu.reciprocal %46 {approx = true} : vector<4x16x1xf32> -> vector<4x16x1xf32>
    %48 = vector.broadcast %47 : vector<4x16x1xf32> to vector<4x16x16xf32>
    %49 = arith.mulf %44, %48 : vector<4x16x16xf32>
    %50 = arith.truncf %49 : vector<4x16x16xf32> to vector<4x16x16xbf16>
    "tpu.trace_start"() <{level = 10 : i32, message = "hqk,khd->qhd"}> : () -> ()
    %cst_31 = arith.constant dense<0.000000e+00> : vector<4x8x16xf32>
    %51 = tpu.matmul %34, %50, %cst_31 {dimension_numbers = #tpu.dot_dimension_numbers<[0], [2], [2], [1], [0, 1, 0, 2, 1, 1], [1], [0]>} : vector<16x4x8xbf16>, vector<4x16x16xbf16>, vector<4x8x16xf32> -> vector<4x8x16xf32>
    %52 = tpu.transpose %51, [2, 0, 1] : vector<4x8x16xf32> -> vector<16x4x8xf32>
    "tpu.trace_stop"() : () -> ()
    %53 = vector.shape_cast %52 : vector<16x4x8xf32> to vector<16x32xf32>
    %54 = arith.truncf %53 : vector<16x32xf32> to vector<16x32xbf16>
    %c0_32 = arith.constant 0 : index
    %c0_33 = arith.constant 0 : index
    %c0_34 = arith.constant 0 : index
    %55 = vector.load %arg9[%c0_32, %c0_33, %c0_34] : memref<2x32x32xbf16, #tpu.memory_space<vmem>>, vector<1x32x32xbf16>
    %56 = vector.shape_cast %55 : vector<1x32x32xbf16> to vector<32x32xbf16>
    %cst_35 = arith.constant dense<0.000000e+00> : vector<16x32xf32>
    %57 = tpu.matmul %54, %56, %cst_35 {dimension_numbers = #tpu.dot_dimension_numbers<[1], [0], [0], [1], [0, 0, 1, 1], [], []>} : vector<16x32xbf16>, vector<32x32xbf16>, vector<16x32xf32> -> vector<16x32xf32>
    %c0_36 = arith.constant 0 : index
    %c0_37 = arith.constant 0 : index
    %c0_38 = arith.constant 0 : index
    %58 = vector.load %arg10[%c0_36, %c0_37, %c0_38] : memref<2x1x32xf32, #tpu.memory_space<vmem>>, vector<1x1x32xf32>
    %59 = vector.shape_cast %58 : vector<1x1x32xf32> to vector<1x32xf32>
    %60 = vector.broadcast %59 : vector<1x32xf32> to vector<16x32xf32>
    %61 = arith.addf %57, %60 : vector<16x32xf32>
    %62 = arith.addf %1, %61 : vector<16x32xf32>
    %c0_39 = arith.constant 0 : index
    %c0_40 = arith.constant 0 : index
    %c0_41 = arith.constant 0 : index
    %63 = vector.load %arg11[%c0_39, %c0_40, %c0_41] : memref<2x1x32xf32, #tpu.memory_space<vmem>>, vector<1x1x32xf32>
    %64 = vector.shape_cast %63 : vector<1x1x32xf32> to vector<1x32xf32>
    %c0_42 = arith.constant 0 : index
    %c0_43 = arith.constant 0 : index
    %c0_44 = arith.constant 0 : index
    %65 = vector.load %arg12[%c0_42, %c0_43, %c0_44] : memref<2x1x32xf32, #tpu.memory_space<vmem>>, vector<1x1x32xf32>
    %66 = vector.shape_cast %65 : vector<1x1x32xf32> to vector<1x32xf32>
    %cst_45 = arith.constant dense<0.000000e+00> : vector<16xf32>
    %67 = vector.multi_reduction <add>, %62, %cst_45 [1] : vector<16x32xf32> to vector<16xf32>
    %68 = vector.shape_cast %67 : vector<16xf32> to vector<16x1xf32>
    %cst_46 = arith.constant 3.200000e+01 : f32
    %69 = vector.broadcast %cst_46 : f32 to vector<16x1xf32>
    %70 = arith.divf %68, %69 : vector<16x1xf32>
    %71 = vector.broadcast %70 : vector<16x1xf32> to vector<16x32xf32>
    %72 = arith.subf %62, %71 : vector<16x32xf32>
    %73 = arith.mulf %72, %72 : vector<16x32xf32>
    %cst_47 = arith.constant dense<0.000000e+00> : vector<16xf32>
    %74 = vector.multi_reduction <add>, %73, %cst_47 [1] : vector<16x32xf32> to vector<16xf32>
    %75 = vector.shape_cast %74 : vector<16xf32> to vector<16x1xf32>
    %cst_48 = arith.constant 3.200000e+01 : f32
    %76 = vector.broadcast %cst_48 : f32 to vector<16x1xf32>
    %77 = arith.divf %75, %76 : vector<16x1xf32>
    %78 = vector.broadcast %70 : vector<16x1xf32> to vector<16x32xf32>
    %79 = arith.subf %62, %78 : vector<16x32xf32>
    %cst_49 = arith.constant 9.99999996E-13 : f32
    %80 = vector.broadcast %cst_49 : f32 to vector<16x1xf32>
    %81 = arith.addf %77, %80 : vector<16x1xf32>
    %82 = math.rsqrt %81 : vector<16x1xf32>
    %83 = vector.broadcast %82 : vector<16x1xf32> to vector<16x32xf32>
    %84 = arith.mulf %79, %83 : vector<16x32xf32>
    %85 = vector.broadcast %64 : vector<1x32xf32> to vector<16x32xf32>
    %86 = arith.mulf %84, %85 : vector<16x32xf32>
    %87 = vector.broadcast %66 : vector<1x32xf32> to vector<16x32xf32>
    %88 = arith.addf %86, %87 : vector<16x32xf32>
    %89 = arith.truncf %88 : vector<16x32xf32> to vector<16x32xbf16>
    %c0_50 = arith.constant 0 : index
    %c0_51 = arith.constant 0 : index
    %c0_52 = arith.constant 0 : index
    %90 = vector.load %arg13[%c0_50, %c0_51, %c0_52] : memref<2x32x64xbf16, #tpu.memory_space<vmem>>, vector<1x32x64xbf16>
    %91 = vector.shape_cast %90 : vector<1x32x64xbf16> to vector<32x64xbf16>
    %cst_53 = arith.constant dense<0.000000e+00> : vector<16x64xf32>
    %92 = tpu.matmul %89, %91, %cst_53 {dimension_numbers = #tpu.dot_dimension_numbers<[1], [0], [0], [1], [0, 0, 1, 1], [], []>} : vector<16x32xbf16>, vector<32x64xbf16>, vector<16x64xf32> -> vector<16x64xf32>
    %c0_54 = arith.constant 0 : index
    %c0_55 = arith.constant 0 : index
    %c0_56 = arith.constant 0 : index
    %93 = vector.load %arg14[%c0_54, %c0_55, %c0_56] : memref<2x1x64xf32, #tpu.memory_space<vmem>>, vector<1x1x64xf32>
    %94 = vector.shape_cast %93 : vector<1x1x64xf32> to vector<1x64xf32>
    %95 = vector.broadcast %94 : vector<1x64xf32> to vector<16x64xf32>
    %96 = arith.addf %92, %95 : vector<16x64xf32>
    %97 = arith.mulf %96, %96 : vector<16x64xf32>
    %98 = arith.mulf %96, %97 : vector<16x64xf32>
    %cst_57 = arith.constant 4.471500e-02 : f32
    %99 = vector.broadcast %cst_57 : f32 to vector<16x64xf32>
    %100 = arith.mulf %99, %98 : vector<16x64xf32>
    %101 = arith.addf %96, %100 : vector<16x64xf32>
    %cst_58 = arith.constant 0.797884583 : f32
    %102 = vector.broadcast %cst_58 : f32 to vector<16x64xf32>
    %103 = arith.mulf %102, %101 : vector<16x64xf32>
    %104 = math.tanh %103 : vector<16x64xf32>
    %cst_59 = arith.constant 1.000000e+00 : f32
    %105 = vector.broadcast %cst_59 : f32 to vector<16x64xf32>
    %106 = arith.addf %105, %104 : vector<16x64xf32>
    %cst_60 = arith.constant 5.000000e-01 : f32
    %107 = vector.broadcast %cst_60 : f32 to vector<16x64xf32>
    %108 = arith.mulf %107, %106 : vector<16x64xf32>
    %109 = arith.mulf %96, %108 : vector<16x64xf32>
    %110 = arith.truncf %109 : vector<16x64xf32> to vector<16x64xbf16>
    %c0_61 = arith.constant 0 : index
    %c0_62 = arith.constant 0 : index
    %c0_63 = arith.constant 0 : index
    %111 = vector.load %arg15[%c0_61, %c0_62, %c0_63] : memref<2x64x32xbf16, #tpu.memory_space<vmem>>, vector<1x64x32xbf16>
    %112 = vector.shape_cast %111 : vector<1x64x32xbf16> to vector<64x32xbf16>
    %cst_64 = arith.constant dense<0.000000e+00> : vector<16x32xf32>
    %113 = tpu.matmul %110, %112, %cst_64 {dimension_numbers = #tpu.dot_dimension_numbers<[1], [0], [0], [1], [0, 0, 1, 1], [], []>} : vector<16x64xbf16>, vector<64x32xbf16>, vector<16x32xf32> -> vector<16x32xf32>
    %c0_65 = arith.constant 0 : index
    %c0_66 = arith.constant 0 : index
    %c0_67 = arith.constant 0 : index
    %114 = vector.load %arg16[%c0_65, %c0_66, %c0_67] : memref<2x1x32xf32, #tpu.memory_space<vmem>>, vector<1x1x32xf32>
    %115 = vector.shape_cast %114 : vector<1x1x32xf32> to vector<1x32xf32>
    %116 = vector.broadcast %115 : vector<1x32xf32> to vector<16x32xf32>
    %117 = arith.addf %113, %116 : vector<16x32xf32>
    %118 = arith.addf %88, %117 : vector<16x32xf32>
    %c0_68 = arith.constant 0 : index
    %c0_69 = arith.constant 0 : index
    %c0_70 = arith.constant 0 : index
    %119 = vector.load %arg17[%c0_68, %c0_69, %c0_70] : memref<2x1x32xf32, #tpu.memory_space<vmem>>, vector<1x1x32xf32>
    %120 = vector.shape_cast %119 : vector<1x1x32xf32> to vector<1x32xf32>
    %c0_71 = arith.constant 0 : index
    %c0_72 = arith.constant 0 : index
    %c0_73 = arith.constant 0 : index
    %121 = vector.load %arg18[%c0_71, %c0_72, %c0_73] : memref<2x1x32xf32, #tpu.memory_space<vmem>>, vector<1x1x32xf32>
    %122 = vector.shape_cast %121 : vector<1x1x32xf32> to vector<1x32xf32>
    %cst_74 = arith.constant dense<0.000000e+00> : vector<16xf32>
    %123 = vector.multi_reduction <add>, %118, %cst_74 [1] : vector<16x32xf32> to vector<16xf32>
    %124 = vector.shape_cast %123 : vector<16xf32> to vector<16x1xf32>
    %cst_75 = arith.constant 3.200000e+01 : f32
    %125 = vector.broadcast %cst_75 : f32 to vector<16x1xf32>
    %126 = arith.divf %124, %125 : vector<16x1xf32>
    %127 = vector.broadcast %126 : vector<16x1xf32> to vector<16x32xf32>
    %128 = arith.subf %118, %127 : vector<16x32xf32>
    %129 = arith.mulf %128, %128 : vector<16x32xf32>
    %cst_76 = arith.constant dense<0.000000e+00> : vector<16xf32>
    %130 = vector.multi_reduction <add>, %129, %cst_76 [1] : vector<16x32xf32> to vector<16xf32>
    %131 = vector.shape_cast %130 : vector<16xf32> to vector<16x1xf32>
    %cst_77 = arith.constant 3.200000e+01 : f32
    %132 = vector.broadcast %cst_77 : f32 to vector<16x1xf32>
    %133 = arith.divf %131, %132 : vector<16x1xf32>
    %134 = vector.broadcast %126 : vector<16x1xf32> to vector<16x32xf32>
    %135 = arith.subf %118, %134 : vector<16x32xf32>
    %cst_78 = arith.constant 9.99999996E-13 : f32
    %136 = vector.broadcast %cst_78 : f32 to vector<16x1xf32>
    %137 = arith.addf %133, %136 : vector<16x1xf32>
    %138 = math.rsqrt %137 : vector<16x1xf32>
    %139 = vector.broadcast %138 : vector<16x1xf32> to vector<16x32xf32>
    %140 = arith.mulf %135, %139 : vector<16x32xf32>
    %141 = vector.broadcast %120 : vector<1x32xf32> to vector<16x32xf32>
    %142 = arith.mulf %140, %141 : vector<16x32xf32>
    %143 = vector.broadcast %122 : vector<1x32xf32> to vector<16x32xf32>
    %144 = arith.addf %142, %143 : vector<16x32xf32>
    %145 = arith.truncf %144 : vector<16x32xf32> to vector<16x32xbf16>
    %c1 = arith.constant 1 : index
    %c0_79 = arith.constant 0 : index
    %c0_80 = arith.constant 0 : index
    %146 = vector.load %arg3[%c1, %c0_79, %c0_80] : memref<2x32x32xbf16, #tpu.memory_space<vmem>>, vector<1x32x32xbf16>
    %147 = vector.shape_cast %146 : vector<1x32x32xbf16> to vector<32x32xbf16>
    %cst_81 = arith.constant dense<0.000000e+00> : vector<16x32xf32>
    %148 = tpu.matmul %145, %147, %cst_81 {dimension_numbers = #tpu.dot_dimension_numbers<[1], [0], [0], [1], [0, 0, 1, 1], [], []>} : vector<16x32xbf16>, vector<32x32xbf16>, vector<16x32xf32> -> vector<16x32xf32>
    %c1_82 = arith.constant 1 : index
    %c0_83 = arith.constant 0 : index
    %c0_84 = arith.constant 0 : index
    %149 = vector.load %arg4[%c1_82, %c0_83, %c0_84] : memref<2x1x32xf32, #tpu.memory_space<vmem>>, vector<1x1x32xf32>
    %150 = vector.shape_cast %149 : vector<1x1x32xf32> to vector<1x32xf32>
    %151 = vector.broadcast %150 : vector<1x32xf32> to vector<16x32xf32>
    %152 = arith.addf %148, %151 : vector<16x32xf32>
    %c1_85 = arith.constant 1 : index
    %c0_86 = arith.constant 0 : index
    %c0_87 = arith.constant 0 : index
    %153 = vector.load %arg5[%c1_85, %c0_86, %c0_87] : memref<2x32x32xbf16, #tpu.memory_space<vmem>>, vector<1x32x32xbf16>
    %154 = vector.shape_cast %153 : vector<1x32x32xbf16> to vector<32x32xbf16>
    %cst_88 = arith.constant dense<0.000000e+00> : vector<16x32xf32>
    %155 = tpu.matmul %145, %154, %cst_88 {dimension_numbers = #tpu.dot_dimension_numbers<[1], [0], [0], [1], [0, 0, 1, 1], [], []>} : vector<16x32xbf16>, vector<32x32xbf16>, vector<16x32xf32> -> vector<16x32xf32>
    %c1_89 = arith.constant 1 : index
    %c0_90 = arith.constant 0 : index
    %c0_91 = arith.constant 0 : index
    %156 = vector.load %arg6[%c1_89, %c0_90, %c0_91] : memref<2x1x32xf32, #tpu.memory_space<vmem>>, vector<1x1x32xf32>
    %157 = vector.shape_cast %156 : vector<1x1x32xf32> to vector<1x32xf32>
    %158 = vector.broadcast %157 : vector<1x32xf32> to vector<16x32xf32>
    %159 = arith.addf %155, %158 : vector<16x32xf32>
    %c1_92 = arith.constant 1 : index
    %c0_93 = arith.constant 0 : index
    %c0_94 = arith.constant 0 : index
    %160 = vector.load %arg7[%c1_92, %c0_93, %c0_94] : memref<2x32x32xbf16, #tpu.memory_space<vmem>>, vector<1x32x32xbf16>
    %161 = vector.shape_cast %160 : vector<1x32x32xbf16> to vector<32x32xbf16>
    %cst_95 = arith.constant dense<0.000000e+00> : vector<16x32xf32>
    %162 = tpu.matmul %145, %161, %cst_95 {dimension_numbers = #tpu.dot_dimension_numbers<[1], [0], [0], [1], [0, 0, 1, 1], [], []>} : vector<16x32xbf16>, vector<32x32xbf16>, vector<16x32xf32> -> vector<16x32xf32>
    %c1_96 = arith.constant 1 : index
    %c0_97 = arith.constant 0 : index
    %c0_98 = arith.constant 0 : index
    %163 = vector.load %arg8[%c1_96, %c0_97, %c0_98] : memref<2x1x32xf32, #tpu.memory_space<vmem>>, vector<1x1x32xf32>
    %164 = vector.shape_cast %163 : vector<1x1x32xf32> to vector<1x32xf32>
    %165 = vector.broadcast %164 : vector<1x32xf32> to vector<16x32xf32>
    %166 = arith.addf %162, %165 : vector<16x32xf32>
    %167 = vector.shape_cast %152 : vector<16x32xf32> to vector<16x4x8xf32>
    %168 = arith.truncf %167 : vector<16x4x8xf32> to vector<16x4x8xbf16>
    %169 = vector.shape_cast %159 : vector<16x32xf32> to vector<16x4x8xf32>
    %170 = arith.truncf %169 : vector<16x4x8xf32> to vector<16x4x8xbf16>
    %171 = vector.shape_cast %166 : vector<16x32xf32> to vector<16x4x8xf32>
    %172 = arith.truncf %171 : vector<16x4x8xf32> to vector<16x4x8xbf16>
    "tpu.trace_start"() <{level = 10 : i32, message = "qhd,khd->hqk"}> : () -> ()
    %cst_99 = arith.constant dense<0.000000e+00> : vector<4x16x16xf32>
    %173 = tpu.matmul %168, %170, %cst_99 {dimension_numbers = #tpu.dot_dimension_numbers<[2], [2], [0], [0], [0, 1, 0, 0, 1, 0], [1], [1]>} : vector<16x4x8xbf16>, vector<16x4x8xbf16>, vector<4x16x16xf32> -> vector<4x16x16xf32>
    "tpu.trace_stop"() : () -> ()
    %cst_100 = arith.constant 0.353553385 : f32
    %174 = vector.broadcast %cst_100 : f32 to vector<4x16x16xf32>
    %175 = arith.mulf %173, %174 : vector<4x16x16xf32>
    %176 = vector.broadcast %6 : vector<1x1x16xf32> to vector<4x16x16xf32>
    %177 = arith.addf %175, %176 : vector<4x16x16xf32>
    %cst_101 = arith.constant dense<0xFF800000> : vector<4x16xf32>
    %178 = vector.multi_reduction <maximumf>, %177, %cst_101 [2] : vector<4x16x16xf32> to vector<4x16xf32>
    %179 = vector.shape_cast %178 : vector<4x16xf32> to vector<4x16x1xf32>
    %180 = vector.broadcast %179 : vector<4x16x1xf32> to vector<4x16x16xf32>
    %181 = arith.subf %177, %180 : vector<4x16x16xf32>
    %182 = math.exp %181 : vector<4x16x16xf32>
    %cst_102 = arith.constant dense<0.000000e+00> : vector<4x16xf32>
    %183 = vector.multi_reduction <add>, %182, %cst_102 [2] : vector<4x16x16xf32> to vector<4x16xf32>
    %184 = vector.shape_cast %183 : vector<4x16xf32> to vector<4x16x1xf32>
    %185 = tpu.reciprocal %184 {approx = true} : vector<4x16x1xf32> -> vector<4x16x1xf32>
    %186 = vector.broadcast %185 : vector<4x16x1xf32> to vector<4x16x16xf32>
    %187 = arith.mulf %182, %186 : vector<4x16x16xf32>
    %188 = arith.truncf %187 : vector<4x16x16xf32> to vector<4x16x16xbf16>
    "tpu.trace_start"() <{level = 10 : i32, message = "hqk,khd->qhd"}> : () -> ()
    %cst_103 = arith.constant dense<0.000000e+00> : vector<4x8x16xf32>
    %189 = tpu.matmul %172, %188, %cst_103 {dimension_numbers = #tpu.dot_dimension_numbers<[0], [2], [2], [1], [0, 1, 0, 2, 1, 1], [1], [0]>} : vector<16x4x8xbf16>, vector<4x16x16xbf16>, vector<4x8x16xf32> -> vector<4x8x16xf32>
    %190 = tpu.transpose %189, [2, 0, 1] : vector<4x8x16xf32> -> vector<16x4x8xf32>
    "tpu.trace_stop"() : () -> ()
    %191 = vector.shape_cast %190 : vector<16x4x8xf32> to vector<16x32xf32>
    %192 = arith.truncf %191 : vector<16x32xf32> to vector<16x32xbf16>
    %c1_104 = arith.constant 1 : index
    %c0_105 = arith.constant 0 : index
    %c0_106 = arith.constant 0 : index
    %193 = vector.load %arg9[%c1_104, %c0_105, %c0_106] : memref<2x32x32xbf16, #tpu.memory_space<vmem>>, vector<1x32x32xbf16>
    %194 = vector.shape_cast %193 : vector<1x32x32xbf16> to vector<32x32xbf16>
    %cst_107 = arith.constant dense<0.000000e+00> : vector<16x32xf32>
    %195 = tpu.matmul %192, %194, %cst_107 {dimension_numbers = #tpu.dot_dimension_numbers<[1], [0], [0], [1], [0, 0, 1, 1], [], []>} : vector<16x32xbf16>, vector<32x32xbf16>, vector<16x32xf32> -> vector<16x32xf32>
    %c1_108 = arith.constant 1 : index
    %c0_109 = arith.constant 0 : index
    %c0_110 = arith.constant 0 : index
    %196 = vector.load %arg10[%c1_108, %c0_109, %c0_110] : memref<2x1x32xf32, #tpu.memory_space<vmem>>, vector<1x1x32xf32>
    %197 = vector.shape_cast %196 : vector<1x1x32xf32> to vector<1x32xf32>
    %198 = vector.broadcast %197 : vector<1x32xf32> to vector<16x32xf32>
    %199 = arith.addf %195, %198 : vector<16x32xf32>
    %200 = arith.addf %144, %199 : vector<16x32xf32>
    %c1_111 = arith.constant 1 : index
    %c0_112 = arith.constant 0 : index
    %c0_113 = arith.constant 0 : index
    %201 = vector.load %arg11[%c1_111, %c0_112, %c0_113] : memref<2x1x32xf32, #tpu.memory_space<vmem>>, vector<1x1x32xf32>
    %202 = vector.shape_cast %201 : vector<1x1x32xf32> to vector<1x32xf32>
    %c1_114 = arith.constant 1 : index
    %c0_115 = arith.constant 0 : index
    %c0_116 = arith.constant 0 : index
    %203 = vector.load %arg12[%c1_114, %c0_115, %c0_116] : memref<2x1x32xf32, #tpu.memory_space<vmem>>, vector<1x1x32xf32>
    %204 = vector.shape_cast %203 : vector<1x1x32xf32> to vector<1x32xf32>
    %cst_117 = arith.constant dense<0.000000e+00> : vector<16xf32>
    %205 = vector.multi_reduction <add>, %200, %cst_117 [1] : vector<16x32xf32> to vector<16xf32>
    %206 = vector.shape_cast %205 : vector<16xf32> to vector<16x1xf32>
    %cst_118 = arith.constant 3.200000e+01 : f32
    %207 = vector.broadcast %cst_118 : f32 to vector<16x1xf32>
    %208 = arith.divf %206, %207 : vector<16x1xf32>
    %209 = vector.broadcast %208 : vector<16x1xf32> to vector<16x32xf32>
    %210 = arith.subf %200, %209 : vector<16x32xf32>
    %211 = arith.mulf %210, %210 : vector<16x32xf32>
    %cst_119 = arith.constant dense<0.000000e+00> : vector<16xf32>
    %212 = vector.multi_reduction <add>, %211, %cst_119 [1] : vector<16x32xf32> to vector<16xf32>
    %213 = vector.shape_cast %212 : vector<16xf32> to vector<16x1xf32>
    %cst_120 = arith.constant 3.200000e+01 : f32
    %214 = vector.broadcast %cst_120 : f32 to vector<16x1xf32>
    %215 = arith.divf %213, %214 : vector<16x1xf32>
    %216 = vector.broadcast %208 : vector<16x1xf32> to vector<16x32xf32>
    %217 = arith.subf %200, %216 : vector<16x32xf32>
    %cst_121 = arith.constant 9.99999996E-13 : f32
    %218 = vector.broadcast %cst_121 : f32 to vector<16x1xf32>
    %219 = arith.addf %215, %218 : vector<16x1xf32>
    %220 = math.rsqrt %219 : vector<16x1xf32>
    %221 = vector.broadcast %220 : vector<16x1xf32> to vector<16x32xf32>
    %222 = arith.mulf %217, %221 : vector<16x32xf32>
    %223 = vector.broadcast %202 : vector<1x32xf32> to vector<16x32xf32>
    %224 = arith.mulf %222, %223 : vector<16x32xf32>
    %225 = vector.broadcast %204 : vector<1x32xf32> to vector<16x32xf32>
    %226 = arith.addf %224, %225 : vector<16x32xf32>
    %227 = arith.truncf %226 : vector<16x32xf32> to vector<16x32xbf16>
    %c1_122 = arith.constant 1 : index
    %c0_123 = arith.constant 0 : index
    %c0_124 = arith.constant 0 : index
    %228 = vector.load %arg13[%c1_122, %c0_123, %c0_124] : memref<2x32x64xbf16, #tpu.memory_space<vmem>>, vector<1x32x64xbf16>
    %229 = vector.shape_cast %228 : vector<1x32x64xbf16> to vector<32x64xbf16>
    %cst_125 = arith.constant dense<0.000000e+00> : vector<16x64xf32>
    %230 = tpu.matmul %227, %229, %cst_125 {dimension_numbers = #tpu.dot_dimension_numbers<[1], [0], [0], [1], [0, 0, 1, 1], [], []>} : vector<16x32xbf16>, vector<32x64xbf16>, vector<16x64xf32> -> vector<16x64xf32>
    %c1_126 = arith.constant 1 : index
    %c0_127 = arith.constant 0 : index
    %c0_128 = arith.constant 0 : index
    %231 = vector.load %arg14[%c1_126, %c0_127, %c0_128] : memref<2x1x64xf32, #tpu.memory_space<vmem>>, vector<1x1x64xf32>
    %232 = vector.shape_cast %231 : vector<1x1x64xf32> to vector<1x64xf32>
    %233 = vector.broadcast %232 : vector<1x64xf32> to vector<16x64xf32>
    %234 = arith.addf %230, %233 : vector<16x64xf32>
    %235 = arith.mulf %234, %234 : vector<16x64xf32>
    %236 = arith.mulf %234, %235 : vector<16x64xf32>
    %cst_129 = arith.constant 4.471500e-02 : f32
    %237 = vector.broadcast %cst_129 : f32 to vector<16x64xf32>
    %238 = arith.mulf %237, %236 : vector<16x64xf32>
    %239 = arith.addf %234, %238 : vector<16x64xf32>
    %cst_130 = arith.constant 0.797884583 : f32
    %240 = vector.broadcast %cst_130 : f32 to vector<16x64xf32>
    %241 = arith.mulf %240, %239 : vector<16x64xf32>
    %242 = math.tanh %241 : vector<16x64xf32>
    %cst_131 = arith.constant 1.000000e+00 : f32
    %243 = vector.broadcast %cst_131 : f32 to vector<16x64xf32>
    %244 = arith.addf %243, %242 : vector<16x64xf32>
    %cst_132 = arith.constant 5.000000e-01 : f32
    %245 = vector.broadcast %cst_132 : f32 to vector<16x64xf32>
    %246 = arith.mulf %245, %244 : vector<16x64xf32>
    %247 = arith.mulf %234, %246 : vector<16x64xf32>
    %248 = arith.truncf %247 : vector<16x64xf32> to vector<16x64xbf16>
    %c1_133 = arith.constant 1 : index
    %c0_134 = arith.constant 0 : index
    %c0_135 = arith.constant 0 : index
    %249 = vector.load %arg15[%c1_133, %c0_134, %c0_135] : memref<2x64x32xbf16, #tpu.memory_space<vmem>>, vector<1x64x32xbf16>
    %250 = vector.shape_cast %249 : vector<1x64x32xbf16> to vector<64x32xbf16>
    %cst_136 = arith.constant dense<0.000000e+00> : vector<16x32xf32>
    %251 = tpu.matmul %248, %250, %cst_136 {dimension_numbers = #tpu.dot_dimension_numbers<[1], [0], [0], [1], [0, 0, 1, 1], [], []>} : vector<16x64xbf16>, vector<64x32xbf16>, vector<16x32xf32> -> vector<16x32xf32>
    %c1_137 = arith.constant 1 : index
    %c0_138 = arith.constant 0 : index
    %c0_139 = arith.constant 0 : index
    %252 = vector.load %arg16[%c1_137, %c0_138, %c0_139] : memref<2x1x32xf32, #tpu.memory_space<vmem>>, vector<1x1x32xf32>
    %253 = vector.shape_cast %252 : vector<1x1x32xf32> to vector<1x32xf32>
    %254 = vector.broadcast %253 : vector<1x32xf32> to vector<16x32xf32>
    %255 = arith.addf %251, %254 : vector<16x32xf32>
    %256 = arith.addf %226, %255 : vector<16x32xf32>
    %c1_140 = arith.constant 1 : index
    %c0_141 = arith.constant 0 : index
    %c0_142 = arith.constant 0 : index
    %257 = vector.load %arg17[%c1_140, %c0_141, %c0_142] : memref<2x1x32xf32, #tpu.memory_space<vmem>>, vector<1x1x32xf32>
    %258 = vector.shape_cast %257 : vector<1x1x32xf32> to vector<1x32xf32>
    %c1_143 = arith.constant 1 : index
    %c0_144 = arith.constant 0 : index
    %c0_145 = arith.constant 0 : index
    %259 = vector.load %arg18[%c1_143, %c0_144, %c0_145] : memref<2x1x32xf32, #tpu.memory_space<vmem>>, vector<1x1x32xf32>
    %260 = vector.shape_cast %259 : vector<1x1x32xf32> to vector<1x32xf32>
    %cst_146 = arith.constant dense<0.000000e+00> : vector<16xf32>
    %261 = vector.multi_reduction <add>, %256, %cst_146 [1] : vector<16x32xf32> to vector<16xf32>
    %262 = vector.shape_cast %261 : vector<16xf32> to vector<16x1xf32>
    %cst_147 = arith.constant 3.200000e+01 : f32
    %263 = vector.broadcast %cst_147 : f32 to vector<16x1xf32>
    %264 = arith.divf %262, %263 : vector<16x1xf32>
    %265 = vector.broadcast %264 : vector<16x1xf32> to vector<16x32xf32>
    %266 = arith.subf %256, %265 : vector<16x32xf32>
    %267 = arith.mulf %266, %266 : vector<16x32xf32>
    %cst_148 = arith.constant dense<0.000000e+00> : vector<16xf32>
    %268 = vector.multi_reduction <add>, %267, %cst_148 [1] : vector<16x32xf32> to vector<16xf32>
    %269 = vector.shape_cast %268 : vector<16xf32> to vector<16x1xf32>
    %cst_149 = arith.constant 3.200000e+01 : f32
    %270 = vector.broadcast %cst_149 : f32 to vector<16x1xf32>
    %271 = arith.divf %269, %270 : vector<16x1xf32>
    %272 = vector.broadcast %264 : vector<16x1xf32> to vector<16x32xf32>
    %273 = arith.subf %256, %272 : vector<16x32xf32>
    %cst_150 = arith.constant 9.99999996E-13 : f32
    %274 = vector.broadcast %cst_150 : f32 to vector<16x1xf32>
    %275 = arith.addf %271, %274 : vector<16x1xf32>
    %276 = math.rsqrt %275 : vector<16x1xf32>
    %277 = vector.broadcast %276 : vector<16x1xf32> to vector<16x32xf32>
    %278 = arith.mulf %273, %277 : vector<16x32xf32>
    %279 = vector.broadcast %258 : vector<1x32xf32> to vector<16x32xf32>
    %280 = arith.mulf %278, %279 : vector<16x32xf32>
    %281 = vector.broadcast %260 : vector<1x32xf32> to vector<16x32xf32>
    %282 = arith.addf %280, %281 : vector<16x32xf32>
    %c0_151 = arith.constant 0 : index
    %c0_152 = arith.constant 0 : index
    %c0_153 = arith.constant 0 : index
    %283 = vector.load %arg19[%c0_151, %c0_152, %c0_153] : memref<1x16x32xf32, #tpu.memory_space<vmem>>, vector<1x16x32xf32>
    %284 = vector.shape_cast %283 : vector<1x16x32xf32> to vector<16x32xf32>
    %285 = vector.shape_cast %282 : vector<16x32xf32> to vector<1x16x32xf32>
    tpu.vector_store %arg19[%c0_151, %c0_152, %c0_153], %285 {strides = array<i32>} : memref<1x16x32xf32, #tpu.memory_space<vmem>>, vector<1x16x32xf32>,
    return
  }
  func.func @transform_0(%arg0: i32) -> (i32, i32, i32) {
    %c0_i32 = arith.constant 0 : i32
    %c0_i32_0 = arith.constant 0 : i32
    %c0_i32_1 = arith.constant 0 : i32
    return %arg0, %c0_i32, %c0_i32_0 : i32, i32, i32
  }
  func.func @transform_1(%arg0: i32) -> (i32, i32, i32) {
    %c0_i32 = arith.constant 0 : i32
    %c0_i32_0 = arith.constant 0 : i32
    %c0_i32_1 = arith.constant 0 : i32
    return %arg0, %c0_i32, %c0_i32_0 : i32, i32, i32
  }
  func.func @transform_2(%arg0: i32) -> (i32, i32, i32) {
    %c0_i32 = arith.constant 0 : i32
    %c0_i32_0 = arith.constant 0 : i32
    %c0_i32_1 = arith.constant 0 : i32
    %c0_i32_2 = arith.constant 0 : i32
    return %c0_i32, %c0_i32_0, %c0_i32_1 : i32, i32, i32
  }
  func.func @transform_3(%arg0: i32) -> (i32, i32, i32) {
    %c0_i32 = arith.constant 0 : i32
    %c0_i32_0 = arith.constant 0 : i32
    %c0_i32_1 = arith.constant 0 : i32
    %c0_i32_2 = arith.constant 0 : i32
    return %c0_i32, %c0_i32_0, %c0_i32_1 : i32, i32, i32
  }
  func.func @transform_4(%arg0: i32) -> (i32, i32, i32) {
    %c0_i32 = arith.constant 0 : i32
    %c0_i32_0 = arith.constant 0 : i32
    %c0_i32_1 = arith.constant 0 : i32
    %c0_i32_2 = arith.constant 0 : i32
    return %c0_i32, %c0_i32_0, %c0_i32_1 : i32, i32, i32
  }
  func.func @transform_5(%arg0: i32) -> (i32, i32, i32) {
    %c0_i32 = arith.constant 0 : i32
    %c0_i32_0 = arith.constant 0 : i32
    %c0_i32_1 = arith.constant 0 : i32
    %c0_i32_2 = arith.constant 0 : i32
    return %c0_i32, %c0_i32_0, %c0_i32_1 : i32, i32, i32
  }
  func.func @transform_6(%arg0: i32) -> (i32, i32, i32) {
    %c0_i32 = arith.constant 0 : i32
    %c0_i32_0 = arith.constant 0 : i32
    %c0_i32_1 = arith.constant 0 : i32
    %c0_i32_2 = arith.constant 0 : i32
    return %c0_i32, %c0_i32_0, %c0_i32_1 : i32, i32, i32
  }
  func.func @transform_7(%arg0: i32) -> (i32, i32, i32) {
    %c0_i32 = arith.constant 0 : i32
    %c0_i32_0 = arith.constant 0 : i32
    %c0_i32_1 = arith.constant 0 : i32
    %c0_i32_2 = arith.constant 0 : i32
    return %c0_i32, %c0_i32_0, %c0_i32_1 : i32, i32, i32
  }
  func.func @transform_8(%arg0: i32) -> (i32, i32, i32) {
    %c0_i32 = arith.constant 0 : i32
    %c0_i32_0 = arith.constant 0 : i32
    %c0_i32_1 = arith.constant 0 : i32
    %c0_i32_2 = arith.constant 0 : i32
    return %c0_i32, %c0_i32_0, %c0_i32_1 : i32, i32, i32
  }
  func.func @transform_9(%arg0: i32) -> (i32, i32, i32) {
    %c0_i32 = arith.constant 0 : i32
    %c0_i32_0 = arith.constant 0 : i32
    %c0_i32_1 = arith.constant 0 : i32
    %c0_i32_2 = arith.constant 0 : i32
    return %c0_i32, %c0_i32_0, %c0_i32_1 : i32, i32, i32
  }
  func.func @transform_10(%arg0: i32) -> (i32, i32, i32) {
    %c0_i32 = arith.constant 0 : i32
    %c0_i32_0 = arith.constant 0 : i32
    %c0_i32_1 = arith.constant 0 : i32
    %c0_i32_2 = arith.constant 0 : i32
    return %c0_i32, %c0_i32_0, %c0_i32_1 : i32, i32, i32
  }
  func.func @transform_11(%arg0: i32) -> (i32, i32, i32) {
    %c0_i32 = arith.constant 0 : i32
    %c0_i32_0 = arith.constant 0 : i32
    %c0_i32_1 = arith.constant 0 : i32
    %c0_i32_2 = arith.constant 0 : i32
    return %c0_i32, %c0_i32_0, %c0_i32_1 : i32, i32, i32
  }
  func.func @transform_12(%arg0: i32) -> (i32, i32, i32) {
    %c0_i32 = arith.constant 0 : i32
    %c0_i32_0 = arith.constant 0 : i32
    %c0_i32_1 = arith.constant 0 : i32
    %c0_i32_2 = arith.constant 0 : i32
    return %c0_i32, %c0_i32_0, %c0_i32_1 : i32, i32, i32
  }
  func.func @transform_13(%arg0: i32) -> (i32, i32, i32) {
    %c0_i32 = arith.constant 0 : i32
    %c0_i32_0 = arith.constant 0 : i32
    %c0_i32_1 = arith.constant 0 : i32
    %c0_i32_2 = arith.constant 0 : i32
    return %c0_i32, %c0_i32_0, %c0_i32_1 : i32, i32, i32
  }
  func.func @transform_14(%arg0: i32) -> (i32, i32, i32) {
    %c0_i32 = arith.constant 0 : i32
    %c0_i32_0 = arith.constant 0 : i32
    %c0_i32_1 = arith.constant 0 : i32
    %c0_i32_2 = arith.constant 0 : i32
    return %c0_i32, %c0_i32_0, %c0_i32_1 : i32, i32, i32
  }
  func.func @transform_15(%arg0: i32) -> (i32, i32, i32) {
    %c0_i32 = arith.constant 0 : i32
    %c0_i32_0 = arith.constant 0 : i32
    %c0_i32_1 = arith.constant 0 : i32
    %c0_i32_2 = arith.constant 0 : i32
    return %c0_i32, %c0_i32_0, %c0_i32_1 : i32, i32, i32
  }
  func.func @transform_16(%arg0: i32) -> (i32, i32, i32) {
    %c0_i32 = arith.constant 0 : i32
    %c0_i32_0 = arith.constant 0 : i32
    %c0_i32_1 = arith.constant 0 : i32
    %c0_i32_2 = arith.constant 0 : i32
    return %c0_i32, %c0_i32_0, %c0_i32_1 : i32, i32, i32
  }
  func.func @transform_17(%arg0: i32) -> (i32, i32, i32) {
    %c0_i32 = arith.constant 0 : i32
    %c0_i32_0 = arith.constant 0 : i32
    %c0_i32_1 = arith.constant 0 : i32
    %c0_i32_2 = arith.constant 0 : i32
    return %c0_i32, %c0_i32_0, %c0_i32_1 : i32, i32, i32
  }
  func.func @transform_18(%arg0: i32) -> (i32, i32, i32) {
    %c0_i32 = arith.constant 0 : i32
    %c0_i32_0 = arith.constant 0 : i32
    %c0_i32_1 = arith.constant 0 : i32
    return %arg0, %c0_i32, %c0_i32_0 : i32, i32, i32
  }
}

</mosaic_0001>

<bundles_post_ra>
// kernel: tpu_custom_call.1
= control target key start
LH: loop header
LB: loop body
LE: loop exit
PB: predicated region body
PF: predicated region fallthrough
CT: control target
= control target key end

     0   :  { %s9562_s0 = inlined_call_operand.vmem [shape: f32[2,16,32], index: 0, kind: input, shape index: {}]   ;;  %s9563_s1 = inlined_call_operand.hbm [shape: f32[2,1,16], index: 1, kind: input, shape index: {}]   ;;  %s9564_s2 = inlined_call_operand.vmem [shape: bf16[2,32,32], index: 2, kind: input, shape index: {}]   ;;  %s9565_s3 = inlined_call_operand.vmem [shape: f32[2,1,32], index: 3, kind: input, shape index: {}]   ;;  %s9566_s4 = inlined_call_operand.vmem [shape: bf16[2,32,32], index: 4, kind: input, shape index: {}]   ;;  %s9567_s5 = inlined_call_operand.vmem [shape: f32[2,1,32], index: 5, kind: input, shape index: {}]   ;;  %s9568_s6 = inlined_call_operand.hbm [shape: bf16[2,32,32], index: 6, kind: input, shape index: {}]   ;;  %s9569_s7 = inlined_call_operand.vmem [shape: f32[2,1,32], index: 7, kind: input, shape index: {}]   ;;  %s9570_s8 = inlined_call_operand.hbm [shape: bf16[2,32,32], index: 8, kind: input, shape index: {}]   ;;  %s9571_s9 = inlined_call_operand.vmem [shape: f32[2,1,32], index: 9, kind: input, shape index: {}]   ;;  %s9572_s10 = inlined_call_operand.vmem [shape: f32[2,1,32], index: 10, kind: input, shape index: {}]   ;;  %s9573_s11 = inlined_call_operand.vmem [shape: f32[2,1,32], index: 11, kind: input, shape index: {}]   ;;  %s9574_s12 = inlined_call_operand.hbm [shape: bf16[2,32,64], index: 12, kind: input, shape index: {}]   ;;  %s9575_s13 = inlined_call_operand.vmem [shape: f32[2,1,64], index: 13, kind: input, shape index: {}]   ;;  %s9576_s14 = inlined_call_operand.vmem [shape: bf16[2,64,32], index: 14, kind: input, shape index: {}]   ;;  %s9577_s15 = inlined_call_operand.vmem [shape: f32[2,1,32], index: 15, kind: input, shape index: {}]   ;;  %s9578_s16 = inlined_call_operand.vmem [shape: f32[2,1,32], index: 16, kind: input, shape index: {}]   ;;  %s9579_s17 = inlined_call_operand.vmem [shape: f32[2,1,32], index: 17, kind: input, shape index: {}]   ;;  %s9580_s18 = inlined_call_operand.hbm [shape: f32[2,16,32], index: 18, kind: output, shape index: {}]  }
   0x1   :  { %9595 = sst [smem:[#allocation21_spill]] %s9562_s0 }
   0x2   :  { %9596 = sst [smem:[#allocation22_spill]] %s9563_s1 }
   0x3   :  { %9597 = sst [smem:[#allocation23_spill]] %s9564_s2 }
   0x4   :  { %9598 = sst [smem:[#allocation24_spill]] %s9568_s6 }
   0x5   :  { %9599 = sst [smem:[#allocation25_spill]] %s9570_s8 }
   0x6   :  { %9600 = sst [smem:[#allocation26_spill]] %s9574_s12 }
   0x7   :  { %9601 = sst [smem:[#allocation27_spill]] %s9579_s17 }
   0x8   :  { %9602 = sst [smem:[#allocation28_spill]] %s9580_s18 }
   0x9   :  { %23 = vsyncpa [#allocation3], 0 }
   0xa   :  { %25 = vsyncpa [#allocation3 + $0x1], 0 }
   0xb   :  { %26 = vsyncpa [#allocation6], 0 }
   0xc   :  { %27 = vsyncpa [#allocation9], 0 }
   0xd   :  { %28 = vsyncpa [#allocation4], 0 }
   0xe   :  { %30 = vsyncpa [#allocation4 + $0x1], 0  ;;  %s8351_s27 = smov 0   ;;  %s8353_s28 = smov 0  }
   0xf   :  { %s8355_s29 = smov 0   ;;  %s8357_s30 = smov 0  }
  0x10 LB: > { %9603 = sst [smem:[#allocation15_spill]] %s8223_s27  ;;  %s8372_s0 = sadd.s32 4294967295, %s8235_s30   ;;  %s8235_s30 = sphi %s8357_s30, %s9637_s30   ;;  %s8231_s29 = sphi %s8355_s29, %s9639_s29   ;;  %s8227_s28 = sphi %s8353_s28, %s9641_s28   ;;  %s8223_s27 = sphi %s8351_s27, %s9640_s27  }
  0x11   : > { %9604 = sst [smem:[#allocation16_spill]] %s8231_s29  ;;  %s7398_s19 = sadd.s32 4294967294, %s8235_s30  }
  0x12   : > { %9605 = sst [smem:[#allocation17_spill]] %s8235_s30  ;;  %p82_p0 = scmp.ne.s32.totalorder %s8227_s28, %s8223_s27 }
  0x13   : > { %p9586_p1 = scmp.eq.s32.totalorder %s8372_s0, 0  ;;  %p448_p3 = scmp.eq.s32.totalorder %s7398_s19, 1 }
  0x14   : > { %p7399_p5 = scmp.ge.s32.totalorder %s8235_s30, 1  ;;  %p455_p7 = scmp.lt.s32.totalorder %s8235_s30, 3 }
  0x15   : > { %p8381_p4 = por %p9586_p1, %p82_p0  ;;  %p8386_p6 = por %p448_p3, %p82_p0 }
  0x16   : > { %p8391_p8 = pnand %p7399_p5, %p455_p7  ;;  %s8237_s22 = smov [#allocation5]  }
  0x17   : > { %s9606_s1 = scalar_select %p8381_p4, 1, 0 }
  0x18   : > { %s9607_s20 = scalar_select %p8386_p6, 1, 0 }
  0x19   : > { %s9609_s21 = scalar_select %p8391_p8, 1, 0 }
  0x1a   : > { %9608 = sst [smem:[#allocation18_spill]] %s9607_s20  ;;  %s479_s2 = sshll.u32 %s8237_s22, 4  ;;  %s480_s2 = int_to_ptr.vmem [resolvable:$true] %s479_s2 }
  0x1b   : > { %p7834_p9 = pneg %p8391_p8  ;;  %s8238_s24 = smov [#allocation7]  }
  0x1c   : > { %s495_s25 = sshll.u32 %s8238_s24, 4  ;;  %s8239_s26 = smov [#allocation8]   ;;  %s496_s25 = int_to_ptr.vmem [resolvable:$true] %s495_s25 }
  0x1d   : > { %p8400_p11 = pnand %p7834_p9, %p9586_p1  ;;  %s517_s19 = sshll.u32 %s8239_s26, 4  ;;  %s518_s19 = int_to_ptr.vmem [resolvable:$true] %s517_s19 }
  0x1e   : > { %s8068_s20 = scalar_lea.vmem %s480_s2, 512  ;;  %p8076_p5 = scmp.lt.s32.totalorder %s480_s2, %s480_s2 }
  0x1f   : > { %p8059_p12 = pneg %p8400_p11  ;;  %p8069_p13 = scmp.ne.s32.totalorder %s480_s2, %s8068_s20 }
  0x20   : > { %p8077_p7 = scmp.lt.s32.totalorder %s8068_s20, %s8068_s20 }
  0x21   : > { %p8071_p0 = pnand %p8069_p13, %p8059_p12 }
  0x22   : > { %p8078_p9 = por %p8077_p7, %p8076_p5 }
  0x23   : > { %p8072_p3 = pneg %p8071_p0 }
  0x25   : > { %p8079_p10 = pnand %p8078_p9, %p8072_p3 }
  0x27   : > { %8082 = shalt.err (!%p8079_p10)
}
  0x28   : > { %s8240_s22 = smov 64   ;;  %s8241_s24 = smov 4  }
  0x29   : > { %s9611_s6 = sld [smem:[#allocation24_spill]]  ;;  %s8094_s18 = scalar_lea.vmem %s496_s25, 512 }
  0x2a   : > { %p8095_p1 = scmp.ne.s32.totalorder %s496_s25, %s8094_s18  ;;  %p8102_p2 = scmp.lt.s32.totalorder %s496_s25, %s496_s25 }
  0x2b   : > { %p8103_p6 = scmp.lt.s32.totalorder %s8094_s18, %s8094_s18 }
  0x2c   : > { %p8097_p13 = pnand %p8095_p1, %p8059_p12 }
  0x2d   : > { %p8104_p5 = por %p8103_p6, %p8102_p2 }
  0x2e   : > { %p8098_p0 = pneg %p8097_p13 }
  0x2f   : > { %7837 = dma.hbm_to_vmem [thread:$0]  (!%p8400_p11), %s9611_s6, 512, %s480_s2, [#allocation6], %s8240_s22, %s8240_s22, %s8241_s24  }
  0x30   : > { %p8105_p3 = pnand %p8104_p5, %p8098_p0 }
  0x32   : > { %8108 = shalt.err (!%p8105_p3)
}
  0x33   : > { %s9612_s8 = sld [smem:[#allocation25_spill]]  ;;  %s8120_s27 = scalar_lea.vmem %s518_s19, 512 }
  0x34   : > { %p8121_p10 = scmp.ne.s32.totalorder %s518_s19, %s8120_s27  ;;  %p8128_p9 = scmp.lt.s32.totalorder %s518_s19, %s518_s19 }
  0x35   : > { %p8129_p13 = scmp.lt.s32.totalorder %s8120_s27, %s8120_s27 }
  0x36   : > { %p8123_p7 = pnand %p8121_p10, %p8059_p12 }
  0x37   : > { %p8130_p4 = por %p8129_p13, %p8128_p9 }
  0x38   : > { %p8124_p1 = pneg %p8123_p7 }
  0x39   : > { %7840 = dma.hbm_to_vmem [thread:$0]  (!%p8400_p11), %s9612_s8, 512, %s496_s25, [#allocation6], %s8240_s22, %s8240_s22, %s8241_s24  }
  0x3a   : > { %p8131_p2 = pnand %p8130_p4, %p8124_p1 }
  0x3c   : > { %8134 = shalt.err (!%p8131_p2)
}
  0x3d   : > { %s9613_s12 = sld [smem:[#allocation26_spill]]  ;;  %s8431_s17 = sadd.s32 1, %s8235_s30  }
  0x3e   : > { %9614 = sst [smem:[#allocation19_spill]] %s8431_s17  ;;  %s66_s25 = ssub.s32 %s8235_s30, %s8431_s17 }
  0x3f   : > { %s69_s23 = sadd.s32 1, %s8231_s29  ;;  %p67_p4 = scmp.eq.s32.totalorder %s66_s25, 0 }
  0x40   : > { %p76_p6 = scmp.ne.s32.totalorder %s8231_s29, %s8227_s28  ;;  %p77_p12 = scmp.eq.s32.totalorder %s8235_s30, 0 }
  0x41   : > { %p7855_p0 = scmp.lt.s32.totalorder %s8235_s30, 2  ;;  %p9616_p3 = scmp.eq.s32.totalorder %s8372_s0, 1 }
  0x42   : > { %s8441_s26 = scalar_select %p67_p4, %s8231_s29, %s69_s23  }
  0x43   : > { %7843 = dma.hbm_to_vmem [thread:$0]  (!%p8400_p11), %s9613_s12, 512, %s518_s19, [#allocation9], %s8240_s22, %s8240_s22, %s8241_s24  }
  0x44   : > { %9615 = sst [smem:[#allocation20_spill]] %s8441_s26  ;;  %p78_p5 = por %p77_p12, %p76_p6 }
  0x45   : > { %p8445_p10 = por %p9616_p3, %p76_p6  ;;  %s554_s27 = sand.u32 1, %s8231_s29  }
  0x46   : > { %s7404_s18 = sshll.u32 %s8235_s30, 4  ;;  %s9618_s24 = sld [smem:[#allocation22_spill]] }
  0x47   : > { %s9617_s20 = scalar_select %p8445_p10, 1, 0 }
  0x48   : > { %s557_s25 = scalar_lea.vmem [#allocation2], %s554_s27  ;;  %p8456_p11 = pnand %p7855_p0, %p78_p5 }
  0x49   : > { %s564_s6 = sshll.u32 %s557_s25, 4  ;;  %s555_s8 = scalar_lea.sflag [#allocation3], %s554_s27  ;;  %s565_s6 = int_to_ptr.vmem [resolvable:$true] %s564_s6 }
  0x4a   : > { %p8137_p1 = pneg %p8456_p11 }
  0x4c   : > { %s8454_s2 = scalar_lea.hbm %s9618_s24, %s7404_s18  ;;  %s8140_s22 = scalar_lea.hbm %s9618_s24, 32 }
  0x4d   : > { %s8135_s12 = scalar_lea.hbm %s8454_s2, 16  ;;  %p8141_p2 = scmp.lt.s32.totalorder %s8454_s2, %s9618_s24 }
  0x4e   : > { %p8136_p7 = scmp.ne.s32.totalorder %s8454_s2, %s8135_s12  ;;  %p8142_p4 = scmp.lt.s32.totalorder %s8140_s22, %s8135_s12 }
  0x50   : > { %p8138_p9 = pnand %p8137_p1, %p8136_p7  ;;  %p8143_p6 = por %p8142_p4, %p8141_p2 }
  0x52   : > { %p8139_p13 = pneg %p8138_p9 }
  0x54   : > { %p8144_p12 = pnand %p8143_p6, %p8139_p13 }
  0x56   : > { %8147 = shalt.err (!%p8144_p12)
}
  0x57   : > { %s8148_s25 = scalar_lea.vmem %s565_s6, 16  ;;  %s8242_s27 = smov [#allocation2]  }
  0x58   : > { %p8149_p0 = scmp.ne.s32.totalorder %s565_s6, %s8148_s25  ;;  %s8153_s17 = sshll.u32 %s8242_s27, 4  ;;  %s8154_s17 = int_to_ptr.vmem [resolvable:$false] %s8153_s17 }
  0x59   : > { %s8155_s30 = scalar_lea.vmem %s8154_s17, 32  ;;  %p8156_p7 = scmp.lt.s32.totalorder %s565_s6, %s8154_s17 }
  0x5a   : > { %p8151_p5 = pnand %p8149_p0, %p8137_p1  ;;  %p8157_p9 = scmp.lt.s32.totalorder %s8155_s30, %s8148_s25 }
  0x5c   : > { %p8152_p3 = pneg %p8151_p5  ;;  %p8158_p10 = por %p8157_p9, %p8156_p7 }
  0x5e   : > { %p8159_p8 = pnand %p8158_p10, %p8152_p3 }
  0x60   : > { %8162 = shalt.err (!%p8159_p8)
}
  0x61   : > { %7847 = dma.hbm_to_vmem [thread:$0]  (!%p8456_p11), %s8454_s2, 16, %s565_s6, %s555_s8  }
  0x62   : > { %p9620_p13 = scmp.ne.s32.totalorder %s9609_s21, 0 }
  0x63   : > { %s8477_s12 = sand.u32 (!%p9620_p13), 1, %s8227_s28   ;;  %p9621_p1 = scmp.ne.s32.totalorder (!%p9620_p13), %s9606_s1, 0 }
  0x64   : > { %573 = sbr.rel (%p9620_p13) target bundleno = 5932 (0x172c), region = 92  ;;  %s576_s29 = scalar_lea.sflag (!%p9620_p13), [#allocation3], %s8477_s12 }
  0x65   : > { %s578_s26 = scalar_lea.vmem (!%p9620_p13), [#allocation2], %s8477_s12 }
  0x69   : > { %8206 = dma.done.wait (%p9621_p1), %s576_s29, 16  }
  0x6a   : > { %8208 = vsyncadd (%p9621_p1), %s576_s29, 4294967280  ;;  %p9622_p8 = scmp.eq.s32.totalorder %s8372_s0, 0 }
  0x6c   : > { %8210 = dma.done.wait (%p9622_p8), [#allocation6], 1024   ;;  %p9623_p10 = pmov %p9622_p8 }
  0x6d   : > { %p9624_p11 = pmov %p9622_p8 }
  0x6e   : > { %8212 = vsyncadd (%p9623_p10), [#allocation6], 4294966272 }
  0x6f   : > { %8214 = dma.done.wait (%p9624_p11), [#allocation9], 512   ;;  %p9625_p2 = pmov %p9622_p8 }
  0x70   : > { %p647_p4 = scmp.lt.s32.totalorder %s8372_s0, 1  ;;  %v8243_v0 = vmov 0.0   ;;  %vm8244_vm0 = vmmov 0   ;;  %s9626_s21 = sld [smem:[#allocation21_spill]]  ;;  %vm682_vm1 = vcmask 261120   ;;  %v7941_v5 = vld [vmem:[%s9566_s4 + $0x8] sm:$0xff]   ;;  %v880_v26 = vlaneseq }
  0x71   : > { %8216 = vsyncadd (%p9625_p2), [#allocation9], 4294966784  ;;  %7618 = vmatprep.subr.bf16.mxu1 %v8243_v0  ;;  %7622 = vmatprep.mubr.msk.bf16.mxu1 %vm8244_vm0, %v8243_v0  ;;  %s9627_s18 = sld [smem:[#allocation23_spill]]  ;;  %v7942_v7 = vld [vmem:[%s9566_s4] sm:$0xff]   ;;  %v7943_v8 = vld [vmem:[#allocation5 + $0x8] sm:$0xff]   ;;  %s8245_s1 = smov 112  }
  0x72   : > { %s648_s6 = scalar_select %p647_p4, %s8372_s0, 1  ;;  %7634 = vmatprep.subr.bf16.mxu0 %v8243_v0  ;;  %7638 = vmatprep.mubr.msk.bf16.mxu0 %vm8244_vm0, %v8243_v0  ;;  %v7944_v9 = vld [vmem:[#allocation5] sm:$0xff]   ;;  %v7417_v14 = vld [vmem:[%s9567_s5] ss:$0 sm:$0xff]  ;;  %v8248_v24 = vmov 1983009808  }
  0x73   : > { %7635 = vmatpush3.bf16.msra.mxu0 %v7943_v8  ;;  %s8247_s2 = smov 104   ;;  %v7413_v21 = vld [vmem:[%s9565_s3] ss:$0 sm:$0xff]  ;;  %v878_v25 = vunpack.c.l.s4 %v8248_v24  ;;  %v8249_v27 = vmov 1934713408   ;;  %v8562_v30 = vshrl.u32 %v880_v26, 7 }
  0x74   : > { %s7544_s8 = sshll.u32 %s648_s6, 4  ;;  %7636 = vmatprep.subr.bf16.mxu0 %v8243_v0  ;;  %v910_v28 = vunpack.c.l.s4 %v8249_v27  ;;  %vm2101_vm2 = vcmask 1043456   ;;  %vm2097_vm3 = vcmask 64512   ;;  %vm2309_vm4 = vcmask 130048   ;;  %s8252_s27 = smov 8  }
  0x75   : > { %v879_v29 = vunpack.c.0.s8 %v878_v25  ;;  %s8253_s29 = smov 24   ;;  %vm3628_vm5 = vcmask 195584   ;;  %vm3872_vm6 = vcmask 523264   ;;  %s7545_s19 = sshll.u32 %s8372_s0, 8 }
  0x76   : > { %s8504_s17 = scalar_lea.vmem %s9626_s21, %s7544_s8  ;;  %s8246_s21 = smov 120   ;;  %v911_v33 = vunpack.c.0.s8 %v910_v28 }
  0x77   : > { %v7939_v1 = vld [vmem:[%s9627_s18 + $0x8] sm:$0xff]   ;;  %v7940_v2 = vld [vmem:[%s9627_s18] sm:$0xff]   ;;  %7637 = vmatpush3.bf16.msra.mxu0 %v7944_v9  ;;  %v8565_v34 = vsub.s32 %v879_v29, %v8562_v30  ;;  %s7409_s8 = sshll.u32 %s8477_s12, 4  ;;  %s7274_s6 = scalar_lea.sflag [#allocation4], %s8477_s12 }
  0x78   : > { %7619 = vmatpush3.bf16.msra.mxu1 %v7939_v1  ;;  %v653_v3 = vld [vmem:[%s8504_s17] sm:$0xff]  ;;  %v654_v4 = vld [vmem:[%s8504_s17 + $0x8] sm:$0xff]  ;;  %7648 = vmatprep.subr.bf16.mxu0 %v8243_v0  ;;  %v8568_v41 = vsub.s32 %v911_v33, %v8562_v30  ;;  %p9631_p12 = scmp.ne.s32.totalorder %s9617_s20, 0 }
  0x79   : > { %7620 = vmatprep.subr.bf16.mxu1 %v8243_v0  ;;  %v658_v6 = vpack.c.bf16 %v654_v4, %v653_v3 }
  0x7b   : > { %7639 = vmatmul.mubr.msk.bf16.vlgmr.msra.gmra.mxu0 %vm682_vm1, %v658_v6 }
  0x7c   : > { %7621 = vmatpush3.bf16.msra.mxu1 %v7940_v2  ;;  %7650 = vmatprep.mubr.msk.bf16.mxu0 %vm8244_vm0, %v8243_v0 }
  0x7d   : > { %7626 = vmatprep.subr.bf16.mxu1 %v8243_v0 }
  0x7f   : > { %7623 = vmatmul.mubr.msk.bf16.vlgmr.msra.gmra.mxu1 %vm682_vm1, %v658_v6 }
  0x80   : > { %7627 = vmatpush3.bf16.msra.mxu1 %v7941_v5  ;;  %7630 = vmatprep.mubr.msk.bf16.mxu1 %vm8244_vm0, %v8243_v0 }
  0x81   : > { %7628 = vmatprep.subr.bf16.mxu1 %v8243_v0 }
  0x84   : > { %7629 = vmatpush3.bf16.msra.mxu1 %v7942_v7 }
  0x85   : > { %7642 = vmatprep.subr.bf16.mxu1 %v8243_v0 }
  0x87   : > { %7631 = vmatmul.mubr.msk.bf16.vlgmr.msra.gmra.mxu1 %vm682_vm1, %v658_v6 }
  0x88   : > { %7644 = vmatprep.mubr.msk.bf16.mxu1 %vm8244_vm0, %v8243_v0 }
 0x13f   : > { %v720_v10 = vpop.f32.mrf.mxu1 }
 0x140   : > { %v8552_v22 = vadd.f32 %v7413_v21, %v720_v10 }
 0x141   : > { %v7624_v11 = vpop.f32.mrf.mxu1 }
 0x143   : > { %v723_v12 = vpop.f32.mrf.mxu1 }
 0x144   : > { %v8554_v23 = vadd.f32 %v7413_v21, %v723_v12 }
 0x145   : > { %v7625_v13 = vpop.f32.mrf.mxu1 }
 0x147   : > { %v784_v15 = vpop.f32.mrf.mxu1 }
 0x148   : > { %v785_v16 = vadd.f32 %v7417_v14, %v784_v15 }
 0x149   : > { %v7632_v17 = vpop.f32.mrf.mxu1 }
 0x14a   : > { %1035 = vrot.lane.b32.xlu1 %v785_v16, %s8245_s1  ;;  %1029 = vrot.lane.b32.xlu0 %v785_v16, %s8246_s21 }
 0x14b   : > { %v787_v18 = vpop.f32.mrf.mxu1 }
 0x14c   : > { %v8540_v19 = vadd.f32 %v7417_v14, %v787_v18 }
 0x14d   : > { %v7633_v20 = vpop.f32.mrf.mxu1 }
 0x14e   : > { %1041 = vrot.lane.b32.xlu0 %v785_v16, %s8247_s2  ;;  %1037 = vrot.lane.b32.xlu1 %v8540_v19, %s8245_s1 }
 0x152   : > { %1043 = vrot.lane.b32.xlu1 %v8540_v19, %s8247_s2  ;;  %1031 = vrot.lane.b32.xlu0 %v8540_v19, %s8246_s21 }
 0x156   : > { %857 = vrot.lane.b32.xlu1 %v8552_v22, %s8246_s21  ;;  %859 = vrot.lane.b32.xlu0 %v8554_v23, %s8246_s21 }
 0x15a   : > { %863 = vrot.lane.b32.xlu1 %v8552_v22, %s8245_s1 }
 0x1bc   : > { %v1036_v31 = vpop.permute.xlu1 %1035  ;;  %v1030_v32 = vpop.permute.xlu0 %1029 }
 0x1bd   : > { %v1047_v35 = vcombine.low %v785_v16, %v1036_v31  ;;  %v1048_v36 = vcombine.high %v785_v16, %v1036_v31 }
 0x1bf   : > { %v1055_v42 = vrot.slane %v1047_v35, %v8565_v34  ;;  %v1062_v43 = vrot.slane %v1048_v36, %v8565_v34 }
 0x1c0   : > { %v1042_v37 = vpop.permute.xlu0 %1041  ;;  %v1038_v38 = vpop.permute.xlu1 %1037 }
 0x1c1   : > { %v1063_v39 = vcombine.low %v1030_v32, %v1042_v37  ;;  %v1064_v40 = vcombine.high %v1030_v32, %v1042_v37  ;;  %v1115_v53 = vcombine.low %v8540_v19, %v1038_v38  ;;  %v1116_v5 = vcombine.high %v8540_v19, %v1038_v38  ;;  %v8600_v37 = vpop.f32.mrf.mxu0 }
 0x1c3   : > { %v1071_v44 = vrot.slane %v1063_v39, %v8565_v34  ;;  %v1078_v45 = vrot.slane %v1064_v40, %v8565_v34  ;;  %v1123_v61 = vrot.slane %v1115_v53, %v8565_v34  ;;  %v1130_v12 = vrot.slane %v1116_v5, %v8565_v34  ;;  %v7640_v38 = vpop.f32.mrf.mxu0 }
 0x1c4   : > { %v1044_v46 = vpop.permute.xlu1 %1043  ;;  %v1032_v47 = vpop.permute.xlu0 %1031 }
 0x1c5   : > { %v1131_v48 = vcombine.low %v1032_v47, %v1044_v46  ;;  %v1095_v49 = vcombine.low %v1062_v43, %v1078_v45  ;;  %v1079_v50 = vcombine.low %v1055_v42, %v1071_v44  ;;  %v1096_v51 = vcombine.high %v1062_v43, %v1078_v45  ;;  %v8604_v39 = vpop.f32.mrf.mxu0 }
 0x1c6   : > { %v1080_v52 = vcombine.high %v1055_v42, %v1071_v44  ;;  %v1132_v62 = vcombine.high %v1032_v47, %v1044_v46 }
 0x1c7   : > { %v1103_v54 = vrot.slane %v1095_v49, %v8568_v41  ;;  %v1087_v55 = vrot.slane %v1079_v50, %v8568_v41  ;;  %v1139_v56 = vrot.slane %v1131_v48, %v8565_v34  ;;  %v1110_v59 = vrot.slane %v1096_v51, %v8568_v41  ;;  %v7641_v40 = vpop.f32.mrf.mxu0 }
 0x1c8   : > { %v1094_v60 = vrot.slane %v1080_v52, %v8568_v41  ;;  %v1146_v6 = vrot.slane %v1132_v62, %v8565_v34  ;;  %v8606_v42 = vpop.permute.xlu1 %857  ;;  %v8608_v43 = vpop.permute.xlu0 %859 }
 0x1c9   : > { %v1187_v57 = vpack.c.bf16 %v1103_v54, %v1103_v54  ;;  %v1183_v58 = vpack.c.bf16 %v1087_v55, %v1087_v55  ;;  %v1111_v63 = vcombine.high %v1087_v55, %v8243_v0  ;;  %v1189_v1 = vpack.c.bf16 %v1110_v59, %v1110_v59 }
 0x1ca   : > { %v1185_v2 = vpack.c.bf16 %v1094_v60, %v1094_v60  ;;  %v1112_v3 = vcombine.high %v1094_v60, %v8243_v0  ;;  %v1147_v4 = vcombine.low %v1123_v61, %v1139_v56  ;;  %v1113_v7 = vcombine.high %v1103_v54, %v8243_v0 }
 0x1cb   : > { %1547 = vxpose.xlu1.c.b16.start.end [1/1] (short) (narrow) %v1187_v57, 16  ;;  %1483 = vxpose.xlu0.c.b16.start.end [1/1] (short) (narrow) %v1183_v58, 16  ;;  %v1184_v8 = vpack.c.bf16 %v1111_v63, %v1111_v63  ;;  %v1148_v11 = vcombine.high %v1123_v61, %v1139_v56  ;;  %v1114_v13 = vcombine.high %v1110_v59, %v8243_v0 }
 0x1cc   : > { %v1186_v9 = vpack.c.bf16 %v1112_v3, %v1112_v3  ;;  %v1155_v10 = vrot.slane %v1147_v4, %v8568_v41  ;;  %v1188_v14 = vpack.c.bf16 %v1113_v7, %v1113_v7  ;;  %v1163_v17 = vcombine.low %v1130_v12, %v1146_v6  ;;  %v8610_v44 = vpop.permute.xlu1 %863 }
 0x1cd   : > { %v1162_v16 = vrot.slane %v1148_v11, %v8568_v41  ;;  %v1190_v18 = vpack.c.bf16 %v1114_v13, %v1114_v13  ;;  %v1164_v24 = vcombine.high %v1130_v12, %v1146_v6 }
 0x1ce   : > { %v1191_v15 = vpack.c.bf16 %v1155_v10, %v1155_v10  ;;  %v1171_v20 = vrot.slane %v1163_v17, %v8568_v41  ;;  %v1179_v21 = vcombine.high %v1155_v10, %v8243_v0 }
 0x1cf   : > { %1579 = vxpose.xlu1.c.b16.start.end [1/1] (short) (narrow) %v1189_v1, 16  ;;  %1515 = vxpose.xlu0.c.b16.start.end [1/1] (short) (narrow) %v1185_v2, 16  ;;  %v1193_v19 = vpack.c.bf16 %v1162_v16, %v1162_v16  ;;  %v1178_v27 = vrot.slane %v1164_v24, %v8568_v41  ;;  %v1180_v28 = vcombine.high %v1162_v16, %v8243_v0 }
 0x1d0   : > { %v1195_v25 = vpack.c.bf16 %v1171_v20, %v1171_v20  ;;  %v1192_v26 = vpack.c.bf16 %v1179_v21, %v1179_v21  ;;  %v1181_v32 = vcombine.high %v1171_v20, %v8243_v0 }
 0x1d1   : > { %v1197_v29 = vpack.c.bf16 %v1178_v27, %v1178_v27  ;;  %v1194_v31 = vpack.c.bf16 %v1180_v28, %v1180_v28  ;;  %v1182_v35 = vcombine.high %v1178_v27, %v8243_v0 }
 0x1d2   : > { %v1196_v33 = vpack.c.bf16 %v1181_v32, %v1181_v32 }
 0x1d3   : > { %1499 = vxpose.xlu1.c.b16.start.end [1/1] (short) (narrow) %v1184_v8, 16  ;;  %1531 = vxpose.xlu0.c.b16.start.end [1/1] (short) (narrow) %v1186_v9, 16  ;;  %v1198_v36 = vpack.c.bf16 %v1182_v35, %v1182_v35 }
 0x1d7   : > { %1563 = vxpose.xlu0.c.b16.start.end [1/1] (short) (narrow) %v1188_v14, 16  ;;  %1611 = vxpose.xlu1.c.b16.start.end [1/1] (short) (narrow) %v1191_v15, 16 }
 0x1db   : > { %1595 = vxpose.xlu0.c.b16.start.end [1/1] (short) (narrow) %v1190_v18, 16  ;;  %1643 = vxpose.xlu1.c.b16.start.end [1/1] (short) (narrow) %v1193_v19, 16 }
 0x1df   : > { %1675 = vxpose.xlu1.c.b16.start.end [1/1] (short) (narrow) %v1195_v25, 16  ;;  %1627 = vxpose.xlu0.c.b16.start.end [1/1] (short) (narrow) %v1192_v26, 16 }
 0x1e3   : > { %1707 = vxpose.xlu1.c.b16.start.end [1/1] (short) (narrow) %v1197_v29, 16  ;;  %1659 = vxpose.xlu0.c.b16.start.end [1/1] (short) (narrow) %v1194_v31, 16 }
 0x1e7   : > { %865 = vrot.lane.b32.xlu1 %v8554_v23, %s8245_s1  ;;  %1691 = vxpose.xlu0.c.b16.start.end [1/1] (short) (narrow) %v1196_v33, 16 }
 0x1eb   : > { %871 = vrot.lane.b32.xlu1 %v8554_v23, %s8247_s2  ;;  %1723 = vxpose.xlu0.c.b16.start.end [1/1] (short) (narrow) %v1198_v36, 16 }
 0x1f4   : > { %869 = vrot.lane.b32.xlu0 %v8552_v22, %s8247_s2 }
 0x22d   : > { %v1555_v45 = vpop.trf.xlu1  ;;  %v1491_v46 = vpop.trf.xlu0 }
 0x22e   : > { %v1739_v63 = vcombine.low %v1491_v46, %v1555_v45 }
 0x230   : > { %v1746_v8 = vrot.slane %v1739_v63, %v8565_v34 }
 0x231   : > { %v1587_v47 = vpop.trf.xlu1  ;;  %v1523_v48 = vpop.trf.xlu0 }
 0x232   : > { %v1747_v60 = vcombine.low %v1523_v48, %v1587_v47 }
 0x234   : > { %v1754_v4 = vrot.slane %v1747_v60, %v8565_v34 }
 0x235   : > { %v1507_v49 = vpop.trf.xlu1  ;;  %v1539_v50 = vpop.trf.xlu0 }
 0x236   : > { %v1771_v14 = vcombine.low %v1746_v8, %v1754_v4  ;;  %v1772_v15 = vcombine.high %v1746_v8, %v1754_v4 }
 0x238   : > { %v1779_v26 = vrot.slane %v1771_v14, %v8568_v41  ;;  %v1786_v27 = vrot.slane %v1772_v15, %v8568_v41 }
 0x239   : > { %v1619_v51 = vpop.trf.xlu1  ;;  %v1571_v52 = vpop.trf.xlu0 }
 0x23a   : > { %v1807_v2 = vcombine.low %v1507_v49, %v1571_v52 }
 0x23c   : > { %v1814_v10 = vrot.slane %v1807_v2, %v8565_v34 }
 0x23d   : > { %v1651_v53 = vpop.trf.xlu1  ;;  %v1603_v54 = vpop.trf.xlu0 }
 0x23e   : > { %v1815_v61 = vcombine.low %v1539_v50, %v1603_v54 }
 0x240   : > { %v1822_v5 = vrot.slane %v1815_v61, %v8565_v34 }
 0x241   : > { %v1683_v55 = vpop.trf.xlu1  ;;  %v1635_v56 = vpop.trf.xlu0 }
 0x242   : > { %v1755_v62 = vcombine.low %v1619_v51, %v1683_v55  ;;  %v1839_v16 = vcombine.low %v1814_v10, %v1822_v5  ;;  %v1840_v17 = vcombine.high %v1814_v10, %v1822_v5  ;;  %v876_v10 = vcombine.high %v8552_v22, %v8610_v44 }
 0x244   : > { %v1762_v6 = vrot.slane %v1755_v62, %v8565_v34  ;;  %v1847_v28 = vrot.slane %v1839_v16, %v8568_v41  ;;  %v1854_v29 = vrot.slane %v1840_v17, %v8568_v41  ;;  %v890_v16 = vrot.slane %v876_v10, %v8565_v34 }
 0x245   : > { %v1715_v57 = vpop.trf.xlu1  ;;  %v1667_v58 = vpop.trf.xlu0 }
 0x246   : > { %v1763_v59 = vcombine.low %v1651_v53, %v1715_v57 }
 0x248   : > { %v1770_v3 = vrot.slane %v1763_v59, %v8565_v34 }
 0x249   : > { %v1699_v1 = vpop.trf.xlu0 }
 0x24a   : > { %v1823_v7 = vcombine.low %v1635_v56, %v1699_v1  ;;  %v1787_v11 = vcombine.low %v1762_v6, %v1770_v3  ;;  %v1788_v12 = vcombine.high %v1762_v6, %v1770_v3  ;;  %v7421_v56 = vld [vmem:[%s9569_s7] ss:$0 sm:$0xff] }
 0x24b   : > { %v8632_v60 = vadd.f32 %v7421_v56, %v8600_v37  ;;  %v8639_v3 = vadd.f32 %v7421_v56, %v8604_v39 }
 0x24c   : > { %v1830_v18 = vrot.slane %v1823_v7, %v8565_v34  ;;  %v1795_v20 = vrot.slane %v1787_v11, %v8568_v41  ;;  %v1802_v21 = vrot.slane %v1788_v12, %v8568_v41 }
 0x24d   : > { %v1731_v9 = vpop.trf.xlu0 }
 0x24e   : > { %v1831_v13 = vcombine.low %v1667_v58, %v1731_v9  ;;  %v1805_v33 = vcombine.low %v1786_v27, %v1802_v21  ;;  %v1803_v36 = vcombine.low %v1779_v26, %v1795_v20  ;;  %v1804_v49 = vcombine.high %v1779_v26, %v1795_v20 }
 0x24f   : > { %v1806_v54 = vcombine.high %v1786_v27, %v1802_v21  ;;  %v875_v9 = vcombine.low %v8552_v22, %v8610_v44 }
 0x250   : > { %v1838_v19 = vrot.slane %v1831_v13, %v8565_v34  ;;  %v1879_v48 = vshrl.u32 %v1803_v36, 16  ;;  %v1887_v55 = vshrl.u32 %v1804_v49, 16  ;;  %v1895_v61 = vshrl.u32 %v1805_v33, 16 }
 0x251   : > { %v1903_v1 = vshrl.u32 %v1806_v54, 16 }
 0x252   : > { %v1855_v24 = vcombine.low %v1830_v18, %v1838_v19  ;;  %v1856_v25 = vcombine.high %v1830_v18, %v1838_v19 }
 0x254   : > { %v1863_v31 = vrot.slane %v1855_v24, %v8568_v41  ;;  %v1870_v32 = vrot.slane %v1856_v25, %v8568_v41 }
 0x256   : > { %v1873_v35 = vcombine.low %v1854_v29, %v1870_v32  ;;  %v1871_v38 = vcombine.low %v1847_v28, %v1863_v31  ;;  %v1872_v47 = vcombine.high %v1847_v28, %v1863_v31  ;;  %v1874_v52 = vcombine.high %v1854_v29, %v1870_v32 }
 0x258   : > { %v1893_v40 = vpack.i.b16 %v1873_v35, %v1805_v33  ;;  %v1877_v45 = vpack.i.b16 %v1871_v38, %v1803_v36  ;;  %v1880_v46 = vshrl.u32 %v1871_v38, 16  ;;  %v1885_v51 = vpack.i.b16 %v1872_v47, %v1804_v49 }
 0x259   : > { %v1888_v53 = vshrl.u32 %v1872_v47, 16  ;;  %v1901_v57 = vpack.i.b16 %v1874_v52, %v1806_v54  ;;  %v1896_v59 = vshrl.u32 %v1873_v35, 16  ;;  %v1904_v63 = vshrl.u32 %v1874_v52, 16  ;;  %v866_v37 = vpop.permute.xlu1 %865 }
 0x25a   : > { %1971 = vxpose.xlu1.c.b16.start.end [1/1] (short) (narrow) %v1893_v40, 16  ;;  %1907 = vxpose.xlu0.c.b16.start.end [1/1] (short) (narrow) %v1877_v45, 16  ;;  %v1881_v50 = vpack.i.b16 %v1880_v46, %v1879_v48  ;;  %v943_v11 = vcombine.low %v8554_v23, %v866_v37  ;;  %v944_v12 = vcombine.high %v8554_v23, %v866_v37 }
 0x25b   : > { %v1889_v58 = vpack.i.b16 %v1888_v53, %v1887_v55  ;;  %v1897_v62 = vpack.i.b16 %v1896_v59, %v1895_v61  ;;  %v1905_v2 = vpack.i.b16 %v1904_v63, %v1903_v1 }
 0x25c   : > { %v951_v17 = vrot.slane %v943_v11, %v8565_v34  ;;  %v958_v22 = vrot.slane %v944_v12, %v8565_v34 }
 0x25d   : > { %v872_v5 = vpop.permute.xlu1 %871 }
 0x25e   : > { %1923 = vxpose.xlu1.c.b16.start.end [1/1] (short) (narrow) %v1881_v50, 16  ;;  %1939 = vxpose.xlu0.c.b16.start.end [1/1] (short) (narrow) %v1885_v51, 16  ;;  %v959_v7 = vcombine.low %v8608_v43, %v872_v5  ;;  %v960_v8 = vcombine.high %v8608_v43, %v872_v5  ;;  %v883_v43 = vrot.slane %v875_v9, %v8565_v34 }
 0x260   : > { %v974_v15 = vrot.slane %v960_v8, %v8565_v34 }
 0x262   : > { %2003 = vxpose.xlu1.c.b16.start.end [1/1] (short) (narrow) %v1901_v57, 16  ;;  %1955 = vxpose.xlu0.c.b16.start.end [1/1] (short) (narrow) %v1889_v58, 16  ;;  %v991_v24 = vcombine.low %v958_v22, %v974_v15  ;;  %v992_v25 = vcombine.high %v958_v22, %v974_v15 }
 0x264   : > { %v999_v33 = vrot.slane %v991_v24, %v8568_v41  ;;  %v1006_v35 = vrot.slane %v992_v25, %v8568_v41 }
 0x266   : > { %1201 = vrot.lane.b32.xlu1 %v8632_v60, %s8246_s21  ;;  %1987 = vxpose.xlu0.c.b16.start.end [1/1] (short) (narrow) %v1897_v62, 16  ;;  %v870_v4 = vpop.permute.xlu0 %869  ;;  %v1009_v50 = vcombine.high %v999_v33, %v8243_v0  ;;  %v1010_v51 = vcombine.high %v1006_v35, %v8243_v0 }
 0x267   : > { %v891_v6 = vcombine.low %v8606_v42, %v870_v4  ;;  %v892_v39 = vcombine.high %v8606_v42, %v870_v4  ;;  %v967_v42 = vrot.slane %v959_v7, %v8565_v34 }
 0x269   : > { %v899_v13 = vrot.slane %v891_v6, %v8565_v34  ;;  %v906_v14 = vrot.slane %v892_v39, %v8565_v34  ;;  %v975_v20 = vcombine.low %v951_v17, %v967_v42  ;;  %v976_v21 = vcombine.high %v951_v17, %v967_v42 }
 0x26a   : > { %1207 = vrot.lane.b32.xlu1 %v8632_v60, %s8245_s1  ;;  %2019 = vxpose.xlu0.c.b16.start.end [1/1] (short) (narrow) %v1905_v2, 16 }
 0x26b   : > { %v907_v44 = vcombine.low %v883_v43, %v899_v13  ;;  %v908_v18 = vcombine.high %v883_v43, %v899_v13  ;;  %v923_v19 = vcombine.low %v890_v16, %v906_v14  ;;  %v924_v23 = vcombine.high %v890_v16, %v906_v14 }
 0x26c   : > { %v983_v31 = vrot.slane %v975_v20, %v8568_v41  ;;  %v990_v32 = vrot.slane %v976_v21, %v8568_v41 }
 0x26d   : > { %v915_v26 = vrot.slane %v907_v44, %v8568_v41  ;;  %v922_v27 = vrot.slane %v908_v18, %v8568_v41  ;;  %v931_v28 = vrot.slane %v923_v19, %v8568_v41  ;;  %v938_v29 = vrot.slane %v924_v23, %v8568_v41 }
 0x26e   : > { %1209 = vrot.lane.b32.xlu1 %v8639_v3, %s8245_s1  ;;  %v1007_v48 = vcombine.high %v983_v31, %v8243_v0  ;;  %v1008_v49 = vcombine.high %v990_v32, %v8243_v0  ;;  %v7427_v2 = vpack.c.bf16 %v999_v33, %v983_v31  ;;  %v7428_v37 = vpack.c.bf16 %v1006_v35, %v990_v32 }
 0x26f   : > { %v939_v40 = vcombine.high %v915_v26, %v8243_v0  ;;  %v940_v45 = vcombine.high %v922_v27, %v8243_v0  ;;  %v941_v46 = vcombine.high %v931_v28, %v8243_v0  ;;  %v942_v47 = vcombine.high %v938_v29, %v8243_v0 }
 0x270   : > { %v7431_v56 = vpack.c.bf16 %v1009_v50, %v1007_v48  ;;  %v7432_v57 = vpack.c.bf16 %v1010_v51, %v1008_v49  ;;  %v7425_v59 = vpack.c.bf16 %v931_v28, %v915_v26  ;;  %v7426_v61 = vpack.c.bf16 %v938_v29, %v922_v27 }
 0x271   : > { %v7429_v54 = vpack.c.bf16 %v941_v46, %v939_v40  ;;  %v7430_v55 = vpack.c.bf16 %v942_v47, %v940_v45  ;;  %v1394_v12 = vrot.slane %v7427_v2, %v8565_v34  ;;  %v1402_v13 = vrot.slane %v7428_v37, %v8565_v34 }
 0x272   : > { %1215 = vrot.lane.b32.xlu1 %v8639_v3, %s8247_s2  ;;  %v1444_v39 = vrot.slane %v7431_v56, %v8565_v34  ;;  %v1452_v7 = vrot.slane %v7432_v57, %v8565_v34  ;;  %v1378_v8 = vrot.slane %v7425_v59, %v8565_v34  ;;  %v1386_v9 = vrot.slane %v7426_v61, %v8565_v34 }
 0x273   : > { %1203 = vrot.lane.b32.xlu0 %v8639_v3, %s8246_s21  ;;  %v1428_v4 = vrot.slane %v7429_v54, %v8565_v34  ;;  %v1436_v5 = vrot.slane %v7430_v55, %v8565_v34  ;;  %v1411_v44 = vcombine.low %v1394_v12, %v1402_v13  ;;  %v8250_v28 = vmov 0  }
 0x274   : > { %v1461_v43 = vcombine.low %v1444_v39, %v1452_v7  ;;  %v1403_v16 = vcombine.low %v1378_v8, %v1386_v9 }
 0x275   : > { %v1453_v14 = vcombine.low %v1428_v4, %v1436_v5  ;;  %v1418_v26 = vrot.slane %v1411_v44, %v8568_v41 }
 0x276   : > { %v1410_v21 = vrot.slane %v1403_v16, %v8568_v41  ;;  %v1468_v24 = vrot.slane %v1461_v43, %v8568_v41 }
 0x277   : > { %1213 = vrot.lane.b32.xlu0 %v8632_v60, %s8247_s2  ;;  %v1460_v19 = vrot.slane %v1453_v14, %v8568_v41 }
 0x278   : > { %v1419_v32 = vcombine.low %v1410_v21, %v1418_v26  ;;  %v1420_v59 = vcombine.high %v1410_v21, %v1418_v26 }
 0x279   : > { %v1469_v27 = vcombine.low %v1460_v19, %v1468_v24  ;;  %v1470_v57 = vcombine.high %v1460_v19, %v1468_v24 }
 0x27b   : > { %v1475_v40 = vshrl.u32 %v1469_v27, 16  ;;  %v1473_v51 = vpack.i.b16 %v1469_v27, %v1419_v32  ;;  %v1481_v61 = vshrl.u32 %v1470_v57, 16 }
 0x2bc   : > { %v1979_v36 = vpop.trf.xlu1  ;;  %v1915_v38 = vpop.trf.xlu0 }
 0x2bd   : > { %v2035_v62 = vcombine.low %v1915_v38, %v1979_v36 }
 0x2bf   : > { %v2042_v10 = vrot.slane %v2035_v62, %v8565_v34 }
 0x2c0   : > { %v1931_v52 = vpop.trf.xlu1  ;;  %v1947_v53 = vpop.trf.xlu0 }
 0x2c4   : > { %v2011_v58 = vpop.trf.xlu1  ;;  %v1963_v1 = vpop.trf.xlu0 }
 0x2c5   : > { %v2043_v63 = vcombine.low %v1947_v53, %v2011_v58 }
 0x2c7   : > { %v2050_v6 = vrot.slane %v2043_v63, %v8565_v34  ;;  %v1479_v63 = vpack.i.b16 %v1470_v57, %v1420_v59 }
 0x2c8   : > { %v1995_v11 = vpop.trf.xlu0 }
 0x2c9   : > { %v2051_v42 = vcombine.low %v2042_v10, %v2050_v6  ;;  %v2060_v15 = vcombine.low %v1931_v52, %v1995_v11  ;;  %v1474_v52 = vshrl.u32 %v1419_v32, 16 }
 0x2cb   : > { %v2058_v18 = vrot.slane %v2051_v42, %v8568_v41  ;;  %v2067_v23 = vrot.slane %v2060_v15, %v8565_v34  ;;  %v1476_v56 = vpack.i.b16 %v1475_v40, %v1474_v52 }
 0x2cc   : > { %v2027_v17 = vpop.trf.xlu0 }
 0x2cd   : > { %v2068_v22 = vcombine.low %v1963_v1, %v2027_v17  ;;  %v2059_v29 = vcombine.high %v2058_v18, %v8250_v28  ;;  %v2088_v35 = vshrl.u32 %v2058_v18, 16  ;;  %v1480_v1 = vshrl.u32 %v1420_v59, 16 }
 0x2cf   : > { %v2075_v20 = vrot.slane %v2068_v22, %v8565_v34  ;;  %v2094_v45 = vshrl.u32 %v2059_v29, 16  ;;  %v1482_v2 = vpack.i.b16 %v1481_v61, %v1480_v1 }
 0x2d1   : > { %v2076_v25 = vcombine.low %v2067_v23, %v2075_v20 }
 0x2d3   : > { %v2083_v31 = vrot.slane %v2076_v25, %v8568_v41 }
 0x2d5   : > { %v2087_v33 = vpack.i.b16 %v2083_v31, %v2058_v18  ;;  %v2089_v36 = vshrl.u32 %v2083_v31, 16  ;;  %v2084_v38 = vcombine.high %v2083_v31, %v8250_v28 }
 0x2d7   : > { %v2103_v46 = vsel %vm2101_vm2, %v2087_v33, 0  ;;  %v2090_v47 = vpack.i.b16 %v2089_v36, %v2088_v35  ;;  %v2093_v48 = vpack.i.b16 %v2084_v38, %v2059_v29  ;;  %v2095_v49 = vshrl.u32 %v2084_v38, 16 }
 0x2d8   : > { %7643 = vmatpush3.bf16.msra.mxu1 %v2103_v46  ;;  %v1202_v54 = vpop.permute.xlu1 %1201 }
 0x2d9   : > { %v2150_v50 = vsel %vm2101_vm2, %v2090_v47, 0  ;;  %7654 = vmatprep.subr.bf16.mxu1 %v8243_v0  ;;  %v2096_v53 = vpack.i.b16 %v2095_v49, %v2094_v45  ;;  %v2197_v55 = vsel %vm2101_vm2, %v2093_v48, 0 }
 0x2da   : > { %7649 = vmatpush3.bf16.msra.mxu0 %v2150_v50 }
 0x2db   : > { %7645 = vmatmul.mubr.msk.bf16.vlgmr.msra.gmra.mxu1 %vm2097_vm3, %v1473_v51  ;;  %7660 = vmatprep.subr.bf16.mxu0 %v8243_v0  ;;  %v2244_v58 = vsel %vm2101_vm2, %v2096_v53, 0  ;;  %v655_v53 = vld [vmem:[%s578_s26] sm:$0x1]  ;;  %s8251_s26 = smov 16  }
 0x2dc   : > { %7655 = vmatpush3.bf16.msra.mxu1 %v2197_v55  ;;  %7656 = vmatprep.mubr.msk.bf16.mxu1 %vm8244_vm0, %v8243_v0  ;;  %v1208_v62 = vpop.permute.xlu1 %1207 }
 0x2dd   : > { %7651 = vmatmul.mubr.msk.bf16.vlgmr.msra.gmra.mxu0 %vm2097_vm3, %v1476_v56  ;;  %7666 = vmatprep.subr.bf16.mxu1 %v8243_v0  ;;  %v1219_v5 = vcombine.low %v8632_v60, %v1208_v62  ;;  %v1220_v6 = vcombine.high %v8632_v60, %v1208_v62  ;;  %v2298_v56 = vsub.s32 0, %v8562_v30 }
 0x2de   : > { %7661 = vmatpush3.bf16.msra.mxu0 %v2244_v58  ;;  %7662 = vmatprep.mubr.msk.bf16.mxu0 %vm8244_vm0, %v8243_v0 }
 0x2df   : > { %7672 = vmatprep.subr.bf16.mxu0 %v8243_v0  ;;  %v1227_v7 = vrot.slane %v1219_v5, %v8565_v34  ;;  %v1234_v8 = vrot.slane %v1220_v6, %v8565_v34 }
 0x2e0   : > { %v8718_v37 = vpop.permute.xlu1 %1209 }
 0x2e1   : > { %v1287_v14 = vcombine.low %v8639_v3, %v8718_v37 }
 0x2e3   : > { %7657 = vmatmul.mubr.msk.bf16.vlgmr.msra.gmra.mxu1 %vm2097_vm3, %v1479_v63  ;;  %v1295_v22 = vrot.slane %v1287_v14, %v8565_v34 }
 0x2e4   : > { %7668 = vmatprep.mubr.msk.bf16.mxu1 %vm8244_vm0, %v8243_v0  ;;  %v8731_v11 = vpop.permute.xlu1 %1215 }
 0x2e5   : > { %7663 = vmatmul.mubr.msk.bf16.vlgmr.msra.gmra.mxu0 %vm2097_vm3, %v1482_v2  ;;  %v8723_v4 = vpop.permute.xlu0 %1203 }
 0x2e6   : > { %7674 = vmatprep.mubr.msk.bf16.mxu0 %vm8244_vm0, %v8243_v0  ;;  %v1303_v60 = vcombine.low %v8723_v4, %v8731_v11 }
 0x2e8   : > { %v1311_v44 = vrot.slane %v1303_v60, %v8565_v34 }
 0x2e9   : > { %v1214_v39 = vpop.permute.xlu0 %1213 }
 0x2ea   : > { %v1235_v9 = vcombine.low %v1202_v54, %v1214_v39  ;;  %v1236_v10 = vcombine.high %v1202_v54, %v1214_v39  ;;  %v1319_v29 = vcombine.low %v1295_v22, %v1311_v44  ;;  %v1320_v36 = vcombine.high %v1295_v22, %v1311_v44 }
 0x2eb   : > { %v7412_v54 = vadd.f32 -1.0, %v655_v53 }
 0x2ec   : > { %v1243_v12 = vrot.slane %v1235_v9, %v8565_v34  ;;  %v1250_v13 = vrot.slane %v1236_v10, %v8565_v34  ;;  %v1327_v35 = vrot.slane %v1319_v29, %v8568_v41  ;;  %v1334_v46 = vrot.slane %v1320_v36, %v8568_v41 }
 0x2ed   : > { %v657_v55 = vmul.f32 1e+09, %v7412_v54  ;;  %v1288_v36 = vcombine.high %v8639_v3, %v8718_v37 }
 0x2ee   : > { %v1251_v42 = vcombine.low %v1227_v7, %v1243_v12  ;;  %v1252_v15 = vcombine.high %v1227_v7, %v1243_v12  ;;  %v1267_v43 = vcombine.low %v1234_v8, %v1250_v13  ;;  %v1268_v20 = vcombine.high %v1234_v8, %v1250_v13 }
 0x2ef   : > { %v1363_v45 = vpack.c.bf16 %v1327_v35, %v1327_v35  ;;  %v1351_v48 = vcombine.high %v1327_v35, %v8243_v0  ;;  %v1365_v49 = vpack.c.bf16 %v1334_v46, %v1334_v46  ;;  %v1352_v51 = vcombine.high %v1334_v46, %v8243_v0 }
 0x2f0   : > { %v1259_v16 = vrot.slane %v1251_v42, %v8568_v41  ;;  %v1266_v17 = vrot.slane %v1252_v15, %v8568_v41  ;;  %v1275_v23 = vrot.slane %v1267_v43, %v8568_v41  ;;  %v1282_v27 = vrot.slane %v1268_v20, %v8568_v41 }
 0x2f1   : > { %v1364_v50 = vpack.c.bf16 %v1351_v48, %v1351_v48  ;;  %v1366_v52 = vpack.c.bf16 %v1352_v51, %v1352_v51  ;;  %v8756_v57 = vrot.slane %v657_v55, %v2298_v56 }
 0x2f2   : > { %v1355_v18 = vpack.c.bf16 %v1259_v16, %v1259_v16  ;;  %v1283_v19 = vcombine.high %v1259_v16, %v8243_v0  ;;  %v1357_v24 = vpack.c.bf16 %v1266_v17, %v1266_v17  ;;  %v1284_v25 = vcombine.high %v1266_v17, %v8243_v0 }
 0x2f3   : > { %v1359_v26 = vpack.c.bf16 %v1275_v23, %v1275_v23  ;;  %v1285_v32 = vcombine.high %v1275_v23, %v8243_v0  ;;  %v1361_v33 = vpack.c.bf16 %v1282_v27, %v1282_v27  ;;  %v1286_v40 = vcombine.high %v1282_v27, %v8243_v0 }
 0x2f4   : > { %2402 = vxpose.xlu0.c.b16.start.end [1/1] (short) (narrow) %v1355_v18, 16  ;;  %v1356_v21 = vpack.c.bf16 %v1283_v19, %v1283_v19  ;;  %v1358_v31 = vpack.c.bf16 %v1284_v25, %v1284_v25 }
 0x2f5   : > { %v1360_v38 = vpack.c.bf16 %v1285_v32, %v1285_v32  ;;  %v1362_v47 = vpack.c.bf16 %v1286_v40, %v1286_v40  ;;  %v1302_v40 = vrot.slane %v1288_v36, %v8565_v34 }
 0x2f6   : > { %2418 = vxpose.xlu1.c.b16.start.end [1/1] (short) (narrow) %v1356_v21, 16 }
 0x2f8   : > { %2434 = vxpose.xlu0.c.b16.start.end [1/1] (short) (narrow) %v1357_v24, 16 }
 0x2fa   : > { %2466 = vxpose.xlu1.c.b16.start.end [1/1] (short) (narrow) %v1359_v26, 16 }
 0x2fc   : > { %2450 = vxpose.xlu0.c.b16.start.end [1/1] (short) (narrow) %v1358_v31, 16 }
 0x2fe   : > { %2498 = vxpose.xlu1.c.b16.start.end [1/1] (short) (narrow) %v1361_v33, 16 }
 0x300   : > { %2482 = vxpose.xlu0.c.b16.start.end [1/1] (short) (narrow) %v1360_v38, 16  ;;  %v1304_v38 = vcombine.high %v8723_v4, %v8731_v11 }
 0x302   : > { %2530 = vxpose.xlu1.c.b16.start.end [1/1] (short) (narrow) %v1363_v45, 16  ;;  %v1318_v45 = vrot.slane %v1304_v38, %v8565_v34 }
 0x304   : > { %2514 = vxpose.xlu0.c.b16.start.end [1/1] (short) (narrow) %v1362_v47, 16  ;;  %v1335_v46 = vcombine.low %v1302_v40, %v1318_v45  ;;  %v1336_v48 = vcombine.high %v1302_v40, %v1318_v45 }
 0x306   : > { %2562 = vxpose.xlu1.c.b16.start.end [1/1] (short) (narrow) %v1365_v49, 16  ;;  %v1343_v47 = vrot.slane %v1335_v46, %v8568_v41 }
 0x308   : > { %2546 = vxpose.xlu0.c.b16.start.end [1/1] (short) (narrow) %v1364_v50, 16  ;;  %v1367_v49 = vpack.c.bf16 %v1343_v47, %v1343_v47  ;;  %v1350_v50 = vrot.slane %v1336_v48, %v8568_v41  ;;  %v1353_v51 = vcombine.high %v1343_v47, %v8243_v0 }
 0x30a   : > { %v1368_v53 = vpack.c.bf16 %v1353_v51, %v1353_v51  ;;  %v1354_v3 = vcombine.high %v1350_v50, %v8243_v0 }
 0x30c   : > { %2578 = vxpose.xlu0.c.b16.start.end [1/1] (short) (narrow) %v1366_v52, 16  ;;  %v1369_v52 = vpack.c.bf16 %v1350_v50, %v1350_v50  ;;  %v1370_v37 = vpack.c.bf16 %v1354_v3, %v1354_v3 }
 0x356   : > { %v2410_v4 = vpop.trf.xlu0 }
 0x358   : > { %v2426_v54 = vpop.trf.xlu1 }
 0x35a   : > { %v2442_v11 = vpop.trf.xlu0 }
 0x35c   : > { %v2474_v56 = vpop.trf.xlu1 }
 0x35e   : > { %v2458_v55 = vpop.trf.xlu0 }
 0x39b   : > { %v2139_v58 = vpop.f32.mrf.mxu1 }
 0x39c   : > { %v2287_v59 = vmul.f32 0.35355338, %v2139_v58  ;;  %v2490_v58 = vpop.trf.xlu0 }
 0x39d   : > { %v7646_v61 = vpop.f32.mrf.mxu1  ;;  %v2186_v62 = vpop.f32.mrf.mxu0 }
 0x39e   : > { %v2289_v63 = vmul.f32 0.35355338, %v2186_v62  ;;  %v8759_v1 = vadd.f32 %v8756_v57, %v2287_v59  ;;  %v2506_v59 = vpop.trf.xlu1 }
 0x39f   : > { %v2142_v2 = vpop.f32.mrf.mxu1  ;;  %v7652_v5 = vpop.f32.mrf.mxu0 }
 0x3a0   : > { %v2288_v6 = vmul.f32 0.35355338, %v2142_v2  ;;  %v2310_v39 = vsel %vm2309_vm4, %v8759_v1, -inf  ;;  %v8764_v7 = vadd.f32 %v8756_v57, %v2289_v63  ;;  %v2522_v61 = vpop.trf.xlu0 }
 0x3a1   : > { %v2189_v30 = vpop.f32.mrf.mxu0  ;;  %2311 = vmax.xlane.f32.xlu1 %v2310_v39  ;;  %v7647_v8 = vpop.f32.mrf.mxu1 }
 0x3a2   : > { %v2290_v9 = vmul.f32 0.35355338, %v2189_v30  ;;  %v8767_v10 = vadd.f32 %v8756_v57, %v2288_v6  ;;  %v2316_v60 = vsel %vm2309_vm4, %v8764_v7, -inf  ;;  %v2538_v62 = vpop.trf.xlu1 }
 0x3a3   : > { %v7653_v12 = vpop.f32.mrf.mxu0  ;;  %v2233_v13 = vpop.f32.mrf.mxu1 }
 0x3a4   : > { %v2291_v14 = vmul.f32 0.35355338, %v2233_v13  ;;  %v2313_v42 = vsel %vm2309_vm4, %v8767_v10, -inf  ;;  %v8774_v15 = vadd.f32 %v8756_v57, %v2290_v9  ;;  %v2554_v63 = vpop.trf.xlu0 }
 0x3a5   : > { %v2280_v43 = vpop.f32.mrf.mxu0  ;;  %2317 = vmax.xlane.f32.xlu1 %v2316_v60  ;;  %2314 = vmax.xlane.f32.xlu0 %v2313_v42  ;;  %v7658_v16 = vpop.f32.mrf.mxu1  ;;  %v2666_v60 = vcombine.low %v2442_v11, %v2506_v59 }
 0x3a6   : > { %v2293_v17 = vmul.f32 0.35355338, %v2280_v43  ;;  %v8777_v22 = vadd.f32 %v8756_v57, %v2291_v14  ;;  %v2319_v23 = vsel %vm2309_vm4, %v8774_v15, -inf  ;;  %v2570_v2 = vpop.trf.xlu1  ;;  %v2658_v14 = vcombine.low %v2410_v4, %v2474_v56 }
 0x3a7   : > { %v2236_v44 = vpop.f32.mrf.mxu1  ;;  %v7664_v18 = vpop.f32.mrf.mxu0  ;;  %v2726_v16 = vcombine.low %v2426_v54, %v2490_v58 }
 0x3a8   : > { %v2292_v19 = vmul.f32 0.35355338, %v2236_v44  ;;  %v2322_v20 = vsel %vm2309_vm4, %v8777_v22, -inf  ;;  %v8784_v21 = vadd.f32 %v8756_v57, %v2293_v17  ;;  %v2586_v5 = vpop.trf.xlu0  ;;  %v2734_v17 = vcombine.low %v2458_v55, %v2522_v61 }
 0x3a9   : > { %v2283_v24 = vpop.f32.mrf.mxu0  ;;  %2320 = vmax.xlane.f32.xlu0 %v2319_v23  ;;  %2323 = vmax.xlane.f32.xlu1 %v2322_v20  ;;  %v7659_v25 = vpop.f32.mrf.mxu1  ;;  %v2665_v18 = vrot.slane %v2658_v14, %v8565_v34 }
 0x3aa   : > { %v2294_v26 = vmul.f32 0.35355338, %v2283_v24  ;;  %v8787_v27 = vadd.f32 %v8756_v57, %v2292_v19  ;;  %v2328_v31 = vsel %vm2309_vm4, %v8784_v21, -inf  ;;  %v2673_v19 = vrot.slane %v2666_v60, %v8565_v34 }
 0x3ab   : > { %v7665_v29 = vpop.f32.mrf.mxu0  ;;  %v2733_v25 = vrot.slane %v2726_v16, %v8565_v34 }
 0x3ac   : > { %v2325_v32 = vsel %vm2309_vm4, %v8787_v27, -inf  ;;  %v8794_v33 = vadd.f32 %v8756_v57, %v2294_v26  ;;  %v2741_v26 = vrot.slane %v2734_v17, %v8565_v34  ;;  %v2690_v38 = vcombine.low %v2665_v18, %v2673_v19 }
 0x3ad   : > { %2329 = vmax.xlane.f32.xlu1 %v2328_v31  ;;  %2326 = vmax.xlane.f32.xlu0 %v2325_v32 }
 0x3ae   : > { %v2331_v35 = vsel %vm2309_vm4, %v8794_v33, -inf  ;;  %v2758_v47 = vcombine.low %v2733_v25, %v2741_v26  ;;  %v2698_v4 = vrot.slane %v2690_v38, %v8568_v41 }
 0x3b0   : > { %v2766_v55 = vrot.slane %v2758_v47, %v8568_v41 }
 0x3b1   : > { %2332 = vmax.xlane.f32.xlu0 %v2331_v35  ;;  %v2691_v35 = vcombine.high %v2665_v18, %v2673_v19 }
 0x3da   : > { %2594 = vxpose.xlu1.c.b16.start.end [1/1] (short) (narrow) %v1367_v49, 16 }
 0x3de   : > { %2626 = vxpose.xlu1.c.b16.start.end [1/1] (short) (narrow) %v1369_v52, 16  ;;  %2610 = vxpose.xlu0.c.b16.start.end [1/1] (short) (narrow) %v1368_v53, 16  ;;  %v2759_v52 = vcombine.high %v2733_v25, %v2741_v26  ;;  %v2705_v53 = vrot.slane %v2691_v35, %v8568_v41 }
 0x3e0   : > { %v2773_v61 = vrot.slane %v2759_v52, %v8568_v41 }
 0x3e2   : > { %2642 = vxpose.xlu0.c.b16.start.end [1/1] (short) (narrow) %v1370_v37, 16 }
 0x42a   : > { %v2312_v6 = vpop.xlane.xlu1 %2311 }
 0x42b   : > { %v2334_v59 = vsub.f32 %v8759_v1, %v2312_v6 }
 0x42d   : > { %v2342_v17 = vmul.f32 1.442695, %v2334_v59 }
 0x42e   : > { %v8808_v39 = vpop.xlane.xlu1 %2317  ;;  %v2315_v30 = vpop.xlane.xlu0 %2314 }
 0x42f   : > { %v2336_v6 = vsub.f32 %v8764_v7, %v8808_v39  ;;  %7967 = vpow2.f32 %v2342_v17 }
 0x432   : > { %v8810_v8 = vpop.xlane.xlu0 %2320  ;;  %v8812_v9 = vpop.xlane.xlu1 %2323 }
 0x436   : > { %v8814_v12 = vpop.xlane.xlu0 %2326  ;;  %v8816_v13 = vpop.xlane.xlu1 %2329 }
 0x43a   : > { %v8818_v42 = vpop.xlane.xlu0 %2332 }
 0x43c   : > { %v2602_v43 = vpop.trf.xlu1 }
 0x43d   : > { %v2674_v44 = vcombine.low %v2538_v62, %v2602_v43 }
 0x43f   : > { %v2681_v29 = vrot.slane %v2674_v44, %v8565_v34 }
 0x440   : > { %v2634_v23 = vpop.trf.xlu1  ;;  %v2618_v20 = vpop.trf.xlu0 }
 0x441   : > { %v2682_v24 = vcombine.low %v2570_v2, %v2634_v23  ;;  %v2742_v32 = vcombine.low %v2554_v63, %v2618_v20  ;;  %v2335_v2 = vsub.f32 %v8767_v10, %v2315_v30 }
 0x443   : > { %v2689_v31 = vrot.slane %v2682_v24, %v8565_v34  ;;  %v2749_v48 = vrot.slane %v2742_v32, %v8565_v34  ;;  %v2344_v23 = vmul.f32 1.442695, %v2335_v2  ;;  %v2337_v24 = vsub.f32 %v8774_v15, %v8810_v8 }
 0x444   : > { %v2650_v36 = vpop.trf.xlu0  ;;  %v2338_v32 = vsub.f32 %v8777_v22, %v8812_v9  ;;  %v2341_v9 = vsub.f32 %v8794_v33, %v8818_v42 }
 0x445   : > { %v2706_v40 = vcombine.low %v2681_v29, %v2689_v31  ;;  %v2707_v45 = vcombine.high %v2681_v29, %v2689_v31  ;;  %v2750_v46 = vcombine.low %v2586_v5, %v2650_v36  ;;  %v2346_v31 = vmul.f32 1.442695, %v2336_v6 }
 0x446   : > { %7969 = vpow2.f32 %v2344_v23  ;;  %v2348_v35 = vmul.f32 1.442695, %v2337_v24  ;;  %v2339_v36 = vsub.f32 %v8787_v27, %v8814_v12  ;;  %v2350_v8 = vmul.f32 1.442695, %v2338_v32  ;;  %v7968_v12 = vpop.eup %7967 }
 0x447   : > { %v2757_v49 = vrot.slane %v2750_v46, %v8565_v34  ;;  %v2714_v50 = vrot.slane %v2706_v40, %v8568_v41  ;;  %v2721_v51 = vrot.slane %v2707_v45, %v8568_v41  ;;  %7971 = vpow2.f32 %v2346_v31 }
 0x448   : > { %v2340_v40 = vsub.f32 %v8784_v21, %v8816_v13  ;;  %7973 = vpow2.f32 %v2348_v35  ;;  %v2352_v22 = vmul.f32 1.442695, %v2339_v36  ;;  %v2356_v27 = vmul.f32 1.442695, %v2341_v9 }
 0x449   : > { %v2774_v3 = vcombine.low %v2749_v48, %v2757_v49  ;;  %v2775_v37 = vcombine.high %v2749_v48, %v2757_v49  ;;  %v8832_v11 = vcombine.high %v2705_v53, %v2721_v51  ;;  %v2722_v54 = vcombine.low %v2698_v4, %v2714_v50 }
 0x44a   : > { %v2723_v16 = vcombine.high %v2698_v4, %v2714_v50  ;;  %v2724_v29 = vcombine.low %v2705_v53, %v2721_v51  ;;  %7975 = vpow2.f32 %v2350_v8  ;;  %v2354_v46 = vmul.f32 1.442695, %v2340_v40 }
 0x44b   : > { %v2782_v56 = vrot.slane %v2774_v3, %v8568_v41  ;;  %v2789_v58 = vrot.slane %v2775_v37, %v8568_v41  ;;  %v2798_v60 = vshrl.u32 %v2722_v54, 16  ;;  %v2822_v18 = vshrl.u32 %v8832_v11, 16 }
 0x44c   : > { %v2806_v26 = vshrl.u32 %v2723_v16, 16  ;;  %v2814_v15 = vshrl.u32 %v2724_v29, 16  ;;  %7977 = vpow2.f32 %v2352_v22  ;;  %v2358_v48 = vsel %vm2309_vm4, %v7968_v12, 0.0 }
 0x44d   : > { %v2790_v62 = vcombine.low %v2766_v55, %v2782_v56  ;;  %v2791_v63 = vcombine.high %v2766_v55, %v2782_v56  ;;  %v8840_v5 = vcombine.high %v2773_v61, %v2789_v58  ;;  %v2792_v30 = vcombine.low %v2773_v61, %v2789_v58 }
 0x44e   : > { %7979 = vpow2.f32 %v2354_v46 }
 0x44f   : > { %v2796_v14 = vpack.i.b16 %v2790_v62, %v2722_v54  ;;  %v2799_v43 = vshrl.u32 %v2790_v62, 16  ;;  %v2820_v44 = vpack.i.b16 %v8840_v5, %v8832_v11  ;;  %v2823_v1 = vshrl.u32 %v8840_v5, 16 }
 0x450   : > { %v2807_v10 = vshrl.u32 %v2791_v63, 16  ;;  %v2804_v25 = vpack.i.b16 %v2791_v63, %v2723_v16  ;;  %v2815_v39 = vshrl.u32 %v2792_v30, 16  ;;  %v2812_v38 = vpack.i.b16 %v2792_v30, %v2724_v29 }
 0x451   : > { %2826 = vxpose.xlu1.c.b16.start.end [1/1] (short) (narrow) %v2796_v14, 16  ;;  %v2800_v19 = vpack.i.b16 %v2799_v43, %v2798_v60  ;;  %v2824_v20 = vpack.i.b16 %v2823_v1, %v2822_v18  ;;  %7981 = vpow2.f32 %v2356_v27 }
 0x452   : > { %v2808_v7 = vpack.i.b16 %v2807_v10, %v2806_v26  ;;  %v2816_v45 = vpack.i.b16 %v2815_v39, %v2814_v15 }
 0x453   : > { %2842 = vxpose.xlu0.c.b16.start.end [1/1] (short) (narrow) %v2800_v19, 16  ;;  %v7970_v47 = vpop.eup %7969 }
 0x454   : > { %v7972_v49 = vpop.eup %7971  ;;  %v2361_v21 = vsel %vm2309_vm4, %v7970_v47, 0.0 }
 0x455   : > { %2858 = vxpose.xlu1.c.b16.start.end [1/1] (short) (narrow) %v2804_v25, 16  ;;  %v7974_v13 = vpop.eup %7973  ;;  %v2364_v50 = vsel %vm2309_vm4, %v7972_v49, 0.0 }
 0x456   : > { %v2367_v42 = vsel %vm2309_vm4, %v7974_v13, 0.0 }
 0x457   : > { %2874 = vxpose.xlu0.c.b16.start.end [1/1] (short) (narrow) %v2808_v7, 16  ;;  %v8861_v33 = vpop.eup %7975 }
 0x458   : > { %v2370_v52 = vsel %vm2309_vm4, %v8861_v33, 0.0 }
 0x459   : > { %2890 = vxpose.xlu1.c.b16.start.end [1/1] (short) (narrow) %v2812_v38, 16  ;;  %v8864_v51 = vpop.eup %7977 }
 0x45a   : > { %v2373_v3 = vsel %vm2309_vm4, %v8864_v51, 0.0 }
 0x45b   : > { %2906 = vxpose.xlu0.c.b16.start.end [1/1] (short) (narrow) %v2816_v45, 16  ;;  %v8868_v53 = vpop.eup %7979 }
 0x45c   : > { %v2376_v4 = vsel %vm2309_vm4, %v8868_v53, 0.0 }
 0x45e   : > { %v8872_v37 = vpop.eup %7981 }
 0x45f   : > { %v2379_v54 = vsel %vm2309_vm4, %v8872_v37, 0.0 }
 0x466   : > { %2359 = vadd.xlane.f32.xlu1 %v2358_v48 }
 0x468   : > { %2362 = vadd.xlane.f32.xlu0 %v2361_v21 }
 0x46a   : > { %2365 = vadd.xlane.f32.xlu1 %v2364_v50 }
 0x46c   : > { %2368 = vadd.xlane.f32.xlu0 %v2367_v42 }
 0x46e   : > { %2371 = vadd.xlane.f32.xlu1 %v2370_v52 }
 0x470   : > { %2374 = vadd.xlane.f32.xlu0 %v2373_v3 }
 0x472   : > { %2377 = vadd.xlane.f32.xlu1 %v2376_v4 }
 0x474   : > { %2380 = vadd.xlane.f32.xlu0 %v2379_v54 }
 0x49f   : > { %2922 = vxpose.xlu1.c.b16.start.end [1/1] (short) (narrow) %v2820_v44, 16 }
 0x4a1   : > { %2938 = vxpose.xlu0.c.b16.start.end [1/1] (short) (narrow) %v2824_v20, 16 }
 0x4b3   : > { %v2834_v55 = vpop.trf.xlu1 }
 0x4b5   : > { %v2850_v56 = vpop.trf.xlu0 }
 0x4b7   : > { %v2866_v58 = vpop.trf.xlu1 }
 0x4b9   : > { %v2882_v59 = vpop.trf.xlu0 }
 0x4bb   : > { %v2898_v61 = vpop.trf.xlu1 }
 0x4bc   : > { %v2954_v18 = vcombine.low %v2834_v55, %v2898_v61 }
 0x4bd   : > { %v2914_v62 = vpop.trf.xlu0 }
 0x4be   : > { %v2979_v30 = vcombine.low %v2850_v56, %v2914_v62  ;;  %v2961_v25 = vrot.slane %v2954_v18, %v8565_v34 }
 0x4c0   : > { %v2986_v36 = vrot.slane %v2979_v30, %v8565_v34 }
 0x4ef   : > { %v2360_v63 = vpop.xlane.xlu1 %2359 }
 0x4f0   : > { %7983 = vrcp.f32 %v2360_v63 }
 0x4f1   : > { %v2363_v2 = vpop.xlane.xlu0 %2362 }
 0x4f2   : > { %7985 = vrcp.f32 %v2363_v2 }
 0x4f3   : > { %v2366_v14 = vpop.xlane.xlu1 %2365 }
 0x4f4   : > { %7987 = vrcp.f32 %v2366_v14 }
 0x4f5   : > { %v2369_v60 = vpop.xlane.xlu0 %2368 }
 0x4f6   : > { %7989 = vrcp.f32 %v2369_v60 }
 0x4f7   : > { %v2372_v43 = vpop.xlane.xlu1 %2371 }
 0x4f8   : > { %7991 = vrcp.f32 %v2372_v43 }
 0x4f9   : > { %v2375_v16 = vpop.xlane.xlu0 %2374 }
 0x4fa   : > { %7993 = vrcp.f32 %v2375_v16 }
 0x4fb   : > { %v2378_v11 = vpop.xlane.xlu1 %2377 }
 0x4fc   : > { %7995 = vrcp.f32 %v2378_v11 }
 0x4fd   : > { %v7984_v5 = vpop.eup %7983  ;;  %v2381_v17 = vpop.xlane.xlu0 %2380 }
 0x4fe   : > { %7997 = vrcp.f32 %v2381_v17  ;;  %v2390_v1 = vmul.f32 %v7984_v5, %v7968_v12 }
 0x4ff   : > { %v7986_v44 = vpop.eup %7985 }
 0x500   : > { %v2391_v6 = vmul.f32 %v7986_v44, %v7970_v47 }
 0x501   : > { %v7988_v19 = vpop.eup %7987  ;;  %v2930_v10 = vpop.trf.xlu1 }
 0x502   : > { %v2962_v23 = vcombine.low %v2866_v58, %v2930_v10  ;;  %v2398_v20 = vpack.c.bf16 %v2391_v6, %v2390_v1  ;;  %v2392_v29 = vmul.f32 %v7988_v19, %v7972_v49 }
 0x503   : > { %v7990_v24 = vpop.eup %7989  ;;  %v2946_v26 = vpop.trf.xlu0 }
 0x504   : > { %v2969_v31 = vrot.slane %v2962_v23, %v8565_v34  ;;  %v2987_v32 = vcombine.low %v2882_v59, %v2946_v26  ;;  %v3020_v7 = vsel %vm2309_vm4, %v2398_v20, 0  ;;  %v2393_v39 = vmul.f32 %v7990_v24, %v7974_v13 }
 0x505   : > { %v7992_v35 = vpop.eup %7991  ;;  %7667 = vmatpush3.bf16.xpose.msra.mxu1 %v3020_v7 }
 0x506   : > { %v2970_v38 = vcombine.low %v2961_v25, %v2969_v31  ;;  %v2994_v15 = vrot.slane %v2987_v32, %v8565_v34  ;;  %v2399_v8 = vpack.c.bf16 %v2393_v39, %v2392_v29  ;;  %7678 = vmatprep.subr.bf16.mxu1 %v8243_v0  ;;  %v2394_v45 = vmul.f32 %v7992_v35, %v8861_v33 }
 0x507   : > { %v7994_v40 = vpop.eup %7993 }
 0x508   : > { %v2977_v22 = vrot.slane %v2970_v38, %v8568_v41  ;;  %v2995_v9 = vcombine.low %v2986_v36, %v2994_v15  ;;  %v3066_v46 = vsel %vm2309_vm4, %v2399_v8, 0  ;;  %v2395_v27 = vmul.f32 %v7994_v40, %v8864_v51 }
 0x509   : > { %7673 = vmatpush3.bf16.xpose.msra.mxu0 %v3066_v46  ;;  %v7996_v12 = vpop.eup %7995 }
 0x50a   : > { %v3002_v47 = vrot.slane %v2995_v9, %v8568_v41  ;;  %v2400_v48 = vpack.c.bf16 %v2395_v27, %v2394_v45  ;;  %7684 = vmatprep.subr.bf16.mxu0 %v8243_v0  ;;  %v3007_v21 = vshrl.u32 %v2977_v22, 16  ;;  %v2396_v42 = vmul.f32 %v7996_v12, %v8868_v53 }
 0x50b   : > { %v7998_v49 = vpop.eup %7997  ;;  %v2978_v54 = vcombine.high %v2977_v22, %v8250_v28 }
 0x50c   : > { %v3008_v13 = vshrl.u32 %v3002_v47, 16  ;;  %v3006_v50 = vpack.i.b16 %v3002_v47, %v2977_v22  ;;  %v3112_v33 = vsel %vm2309_vm4, %v2400_v48, 0  ;;  %v2397_v52 = vmul.f32 %v7998_v49, %v8872_v37 }
 0x50d   : > { %v3003_v3 = vcombine.high %v3002_v47, %v8250_v28  ;;  %v3013_v56 = vshrl.u32 %v2978_v54, 16 }
 0x50e   : > { %7669 = vmatmul.mubr.msk.bf16.vlgmr.msra.gmra.mxu1 %vm2309_vm4, %v3006_v50  ;;  %v3009_v51 = vpack.i.b16 %v3008_v13, %v3007_v21  ;;  %v2401_v4 = vpack.c.bf16 %v2397_v52, %v2396_v42 }
 0x50f   : > { %7679 = vmatpush3.bf16.xpose.msra.mxu1 %v3112_v33  ;;  %7680 = vmatprep.mubr.msk.bf16.mxu1 %vm8244_vm0, %v8243_v0  ;;  %v3014_v37 = vshrl.u32 %v3003_v3, 16  ;;  %v3012_v55 = vpack.i.b16 %v3003_v3, %v2978_v54 }
 0x510   : > { %7675 = vmatmul.mubr.msk.bf16.vlgmr.msra.gmra.mxu0 %vm2309_vm4, %v3009_v51  ;;  %7690 = vmatprep.subr.bf16.mxu1 %v8243_v0  ;;  %v3158_v53 = vsel %vm2309_vm4, %v2401_v4, 0 }
 0x511   : > { %7686 = vmatprep.mubr.msk.bf16.mxu0 %vm8244_vm0, %v8243_v0  ;;  %7685 = vmatpush3.bf16.xpose.msra.mxu0 %v3158_v53  ;;  %v3015_v58 = vpack.i.b16 %v3014_v37, %v3013_v56 }
 0x512   : > { %7698 = vmatprep.subr.bf16.mxu0 %v8243_v0 }
 0x516   : > { %7681 = vmatmul.mubr.msk.bf16.vlgmr.msra.gmra.mxu1 %vm2309_vm4, %v3012_v55 }
 0x517   : > { %7694 = vmatprep.mubr.msk.bf16.mxu1 %vm8244_vm0, %v8243_v0 }
 0x518   : > { %7687 = vmatmul.mubr.msk.bf16.vlgmr.msra.gmra.mxu0 %vm2309_vm4, %v3015_v58 }
 0x519   : > { %7702 = vmatprep.mubr.msk.bf16.mxu0 %vm8244_vm0, %v8243_v0 }
 0x5ce   : > { %v3056_v59 = vpop.f32.mrf.mxu1 }
 0x5cf   : > { %3200 = vxpose.xlu1.b32.start.end [1/1] (short) (narrow) %v3056_v59, 16 }
 0x5d0   : > { %v7670_v61 = vpop.f32.mrf.mxu1  ;;  %v3102_v62 = vpop.f32.mrf.mxu0 }
 0x5d1   : > { %3232 = vxpose.xlu0.b32.start.end [1/1] (short) (narrow) %v3102_v62, 16 }
 0x5d2   : > { %v3059_v63 = vpop.f32.mrf.mxu1  ;;  %v7676_v2 = vpop.f32.mrf.mxu0 }
 0x5d4   : > { %v7671_v14 = vpop.f32.mrf.mxu1  ;;  %v3105_v60 = vpop.f32.mrf.mxu0 }
 0x5d6   : > { %v7677_v43 = vpop.f32.mrf.mxu0  ;;  %v3148_v16 = vpop.f32.mrf.mxu1 }
 0x5d7   : > { %3264 = vxpose.xlu0.b32.start.end [1/1] (short) (narrow) %v3148_v16, 16 }
 0x5d8   : > { %v7682_v11 = vpop.f32.mrf.mxu1  ;;  %v3194_v5 = vpop.f32.mrf.mxu0 }
 0x5d9   : > { %3296 = vxpose.xlu1.b32.start.end [1/1] (short) (narrow) %v3194_v5, 16 }
 0x5da   : > { %v3151_v17 = vpop.f32.mrf.mxu1  ;;  %v7688_v44 = vpop.f32.mrf.mxu0 }
 0x5dc   : > { %v7683_v18 = vpop.f32.mrf.mxu1  ;;  %v3197_v1 = vpop.f32.mrf.mxu0 }
 0x5dd   : > { %v7945_v18 = vld [vmem:[#allocation7 + $0x8] sm:$0xff]  }
 0x5de   : > { %v7689_v6 = vpop.f32.mrf.mxu0  ;;  %7691 = vmatpush3.bf16.msra.mxu1 %v7945_v18 }
 0x5df   : > { %7692 = vmatprep.subr.bf16.mxu1 %v8243_v0 }
 0x64b   : > { %v3216_v19 = vpop.trf.xlu1 }
 0x64d   : > { %v3248_v10 = vpop.trf.xlu0 }
 0x64f   : > { %v3217_v30 = vpop.trf.xlu1 }
 0x651   : > { %v3249_v23 = vpop.trf.xlu0 }
 0x655   : > { %v3280_v20 = vpop.trf.xlu0  ;;  %v3312_v24 = vpop.trf.xlu1 }
 0x656   : > { %v3328_v25 = vcombine.low %v3216_v19, %v3280_v20  ;;  %v3329_v26 = vcombine.high %v3216_v19, %v3280_v20  ;;  %v3344_v29 = vcombine.low %v3248_v10, %v3312_v24  ;;  %v3345_v31 = vcombine.high %v3248_v10, %v3312_v24 }
 0x658   : > { %v3336_v32 = vrot.slane %v3328_v25, %v8565_v34  ;;  %v3343_v7 = vrot.slane %v3329_v26, %v8565_v34  ;;  %v3352_v39 = vrot.slane %v3344_v29, %v8565_v34  ;;  %v3359_v35 = vrot.slane %v3345_v31, %v8565_v34 }
 0x659   : > { %v3281_v36 = vpop.trf.xlu0  ;;  %v3313_v38 = vpop.trf.xlu1 }
 0x65a   : > { %v3396_v15 = vcombine.low %v3217_v30, %v3281_v36  ;;  %v3397_v8 = vcombine.high %v3217_v30, %v3281_v36  ;;  %v3360_v40 = vcombine.low %v3336_v32, %v3352_v39  ;;  %v3361_v45 = vcombine.high %v3336_v32, %v3352_v39 }
 0x65b   : > { %v3376_v22 = vcombine.low %v3343_v7, %v3359_v35  ;;  %v3377_v9 = vcombine.high %v3343_v7, %v3359_v35  ;;  %v3412_v46 = vcombine.low %v3249_v23, %v3313_v38  ;;  %v3413_v27 = vcombine.high %v3249_v23, %v3313_v38  ;;  %v7946_v7 = vld [vmem:[#allocation7] sm:$0xff]  }
 0x65c   : > { %v3404_v12 = vrot.slane %v3396_v15, %v8565_v34  ;;  %v3411_v47 = vrot.slane %v3397_v8, %v8565_v34  ;;  %v3368_v48 = vrot.slane %v3360_v40, %v8568_v41  ;;  %v3375_v49 = vrot.slane %v3361_v45, %v8568_v41  ;;  %7693 = vmatpush3.bf16.msra.mxu1 %v7946_v7 }
 0x65d   : > { %v3384_v21 = vrot.slane %v3376_v22, %v8568_v41  ;;  %v3391_v13 = vrot.slane %v3377_v9, %v8568_v41  ;;  %v3420_v50 = vrot.slane %v3412_v46, %v8565_v34  ;;  %v3427_v33 = vrot.slane %v3413_v27, %v8565_v34  ;;  %7706 = vmatprep.subr.bf16.mxu1 %v8243_v0 }
 0x65e   : > { %v3464_v42 = vcombine.low %v3368_v48, %v3375_v49  ;;  %v7441_v52 = vcombine.high %v3368_v48, %v3375_v49 }
 0x65f   : > { %v3480_v51 = vcombine.low %v3384_v21, %v3391_v13  ;;  %v7442_v3 = vcombine.high %v3384_v21, %v3391_v13  ;;  %v3428_v4 = vcombine.low %v3404_v12, %v3420_v50  ;;  %v3429_v54 = vcombine.high %v3404_v12, %v3420_v50 }
 0x660   : > { %v3444_v53 = vcombine.low %v3411_v47, %v3427_v33  ;;  %v3445_v37 = vcombine.high %v3411_v47, %v3427_v33  ;;  %v3471_v55 = vrot.slane %v3464_v42, %v8565_v34  ;;  %v3479_v56 = vrot.slane %v7441_v52, %v8565_v34 }
 0x661   : > { %v3487_v58 = vrot.slane %v3480_v51, %v8565_v34  ;;  %v3495_v59 = vrot.slane %v7442_v3, %v8565_v34  ;;  %v3436_v61 = vrot.slane %v3428_v4, %v8568_v41  ;;  %v3443_v62 = vrot.slane %v3429_v54, %v8568_v41 }
 0x662   : > { %v3452_v63 = vrot.slane %v3444_v53, %v8568_v41  ;;  %v3459_v2 = vrot.slane %v3445_v37, %v8568_v41  ;;  %v3497_v14 = vcombine.high %v3471_v55, %v3479_v56  ;;  %v3496_v43 = vcombine.low %v3471_v55, %v3479_v56 }
 0x663   : > { %v3513_v60 = vcombine.high %v3487_v58, %v3495_v59  ;;  %v3512_v16 = vcombine.low %v3487_v58, %v3495_v59  ;;  %v3532_v11 = vcombine.low %v3436_v61, %v3443_v62  ;;  %v7443_v5 = vcombine.high %v3436_v61, %v3443_v62  ;;  %v7445_v58 = vld [vmem:[%s9571_s9] ss:$0 sm:$0xff] }
 0x664   : > { %v3548_v17 = vcombine.low %v3452_v63, %v3459_v2  ;;  %v7444_v44 = vcombine.high %v3452_v63, %v3459_v2  ;;  %v3504_v1 = vrot.slane %v3496_v43, %v8568_v41  ;;  %v3511_v20 = vrot.slane %v3497_v14, %v8568_v41  ;;  %v8055_v63 = vld [vmem:[%s8504_s17] sm:$0xff] }
 0x665   : > { %v3520_v6 = vrot.slane %v3512_v16, %v8568_v41  ;;  %v3539_v19 = vrot.slane %v3532_v11, %v8565_v34  ;;  %v3547_v10 = vrot.slane %v7443_v5, %v8565_v34  ;;  %v3527_v24 = vrot.slane %v3513_v60, %v8568_v41  ;;  %v8056_v11 = vld [vmem:[%s8504_s17 + $0x8] sm:$0xff]  ;;  %s9628_s17 = sld [smem:[#allocation27_spill]] }
 0x666   : > { %v3555_v30 = vrot.slane %v3548_v17, %v8565_v34  ;;  %v3563_v23 = vrot.slane %v7444_v44, %v8565_v34 }
 0x667   : > { %v3528_v25 = vcombine.low %v3504_v1, %v3520_v6  ;;  %v3565_v26 = vcombine.high %v3539_v19, %v3547_v10  ;;  %v3564_v31 = vcombine.low %v3539_v19, %v3547_v10  ;;  %v3530_v15 = vcombine.low %v3511_v20, %v3527_v24 }
 0x668   : > { %v3581_v29 = vcombine.high %v3555_v30, %v3563_v23  ;;  %v3580_v32 = vcombine.low %v3555_v30, %v3563_v23  ;;  %v3529_v40 = vcombine.high %v3504_v1, %v3520_v6  ;;  %v3531_v12 = vcombine.high %v3511_v20, %v3527_v24 }
 0x669   : > { %v3579_v39 = vrot.slane %v3565_v26, %v8568_v41  ;;  %v3572_v36 = vrot.slane %v3564_v31, %v8568_v41  ;;  %v7948_v26 = vld [vmem:[#allocation8] sm:$0xff]  }
 0x66a   : > { %v3595_v35 = vrot.slane %v3581_v29, %v8568_v41  ;;  %v3588_v38 = vrot.slane %v3580_v32, %v8568_v41 }
 0x66c   : > { %v3598_v8 = vcombine.low %v3579_v39, %v3595_v35  ;;  %v3597_v45 = vcombine.high %v3572_v36, %v3588_v38  ;;  %v3596_v22 = vcombine.low %v3572_v36, %v3588_v38  ;;  %v3599_v27 = vcombine.high %v3579_v39, %v3595_v35 }
 0x66e   : > { %v7914_v9 = vpack.i.bf16 %v3598_v8, %v3530_v15  ;;  %v7909_v46 = vpack.i.bf16 %v3597_v45, %v3529_v40  ;;  %v7919_v47 = vpack.i.bf16 %v3599_v27, %v3531_v12  ;;  %v7449_v15 = vld [vmem:[%s9572_s10] ss:$0 sm:$0xff] }
 0x670   : > { %7915 = vrot.lane.b32.xlu1 %v7914_v9, %s8251_s26  ;;  %7910 = vrot.lane.b32.xlu0 %v7909_v46, %s8252_s27 }
 0x674   : > { %7920 = vrot.lane.b32.xlu1 %v7919_v47, %s8253_s29  ;;  %v7949_v47 = vld [vmem:[%s9576_s14 + $0x18] sm:$0xff]  }
 0x6e2   : > { %v7916_v48 = vpop.permute.xlu1 %7915  ;;  %v7911_v49 = vpop.permute.xlu0 %7910 }
 0x6e3   : > { %v7913_v21 = vunpack.i.h.bf16 %v7911_v49  ;;  %v7912_v13 = vunpack.i.l.bf16 %v7911_v49  ;;  %v7918_v50 = vunpack.i.h.bf16 %v7916_v48  ;;  %v7917_v33 = vunpack.i.l.bf16 %v7916_v48  ;;  %v7950_v48 = vld [vmem:[%s9576_s14 + $0x10] sm:$0xff]   ;;  %v7951_v49 = vld [vmem:[%s9576_s14 + $0x8] sm:$0xff]  }
 0x6e5   : > { %v3624_v42 = vsel %vm2097_vm3, %v3528_v25, %v7912_v13  ;;  %v3625_v52 = vsel %vm2097_vm3, %v3596_v22, %v7913_v21  ;;  %v7947_v25 = vld [vmem:[#allocation8 + $0x8] sm:$0xff]   ;;  %v7450_v22 = vld [vmem:[%s9573_s11] ss:$0 sm:$0xff] }
 0x6e6   : > { %v7921_v51 = vpop.permute.xlu1 %7920  ;;  %v3626_v54 = vsel %vm2309_vm4, %v3624_v42, %v7917_v33  ;;  %v3627_v53 = vsel %vm2309_vm4, %v3625_v52, %v7918_v50  ;;  %7699 = vmatpush3.bf16.msra.mxu0 %v7947_v25  ;;  %v7952_v21 = vld [vmem:[%s9576_s14] sm:$0xff]  }
 0x6e7   : > { %v7923_v3 = vunpack.i.h.bf16 %v7921_v51  ;;  %v7922_v4 = vunpack.i.l.bf16 %v7921_v51  ;;  %7700 = vmatprep.subr.bf16.mxu0 %v8243_v0  ;;  %v7451_v13 = vld [vmem:[%s9575_s13] ss:$0 sm:$0xff] }
 0x6e9   : > { %v3629_v37 = vsel %vm3628_vm5, %v3626_v54, %v7922_v4  ;;  %v3630_v55 = vsel %vm3628_vm5, %v3627_v53, %v7923_v3 }
 0x6ea   : > { %v3631_v56 = vpack.c.bf16 %v3630_v55, %v3629_v37  ;;  %7701 = vmatpush3.bf16.msra.mxu0 %v7948_v26 }
 0x6eb   : > { %7718 = vmatprep.subr.bf16.mxu0 %v8243_v0 }
 0x6ec   : > { %7695 = vmatmul.mubr.msk.bf16.vlgmr.msra.gmra.mxu1 %vm682_vm1, %v3631_v56 }
 0x6ed   : > { %7714 = vmatprep.mubr.msk.bf16.mxu1 %vm8244_vm0, %v8243_v0  ;;  %7707 = vmatpush3.bf16.msra.mxu1 %v7949_v47 }
 0x6ee   : > { %7708 = vmatprep.subr.bf16.mxu1 %v8243_v0 }
 0x6f1   : > { %7709 = vmatpush3.bf16.msra.mxu1 %v7950_v48 }
 0x6f2   : > { %7710 = vmatprep.subr.bf16.mxu1 %v8243_v0 }
 0x6f5   : > { %7711 = vmatpush3.bf16.msra.mxu1 %v7951_v49 }
 0x6f6   : > { %7712 = vmatprep.subr.bf16.mxu1 %v8243_v0 }
 0x6f9   : > { %7713 = vmatpush3.bf16.msra.mxu1 %v7952_v21 }
 0x6fa   : > { %7734 = vmatprep.subr.bf16.mxu1 %v8243_v0 }
 0x7ac   : > { %v3692_v59 = vpop.f32.mrf.mxu1 }
 0x7ad   : > { %v3693_v61 = vadd.f32 %v7445_v58, %v3692_v59 }
 0x7ae   : > { %v7696_v62 = vpop.f32.mrf.mxu1 }
 0x7af   : > { %v3699_v2 = vadd.f32 %v8055_v63, %v3693_v61 }
 0x7b0   : > { %v3695_v14 = vpop.f32.mrf.mxu1 }
 0x7b1   : > { %v3696_v60 = vadd.f32 %v7445_v58, %v3695_v14  ;;  %v3703_v43 = vsel %vm682_vm1, %v3699_v2, 0.0 }
 0x7b2   : > { %3704 = vadd.xlane.f32.xlu1 %v3703_v43  ;;  %v7697_v16 = vpop.f32.mrf.mxu1 }
 0x7b3   : > { %v3700_v5 = vadd.f32 %v8056_v11, %v3696_v60 }
 0x7b5   : > { %v3706_v17 = vsel %vm682_vm1, %v3700_v5, 0.0 }
 0x7b6   : > { %3707 = vadd.xlane.f32.xlu0 %v3706_v17 }
 0x83b   : > { %v3705_v44 = vpop.xlane.xlu1 %3704 }
 0x83c   : > { %v3710_v18 = vmul.f32 0.03125, %v3705_v44  ;;  %v7455_v44 = vld [vmem:[%s9577_s15] ss:$0 sm:$0xff] }
 0x83e   : > { %v3712_v1 = vsub.f32 %v3699_v2, %v3710_v18 }
 0x83f   : > { %v3708_v6 = vpop.xlane.xlu0 %3707 }
 0x840   : > { %v3711_v19 = vmul.f32 0.03125, %v3708_v6  ;;  %v3714_v10 = vmul.f32 %v3712_v1, %v3712_v1 }
 0x842   : > { %v3713_v30 = vsub.f32 %v3700_v5, %v3711_v19  ;;  %v3716_v23 = vsel %vm682_vm1, %v3714_v10, 0.0 }
 0x843   : > { %3717 = vadd.xlane.f32.xlu0 %v3716_v23 }
 0x844   : > { %v3715_v20 = vmul.f32 %v3713_v30, %v3713_v30 }
 0x846   : > { %v3719_v24 = vsel %vm682_vm1, %v3715_v20, 0.0 }
 0x847   : > { %3720 = vadd.xlane.f32.xlu1 %v3719_v24 }
 0x8cc   : > { %v3718_v29 = vpop.xlane.xlu0 %3717 }
 0x8cd   : > { %v3722_v31 = vmul.f32 0.03125, %v3718_v29 }
 0x8cf   : > { %v3724_v32 = vadd.f32 1e-12, %v3722_v31 }
 0x8d0   : > { %v3721_v7 = vpop.xlane.xlu1 %3720 }
 0x8d1   : > { %7999 = vrsqrt.f32 %v3724_v32  ;;  %v3723_v39 = vmul.f32 0.03125, %v3721_v7 }
 0x8d3   : > { %v3725_v35 = vadd.f32 1e-12, %v3723_v39 }
 0x8d5   : > { %8001 = vrsqrt.f32 %v3725_v35 }
 0x8de   : > { %v8000_v36 = vpop.eup %7999 }
 0x8df   : > { %v3728_v38 = vmul.f32 %v8000_v36, %v3712_v1 }
 0x8e1   : > { %v3736_v45 = vmul.f32 %v7449_v15, %v3728_v38 }
 0x8e2   : > { %v8002_v8 = vpop.eup %8001 }
 0x8e3   : > { %v3729_v40 = vmul.f32 %v8002_v8, %v3713_v30  ;;  %v3744_v46 = vadd.f32 %v7450_v22, %v3736_v45  ;;  %v7953_v8 = vld [vmem:[%s9627_s18 + $0x18] sm:$0xff]   ;;  %v7955_v45 = vld [vmem:[%s9627_s18 + $0x10] sm:$0xff]  }
 0x8e5   : > { %v3737_v9 = vmul.f32 %v7449_v15, %v3729_v40  ;;  %v7954_v40 = vld [vmem:[#allocation5 + $0x18] sm:$0xff]  }
 0x8e7   : > { %v3745_v27 = vadd.f32 %v7450_v22, %v3737_v9  ;;  %v7956_v22 = vld [vmem:[#allocation5 + $0x10] sm:$0xff]  }
 0x8e9   : > { %v3746_v12 = vpack.c.bf16 %v3745_v27, %v3744_v46 }
 0x8eb   : > { %7703 = vmatmul.mubr.msk.bf16.vlgmr.msra.gmra.mxu0 %vm682_vm1, %v3746_v12 }
 0x8ec   : > { %7722 = vmatprep.mubr.msk.bf16.mxu0 %vm8244_vm0, %v8243_v0  ;;  %7719 = vmatpush3.bf16.msra.mxu0 %v7953_v8 }
 0x8ed   : > { %7720 = vmatprep.subr.bf16.mxu0 %v8243_v0 }
 0x8f0   : > { %7721 = vmatpush3.bf16.msra.mxu0 %v7955_v45 }
 0x8f1   : > { %7726 = vmatprep.subr.bf16.mxu0 %v8243_v0 }
 0x9ab   : > { %v3807_v50 = vpop.f32.mrf.mxu0 }
 0x9ac   : > { %v3808_v33 = vadd.f32 %v7451_v13, %v3807_v50 }
 0x9ad   : > { %v7704_v42 = vpop.f32.mrf.mxu0 }
 0x9ae   : > { %v3814_v52 = vmul.f32 %v3808_v33, %v3808_v33 }
 0x9af   : > { %v3810_v51 = vpop.f32.mrf.mxu0 }
 0x9b0   : > { %v3816_v3 = vmul.f32 %v3814_v52, %v3808_v33  ;;  %v3811_v4 = vadd.f32 %v7451_v13, %v3810_v51  ;;  %v7461_v13 = vld [vmem:[%s9578_s16] ss:$0 sm:$0xff] }
 0x9b1   : > { %v7705_v54 = vpop.f32.mrf.mxu0  ;;  %v7462_v52 = vld [vmem:[%s9628_s17] ss:$0 sm:$0xff] }
 0x9b2   : > { %v3818_v53 = vmul.f32 0.044715, %v3816_v3  ;;  %v3815_v37 = vmul.f32 %v3811_v4, %v3811_v4  ;;  %v7957_v54 = vld [vmem:[%s9566_s4 + $0x18] sm:$0xff]  }
 0x9b4   : > { %v3820_v55 = vadd.f32 %v3818_v53, %v3808_v33  ;;  %v3817_v56 = vmul.f32 %v3815_v37, %v3811_v4  ;;  %v7958_v37 = vld [vmem:[%s9566_s4 + $0x10] sm:$0xff]  }
 0x9b6   : > { %v3822_v58 = vmul.f32 0.7978846, %v3820_v55  ;;  %v3819_v59 = vmul.f32 0.044715, %v3817_v56 }
 0x9b8   : > { %8003 = vtanh.f32 %v3822_v58  ;;  %v3821_v61 = vadd.f32 %v3819_v59, %v3811_v4 }
 0x9ba   : > { %v3823_v62 = vmul.f32 0.7978846, %v3821_v61 }
 0x9bc   : > { %8005 = vtanh.f32 %v3823_v62 }
 0x9c5   : > { %v8004_v63 = vpop.eup %8003 }
 0x9c6   : > { %v3826_v2 = vadd.f32 1.0, %v8004_v63 }
 0x9c8   : > { %v3828_v60 = vmul.f32 0.5, %v3826_v2 }
 0x9c9   : > { %v8006_v14 = vpop.eup %8005 }
 0x9ca   : > { %v3827_v43 = vadd.f32 1.0, %v8006_v14  ;;  %v3830_v11 = vmul.f32 %v3828_v60, %v3808_v33  ;;  %v7477_v14 = vld [vmem:[%s9567_s5 + $0x1] ss:$0 sm:$0xff] }
 0x9cc   : > { %v3829_v16 = vmul.f32 0.5, %v3827_v43 }
 0x9ce   : > { %v3831_v5 = vmul.f32 %v3829_v16, %v3811_v4 }
 0x9d0   : > { %v3832_v17 = vpack.c.bf16 %v3831_v5, %v3830_v11 }
 0x9d2   : > { %7715 = vmatmul.mubr.msk.bf16.vlgmr.msra.gmra.mxu1 %vm3872_vm6, %v3832_v17 }
 0x9d3   : > { %7738 = vmatprep.mubr.msk.bf16.mxu1 %vm8244_vm0, %v8243_v0  ;;  %7735 = vmatpush3.bf16.msra.mxu1 %v7954_v40 }
 0x9d4   : > { %7736 = vmatprep.subr.bf16.mxu1 %v8243_v0 }
 0x9d7   : > { %7737 = vmatpush3.bf16.msra.mxu1 %v7956_v22 }
 0x9d8   : > { %7748 = vmatprep.subr.bf16.mxu1 %v8243_v0 }
 0xa92   : > { %v3910_v18 = vpop.f32.mrf.mxu1 }
 0xa93   : > { %v3911_v1 = vadd.f32 %v7455_v44, %v3910_v18 }
 0xa94   : > { %v7716_v6 = vpop.f32.mrf.mxu1 }
 0xa95   : > { %v3917_v19 = vadd.f32 %v3911_v1, %v3744_v46 }
 0xa96   : > { %v3913_v10 = vpop.f32.mrf.mxu1 }
 0xa97   : > { %v3914_v30 = vadd.f32 %v7455_v44, %v3913_v10  ;;  %v3921_v23 = vsel %vm682_vm1, %v3917_v19, 0.0  ;;  %v7468_v44 = vld [vmem:[%s9565_s3 + $0x1] ss:$0 sm:$0xff] }
 0xa98   : > { %3922 = vadd.xlane.f32.xlu0 %v3921_v23  ;;  %v7717_v20 = vpop.f32.mrf.mxu1 }
 0xa99   : > { %v3918_v24 = vadd.f32 %v3914_v30, %v3745_v27 }
 0xa9b   : > { %v3924_v25 = vsel %vm682_vm1, %v3918_v24, 0.0 }
 0xa9c   : > { %3925 = vadd.xlane.f32.xlu1 %v3924_v25 }
 0xb21   : > { %v3923_v26 = vpop.xlane.xlu0 %3922 }
 0xb22   : > { %v3927_v29 = vmul.f32 0.03125, %v3923_v26 }
 0xb24   : > { %v3929_v31 = vsub.f32 %v3917_v19, %v3927_v29 }
 0xb25   : > { %v3926_v32 = vpop.xlane.xlu1 %3925 }
 0xb26   : > { %v3928_v7 = vmul.f32 0.03125, %v3926_v32  ;;  %v3931_v39 = vmul.f32 %v3929_v31, %v3929_v31 }
 0xb28   : > { %v3930_v35 = vsub.f32 %v3918_v24, %v3928_v7  ;;  %v3933_v36 = vsel %vm682_vm1, %v3931_v39, 0.0 }
 0xb29   : > { %3934 = vadd.xlane.f32.xlu0 %v3933_v36 }
 0xb2a   : > { %v3932_v38 = vmul.f32 %v3930_v35, %v3930_v35 }
 0xb2c   : > { %v3936_v15 = vsel %vm682_vm1, %v3932_v38, 0.0 }
 0xb2d   : > { %3937 = vadd.xlane.f32.xlu1 %v3936_v15 }
 0xbb2   : > { %v3935_v9 = vpop.xlane.xlu0 %3934 }
 0xbb3   : > { %v3939_v46 = vmul.f32 0.03125, %v3935_v9 }
 0xbb5   : > { %v3941_v27 = vadd.f32 1e-12, %v3939_v46 }
 0xbb6   : > { %v3938_v12 = vpop.xlane.xlu1 %3937 }
 0xbb7   : > { %8007 = vrsqrt.f32 %v3941_v27  ;;  %v3940_v47 = vmul.f32 0.03125, %v3938_v12 }
 0xbb9   : > { %v3942_v48 = vadd.f32 1e-12, %v3940_v47 }
 0xbbb   : > { %8009 = vrsqrt.f32 %v3942_v48 }
 0xbc4   : > { %v8008_v49 = vpop.eup %8007 }
 0xbc5   : > { %v3945_v21 = vmul.f32 %v8008_v49, %v3929_v31 }
 0xbc7   : > { %v3953_v42 = vmul.f32 %v7461_v13, %v3945_v21 }
 0xbc8   : > { %v8010_v50 = vpop.eup %8009 }
 0xbc9   : > { %v3946_v33 = vmul.f32 %v8010_v50, %v3930_v35  ;;  %v9024_v3 = vadd.f32 %v7462_v52, %v3953_v42 }
 0xbcb   : > { %v3954_v51 = vmul.f32 %v7461_v13, %v3946_v33 }
 0xbcd   : > { %v9026_v4 = vadd.f32 %v7462_v52, %v3954_v51 }
 0xbcf   : > { %v3963_v53 = vpack.c.bf16 %v9026_v4, %v9024_v3 }
 0xbd1   : > { %7723 = vmatmul.mubr.msk.bf16.vlgmr.msra.gmra.mxu0 %vm682_vm1, %v3963_v53  ;;  %7739 = vmatmul.mubr.msk.bf16.vlgmr.msra.gmra.mxu1 %vm682_vm1, %v3963_v53 }
 0xbd2   : > { %7727 = vmatpush3.bf16.msra.mxu0 %v7957_v54  ;;  %7730 = vmatprep.mubr.msk.bf16.mxu0 %vm8244_vm0, %v8243_v0 }
 0xbd3   : > { %7728 = vmatprep.subr.bf16.mxu0 %v8243_v0  ;;  %7750 = vmatprep.mubr.msk.bf16.mxu1 %vm8244_vm0, %v8243_v0 }
 0xbd6   : > { %7729 = vmatpush3.bf16.msra.mxu0 %v7958_v37 }
 0xbd7   : > { %7742 = vmatprep.subr.bf16.mxu0 %v8243_v0 }
 0xbd9   : > { %7731 = vmatmul.mubr.msk.bf16.vlgmr.msra.gmra.mxu0 %vm682_vm1, %v3963_v53 }
 0xbda   : > { %7744 = vmatprep.mubr.msk.bf16.mxu0 %vm8244_vm0, %v8243_v0 }
 0xc91   : > { %v4026_v55 = vpop.f32.mrf.mxu0  ;;  %v9047_v56 = vpop.f32.mrf.mxu1 }
 0xc92   : > { %v9063_v18 = vadd.f32 %v7468_v44, %v4026_v55 }
 0xc93   : > { %v7724_v58 = vpop.f32.mrf.mxu0  ;;  %v7740_v59 = vpop.f32.mrf.mxu1 }
 0xc95   : > { %v4029_v61 = vpop.f32.mrf.mxu0  ;;  %v9049_v62 = vpop.f32.mrf.mxu1 }
 0xc96   : > { %v9065_v1 = vadd.f32 %v7468_v44, %v4029_v61 }
 0xc97   : > { %v7725_v63 = vpop.f32.mrf.mxu0  ;;  %v7741_v2 = vpop.f32.mrf.mxu1 }
 0xc99   : > { %v4092_v60 = vpop.f32.mrf.mxu0 }
 0xc9a   : > { %v4093_v43 = vadd.f32 %v7477_v14, %v4092_v60 }
 0xc9b   : > { %v7732_v16 = vpop.f32.mrf.mxu0 }
 0xc9c   : > { %4345 = vrot.lane.b32.xlu1 %v4093_v43, %s8245_s1  ;;  %4339 = vrot.lane.b32.xlu0 %v4093_v43, %s8246_s21 }
 0xc9d   : > { %v4095_v11 = vpop.f32.mrf.mxu0 }
 0xc9e   : > { %v4096_v5 = vadd.f32 %v7477_v14, %v4095_v11 }
 0xc9f   : > { %v7733_v17 = vpop.f32.mrf.mxu0 }
 0xca0   : > { %4351 = vrot.lane.b32.xlu1 %v4093_v43, %s8247_s2  ;;  %4347 = vrot.lane.b32.xlu0 %v4096_v5, %s8245_s1 }
 0xca4   : > { %4353 = vrot.lane.b32.xlu0 %v4096_v5, %s8247_s2  ;;  %4341 = vrot.lane.b32.xlu1 %v4096_v5, %s8246_s21 }
 0xca8   : > { %4167 = vrot.lane.b32.xlu0 %v9063_v18, %s8246_s21  ;;  %4169 = vrot.lane.b32.xlu1 %v9065_v1, %s8246_s21 }
 0xcac   : > { %4175 = vrot.lane.b32.xlu0 %v9065_v1, %s8245_s1  ;;  %4173 = vrot.lane.b32.xlu1 %v9063_v18, %s8245_s1 }
 0xd0e   : > { %v4346_v6 = vpop.permute.xlu1 %4345  ;;  %v4340_v19 = vpop.permute.xlu0 %4339 }
 0xd0f   : > { %v4357_v10 = vcombine.low %v4093_v43, %v4346_v6  ;;  %v4358_v30 = vcombine.high %v4093_v43, %v4346_v6 }
 0xd11   : > { %v4365_v26 = vrot.slane %v4357_v10, %v8565_v34  ;;  %v4372_v29 = vrot.slane %v4358_v30, %v8565_v34 }
 0xd12   : > { %v4352_v23 = vpop.permute.xlu1 %4351  ;;  %v4348_v20 = vpop.permute.xlu0 %4347 }
 0xd13   : > { %v4373_v24 = vcombine.low %v4340_v19, %v4352_v23  ;;  %v4374_v25 = vcombine.high %v4340_v19, %v4352_v23  ;;  %v4425_v45 = vcombine.low %v4096_v5, %v4348_v20  ;;  %v4426_v52 = vcombine.high %v4096_v5, %v4348_v20 }
 0xd15   : > { %v4381_v31 = vrot.slane %v4373_v24, %v8565_v34  ;;  %v4388_v32 = vrot.slane %v4374_v25, %v8565_v34  ;;  %v4433_v48 = vrot.slane %v4425_v45, %v8565_v34  ;;  %v4440_v61 = vrot.slane %v4426_v52, %v8565_v34 }
 0xd16   : > { %v4354_v7 = vpop.permute.xlu0 %4353  ;;  %v4342_v39 = vpop.permute.xlu1 %4341 }
 0xd17   : > { %v4389_v35 = vcombine.low %v4365_v26, %v4381_v31  ;;  %v4390_v36 = vcombine.high %v4365_v26, %v4381_v31  ;;  %v4405_v38 = vcombine.low %v4372_v29, %v4388_v32  ;;  %v4441_v15 = vcombine.low %v4342_v39, %v4354_v7 }
 0xd18   : > { %v4406_v22 = vcombine.high %v4372_v29, %v4388_v32  ;;  %v4442_v49 = vcombine.high %v4342_v39, %v4354_v7 }
 0xd19   : > { %v4397_v8 = vrot.slane %v4389_v35, %v8568_v41  ;;  %v4404_v40 = vrot.slane %v4390_v36, %v8568_v41  ;;  %v4413_v27 = vrot.slane %v4405_v38, %v8568_v41  ;;  %v4449_v12 = vrot.slane %v4441_v15, %v8565_v34 }
 0xd1a   : > { %v4420_v13 = vrot.slane %v4406_v22, %v8568_v41  ;;  %v4456_v51 = vrot.slane %v4442_v49, %v8565_v34  ;;  %v9103_v29 = vpop.permute.xlu0 %4167  ;;  %v9105_v31 = vpop.permute.xlu1 %4169 }
 0xd1b   : > { %v4495_v9 = vpack.c.bf16 %v4404_v40, %v4404_v40  ;;  %v4493_v46 = vpack.c.bf16 %v4397_v8, %v4397_v8  ;;  %v4422_v47 = vcombine.high %v4404_v40, %v8243_v0  ;;  %v4497_v21 = vpack.c.bf16 %v4413_v27, %v4413_v27 }
 0xd1c   : > { %v4457_v50 = vcombine.low %v4433_v48, %v4449_v12  ;;  %v4423_v42 = vcombine.high %v4413_v27, %v8243_v0  ;;  %v4499_v54 = vpack.c.bf16 %v4420_v13, %v4420_v13  ;;  %v4421_v53 = vcombine.high %v4397_v8, %v8243_v0 }
 0xd1d   : > { %4825 = vxpose.xlu0.c.b16.start.end [1/1] (short) (narrow) %v4495_v9, 16  ;;  %4793 = vxpose.xlu1.c.b16.start.end [1/1] (short) (narrow) %v4493_v46, 16  ;;  %v4496_v33 = vpack.c.bf16 %v4422_v47, %v4422_v47  ;;  %v4458_v37 = vcombine.high %v4433_v48, %v4449_v12  ;;  %v4424_v58 = vcombine.high %v4420_v13, %v8243_v0 }
 0xd1e   : > { %v4498_v55 = vpack.c.bf16 %v4423_v42, %v4423_v42  ;;  %v4465_v59 = vrot.slane %v4457_v50, %v8568_v41  ;;  %v4494_v63 = vpack.c.bf16 %v4421_v53, %v4421_v53  ;;  %v4473_v2 = vcombine.low %v4440_v61, %v4456_v51  ;;  %v9107_v32 = vpop.permute.xlu0 %4175  ;;  %v9109_v7 = vpop.permute.xlu1 %4173 }
 0xd1f   : > { %v4500_v14 = vpack.c.bf16 %v4424_v58, %v4424_v58  ;;  %v4472_v43 = vrot.slane %v4458_v37, %v8568_v41  ;;  %v4474_v11 = vcombine.high %v4440_v61, %v4456_v51 }
 0xd20   : > { %v4489_v60 = vcombine.high %v4465_v59, %v8243_v0  ;;  %v4501_v16 = vpack.c.bf16 %v4465_v59, %v4465_v59  ;;  %v4481_v44 = vrot.slane %v4473_v2, %v8568_v41 }
 0xd21   : > { %4857 = vxpose.xlu0.c.b16.start.end [1/1] (short) (narrow) %v4497_v21, 16  ;;  %4841 = vxpose.xlu1.c.b16.start.end [1/1] (short) (narrow) %v4496_v33, 16  ;;  %v4490_v17 = vcombine.high %v4472_v43, %v8243_v0  ;;  %v4503_v6 = vpack.c.bf16 %v4472_v43, %v4472_v43  ;;  %v4488_v30 = vrot.slane %v4474_v11, %v8568_v41 }
 0xd22   : > { %v4502_v5 = vpack.c.bf16 %v4489_v60, %v4489_v60  ;;  %v4491_v10 = vcombine.high %v4481_v44, %v8243_v0  ;;  %v4505_v23 = vpack.c.bf16 %v4481_v44, %v4481_v44 }
 0xd23   : > { %v4504_v19 = vpack.c.bf16 %v4490_v17, %v4490_v17  ;;  %v4492_v24 = vcombine.high %v4488_v30, %v8243_v0  ;;  %v4507_v25 = vpack.c.bf16 %v4488_v30, %v4488_v30 }
 0xd24   : > { %v4506_v20 = vpack.c.bf16 %v4491_v10, %v4491_v10 }
 0xd25   : > { %4889 = vxpose.xlu0.c.b16.start.end [1/1] (short) (narrow) %v4499_v54, 16  ;;  %4873 = vxpose.xlu1.c.b16.start.end [1/1] (short) (narrow) %v4498_v55, 16  ;;  %v4508_v26 = vpack.c.bf16 %v4492_v24, %v4492_v24 }
 0xd29   : > { %4809 = vxpose.xlu0.c.b16.start.end [1/1] (short) (narrow) %v4494_v63, 16  ;;  %4905 = vxpose.xlu1.c.b16.start.end [1/1] (short) (narrow) %v4500_v14, 16 }
 0xd2d   : > { %4921 = vxpose.xlu0.c.b16.start.end [1/1] (short) (narrow) %v4501_v16, 16  ;;  %4937 = vxpose.xlu1.c.b16.start.end [1/1] (short) (narrow) %v4502_v5, 16 }
 0xd31   : > { %4953 = vxpose.xlu0.c.b16.start.end [1/1] (short) (narrow) %v4503_v6, 16  ;;  %4969 = vxpose.xlu1.c.b16.start.end [1/1] (short) (narrow) %v4504_v19, 16 }
 0xd35   : > { %4985 = vxpose.xlu0.c.b16.start.end [1/1] (short) (narrow) %v4505_v23, 16  ;;  %5001 = vxpose.xlu1.c.b16.start.end [1/1] (short) (narrow) %v4506_v20, 16 }
 0xd39   : > { %5017 = vxpose.xlu0.c.b16.start.end [1/1] (short) (narrow) %v4507_v25, 16  ;;  %5033 = vxpose.xlu1.c.b16.start.end [1/1] (short) (narrow) %v4508_v26, 16 }
 0xd3d   : > { %4179 = vrot.lane.b32.xlu1 %v9063_v18, %s8247_s2 }
 0xd42   : > { %4181 = vrot.lane.b32.xlu0 %v9065_v1, %s8247_s2 }
 0xd7f   : > { %v4833_v39 = vpop.trf.xlu0  ;;  %v4801_v35 = vpop.trf.xlu1 }
 0xd83   : > { %v4865_v36 = vpop.trf.xlu0  ;;  %v4849_v38 = vpop.trf.xlu1 }
 0xd84   : > { %v5049_v21 = vcombine.low %v4801_v35, %v4865_v36 }
 0xd86   : > { %v5056_v53 = vrot.slane %v5049_v21, %v8565_v34 }
 0xd87   : > { %v4897_v15 = vpop.trf.xlu0  ;;  %v4881_v8 = vpop.trf.xlu1 }
 0xd88   : > { %v5057_v12 = vcombine.low %v4833_v39, %v4897_v15 }
 0xd8a   : > { %v5064_v50 = vrot.slane %v5057_v12, %v8565_v34 }
 0xd8b   : > { %v4817_v40 = vpop.trf.xlu0  ;;  %v4913_v45 = vpop.trf.xlu1 }
 0xd8c   : > { %v5117_v47 = vcombine.low %v4817_v40, %v4881_v8  ;;  %v5125_v48 = vcombine.low %v4849_v38, %v4913_v45  ;;  %v5081_v59 = vcombine.low %v5056_v53, %v5064_v50  ;;  %v5082_v43 = vcombine.high %v5056_v53, %v5064_v50 }
 0xd8e   : > { %v5124_v42 = vrot.slane %v5117_v47, %v8565_v34  ;;  %v5132_v52 = vrot.slane %v5125_v48, %v8565_v34  ;;  %v5089_v6 = vrot.slane %v5081_v59, %v8568_v41  ;;  %v5096_v24 = vrot.slane %v5082_v43, %v8568_v41 }
 0xd8f   : > { %v4929_v22 = vpop.trf.xlu0  ;;  %v4945_v9 = vpop.trf.xlu1  ;;  %v4253_v59 = vcombine.low %v9065_v1, %v9107_v32 }
 0xd90   : > { %v5149_v2 = vcombine.low %v5124_v42, %v5132_v52  ;;  %v5150_v16 = vcombine.high %v5124_v42, %v5132_v52 }
 0xd92   : > { %v5157_v30 = vrot.slane %v5149_v2, %v8568_v41  ;;  %v5164_v25 = vrot.slane %v5150_v16, %v8568_v41  ;;  %v4261_v16 = vrot.slane %v4253_v59, %v8565_v34 }
 0xd93   : > { %v4961_v46 = vpop.trf.xlu0  ;;  %v4977_v27 = vpop.trf.xlu1 }
 0xd97   : > { %v4993_v49 = vpop.trf.xlu0  ;;  %v5009_v13 = vpop.trf.xlu1 }
 0xd98   : > { %v5065_v33 = vcombine.low %v4929_v22, %v4993_v49  ;;  %v5133_v51 = vcombine.low %v4945_v9, %v5009_v13 }
 0xd9a   : > { %v5072_v61 = vrot.slane %v5065_v33, %v8565_v34  ;;  %v5140_v14 = vrot.slane %v5133_v51, %v8565_v34 }
 0xd9b   : > { %v5025_v54 = vpop.trf.xlu0  ;;  %v5041_v55 = vpop.trf.xlu1 }
 0xd9c   : > { %v5073_v37 = vcombine.low %v4961_v46, %v5025_v54  ;;  %v5141_v58 = vcombine.low %v4977_v27, %v5041_v55  ;;  %v7482_v54 = vld [vmem:[%s9569_s7 + $0x1] ss:$0 sm:$0xff] }
 0xd9d   : > { %v9131_v53 = vadd.f32 %v7482_v54, %v9049_v62 }
 0xd9e   : > { %v5080_v63 = vrot.slane %v5073_v37, %v8565_v34  ;;  %v5148_v60 = vrot.slane %v5141_v58, %v8565_v34  ;;  %v9136_v37 = vadd.f32 %v7482_v54, %v9047_v56 }
 0xda0   : > { %v5097_v11 = vcombine.low %v5072_v61, %v5080_v63  ;;  %v5098_v5 = vcombine.high %v5072_v61, %v5080_v63  ;;  %v5165_v17 = vcombine.low %v5140_v14, %v5148_v60  ;;  %v5166_v44 = vcombine.high %v5140_v14, %v5148_v60 }
 0xda1   : > { %v4254_v61 = vcombine.high %v9065_v1, %v9107_v32  ;;  %v4185_v14 = vcombine.low %v9063_v18, %v9109_v7  ;;  %v4186_v60 = vcombine.high %v9063_v18, %v9109_v7 }
 0xda2   : > { %v5105_v19 = vrot.slane %v5097_v11, %v8568_v41  ;;  %v5112_v10 = vrot.slane %v5098_v5, %v8568_v41  ;;  %v5173_v23 = vrot.slane %v5165_v17, %v8568_v41  ;;  %v5180_v20 = vrot.slane %v5166_v44, %v8568_v41 }
 0xda3   : > { %v4268_v11 = vrot.slane %v4254_v61, %v8565_v34  ;;  %v4200_v5 = vrot.slane %v4186_v60, %v8565_v34 }
 0xda4   : > { %v5113_v26 = vcombine.low %v5089_v6, %v5105_v19  ;;  %v5114_v39 = vcombine.high %v5089_v6, %v5105_v19  ;;  %v5181_v35 = vcombine.low %v5157_v30, %v5173_v23  ;;  %v5182_v36 = vcombine.high %v5157_v30, %v5173_v23 }
 0xda5   : > { %v5115_v38 = vcombine.low %v5096_v24, %v5112_v10  ;;  %v5183_v15 = vcombine.low %v5164_v25, %v5180_v20  ;;  %v5116_v49 = vcombine.high %v5096_v24, %v5112_v10  ;;  %v5184_v21 = vcombine.high %v5164_v25, %v5180_v20 }
 0xda6   : > { %v5195_v8 = vpack.i.b16 %v5182_v36, %v5114_v39  ;;  %v5187_v40 = vpack.i.b16 %v5181_v35, %v5113_v26  ;;  %v5197_v45 = vshrl.u32 %v5114_v39, 16  ;;  %v5198_v22 = vshrl.u32 %v5182_v36, 16 }
 0xda7   : > { %v5189_v9 = vshrl.u32 %v5113_v26, 16  ;;  %v5205_v46 = vshrl.u32 %v5115_v38, 16  ;;  %v5203_v27 = vpack.i.b16 %v5183_v15, %v5115_v38  ;;  %v5190_v47 = vshrl.u32 %v5181_v35, 16 }
 0xda8   : > { %5249 = vxpose.xlu0.c.b16.start.end [1/1] (short) (narrow) %v5195_v8, 16  ;;  %5217 = vxpose.xlu1.c.b16.start.end [1/1] (short) (narrow) %v5187_v40, 16  ;;  %v5199_v12 = vpack.i.b16 %v5198_v22, %v5197_v45  ;;  %v5206_v48 = vshrl.u32 %v5183_v15, 16  ;;  %v5213_v33 = vshrl.u32 %v5116_v49, 16  ;;  %v5214_v42 = vshrl.u32 %v5184_v21, 16 }
 0xda9   : > { %v5191_v13 = vpack.i.b16 %v5190_v47, %v5189_v9  ;;  %v5211_v52 = vpack.i.b16 %v5184_v21, %v5116_v49 }
 0xdaa   : > { %v5207_v50 = vpack.i.b16 %v5206_v48, %v5205_v46  ;;  %v5215_v51 = vpack.i.b16 %v5214_v42, %v5213_v33 }
 0xdac   : > { %5281 = vxpose.xlu0.c.b16.start.end [1/1] (short) (narrow) %v5203_v27, 16  ;;  %5265 = vxpose.xlu1.c.b16.start.end [1/1] (short) (narrow) %v5199_v12, 16 }
 0xdaf   : > { %v4180_v55 = vpop.permute.xlu1 %4179 }
 0xdb0   : > { %5233 = vxpose.xlu0.c.b16.start.end [1/1] (short) (narrow) %v5191_v13, 16  ;;  %5297 = vxpose.xlu1.c.b16.start.end [1/1] (short) (narrow) %v5207_v50, 16  ;;  %v4201_v63 = vcombine.low %v9103_v29, %v4180_v55  ;;  %v4202_v2 = vcombine.high %v9103_v29, %v4180_v55  ;;  %v4193_v29 = vrot.slane %v4185_v14, %v8565_v34 }
 0xdb2   : > { %v4209_v1 = vrot.slane %v4201_v63, %v8565_v34  ;;  %v4216_v32 = vrot.slane %v4202_v2, %v8565_v34 }
 0xdb4   : > { %5313 = vxpose.xlu0.c.b16.start.end [1/1] (short) (narrow) %v5211_v52, 16  ;;  %5329 = vxpose.xlu1.c.b16.start.end [1/1] (short) (narrow) %v5215_v51, 16  ;;  %v4182_v62 = vpop.permute.xlu0 %4181  ;;  %v4217_v7 = vcombine.low %v4193_v29, %v4209_v1  ;;  %v4218_v19 = vcombine.high %v4193_v29, %v4209_v1  ;;  %v4233_v10 = vcombine.low %v4200_v5, %v4216_v32 }
 0xdb5   : > { %v4269_v56 = vcombine.low %v9105_v31, %v4182_v62  ;;  %v4270_v58 = vcombine.high %v9105_v31, %v4182_v62  ;;  %v4234_v30 = vcombine.high %v4200_v5, %v4216_v32 }
 0xdb6   : > { %v4225_v26 = vrot.slane %v4217_v7, %v8568_v41  ;;  %v4232_v39 = vrot.slane %v4218_v19, %v8568_v41  ;;  %v4241_v35 = vrot.slane %v4233_v10, %v8568_v41 }
 0xdb7   : > { %v4277_v43 = vrot.slane %v4269_v56, %v8565_v34  ;;  %v4284_v31 = vrot.slane %v4270_v58, %v8565_v34  ;;  %v4248_v36 = vrot.slane %v4234_v30, %v8568_v41 }
 0xdb8   : > { %4513 = vrot.lane.b32.xlu1 %v9131_v53, %s8246_s21  ;;  %v4249_v9 = vcombine.high %v4225_v26, %v8243_v0  ;;  %v4250_v46 = vcombine.high %v4232_v39, %v8243_v0  ;;  %v4251_v27 = vcombine.high %v4241_v35, %v8243_v0  ;;  %v7486_v54 = vpack.c.bf16 %v4241_v35, %v4225_v26 }
 0xdb9   : > { %v4285_v17 = vcombine.low %v4261_v16, %v4277_v43  ;;  %v4286_v44 = vcombine.high %v4261_v16, %v4277_v43  ;;  %v4301_v6 = vcombine.low %v4268_v11, %v4284_v31  ;;  %v4302_v18 = vcombine.high %v4268_v11, %v4284_v31 }
 0xdba   : > { %v4252_v12 = vcombine.high %v4248_v36, %v8243_v0  ;;  %v7490_v13 = vpack.c.bf16 %v4251_v27, %v4249_v9  ;;  %v7487_v62 = vpack.c.bf16 %v4248_v36, %v4232_v39  ;;  %v4688_v60 = vrot.slane %v7486_v54, %v8565_v34 }
 0xdbb   : > { %v4293_v23 = vrot.slane %v4285_v17, %v8568_v41  ;;  %v4300_v20 = vrot.slane %v4286_v44, %v8568_v41  ;;  %v4309_v24 = vrot.slane %v4301_v6, %v8568_v41  ;;  %v4316_v25 = vrot.slane %v4302_v18, %v8568_v41 }
 0xdbc   : > { %4517 = vrot.lane.b32.xlu1 %v9136_v37, %s8245_s1  ;;  %v7491_v50 = vpack.c.bf16 %v4252_v12, %v4250_v46  ;;  %v4738_v58 = vrot.slane %v7490_v13, %v8565_v34  ;;  %v4696_v43 = vrot.slane %v7487_v62, %v8565_v34 }
 0xdbd   : > { %4511 = vrot.lane.b32.xlu0 %v9136_v37, %s8246_s21  ;;  %v4317_v38 = vcombine.high %v4293_v23, %v8243_v0  ;;  %v4318_v15 = vcombine.high %v4300_v20, %v8243_v0  ;;  %v4319_v8 = vcombine.high %v4309_v24, %v8243_v0  ;;  %v4320_v40 = vcombine.high %v4316_v25, %v8243_v0 }
 0xdbe   : > { %v7488_v33 = vpack.c.bf16 %v4309_v24, %v4293_v23  ;;  %v7489_v42 = vpack.c.bf16 %v4316_v25, %v4300_v20  ;;  %v4746_v59 = vrot.slane %v7491_v50, %v8565_v34  ;;  %v4713_v18 = vcombine.low %v4688_v60, %v4696_v43 }
 0xdbf   : > { %v7492_v47 = vpack.c.bf16 %v4319_v8, %v4317_v38  ;;  %v7493_v48 = vpack.c.bf16 %v4320_v40, %v4318_v15 }
 0xdc0   : > { %4523 = vrot.lane.b32.xlu1 %v9136_v37, %s8247_s2  ;;  %v4704_v61 = vrot.slane %v7488_v33, %v8565_v34  ;;  %v4712_v63 = vrot.slane %v7489_v42, %v8565_v34  ;;  %v4763_v11 = vcombine.low %v4738_v58, %v4746_v59  ;;  %v4720_v26 = vrot.slane %v4713_v18, %v8568_v41 }
 0xdc1   : > { %4519 = vrot.lane.b32.xlu0 %v9131_v53, %s8245_s1  ;;  %v4754_v52 = vrot.slane %v7492_v47, %v8565_v34  ;;  %v4762_v51 = vrot.slane %v7493_v48, %v8565_v34  ;;  %s646_s1 = scalar_lea.vmem [#allocation10], %s7409_s8  ;;  %s8254_s8 = smov [#allocation10]  }
 0xdc2   : > { %v4721_v29 = vcombine.low %v4704_v61, %v4712_v63  ;;  %v4770_v30 = vrot.slane %v4763_v11, %v8568_v41  ;;  %s7287_s21 = sshll.u32 %s646_s1, 4  ;;  %s8167_s30 = sshll.u32 %s8254_s8, 4  ;;  %s9517_s21 = int_to_ptr.vmem [resolvable:$true] %s7287_s21  ;;  %s8168_s30 = int_to_ptr.vmem [resolvable:$false] %s8167_s30 }
 0xdc3   : > { %v4771_v2 = vcombine.low %v4754_v52, %v4762_v51  ;;  %s8163_s0 = scalar_lea.vmem %s9517_s21, 256  ;;  %s8169_s23 = scalar_lea.vmem %s8168_s30, 512 }
 0xdc4   : > { %v4728_v23 = vrot.slane %v4721_v29, %v8568_v41  ;;  %p8164_p6 = scmp.ne.s32.totalorder %s9517_s21, %s8163_s0  ;;  %p8170_p3 = scmp.lt.s32.totalorder %s9517_s21, %s8168_s30 }
 0xdc5   : > { %4525 = vrot.lane.b32.xlu0 %v9131_v53, %s8247_s2  ;;  %v4778_v6 = vrot.slane %v4771_v2, %v8568_v41  ;;  %p8171_p7 = scmp.lt.s32.totalorder %s8169_s23, %s8163_s0 }
 0xdc6   : > { %v4729_v8 = vcombine.low %v4720_v26, %v4728_v23  ;;  %v4730_v52 = vcombine.high %v4720_v26, %v4728_v23  ;;  %p8165_p0 = pnand %p8164_p6, %p9631_p12 }
 0xdc7   : > { %v4779_v25 = vcombine.low %v4770_v30, %v4778_v6  ;;  %v4780_v33 = vcombine.high %v4770_v30, %v4778_v6  ;;  %p8172_p9 = por %p8171_p7, %p8170_p3 }
 0xdc8   : > { %p8166_p5 = pneg %p8165_p0 }
 0xdc9   : > { %v4783_v48 = vpack.i.b16 %v4779_v25, %v4729_v8  ;;  %v4791_v51 = vshrl.u32 %v4780_v33, 16  ;;  %v4789_v62 = vpack.i.b16 %v4780_v33, %v4730_v52 }
 0xdca   : > { %p8173_p13 = pnand %p8172_p9, %p8166_p5 }
 0xe0a   : > { %v5257_v45 = vpop.trf.xlu0  ;;  %v5225_v22 = vpop.trf.xlu1 }
 0xe0e   : > { %v5289_v49 = vpop.trf.xlu0  ;;  %v5273_v21 = vpop.trf.xlu1 }
 0xe0f   : > { %v5345_v14 = vcombine.low %v5225_v22, %v5289_v49  ;;  %v4784_v49 = vshrl.u32 %v4729_v8, 16 }
 0xe11   : > { %v5352_v17 = vrot.slane %v5345_v14, %v8565_v34 }
 0xe12   : > { %v5241_v55 = vpop.trf.xlu0  ;;  %v5305_v56 = vpop.trf.xlu1 }
 0xe13   : > { %v5370_v31 = vcombine.low %v5241_v55, %v5305_v56  ;;  %v4790_v55 = vshrl.u32 %v4730_v52, 16 }
 0xe15   : > { %v5377_v7 = vrot.slane %v5370_v31, %v8565_v34  ;;  %v4792_v56 = vpack.i.b16 %v4791_v51, %v4790_v55 }
 0xe16   : > { %v5321_v16 = vpop.trf.xlu0  ;;  %v5337_v32 = vpop.trf.xlu1 }
 0xe17   : > { %v5353_v1 = vcombine.low %v5257_v45, %v5321_v16  ;;  %v5378_v5 = vcombine.low %v5273_v21, %v5337_v32  ;;  %v4785_v45 = vshrl.u32 %v4779_v25, 16 }
 0xe19   : > { %v5360_v44 = vrot.slane %v5353_v1, %v8565_v34  ;;  %v5385_v19 = vrot.slane %v5378_v5, %v8565_v34  ;;  %v4786_v50 = vpack.i.b16 %v4785_v45, %v4784_v49 }
 0xe1b   : > { %v5361_v10 = vcombine.low %v5352_v17, %v5360_v44  ;;  %v5386_v20 = vcombine.low %v5377_v7, %v5385_v19 }
 0xe1d   : > { %v5368_v24 = vrot.slane %v5361_v10, %v8568_v41  ;;  %v5393_v39 = vrot.slane %v5386_v20, %v8568_v41 }
 0xe1f   : > { %v5398_v35 = vshrl.u32 %v5368_v24, 16  ;;  %v5369_v36 = vcombine.high %v5368_v24, %v8250_v28  ;;  %v5397_v38 = vpack.i.b16 %v5393_v39, %v5368_v24  ;;  %v5399_v15 = vshrl.u32 %v5393_v39, 16 }
 0xe20   : > { %v5394_v40 = vcombine.high %v5393_v39, %v8250_v28 }
 0xe21   : > { %v5404_v22 = vshrl.u32 %v5369_v36, 16  ;;  %v5411_v9 = vsel %vm2101_vm2, %v5397_v38, 0  ;;  %v5400_v46 = vpack.i.b16 %v5399_v15, %v5398_v35 }
 0xe22   : > { %v5403_v27 = vpack.i.b16 %v5394_v40, %v5369_v36  ;;  %v5405_v12 = vshrl.u32 %v5394_v40, 16  ;;  %7743 = vmatpush3.bf16.msra.mxu0 %v5411_v9 }
 0xe23   : > { %v5458_v47 = vsel %vm2101_vm2, %v5400_v46, 0  ;;  %7754 = vmatprep.subr.bf16.mxu0 %v8243_v0 }
 0xe24   : > { %v5406_v21 = vpack.i.b16 %v5405_v12, %v5404_v22  ;;  %7749 = vmatpush3.bf16.msra.mxu1 %v5458_v47  ;;  %v5505_v13 = vsel %vm2101_vm2, %v5403_v27, 0 }
 0xe25   : > { %7745 = vmatmul.mubr.msk.bf16.vlgmr.msra.gmra.mxu0 %vm2097_vm3, %v4783_v48  ;;  %7760 = vmatprep.subr.bf16.mxu1 %v8243_v0 }
 0xe26   : > { %7755 = vmatpush3.bf16.msra.mxu0 %v5505_v13  ;;  %7756 = vmatprep.mubr.msk.bf16.mxu0 %vm8244_vm0, %v8243_v0  ;;  %v5552_v42 = vsel %vm2101_vm2, %v5406_v21, 0 }
 0xe27   : > { %7751 = vmatmul.mubr.msk.bf16.vlgmr.msra.gmra.mxu1 %vm2097_vm3, %v4786_v50  ;;  %7766 = vmatprep.subr.bf16.mxu0 %v8243_v0 }
 0xe28   : > { %7761 = vmatpush3.bf16.msra.mxu1 %v5552_v42  ;;  %7762 = vmatprep.mubr.msk.bf16.mxu1 %vm8244_vm0, %v8243_v0 }
 0xe29   : > { %7772 = vmatprep.subr.bf16.mxu1 %v8243_v0 }
 0xe2a   : > { %v4514_v54 = vpop.permute.xlu1 %4513 }
 0xe2d   : > { %7757 = vmatmul.mubr.msk.bf16.vlgmr.msra.gmra.mxu0 %vm2097_vm3, %v4789_v62 }
 0xe2e   : > { %v4518_v58 = vpop.permute.xlu1 %4517  ;;  %7768 = vmatprep.mubr.msk.bf16.mxu0 %vm8244_vm0, %v8243_v0 }
 0xe2f   : > { %v4512_v59 = vpop.permute.xlu0 %4511  ;;  %7763 = vmatmul.mubr.msk.bf16.vlgmr.msra.gmra.mxu1 %vm2097_vm3, %v4792_v56  ;;  %v4529_v61 = vcombine.low %v9136_v37, %v4518_v58  ;;  %v4530_v63 = vcombine.high %v9136_v37, %v4518_v58 }
 0xe30   : > { %7774 = vmatprep.mubr.msk.bf16.mxu1 %vm8244_vm0, %v8243_v0 }
 0xe31   : > { %v4537_v31 = vrot.slane %v4529_v61, %v8565_v34  ;;  %v4544_v16 = vrot.slane %v4530_v63, %v8565_v34 }
 0xe32   : > { %v4524_v2 = vpop.permute.xlu1 %4523 }
 0xe33   : > { %v4520_v14 = vpop.permute.xlu0 %4519  ;;  %v4545_v60 = vcombine.low %v4512_v59, %v4524_v2  ;;  %v4546_v43 = vcombine.high %v4512_v59, %v4524_v2 }
 0xe34   : > { %v4598_v32 = vcombine.high %v9131_v53, %v4520_v14  ;;  %v4597_v7 = vcombine.low %v9131_v53, %v4520_v14 }
 0xe35   : > { %v4553_v11 = vrot.slane %v4545_v60, %v8565_v34  ;;  %v4560_v1 = vrot.slane %v4546_v43, %v8565_v34 }
 0xe36   : > { %v9235_v30 = vrot.slane %v4598_v32, %v8565_v34  ;;  %v4605_v36 = vrot.slane %v4597_v7, %v8565_v34 }
 0xe37   : > { %v4526_v29 = vpop.permute.xlu0 %4525  ;;  %v4561_v5 = vcombine.low %v4537_v31, %v4553_v11  ;;  %v4562_v17 = vcombine.high %v4537_v31, %v4553_v11  ;;  %v4577_v44 = vcombine.low %v4544_v16, %v4560_v1  ;;  %v4578_v10 = vcombine.high %v4544_v16, %v4560_v1 }
 0xe38   : > { %v4613_v6 = vcombine.low %v4514_v54, %v4526_v29  ;;  %v4614_v37 = vcombine.high %v4514_v54, %v4526_v29 }
 0xe39   : > { %v4569_v18 = vrot.slane %v4561_v5, %v8568_v41  ;;  %v4576_v19 = vrot.slane %v4562_v17, %v8568_v41  ;;  %v4585_v20 = vrot.slane %v4577_v44, %v8568_v41  ;;  %v4592_v45 = vrot.slane %v4578_v10, %v8568_v41 }
 0xe3a   : > { %v9238_v23 = vrot.slane %v4614_v37, %v8565_v34  ;;  %v4621_v24 = vrot.slane %v4613_v6, %v8565_v34 }
 0xe3b   : > { %v4665_v25 = vpack.c.bf16 %v4569_v18, %v4569_v18  ;;  %v4593_v26 = vcombine.high %v4569_v18, %v8243_v0  ;;  %v4594_v39 = vcombine.high %v4576_v19, %v8243_v0  ;;  %v4595_v40 = vcombine.high %v4585_v20, %v8243_v0 }
 0xe3c   : > { %v4645_v53 = vcombine.low %v9235_v30, %v9238_v23  ;;  %v4646_v35 = vcombine.high %v9235_v30, %v9238_v23  ;;  %v4629_v15 = vcombine.low %v4605_v36, %v4621_v24  ;;  %v4667_v22 = vpack.c.bf16 %v4576_v19, %v4576_v19 }
 0xe3d   : > { %5703 = vxpose.xlu1.c.b16.start.end [1/1] (short) (narrow) %v4665_v25, 16  ;;  %v4666_v38 = vpack.c.bf16 %v4593_v26, %v4593_v26  ;;  %v4668_v8 = vpack.c.bf16 %v4594_v39, %v4594_v39  ;;  %v4630_v9 = vcombine.high %v4605_v36, %v4621_v24  ;;  %v4670_v46 = vpack.c.bf16 %v4595_v40, %v4595_v40 }
 0xe3e   : > { %v4596_v27 = vcombine.high %v4592_v45, %v8243_v0  ;;  %v4637_v12 = vrot.slane %v4629_v15, %v8568_v41  ;;  %v4669_v47 = vpack.c.bf16 %v4585_v20, %v4585_v20  ;;  %v4671_v13 = vpack.c.bf16 %v4592_v45, %v4592_v45 }
 0xe3f   : > { %5719 = vxpose.xlu0.c.b16.start.end [1/1] (short) (narrow) %v4666_v38, 16  ;;  %v4644_v21 = vrot.slane %v4630_v9, %v8568_v41 }
 0xe40   : > { %v4672_v48 = vpack.c.bf16 %v4596_v27, %v4596_v27  ;;  %v4661_v49 = vcombine.high %v4637_v12, %v8243_v0  ;;  %v4673_v42 = vpack.c.bf16 %v4637_v12, %v4637_v12 }
 0xe41   : > { %5751 = vxpose.xlu1.c.b16.start.end [1/1] (short) (narrow) %v4668_v8, 16  ;;  %v4662_v33 = vcombine.high %v4644_v21, %v8243_v0  ;;  %v4675_v51 = vpack.c.bf16 %v4644_v21, %v4644_v21 }
 0xe42   : > { %v4674_v50 = vpack.c.bf16 %v4661_v49, %v4661_v49 }
 0xe43   : > { %5735 = vxpose.xlu0.c.b16.start.end [1/1] (short) (narrow) %v4667_v22, 16  ;;  %v4676_v52 = vpack.c.bf16 %v4662_v33, %v4662_v33 }
 0xe45   : > { %5783 = vxpose.xlu1.c.b16.start.end [1/1] (short) (narrow) %v4670_v46, 16  ;;  %v4653_v46 = vrot.slane %v4645_v53, %v8568_v41 }
 0xe47   : > { %5767 = vxpose.xlu0.c.b16.start.end [1/1] (short) (narrow) %v4669_v47, 16  ;;  %v4677_v27 = vpack.c.bf16 %v4653_v46, %v4653_v46  ;;  %v4663_v12 = vcombine.high %v4653_v46, %v8243_v0 }
 0xe49   : > { %5815 = vxpose.xlu1.c.b16.start.end [1/1] (short) (narrow) %v4672_v48, 16  ;;  %v4678_v48 = vpack.c.bf16 %v4663_v12, %v4663_v12 }
 0xe4b   : > { %5799 = vxpose.xlu0.c.b16.start.end [1/1] (short) (narrow) %v4671_v13, 16 }
 0xe4d   : > { %5847 = vxpose.xlu1.c.b16.start.end [1/1] (short) (narrow) %v4674_v50, 16 }
 0xe4f   : > { %5831 = vxpose.xlu0.c.b16.start.end [1/1] (short) (narrow) %v4673_v42, 16 }
 0xe51   : > { %5879 = vxpose.xlu1.c.b16.start.end [1/1] (short) (narrow) %v4676_v52, 16 }
 0xe53   : > { %5863 = vxpose.xlu0.c.b16.start.end [1/1] (short) (narrow) %v4675_v51, 16 }
 0xe9f   : > { %v5711_v50 = vpop.trf.xlu1 }
 0xea1   : > { %v5727_v13 = vpop.trf.xlu0 }
 0xea3   : > { %v5759_v33 = vpop.trf.xlu1 }
 0xea5   : > { %v5743_v53 = vpop.trf.xlu0 }
 0xea7   : > { %v5791_v52 = vpop.trf.xlu1 }
 0xea9   : > { %v5775_v42 = vpop.trf.xlu0 }
 0xeab   : > { %v5823_v30 = vpop.trf.xlu1 }
 0xead   : > { %v5807_v51 = vpop.trf.xlu0 }
 0xeb1   : > { %v5839_v23 = vpop.trf.xlu0 }
 0xee5   : > { %v5447_v54 = vpop.f32.mrf.mxu0 }
 0xee6   : > { %v5595_v62 = vmul.f32 0.35355338, %v5447_v54  ;;  %v5871_v54 = vpop.trf.xlu0 }
 0xee7   : > { %v7746_v55 = vpop.f32.mrf.mxu0  ;;  %v5494_v56 = vpop.f32.mrf.mxu1 }
 0xee8   : > { %v9257_v58 = vadd.f32 %v5595_v62, %v8756_v57  ;;  %v5597_v59 = vmul.f32 0.35355338, %v5494_v56 }
 0xee9   : > { %v5450_v61 = vpop.f32.mrf.mxu0  ;;  %v7752_v63 = vpop.f32.mrf.mxu1 }
 0xeea   : > { %v9260_v2 = vadd.f32 %v5597_v59, %v8756_v57  ;;  %v5596_v14 = vmul.f32 0.35355338, %v5450_v61  ;;  %v5611_v60 = vsel %vm2309_vm4, %v9257_v58, -inf }
 0xeeb   : > { %v7747_v43 = vpop.f32.mrf.mxu0  ;;  %5612 = vmax.xlane.f32.xlu0 %v5611_v60  ;;  %v5497_v31 = vpop.f32.mrf.mxu1 }
 0xeec   : > { %v9265_v16 = vadd.f32 %v5596_v14, %v8756_v57  ;;  %v5598_v11 = vmul.f32 0.35355338, %v5497_v31  ;;  %v5617_v44 = vsel %vm2309_vm4, %v9260_v2, -inf  ;;  %v5959_v43 = vcombine.low %v5711_v50, %v5775_v42 }
 0xeed   : > { %v7753_v1 = vpop.f32.mrf.mxu1  ;;  %v5541_v32 = vpop.f32.mrf.mxu0  ;;  %v5967_v31 = vcombine.low %v5743_v53, %v5807_v51 }
 0xeee   : > { %v9268_v29 = vadd.f32 %v5598_v11, %v8756_v57  ;;  %v5599_v5 = vmul.f32 0.35355338, %v5541_v32  ;;  %v5614_v17 = vsel %vm2309_vm4, %v9265_v16, -inf  ;;  %v6027_v32 = vcombine.low %v5727_v13, %v5791_v52 }
 0xeef   : > { %v7758_v6 = vpop.f32.mrf.mxu0  ;;  %5615 = vmax.xlane.f32.xlu1 %v5614_v17  ;;  %5618 = vmax.xlane.f32.xlu0 %v5617_v44  ;;  %v5588_v37 = vpop.f32.mrf.mxu1  ;;  %v6035_v17 = vcombine.low %v5759_v33, %v5823_v30  ;;  %v5974_v44 = vrot.slane %v5967_v31, %v8565_v34 }
 0xef0   : > { %v9275_v18 = vadd.f32 %v5599_v5, %v8756_v57  ;;  %v5601_v7 = vmul.f32 0.35355338, %v5588_v37  ;;  %v5620_v26 = vsel %vm2309_vm4, %v9268_v29, -inf  ;;  %v5966_v5 = vrot.slane %v5959_v43, %v8565_v34 }
 0xef1   : > { %v5544_v19 = vpop.f32.mrf.mxu0  ;;  %v7764_v10 = vpop.f32.mrf.mxu1 }
 0xef2   : > { %v9278_v20 = vadd.f32 %v5601_v7, %v8756_v57  ;;  %v5600_v24 = vmul.f32 0.35355338, %v5544_v19  ;;  %v5623_v25 = vsel %vm2309_vm4, %v9275_v18, -inf  ;;  %v6034_v10 = vrot.slane %v6027_v32, %v8565_v34 }
 0xef3   : > { %v7759_v39 = vpop.f32.mrf.mxu0  ;;  %5624 = vmax.xlane.f32.xlu0 %v5623_v25  ;;  %5621 = vmax.xlane.f32.xlu1 %v5620_v26  ;;  %v5591_v36 = vpop.f32.mrf.mxu1  ;;  %v5992_v25 = vcombine.high %v5966_v5, %v5974_v44 }
 0xef4   : > { %v9285_v38 = vadd.f32 %v5600_v24, %v8756_v57  ;;  %v5602_v15 = vmul.f32 0.35355338, %v5591_v36  ;;  %v5629_v22 = vsel %vm2309_vm4, %v9278_v20, -inf  ;;  %v6042_v24 = vrot.slane %v6035_v17, %v8565_v34 }
 0xef5   : > { %v7765_v8 = vpop.f32.mrf.mxu1 }
 0xef6   : > { %v9288_v40 = vadd.f32 %v5602_v15, %v8756_v57  ;;  %v5626_v45 = vsel %vm2309_vm4, %v9285_v38, -inf  ;;  %v4660_v57 = vrot.slane %v4646_v35, %v8568_v41  ;;  %v5855_v35 = vpop.trf.xlu1  ;;  %v5991_v8 = vcombine.low %v5966_v5, %v5974_v44 }
 0xef7   : > { %5627 = vmax.xlane.f32.xlu1 %v5626_v45  ;;  %5630 = vmax.xlane.f32.xlu0 %v5629_v22  ;;  %v6059_v46 = vcombine.low %v6034_v10, %v6042_v24 }
 0xef8   : > { %v5632_v9 = vsel %vm2309_vm4, %v9288_v40, -inf  ;;  %v4679_v47 = vpack.c.bf16 %v4660_v57, %v4660_v57  ;;  %v4664_v49 = vcombine.high %v4660_v57, %v8243_v0  ;;  %v6006_v57 = vrot.slane %v5992_v25, %v8568_v41 }
 0xef9   : > { %v6067_v33 = vrot.slane %v6059_v46, %v8568_v41 }
 0xefa   : > { %v4680_v21 = vpack.c.bf16 %v4664_v49, %v4664_v49  ;;  %v5887_v62 = vpop.trf.xlu1 }
 0xefb   : > { %5633 = vmax.xlane.f32.xlu1 %v5632_v9 }
 0xf24   : > { %5895 = vxpose.xlu0.c.b16.start.end [1/1] (short) (narrow) %v4677_v27, 16  ;;  %v6060_v27 = vcombine.high %v6034_v10, %v6042_v24 }
 0xf26   : > { %v6074_v42 = vrot.slane %v6060_v27, %v8568_v41 }
 0xf28   : > { %5927 = vxpose.xlu0.c.b16.start.end [1/1] (short) (narrow) %v4679_v47, 16  ;;  %5911 = vxpose.xlu1.c.b16.start.end [1/1] (short) (narrow) %v4678_v48, 16 }
 0xf2c   : > { %5943 = vxpose.xlu1.c.b16.start.end [1/1] (short) (narrow) %v4680_v21, 16  ;;  %v5999_v21 = vrot.slane %v5991_v8, %v8568_v41 }
 0xf74   : > { %v5613_v55 = vpop.xlane.xlu0 %5612 }
 0xf78   : > { %v9306_v56 = vpop.xlane.xlu1 %5615  ;;  %v9308_v59 = vpop.xlane.xlu0 %5618 }
 0xf79   : > { %v5636_v43 = vsub.f32 %v9265_v16, %v9306_v56 }
 0xf7b   : > { %v5645_v16 = vmul.f32 1.442695, %v5636_v43 }
 0xf7c   : > { %v9310_v61 = vpop.xlane.xlu0 %5624  ;;  %v9312_v63 = vpop.xlane.xlu1 %5621 }
 0xf7d   : > { %v5638_v10 = vsub.f32 %v9268_v29, %v9312_v63 }
 0xf80   : > { %v9314_v14 = vpop.xlane.xlu1 %5627  ;;  %v9316_v60 = vpop.xlane.xlu0 %5630 }
 0xf81   : > { %v5640_v8 = vsub.f32 %v9285_v38, %v9314_v14 }
 0xf84   : > { %v9318_v11 = vpop.xlane.xlu1 %5633 }
 0xf86   : > { %v5903_v1 = vpop.trf.xlu0 }
 0xf87   : > { %v5975_v6 = vcombine.low %v5839_v23, %v5903_v1  ;;  %v5635_v23 = vsub.f32 %v9257_v58, %v5613_v55  ;;  %v5637_v58 = vsub.f32 %v9260_v2, %v9308_v59 }
 0xf89   : > { %v5982_v26 = vrot.slane %v5975_v6, %v8565_v34  ;;  %v5643_v17 = vmul.f32 1.442695, %v5635_v23 }
 0xf8a   : > { %v5935_v37 = vpop.trf.xlu0  ;;  %v5919_v7 = vpop.trf.xlu1 }
 0xf8b   : > { %v5983_v19 = vcombine.low %v5871_v54, %v5935_v37  ;;  %v6043_v36 = vcombine.low %v5855_v35, %v5919_v7  ;;  %8011 = vpow2.f32 %v5643_v17 }
 0xf8c   : > { %8013 = vpow2.f32 %v5645_v16 }
 0xf8d   : > { %v5990_v39 = vrot.slane %v5983_v19, %v8565_v34  ;;  %v6050_v48 = vrot.slane %v6043_v36, %v8565_v34  ;;  %v5639_v36 = vsub.f32 %v9275_v18, %v9310_v61  ;;  %v5653_v18 = vmul.f32 1.442695, %v5640_v8 }
 0xf8e   : > { %v5951_v15 = vpop.trf.xlu1  ;;  %v5642_v61 = vsub.f32 %v9288_v40, %v9318_v11 }
 0xf8f   : > { %v6007_v45 = vcombine.low %v5982_v26, %v5990_v39  ;;  %v6008_v22 = vcombine.high %v5982_v26, %v5990_v39  ;;  %v6051_v9 = vcombine.low %v5887_v62, %v5951_v15  ;;  %v5647_v39 = vmul.f32 1.442695, %v5637_v58 }
 0xf90   : > { %v5649_v15 = vmul.f32 1.442695, %v5638_v10  ;;  %v5651_v63 = vmul.f32 1.442695, %v5639_v36  ;;  %v5657_v38 = vmul.f32 1.442695, %v5642_v61 }
 0xf91   : > { %v6015_v12 = vrot.slane %v6007_v45, %v8568_v41  ;;  %v6022_v47 = vrot.slane %v6008_v22, %v8568_v41  ;;  %v6058_v49 = vrot.slane %v6051_v9, %v8565_v34  ;;  %8015 = vpow2.f32 %v5647_v39 }
 0xf92   : > { %v5641_v22 = vsub.f32 %v9278_v20, %v9316_v60  ;;  %8017 = vpow2.f32 %v5649_v15 }
 0xf93   : > { %v9332_v13 = vcombine.high %v6006_v57, %v6022_v47  ;;  %v6075_v50 = vcombine.low %v6050_v48, %v6058_v49  ;;  %v6076_v53 = vcombine.high %v6050_v48, %v6058_v49  ;;  %v6023_v30 = vcombine.low %v5999_v21, %v6015_v12 }
 0xf94   : > { %v6024_v5 = vcombine.high %v5999_v21, %v6015_v12  ;;  %v6025_v26 = vcombine.low %v6006_v57, %v6022_v47  ;;  %8019 = vpow2.f32 %v5651_v63  ;;  %v5655_v46 = vmul.f32 1.442695, %v5641_v22 }
 0xf95   : > { %v6083_v52 = vrot.slane %v6075_v50, %v8568_v41  ;;  %v6090_v51 = vrot.slane %v6076_v53, %v8568_v41  ;;  %v6099_v1 = vshrl.u32 %v6023_v30, 16  ;;  %v6123_v6 = vshrl.u32 %v9332_v13, 16 }
 0xf96   : > { %v6107_v25 = vshrl.u32 %v6024_v5, 16  ;;  %v6115_v29 = vshrl.u32 %v6025_v26, 16  ;;  %8021 = vpow2.f32 %v5653_v18 }
 0xf97   : > { %v9339_v35 = vcombine.high %v6074_v42, %v6090_v51  ;;  %v6091_v54 = vcombine.low %v6067_v33, %v6083_v52  ;;  %v6092_v62 = vcombine.high %v6067_v33, %v6083_v52  ;;  %v6093_v19 = vcombine.low %v6074_v42, %v6090_v51 }
 0xf98   : > { %v8012_v14 = vpop.eup %8011  ;;  %8023 = vpow2.f32 %v5655_v46 }
 0xf99   : > { %v6097_v31 = vpack.i.b16 %v6091_v54, %v6023_v30  ;;  %v6100_v32 = vshrl.u32 %v6091_v54, 16  ;;  %v6121_v44 = vpack.i.b16 %v9339_v35, %v9332_v13  ;;  %v6124_v37 = vshrl.u32 %v9339_v35, 16  ;;  %v8014_v27 = vpop.eup %8013 }
 0xf9a   : > { %v6108_v7 = vshrl.u32 %v6092_v62, 16  ;;  %v6105_v24 = vpack.i.b16 %v6092_v62, %v6024_v5  ;;  %v6116_v59 = vshrl.u32 %v6093_v19, 16  ;;  %v6113_v45 = vpack.i.b16 %v6093_v19, %v6025_v26 }
 0xf9b   : > { %6127 = vxpose.xlu0.c.b16.start.end [1/1] (short) (narrow) %v6097_v31, 16  ;;  %v6101_v55 = vpack.i.b16 %v6100_v32, %v6099_v1  ;;  %v6125_v56 = vpack.i.b16 %v6124_v37, %v6123_v6  ;;  %8025 = vpow2.f32 %v5657_v38  ;;  %v5659_v57 = vsel %vm2309_vm4, %v8012_v14, 0.0 }
 0xf9c   : > { %v6109_v2 = vpack.i.b16 %v6108_v7, %v6107_v25  ;;  %v6117_v9 = vpack.i.b16 %v6116_v59, %v6115_v29  ;;  %v5662_v20 = vsel %vm2309_vm4, %v8014_v27, 0.0 }
 0xf9d   : > { %6143 = vxpose.xlu1.c.b16.start.end [1/1] (short) (narrow) %v6101_v55, 16 }
 0xf9e   : > { %v8016_v12 = vpop.eup %8015 }
 0xf9f   : > { %6159 = vxpose.xlu0.c.b16.start.end [1/1] (short) (narrow) %v6105_v24, 16  ;;  %v8018_v60 = vpop.eup %8017  ;;  %v5665_v47 = vsel %vm2309_vm4, %v8016_v12, 0.0 }
 0xfa0   : > { %v5668_v11 = vsel %vm2309_vm4, %v8018_v60, 0.0 }
 0xfa1   : > { %6175 = vxpose.xlu1.c.b16.start.end [1/1] (short) (narrow) %v6109_v2, 16  ;;  %v9362_v40 = vpop.eup %8019 }
 0xfa2   : > { %v5671_v49 = vsel %vm2309_vm4, %v9362_v40, 0.0 }
 0xfa3   : > { %6191 = vxpose.xlu0.c.b16.start.end [1/1] (short) (narrow) %v6113_v45, 16  ;;  %v9365_v48 = vpop.eup %8021 }
 0xfa4   : > { %v5674_v50 = vsel %vm2309_vm4, %v9365_v48, 0.0 }
 0xfa5   : > { %6207 = vxpose.xlu1.c.b16.start.end [1/1] (short) (narrow) %v6117_v9, 16  ;;  %v9369_v21 = vpop.eup %8023 }
 0xfa6   : > { %v5677_v33 = vsel %vm2309_vm4, %v9369_v21, 0.0 }
 0xfa8   : > { %v9373_v53 = vpop.eup %8025 }
 0xfa9   : > { %v5680_v42 = vsel %vm2309_vm4, %v9373_v53, 0.0 }
 0xfb0   : > { %5660 = vadd.xlane.f32.xlu0 %v5659_v57 }
 0xfb2   : > { %5663 = vadd.xlane.f32.xlu1 %v5662_v20 }
 0xfb4   : > { %5666 = vadd.xlane.f32.xlu0 %v5665_v47 }
 0xfb6   : > { %5669 = vadd.xlane.f32.xlu1 %v5668_v11 }
 0xfb8   : > { %5672 = vadd.xlane.f32.xlu0 %v5671_v49 }
 0xfba   : > { %5675 = vadd.xlane.f32.xlu1 %v5674_v50 }
 0xfbc   : > { %5678 = vadd.xlane.f32.xlu0 %v5677_v33 }
 0xfbe   : > { %5681 = vadd.xlane.f32.xlu1 %v5680_v42 }
 0xfe9   : > { %6223 = vxpose.xlu0.c.b16.start.end [1/1] (short) (narrow) %v6121_v44, 16 }
 0xfeb   : > { %6239 = vxpose.xlu1.c.b16.start.end [1/1] (short) (narrow) %v6125_v56, 16 }
 0xffd   : > { %v6135_v52 = vpop.trf.xlu0 }
 0xfff   : > { %v6151_v51 = vpop.trf.xlu1 }
0x1001   : > { %v6167_v30 = vpop.trf.xlu0 }
0x1003   : > { %v6183_v23 = vpop.trf.xlu1 }
0x1005   : > { %v6199_v54 = vpop.trf.xlu0 }
0x1006   : > { %v6255_v37 = vcombine.low %v6135_v52, %v6199_v54 }
0x1007   : > { %v6215_v62 = vpop.trf.xlu1 }
0x1008   : > { %v6280_v16 = vcombine.low %v6151_v51, %v6215_v62  ;;  %v6262_v25 = vrot.slane %v6255_v37, %v8565_v34 }
0x100a   : > { %v6287_v45 = vrot.slane %v6280_v16, %v8565_v34 }
0x1039   : > { %v5661_v43 = vpop.xlane.xlu0 %5660 }
0x103a   : > { %8027 = vrcp.f32 %v5661_v43 }
0x103b   : > { %v5664_v31 = vpop.xlane.xlu1 %5663 }
0x103c   : > { %8029 = vrcp.f32 %v5664_v31 }
0x103d   : > { %v5667_v1 = vpop.xlane.xlu0 %5666 }
0x103e   : > { %8031 = vrcp.f32 %v5667_v1 }
0x103f   : > { %v5670_v32 = vpop.xlane.xlu1 %5669 }
0x1040   : > { %8033 = vrcp.f32 %v5670_v32 }
0x1041   : > { %v5673_v5 = vpop.xlane.xlu0 %5672 }
0x1042   : > { %8035 = vrcp.f32 %v5673_v5 }
0x1043   : > { %v5676_v17 = vpop.xlane.xlu1 %5675 }
0x1044   : > { %8037 = vrcp.f32 %v5676_v17 }
0x1045   : > { %v5679_v13 = vpop.xlane.xlu0 %5678 }
0x1046   : > { %8039 = vrcp.f32 %v5679_v13 }
0x1047   : > { %v8028_v35 = vpop.eup %8027  ;;  %v5682_v44 = vpop.xlane.xlu1 %5681 }
0x1048   : > { %8041 = vrcp.f32 %v5682_v44  ;;  %v5691_v58 = vmul.f32 %v8028_v35, %v8012_v14 }
0x1049   : > { %v8030_v6 = vpop.eup %8029 }
0x104a   : > { %v5692_v55 = vmul.f32 %v8030_v6, %v8014_v27 }
0x104b   : > { %v8032_v7 = vpop.eup %8031  ;;  %v6231_v19 = vpop.trf.xlu0 }
0x104c   : > { %v6263_v56 = vcombine.low %v6167_v30, %v6231_v19  ;;  %v5699_v10 = vpack.c.bf16 %v5692_v55, %v5691_v58  ;;  %v5693_v39 = vmul.f32 %v8032_v7, %v8016_v12 }
0x104d   : > { %v8034_v24 = vpop.eup %8033  ;;  %v6247_v26 = vpop.trf.xlu1 }
0x104e   : > { %v6270_v36 = vrot.slane %v6263_v56, %v8565_v34  ;;  %v6288_v2 = vcombine.low %v6183_v23, %v6247_v26  ;;  %v6321_v59 = vsel %vm2309_vm4, %v5699_v10, 0  ;;  %v5694_v15 = vmul.f32 %v8034_v24, %v8018_v60 }
0x104f   : > { %v8036_v8 = vpop.eup %8035  ;;  %7767 = vmatpush3.bf16.xpose.msra.mxu0 %v6321_v59 }
0x1050   : > { %v6271_v29 = vcombine.low %v6262_v25, %v6270_v36  ;;  %v6295_v63 = vrot.slane %v6288_v2, %v8565_v34  ;;  %v5700_v22 = vpack.c.bf16 %v5694_v15, %v5693_v39  ;;  %7778 = vmatprep.subr.bf16.mxu0 %v8243_v0  ;;  %v5695_v18 = vmul.f32 %v8036_v8, %v9362_v40 }
0x1051   : > { %v8038_v9 = vpop.eup %8037 }
0x1052   : > { %v6278_v61 = vrot.slane %v6271_v29, %v8568_v41  ;;  %v6296_v46 = vcombine.low %v6287_v45, %v6295_v63  ;;  %v6367_v38 = vsel %vm2309_vm4, %v5700_v22, 0  ;;  %v5696_v14 = vmul.f32 %v8038_v9, %v9365_v48 }
0x1053   : > { %7773 = vmatpush3.bf16.xpose.msra.mxu1 %v6367_v38  ;;  %v8040_v27 = vpop.eup %8039 }
0x1054   : > { %v6303_v57 = vrot.slane %v6296_v46, %v8568_v41  ;;  %v5701_v12 = vpack.c.bf16 %v5696_v14, %v5695_v18  ;;  %7784 = vmatprep.subr.bf16.mxu1 %v8243_v0  ;;  %v6308_v60 = vshrl.u32 %v6278_v61, 16  ;;  %v5697_v49 = vmul.f32 %v8040_v27, %v9369_v21 }
0x1055   : > { %v8042_v20 = vpop.eup %8041  ;;  %v6279_v52 = vcombine.high %v6278_v61, %v8250_v28 }
0x1056   : > { %v6307_v47 = vpack.i.b16 %v6303_v57, %v6278_v61  ;;  %v6309_v11 = vshrl.u32 %v6303_v57, 16  ;;  %v6413_v40 = vsel %vm2309_vm4, %v5701_v12, 0  ;;  %v5698_v50 = vmul.f32 %v8042_v20, %v9373_v53 }
0x1057   : > { %v6304_v33 = vcombine.high %v6303_v57, %v8250_v28  ;;  %v6314_v30 = vshrl.u32 %v6279_v52, 16 }
0x1058   : > { %7769 = vmatmul.mubr.msk.bf16.vlgmr.msra.gmra.mxu0 %vm2309_vm4, %v6307_v47  ;;  %v6310_v48 = vpack.i.b16 %v6309_v11, %v6308_v60  ;;  %v5702_v42 = vpack.c.bf16 %v5698_v50, %v5697_v49 }
0x1059   : > { %7779 = vmatpush3.bf16.xpose.msra.mxu0 %v6413_v40  ;;  %7780 = vmatprep.mubr.msk.bf16.mxu0 %vm8244_vm0, %v8243_v0  ;;  %v6315_v53 = vshrl.u32 %v6304_v33, 16  ;;  %v6313_v51 = vpack.i.b16 %v6304_v33, %v6279_v52 }
0x105a   : > { %7775 = vmatmul.mubr.msk.bf16.vlgmr.msra.gmra.mxu1 %vm2309_vm4, %v6310_v48  ;;  %7790 = vmatprep.subr.bf16.mxu0 %v8243_v0  ;;  %v6459_v21 = vsel %vm2309_vm4, %v5702_v42, 0 }
0x105b   : > { %7786 = vmatprep.mubr.msk.bf16.mxu1 %vm8244_vm0, %v8243_v0  ;;  %7785 = vmatpush3.bf16.xpose.msra.mxu1 %v6459_v21  ;;  %v6316_v23 = vpack.i.b16 %v6315_v53, %v6314_v30 }
0x105c   : > { %7798 = vmatprep.subr.bf16.mxu1 %v8243_v0 }
0x1060   : > { %7781 = vmatmul.mubr.msk.bf16.vlgmr.msra.gmra.mxu0 %vm2309_vm4, %v6313_v51 }
0x1061   : > { %7794 = vmatprep.mubr.msk.bf16.mxu0 %vm8244_vm0, %v8243_v0 }
0x1062   : > { %7787 = vmatmul.mubr.msk.bf16.vlgmr.msra.gmra.mxu1 %vm2309_vm4, %v6316_v23 }
0x1063   : > { %7802 = vmatprep.mubr.msk.bf16.mxu1 %vm8244_vm0, %v8243_v0 }
0x1118   : > { %v6357_v28 = vpop.f32.mrf.mxu0 }
0x1119   : > { %6501 = vxpose.xlu0.b32.start.end [1/1] (short) (narrow) %v6357_v28, 16 }
0x111a   : > { %v7770_v54 = vpop.f32.mrf.mxu0  ;;  %v6403_v62 = vpop.f32.mrf.mxu1 }
0x111b   : > { %6533 = vxpose.xlu1.b32.start.end [1/1] (short) (narrow) %v6403_v62, 16 }
0x111c   : > { %v6360_v43 = vpop.f32.mrf.mxu0  ;;  %v7776_v31 = vpop.f32.mrf.mxu1 }
0x111e   : > { %v7771_v1 = vpop.f32.mrf.mxu0  ;;  %v6406_v32 = vpop.f32.mrf.mxu1 }
0x1120   : > { %v7777_v5 = vpop.f32.mrf.mxu1  ;;  %v6449_v17 = vpop.f32.mrf.mxu0 }
0x1121   : > { %6565 = vxpose.xlu0.b32.start.end [1/1] (short) (narrow) %v6449_v17, 16 }
0x1122   : > { %v7782_v13 = vpop.f32.mrf.mxu0  ;;  %v6495_v35 = vpop.f32.mrf.mxu1 }
0x1124   : > { %v6452_v44 = vpop.f32.mrf.mxu0  ;;  %v7788_v6 = vpop.f32.mrf.mxu1 }
0x1126   : > { %v7783_v37 = vpop.f32.mrf.mxu0  ;;  %6597 = vxpose.xlu0.b32.start.end [1/1] (short) (narrow) %v6495_v35, 16  ;;  %v6498_v58 = vpop.f32.mrf.mxu1 }
0x1128   : > { %v7789_v55 = vpop.f32.mrf.mxu1 }
0x1129   : > { %v7959_v55 = vld [vmem:[#allocation7 + $0x18] sm:$0xff]  }
0x112a   : > { %7791 = vmatpush3.bf16.msra.mxu0 %v7959_v55 }
0x112b   : > { %7792 = vmatprep.subr.bf16.mxu0 %v8243_v0 }
0x1195   : > { %v6517_v7 = vpop.trf.xlu0 }
0x1197   : > { %v6549_v10 = vpop.trf.xlu1 }
0x1199   : > { %v6518_v19 = vpop.trf.xlu0 }
0x119b   : > { %v6550_v45 = vpop.trf.xlu1 }
0x119d   : > { %v6581_v16 = vpop.trf.xlu0 }
0x119e   : > { %v6629_v24 = vcombine.low %v6517_v7, %v6581_v16  ;;  %v6630_v25 = vcombine.high %v6517_v7, %v6581_v16 }
0x11a0   : > { %v6637_v2 = vrot.slane %v6629_v24, %v8565_v34  ;;  %v6644_v59 = vrot.slane %v6630_v25, %v8565_v34 }
0x11a1   : > { %v6582_v56 = vpop.trf.xlu0 }
0x11a2   : > { %v6697_v29 = vcombine.low %v6518_v19, %v6582_v56  ;;  %v6698_v63 = vcombine.high %v6518_v19, %v6582_v56 }
0x11a4   : > { %v6705_v60 = vrot.slane %v6697_v29, %v8565_v34  ;;  %v6712_v47 = vrot.slane %v6698_v63, %v8565_v34 }
0x11a5   : > { %v6613_v26 = vpop.trf.xlu0 }
0x11a6   : > { %v6645_v39 = vcombine.low %v6549_v10, %v6613_v26  ;;  %v6646_v36 = vcombine.high %v6549_v10, %v6613_v26 }
0x11a8   : > { %v6653_v15 = vrot.slane %v6645_v39, %v8565_v34  ;;  %v6660_v8 = vrot.slane %v6646_v36, %v8565_v34 }
0x11a9   : > { %v6614_v22 = vpop.trf.xlu0 }
0x11aa   : > { %v6661_v9 = vcombine.low %v6637_v2, %v6653_v15  ;;  %v6662_v18 = vcombine.high %v6637_v2, %v6653_v15  ;;  %v6677_v61 = vcombine.low %v6644_v59, %v6660_v8  ;;  %v6678_v46 = vcombine.high %v6644_v59, %v6660_v8 }
0x11ab   : > { %v6713_v38 = vcombine.low %v6550_v45, %v6614_v22  ;;  %v6714_v14 = vcombine.high %v6550_v45, %v6614_v22  ;;  %v7960_v45 = vld [vmem:[#allocation7 + $0x10] sm:$0xff]  }
0x11ac   : > { %v6669_v27 = vrot.slane %v6661_v9, %v8568_v41  ;;  %v6676_v57 = vrot.slane %v6662_v18, %v8568_v41  ;;  %v6685_v12 = vrot.slane %v6677_v61, %v8568_v41  ;;  %v6692_v20 = vrot.slane %v6678_v46, %v8568_v41  ;;  %7793 = vmatpush3.bf16.msra.mxu0 %v7960_v45 }
0x11ad   : > { %v6721_v11 = vrot.slane %v6713_v38, %v8565_v34  ;;  %v6728_v40 = vrot.slane %v6714_v14, %v8565_v34  ;;  %7806 = vmatprep.subr.bf16.mxu0 %v8243_v0 }
0x11ae   : > { %v6765_v49 = vcombine.low %v6669_v27, %v6676_v57  ;;  %v7502_v50 = vcombine.high %v6669_v27, %v6676_v57  ;;  %v6781_v48 = vcombine.low %v6685_v12, %v6692_v20  ;;  %v7503_v33 = vcombine.high %v6685_v12, %v6692_v20 }
0x11af   : > { %v6729_v42 = vcombine.low %v6705_v60, %v6721_v11  ;;  %v6730_v52 = vcombine.high %v6705_v60, %v6721_v11  ;;  %v6745_v21 = vcombine.low %v6712_v47, %v6728_v40  ;;  %v6746_v53 = vcombine.high %v6712_v47, %v6728_v40 }
0x11b0   : > { %v6772_v51 = vrot.slane %v6765_v49, %v8565_v34  ;;  %v6780_v30 = vrot.slane %v7502_v50, %v8565_v34  ;;  %v6788_v23 = vrot.slane %v6781_v48, %v8565_v34  ;;  %v6796_v28 = vrot.slane %v7503_v33, %v8565_v34 }
0x11b1   : > { %v6737_v54 = vrot.slane %v6729_v42, %v8568_v41  ;;  %v6744_v62 = vrot.slane %v6730_v52, %v8568_v41  ;;  %v6753_v43 = vrot.slane %v6745_v21, %v8568_v41  ;;  %v6760_v31 = vrot.slane %v6746_v53, %v8568_v41 }
0x11b2   : > { %v6798_v1 = vcombine.high %v6772_v51, %v6780_v30  ;;  %v6814_v32 = vcombine.high %v6788_v23, %v6796_v28  ;;  %v6797_v5 = vcombine.low %v6772_v51, %v6780_v30  ;;  %v6813_v17 = vcombine.low %v6788_v23, %v6796_v28  ;;  %v7507_v51 = vld [vmem:[%s9571_s9 + $0x1] ss:$0 sm:$0xff] }
0x11b3   : > { %v6833_v13 = vcombine.low %v6737_v54, %v6744_v62  ;;  %v7504_v35 = vcombine.high %v6737_v54, %v6744_v62  ;;  %v6849_v44 = vcombine.low %v6753_v43, %v6760_v31  ;;  %v7505_v6 = vcombine.high %v6753_v43, %v6760_v31 }
0x11b4   : > { %v6805_v37 = vrot.slane %v6797_v5, %v8568_v41  ;;  %v6821_v58 = vrot.slane %v6813_v17, %v8568_v41  ;;  %v6812_v10 = vrot.slane %v6798_v1, %v8568_v41  ;;  %v6828_v24 = vrot.slane %v6814_v32, %v8568_v41 }
0x11b5   : > { %v6840_v7 = vrot.slane %v6833_v13, %v8565_v34  ;;  %v6848_v19 = vrot.slane %v7504_v35, %v8565_v34  ;;  %v6856_v16 = vrot.slane %v6849_v44, %v8565_v34  ;;  %v6864_v56 = vrot.slane %v7505_v6, %v8565_v34 }
0x11b6   : > { %v6829_v25 = vcombine.low %v6805_v37, %v6821_v58  ;;  %v6831_v29 = vcombine.low %v6812_v10, %v6828_v24  ;;  %v6830_v22 = vcombine.high %v6805_v37, %v6821_v58  ;;  %v6832_v14 = vcombine.high %v6812_v10, %v6828_v24 }
0x11b7   : > { %v6866_v26 = vcombine.high %v6840_v7, %v6848_v19  ;;  %v6882_v39 = vcombine.high %v6856_v16, %v6864_v56  ;;  %v6865_v36 = vcombine.low %v6840_v7, %v6848_v19  ;;  %v6881_v2 = vcombine.low %v6856_v16, %v6864_v56  ;;  %v7961_v19 = vld [vmem:[#allocation8 + $0x18] sm:$0xff]  }
0x11b8   : > { %7799 = vmatpush3.bf16.msra.mxu1 %v7961_v19 }
0x11b9   : > { %v6880_v59 = vrot.slane %v6866_v26, %v8568_v41  ;;  %v6896_v15 = vrot.slane %v6882_v39, %v8568_v41  ;;  %v6873_v8 = vrot.slane %v6865_v36, %v8568_v41  ;;  %v6889_v34 = vrot.slane %v6881_v2, %v8568_v41  ;;  %7800 = vmatprep.subr.bf16.mxu1 %v8243_v0  ;;  %v7513_v2 = vld [vmem:[%s9572_s10 + $0x1] ss:$0 sm:$0xff] }
0x11bb   : > { %v6899_v63 = vcombine.low %v6880_v59, %v6896_v15  ;;  %v6898_v9 = vcombine.high %v6873_v8, %v6889_v34  ;;  %v6897_v18 = vcombine.low %v6873_v8, %v6889_v34  ;;  %v6900_v38 = vcombine.high %v6880_v59, %v6896_v15  ;;  %v7514_v34 = vld [vmem:[%s9573_s11 + $0x1] ss:$0 sm:$0xff] }
0x11bd   : > { %v7929_v61 = vpack.i.bf16 %v6899_v63, %v6831_v29  ;;  %v7924_v46 = vpack.i.bf16 %v6898_v9, %v6830_v22  ;;  %v7934_v27 = vpack.i.bf16 %v6900_v38, %v6832_v14  ;;  %v7963_v9 = vld [vmem:[%s9576_s14 + $0x38] sm:$0xff]   ;;  %v7516_v38 = vld [vmem:[%s9575_s13 + $0x1] ss:$0 sm:$0xff] }
0x11bf   : > { %7930 = vrot.lane.b32.xlu0 %v7929_v61, %s8251_s26  ;;  %7925 = vrot.lane.b32.xlu1 %v7924_v46, %s8252_s27  ;;  %v7965_v61 = vld [vmem:[%s9576_s14 + $0x28] sm:$0xff]   ;;  %v7966_v46 = vld [vmem:[%s9576_s14 + $0x20] sm:$0xff]  }
0x11c3   : > { %7935 = vrot.lane.b32.xlu1 %v7934_v27, %s8253_s29  ;;  %s9629_s29 = sld [smem:[#allocation28_spill]] }
0x11c9   : > { %s9630_s22 = smov %s9629_s29  ;;  %s9515_s25 = scalar_lea.hbm %s9629_s29, %s7545_s19 }
0x1231   : > { %v7931_v41 = vpop.permute.xlu0 %7930  ;;  %v7926_v57 = vpop.permute.xlu1 %7925 }
0x1232   : > { %v7928_v12 = vunpack.i.h.bf16 %v7926_v57  ;;  %v7927_v20 = vunpack.i.l.bf16 %v7926_v57  ;;  %v7933_v60 = vunpack.i.h.bf16 %v7931_v41  ;;  %v7932_v47 = vunpack.i.l.bf16 %v7931_v41 }
0x1234   : > { %v6925_v11 = vsel %vm2097_vm3, %v6829_v25, %v7927_v20  ;;  %v6926_v40 = vsel %vm2097_vm3, %v6897_v18, %v7928_v12  ;;  %v7964_v18 = vld [vmem:[%s9576_s14 + $0x30] sm:$0xff]  }
0x1235   : > { %v7936_v49 = vpop.permute.xlu1 %7935  ;;  %v6927_v33 = vsel %vm2309_vm4, %v6925_v11, %v7932_v47  ;;  %v6928_v42 = vsel %vm2309_vm4, %v6926_v40, %v7933_v60 }
0x1236   : > { %v7938_v50 = vunpack.i.h.bf16 %v7936_v49  ;;  %v7937_v48 = vunpack.i.l.bf16 %v7936_v49 }
0x1238   : > { %v6929_v52 = vsel %vm3628_vm5, %v6927_v33, %v7937_v48  ;;  %v6930_v21 = vsel %vm3628_vm5, %v6928_v42, %v7938_v50 }
0x1239   : > { %v6931_v53 = vpack.c.bf16 %v6930_v21, %v6929_v52 }
0x123b   : > { %7795 = vmatmul.mubr.msk.bf16.vlgmr.msra.gmra.mxu0 %vm682_vm1, %v6931_v53 }
0x123c   : > { %7814 = vmatprep.mubr.msk.bf16.mxu0 %vm8244_vm0, %v8243_v0  ;;  %7807 = vmatpush3.bf16.msra.mxu0 %v7963_v9 }
0x123d   : > { %7808 = vmatprep.subr.bf16.mxu0 %v8243_v0 }
0x1240   : > { %7809 = vmatpush3.bf16.msra.mxu0 %v7964_v18 }
0x1241   : > { %7810 = vmatprep.subr.bf16.mxu0 %v8243_v0 }
0x1244   : > { %7811 = vmatpush3.bf16.msra.mxu0 %v7965_v61 }
0x1245   : > { %7812 = vmatprep.subr.bf16.mxu0 %v8243_v0 }
0x1248   : > { %7813 = vmatpush3.bf16.msra.mxu0 %v7966_v46 }
0x12fb   : > { %v6994_v30 = vpop.f32.mrf.mxu0 }
0x12fc   : > { %v6995_v23 = vadd.f32 %v7507_v51, %v6994_v30 }
0x12fd   : > { %v7796_v28 = vpop.f32.mrf.mxu0 }
0x12fe   : > { %v7001_v54 = vadd.f32 %v6995_v23, %v9024_v3 }
0x12ff   : > { %v6997_v62 = vpop.f32.mrf.mxu0 }
0x1300   : > { %v6998_v43 = vadd.f32 %v7507_v51, %v6997_v62  ;;  %v7007_v31 = vsel %vm682_vm1, %v7001_v54, 0.0 }
0x1301   : > { %7008 = vadd.xlane.f32.xlu1 %v7007_v31  ;;  %v7797_v1 = vpop.f32.mrf.mxu0 }
0x1302   : > { %v7002_v32 = vadd.f32 %v6998_v43, %v9026_v4  ;;  %v7962_v4 = vld [vmem:[#allocation8 + $0x10] sm:$0xff]   ;;  %v7529_v43 = vld [vmem:[%s9577_s15 + $0x1] ss:$0 sm:$0xff] }
0x1303   : > { %7801 = vmatpush3.bf16.msra.mxu1 %v7962_v4 }
0x1304   : > { %v7010_v5 = vsel %vm682_vm1, %v7002_v32, 0.0 }
0x1305   : > { %7011 = vadd.xlane.f32.xlu0 %v7010_v5 }
0x138a   : > { %v7009_v17 = vpop.xlane.xlu1 %7008 }
0x138b   : > { %v7013_v13 = vmul.f32 0.03125, %v7009_v17 }
0x138d   : > { %v7015_v35 = vsub.f32 %v7001_v54, %v7013_v13 }
0x138e   : > { %v7012_v44 = vpop.xlane.xlu0 %7011 }
0x138f   : > { %v7014_v6 = vmul.f32 0.03125, %v7012_v44  ;;  %v7017_v37 = vmul.f32 %v7015_v35, %v7015_v35 }
0x1391   : > { %v7016_v58 = vsub.f32 %v7002_v32, %v7014_v6  ;;  %v7019_v3 = vsel %vm682_vm1, %v7017_v37, 0.0 }
0x1392   : > { %7020 = vadd.xlane.f32.xlu1 %v7019_v3 }
0x1393   : > { %v7018_v55 = vmul.f32 %v7016_v58, %v7016_v58 }
0x1395   : > { %v7022_v7 = vsel %vm682_vm1, %v7018_v55, 0.0 }
0x1396   : > { %7023 = vadd.xlane.f32.xlu1 %v7022_v7 }
0x141b   : > { %v7021_v16 = vpop.xlane.xlu1 %7020 }
0x141c   : > { %v7025_v56 = vmul.f32 0.03125, %v7021_v16 }
0x141e   : > { %v7027_v10 = vadd.f32 1e-12, %v7025_v56 }
0x141f   : > { %v7024_v24 = vpop.xlane.xlu1 %7023 }
0x1420   : > { %8043 = vrsqrt.f32 %v7027_v10  ;;  %v7026_v25 = vmul.f32 0.03125, %v7024_v24 }
0x1422   : > { %v7028_v26 = vadd.f32 1e-12, %v7026_v25 }
0x1424   : > { %8045 = vrsqrt.f32 %v7028_v26 }
0x142d   : > { %v8044_v39 = vpop.eup %8043 }
0x142e   : > { %v7031_v36 = vmul.f32 %v8044_v39, %v7015_v35 }
0x1430   : > { %v7039_v8 = vmul.f32 %v7513_v2, %v7031_v36 }
0x1431   : > { %v8046_v59 = vpop.eup %8045 }
0x1432   : > { %v7032_v15 = vmul.f32 %v8046_v59, %v7016_v58  ;;  %v7047_v29 = vadd.f32 %v7514_v34, %v7039_v8  ;;  %v7537_v8 = vld [vmem:[%s9578_s16 + $0x1] ss:$0 sm:$0xff] }
0x1434   : > { %v7040_v45 = vmul.f32 %v7513_v2, %v7032_v15 }
0x1436   : > { %v7048_v63 = vadd.f32 %v7514_v34, %v7040_v45  ;;  %v7538_v45 = vld [vmem:[%s9628_s17 + $0x1] ss:$0 sm:$0xff] }
0x1438   : > { %v7049_v22 = vpack.c.bf16 %v7048_v63, %v7047_v29 }
0x143a   : > { %7803 = vmatmul.mubr.msk.bf16.vlgmr.msra.gmra.mxu1 %vm682_vm1, %v7049_v22 }
0x14fa   : > { %v7112_v14 = vpop.f32.mrf.mxu1 }
0x14fb   : > { %v7113_v27 = vadd.f32 %v7516_v38, %v7112_v14 }
0x14fc   : > { %v7804_v41 = vpop.f32.mrf.mxu1 }
0x14fd   : > { %v7119_v57 = vmul.f32 %v7113_v27, %v7113_v27 }
0x14fe   : > { %v7115_v12 = vpop.f32.mrf.mxu1 }
0x14ff   : > { %v7121_v20 = vmul.f32 %v7119_v57, %v7113_v27  ;;  %v7116_v60 = vadd.f32 %v7516_v38, %v7115_v12 }
0x1500   : > { %v7805_v47 = vpop.f32.mrf.mxu1 }
0x1501   : > { %v7123_v11 = vmul.f32 0.044715, %v7121_v20  ;;  %v7120_v40 = vmul.f32 %v7116_v60, %v7116_v60 }
0x1503   : > { %v7125_v0 = vadd.f32 %v7123_v11, %v7113_v27  ;;  %v7122_v49 = vmul.f32 %v7120_v40, %v7116_v60 }
0x1505   : > { %v7127_v50 = vmul.f32 0.7978846, %v7125_v0  ;;  %v7124_v48 = vmul.f32 0.044715, %v7122_v49 }
0x1507   : > { %8047 = vtanh.f32 %v7127_v50  ;;  %v7126_v33 = vadd.f32 %v7124_v48, %v7116_v60 }
0x1509   : > { %v7128_v42 = vmul.f32 0.7978846, %v7126_v33 }
0x150b   : > { %8049 = vtanh.f32 %v7128_v42 }
0x1514   : > { %v8048_v52 = vpop.eup %8047 }
0x1515   : > { %v7131_v21 = vadd.f32 1.0, %v8048_v52 }
0x1517   : > { %v7133_v51 = vmul.f32 0.5, %v7131_v21 }
0x1518   : > { %v8050_v53 = vpop.eup %8049 }
0x1519   : > { %v7132_v30 = vadd.f32 1.0, %v8050_v53  ;;  %v7135_v28 = vmul.f32 %v7133_v51, %v7113_v27 }
0x151b   : > { %v7134_v23 = vmul.f32 0.5, %v7132_v30 }
0x151d   : > { %v7136_v54 = vmul.f32 %v7134_v23, %v7116_v60 }
0x151f   : > { %v7137_v62 = vpack.c.bf16 %v7136_v54, %v7135_v28 }
0x1521   : > { %7815 = vmatmul.mubr.msk.bf16.vlgmr.msra.gmra.mxu0 %vm3872_vm6, %v7137_v62 }
0x15e1   : > { %v7216_v31 = vpop.f32.mrf.mxu0 }
0x15e2   : > { %v7217_v1 = vadd.f32 %v7529_v43, %v7216_v31 }
0x15e3   : > { %v7816_v32 = vpop.f32.mrf.mxu0 }
0x15e4   : > { %v7223_v5 = vadd.f32 %v7217_v1, %v7047_v29 }
0x15e5   : > { %v7219_v17 = vpop.f32.mrf.mxu0 }
0x15e6   : > { %v7220_v13 = vadd.f32 %v7529_v43, %v7219_v17  ;;  %v7229_v35 = vsel %vm682_vm1, %v7223_v5, 0.0 }
0x15e7   : > { %7230 = vadd.xlane.f32.xlu0 %v7229_v35  ;;  %v7817_v44 = vpop.f32.mrf.mxu0 }
0x15e8   : > { %v7224_v6 = vadd.f32 %v7220_v13, %v7048_v63 }
0x15ea   : > { %v7232_v37 = vsel %vm682_vm1, %v7224_v6, 0.0 }
0x15eb   : > { %7233 = vadd.xlane.f32.xlu1 %v7232_v37 }
0x1670   : > { %v7231_v58 = vpop.xlane.xlu0 %7230 }
0x1671   : > { %v7235_v3 = vmul.f32 0.03125, %v7231_v58 }
0x1673   : > { %v7237_v55 = vsub.f32 %v7223_v5, %v7235_v3 }
0x1674   : > { %v7234_v7 = vpop.xlane.xlu1 %7233 }
0x1675   : > { %v7236_v19 = vmul.f32 0.03125, %v7234_v7  ;;  %v7239_v4 = vmul.f32 %v7237_v55, %v7237_v55 }
0x1677   : > { %v7238_v16 = vsub.f32 %v7224_v6, %v7236_v19  ;;  %v7241_v56 = vsel %vm682_vm1, %v7239_v4, 0.0 }
0x1678   : > { %7242 = vadd.xlane.f32.xlu0 %v7241_v56 }
0x1679   : > { %v7240_v10 = vmul.f32 %v7238_v16, %v7238_v16 }
0x167b   : > { %v7244_v24 = vsel %vm682_vm1, %v7240_v10, 0.0 }
0x167c   : > { %7245 = vadd.xlane.f32.xlu1 %v7244_v24 }
0x1701   : > { %v7243_v25 = vpop.xlane.xlu0 %7242 }
0x1702   : > { %v7247_v26 = vmul.f32 0.03125, %v7243_v25 }
0x1704   : > { %v7249_v39 = vadd.f32 1e-12, %v7247_v26 }
0x1705   : > { %v7246_v36 = vpop.xlane.xlu1 %7245 }
0x1706   : > { %8051 = vrsqrt.f32 %v7249_v39  ;;  %v7248_v2 = vmul.f32 0.03125, %v7246_v36 }
0x1708   : > { %v7250_v59 = vadd.f32 1e-12, %v7248_v2 }
0x170a   : > { %8053 = vrsqrt.f32 %v7250_v59 }
0x1713   : > { %v8052_v15 = vpop.eup %8051 }
0x1714   : > { %v7253_v34 = vmul.f32 %v8052_v15, %v7237_v55 }
0x1716   : > { %v7261_v29 = vmul.f32 %v7537_v8, %v7253_v34 }
0x1717   : > { %v8054_v63 = vpop.eup %8053 }
0x1718   : > { %v7269_v22 = vadd.f32 %v7538_v45, %v7261_v29  ;;  %v7254_v9 = vmul.f32 %v8054_v63, %v7238_v16 }
0x171a   : > { %v7262_v18 = vmul.f32 %v7537_v8, %v7254_v9  ;;  %7271 = vst.msk [vmem:[%s646_s1] sm:$0xff] %vm682_vm1, %v7269_v22 }
0x171c   : > { %v7270_v61 = vadd.f32 %v7538_v45, %v7262_v18 }
0x171e   : > { %7272 = vst.msk [vmem:[%s646_s1 + $0x8] sm:$0xff] %vm682_vm1, %v7270_v61 }
0x171f   : > { %8176 = shalt.err (!%p8173_p13)
}
0x1720   : > { %s8177_s19 = scalar_lea.hbm %s9515_s25, 256  ;;  %s8181_s26 = scalar_lea.hbm %s9630_s22, 512 }
0x1721   : > { %p8178_p1 = scmp.ne.s32.totalorder %s9515_s25, %s8177_s19  ;;  %p8182_p11 = scmp.lt.s32.totalorder %s9515_s25, %s9630_s22 }
0x1722   : > { %p8183_p2 = scmp.lt.s32.totalorder %s8181_s26, %s8177_s19 }
0x1723   : > { %p8179_p8 = pnand %p8178_p1, %p9631_p12 }
0x1724   : > { %p8184_p4 = por %p8183_p2, %p8182_p11 }
0x1725   : > { %p8180_p10 = pneg %p8179_p8 }
0x1727   : > { %p8185_p6 = pnand %p8184_p4, %p8180_p10 }
0x1729   : > { %8188 = shalt.err (!%p8185_p6)
}
0x172a   : > { %s8255_s0 = smov 128  }
0x172b   : > { %7832 = dma.vmem_to_hbm [thread:$0]  (%p9631_p12), %s9517_s21, 256, %s9515_s25, %s7274_s6, %s8255_s0, %s8255_s0, %s8252_s27  }
0x172c PF: > { %s9632_s30 = sld [smem:[#allocation15_spill]] }
0x172d   : > { %s9633_s23 = sld [smem:[#allocation18_spill]] }
0x172e   : > { %s9634_s1 = sld [smem:[#allocation17_spill]] }
0x1732   : > { %s7302_s2 = sand.u32 1, %s9632_s30  }
0x1733   : > { %p9635_p0 = scmp.ne.s32.totalorder %s9633_s23, 0  ;;  %s7303_s19 = scalar_lea.sflag [#allocation4], %s7302_s2 }
0x1734   : > { %p9636_p5 = scmp.ge.s32.totalorder %s9634_s1, 2 }
0x1736   : > { %p7849_p3 = pnand %p9636_p5, %p9635_p0 }
0x1738   : > { %p7850_p7 = pneg %p7849_p3 }
0x173a   : > { %8218 = dma.done.wait (%p7850_p7), %s7303_s19, 256  }
0x173b   : > { %8220 = vsyncadd (%p7850_p7), %s7303_s19, 4294967040  ;;  %s9637_s30 = sld [smem:[#allocation19_spill]]  ;;  %s9640_s27 = smov %s8227_s28 }
0x173c   : > { %s9638_s20 = sld [smem:[#allocation16_spill]] }
0x173d   : > { %s9639_s29 = sld [smem:[#allocation20_spill]] }
0x1741   : > { %p33_p9 = scmp.ge.s32.totalorder %s9637_s30, 4  }
0x1742   : > { %s9641_s28 = smov %s9638_s20 }
0x1743   :  { %35 = sbr.rel (!%p33_p9) target bundleno = 16 (0x10), region = 168 }
0x1748   :  { %7308 = vsyncpa [#allocation3], 1 }
0x1749   :  { %7310 = vsyncpa [#allocation3 + $0x1], 1 }
0x174a   :  { %7311 = vsyncpa [#allocation6], 1 }
0x174b   :  { %7312 = vsyncpa [#allocation9], 1 }
0x174c   :  { %7313 = vsyncpa [#allocation4], 1 }
0x174d   :  { %7315 = vsyncpa [#allocation4 + $0x1], 1 }

// kernel: tpu_custom_call.1
= control target key start
LH: loop header
LB: loop body
LE: loop exit
PB: predicated region body
PF: predicated region fallthrough
CT: control target
= control target key end

     0   :  { %s9562_s0 = inlined_call_operand.vmem [shape: f32[2,16,32], index: 0, kind: input, shape index: {}]   ;;  %s9563_s1 = inlined_call_operand.hbm [shape: f32[2,1,16], index: 1, kind: input, shape index: {}]   ;;  %s9564_s2 = inlined_call_operand.vmem [shape: bf16[2,32,32], index: 2, kind: input, shape index: {}]   ;;  %s9565_s3 = inlined_call_operand.vmem [shape: f32[2,1,32], index: 3, kind: input, shape index: {}]   ;;  %s9566_s4 = inlined_call_operand.vmem [shape: bf16[2,32,32], index: 4, kind: input, shape index: {}]   ;;  %s9567_s5 = inlined_call_operand.vmem [shape: f32[2,1,32], index: 5, kind: input, shape index: {}]   ;;  %s9568_s6 = inlined_call_operand.hbm [shape: bf16[2,32,32], index: 6, kind: input, shape index: {}]   ;;  %s9569_s7 = inlined_call_operand.vmem [shape: f32[2,1,32], index: 7, kind: input, shape index: {}]   ;;  %s9570_s8 = inlined_call_operand.hbm [shape: bf16[2,32,32], index: 8, kind: input, shape index: {}]   ;;  %s9571_s9 = inlined_call_operand.vmem [shape: f32[2,1,32], index: 9, kind: input, shape index: {}]   ;;  %s9572_s10 = inlined_call_operand.vmem [shape: f32[2,1,32], index: 10, kind: input, shape index: {}]   ;;  %s9573_s11 = inlined_call_operand.vmem [shape: f32[2,1,32], index: 11, kind: input, shape index: {}]   ;;  %s9574_s12 = inlined_call_operand.hbm [shape: bf16[2,32,64], index: 12, kind: input, shape index: {}]   ;;  %s9575_s13 = inlined_call_operand.vmem [shape: f32[2,1,64], index: 13, kind: input, shape index: {}]   ;;  %s9576_s14 = inlined_call_operand.vmem [shape: bf16[2,64,32], index: 14, kind: input, shape index: {}]   ;;  %s9577_s15 = inlined_call_operand.vmem [shape: f32[2,1,32], index: 15, kind: input, shape index: {}]   ;;  %s9578_s16 = inlined_call_operand.vmem [shape: f32[2,1,32], index: 16, kind: input, shape index: {}]   ;;  %s9579_s17 = inlined_call_operand.vmem [shape: f32[2,1,32], index: 17, kind: input, shape index: {}]   ;;  %s9580_s18 = inlined_call_operand.hbm [shape: f32[2,16,32], index: 18, kind: output, shape index: {}]  }
   0x1   :  { %9595 = sst [smem:[#allocation21_spill]] %s9562_s0 }
   0x2   :  { %9596 = sst [smem:[#allocation22_spill]] %s9563_s1 }
   0x3   :  { %9597 = sst [smem:[#allocation23_spill]] %s9564_s2 }
   0x4   :  { %9598 = sst [smem:[#allocation24_spill]] %s9568_s6 }
   0x5   :  { %9599 = sst [smem:[#allocation25_spill]] %s9570_s8 }
   0x6   :  { %9600 = sst [smem:[#allocation26_spill]] %s9574_s12 }
   0x7   :  { %9601 = sst [smem:[#allocation27_spill]] %s9579_s17 }
   0x8   :  { %9602 = sst [smem:[#allocation28_spill]] %s9580_s18 }
   0x9   :  { %23 = vsyncpa [#allocation3], 0 }
   0xa   :  { %25 = vsyncpa [#allocation3 + $0x1], 0 }
   0xb   :  { %26 = vsyncpa [#allocation6], 0 }
   0xc   :  { %27 = vsyncpa [#allocation9], 0 }
   0xd   :  { %28 = vsyncpa [#allocation4], 0 }
   0xe   :  { %30 = vsyncpa [#allocation4 + $0x1], 0  ;;  %s8351_s27 = smov 0   ;;  %s8353_s28 = smov 0  }
   0xf   :  { %s8355_s29 = smov 0   ;;  %s8357_s30 = smov 0  }
  0x10 LB: > { %9603 = sst [smem:[#allocation15_spill]] %s8223_s27  ;;  %s8372_s0 = sadd.s32 4294967295, %s8235_s30   ;;  %s8235_s30 = sphi %s8357_s30, %s9637_s30   ;;  %s8231_s29 = sphi %s8355_s29, %s9639_s29   ;;  %s8227_s28 = sphi %s8353_s28, %s9641_s28   ;;  %s8223_s27 = sphi %s8351_s27, %s9640_s27  }
  0x11   : > { %9604 = sst [smem:[#allocation16_spill]] %s8231_s29  ;;  %s7398_s19 = sadd.s32 4294967294, %s8235_s30  }
  0x12   : > { %9605 = sst [smem:[#allocation17_spill]] %s8235_s30  ;;  %p82_p0 = scmp.ne.s32.totalorder %s8227_s28, %s8223_s27 }
  0x13   : > { %p9586_p1 = scmp.eq.s32.totalorder %s8372_s0, 0  ;;  %p448_p3 = scmp.eq.s32.totalorder %s7398_s19, 1 }
  0x14   : > { %p7399_p5 = scmp.ge.s32.totalorder %s8235_s30, 1  ;;  %p455_p7 = scmp.lt.s32.totalorder %s8235_s30, 3 }
  0x15   : > { %p8381_p4 = por %p9586_p1, %p82_p0  ;;  %p8386_p6 = por %p448_p3, %p82_p0 }
  0x16   : > { %p8391_p8 = pnand %p7399_p5, %p455_p7  ;;  %s8237_s22 = smov [#allocation5]  }
  0x17   : > { %s9606_s1 = scalar_select %p8381_p4, 1, 0 }
  0x18   : > { %s9607_s20 = scalar_select %p8386_p6, 1, 0 }
  0x19   : > { %s9609_s21 = scalar_select %p8391_p8, 1, 0 }
  0x1a   : > { %9608 = sst [smem:[#allocation18_spill]] %s9607_s20  ;;  %s479_s2 = sshll.u32 %s8237_s22, 4  ;;  %s480_s2 = int_to_ptr.vmem [resolvable:$true] %s479_s2 }
  0x1b   : > { %p7834_p9 = pneg %p8391_p8  ;;  %s8238_s24 = smov [#allocation7]  }
  0x1c   : > { %s495_s25 = sshll.u32 %s8238_s24, 4  ;;  %s8239_s26 = smov [#allocation8]   ;;  %s496_s25 = int_to_ptr.vmem [resolvable:$true] %s495_s25 }
  0x1d   : > { %p8400_p11 = pnand %p7834_p9, %p9586_p1  ;;  %s517_s19 = sshll.u32 %s8239_s26, 4  ;;  %s518_s19 = int_to_ptr.vmem [resolvable:$true] %s517_s19 }
  0x1e   : > { %s8068_s20 = scalar_lea.vmem %s480_s2, 512  ;;  %p8076_p5 = scmp.lt.s32.totalorder %s480_s2, %s480_s2 }
  0x1f   : > { %p8059_p12 = pneg %p8400_p11  ;;  %p8069_p13 = scmp.ne.s32.totalorder %s480_s2, %s8068_s20 }
  0x20   : > { %p8077_p7 = scmp.lt.s32.totalorder %s8068_s20, %s8068_s20 }
  0x21   : > { %p8071_p0 = pnand %p8069_p13, %p8059_p12 }
  0x22   : > { %p8078_p9 = por %p8077_p7, %p8076_p5 }
  0x23   : > { %p8072_p3 = pneg %p8071_p0 }
  0x25   : > { %p8079_p10 = pnand %p8078_p9, %p8072_p3 }
  0x27   : > { %8082 = shalt.err (!%p8079_p10)
}
  0x28   : > { %s8240_s22 = smov 64   ;;  %s8241_s24 = smov 4  }
  0x29   : > { %s9611_s6 = sld [smem:[#allocation24_spill]]  ;;  %s8094_s18 = scalar_lea.vmem %s496_s25, 512 }
  0x2a   : > { %p8095_p1 = scmp.ne.s32.totalorder %s496_s25, %s8094_s18  ;;  %p8102_p2 = scmp.lt.s32.totalorder %s496_s25, %s496_s25 }
  0x2b   : > { %p8103_p6 = scmp.lt.s32.totalorder %s8094_s18, %s8094_s18 }
  0x2c   : > { %p8097_p13 = pnand %p8095_p1, %p8059_p12 }
  0x2d   : > { %p8104_p5 = por %p8103_p6, %p8102_p2 }
  0x2e   : > { %p8098_p0 = pneg %p8097_p13 }
  0x2f   : > { %7837 = dma.hbm_to_vmem [thread:$0]  (!%p8400_p11), %s9611_s6, 512, %s480_s2, [#allocation6], %s8240_s22, %s8240_s22, %s8241_s24  }
  0x30   : > { %p8105_p3 = pnand %p8104_p5, %p8098_p0 }
  0x32   : > { %8108 = shalt.err (!%p8105_p3)
}
  0x33   : > { %s9612_s8 = sld [smem:[#allocation25_spill]]  ;;  %s8120_s27 = scalar_lea.vmem %s518_s19, 512 }
  0x34   : > { %p8121_p10 = scmp.ne.s32.totalorder %s518_s19, %s8120_s27  ;;  %p8128_p9 = scmp.lt.s32.totalorder %s518_s19, %s518_s19 }
  0x35   : > { %p8129_p13 = scmp.lt.s32.totalorder %s8120_s27, %s8120_s27 }
  0x36   : > { %p8123_p7 = pnand %p8121_p10, %p8059_p12 }
  0x37   : > { %p8130_p4 = por %p8129_p13, %p8128_p9 }
  0x38   : > { %p8124_p1 = pneg %p8123_p7 }
  0x39   : > { %7840 = dma.hbm_to_vmem [thread:$0]  (!%p8400_p11), %s9612_s8, 512, %s496_s25, [#allocation6], %s8240_s22, %s8240_s22, %s8241_s24  }
  0x3a   : > { %p8131_p2 = pnand %p8130_p4, %p8124_p1 }
  0x3c   : > { %8134 = shalt.err (!%p8131_p2)
}
  0x3d   : > { %s9613_s12 = sld [smem:[#allocation26_spill]]  ;;  %s8431_s17 = sadd.s32 1, %s8235_s30  }
  0x3e   : > { %9614 = sst [smem:[#allocation19_spill]] %s8431_s17  ;;  %s66_s25 = ssub.s32 %s8235_s30, %s8431_s17 }
  0x3f   : > { %s69_s23 = sadd.s32 1, %s8231_s29  ;;  %p67_p4 = scmp.eq.s32.totalorder %s66_s25, 0 }
  0x40   : > { %p76_p6 = scmp.ne.s32.totalorder %s8231_s29, %s8227_s28  ;;  %p77_p12 = scmp.eq.s32.totalorder %s8235_s30, 0 }
  0x41   : > { %p7855_p0 = scmp.lt.s32.totalorder %s8235_s30, 2  ;;  %p9616_p3 = scmp.eq.s32.totalorder %s8372_s0, 1 }
  0x42   : > { %s8441_s26 = scalar_select %p67_p4, %s8231_s29, %s69_s23  }
  0x43   : > { %7843 = dma.hbm_to_vmem [thread:$0]  (!%p8400_p11), %s9613_s12, 512, %s518_s19, [#allocation9], %s8240_s22, %s8240_s22, %s8241_s24  }
  0x44   : > { %9615 = sst [smem:[#allocation20_spill]] %s8441_s26  ;;  %p78_p5 = por %p77_p12, %p76_p6 }
  0x45   : > { %p8445_p10 = por %p9616_p3, %p76_p6  ;;  %s554_s27 = sand.u32 1, %s8231_s29  }
  0x46   : > { %s7404_s18 = sshll.u32 %s8235_s30, 4  ;;  %s9618_s24 = sld [smem:[#allocation22_spill]] }
  0x47   : > { %s9617_s20 = scalar_select %p8445_p10, 1, 0 }
  0x48   : > { %s557_s25 = scalar_lea.vmem [#allocation2], %s554_s27  ;;  %p8456_p11 = pnand %p7855_p0, %p78_p5 }
  0x49   : > { %s564_s6 = sshll.u32 %s557_s25, 4  ;;  %s555_s8 = scalar_lea.sflag [#allocation3], %s554_s27  ;;  %s565_s6 = int_to_ptr.vmem [resolvable:$true] %s564_s6 }
  0x4a   : > { %p8137_p1 = pneg %p8456_p11 }
  0x4c   : > { %s8454_s2 = scalar_lea.hbm %s9618_s24, %s7404_s18  ;;  %s8140_s22 = scalar_lea.hbm %s9618_s24, 32 }
  0x4d   : > { %s8135_s12 = scalar_lea.hbm %s8454_s2, 16  ;;  %p8141_p2 = scmp.lt.s32.totalorder %s8454_s2, %s9618_s24 }
  0x4e   : > { %p8136_p7 = scmp.ne.s32.totalorder %s8454_s2, %s8135_s12  ;;  %p8142_p4 = scmp.lt.s32.totalorder %s8140_s22, %s8135_s12 }
  0x50   : > { %p8138_p9 = pnand %p8137_p1, %p8136_p7  ;;  %p8143_p6 = por %p8142_p4, %p8141_p2 }
  0x52   : > { %p8139_p13 = pneg %p8138_p9 }
  0x54   : > { %p8144_p12 = pnand %p8143_p6, %p8139_p13 }
  0x56   : > { %8147 = shalt.err (!%p8144_p12)
}
  0x57   : > { %s8148_s25 = scalar_lea.vmem %s565_s6, 16  ;;  %s8242_s27 = smov [#allocation2]  }
  0x58   : > { %p8149_p0 = scmp.ne.s32.totalorder %s565_s6, %s8148_s25  ;;  %s8153_s17 = sshll.u32 %s8242_s27, 4  ;;  %s8154_s17 = int_to_ptr.vmem [resolvable:$false] %s8153_s17 }
  0x59   : > { %s8155_s30 = scalar_lea.vmem %s8154_s17, 32  ;;  %p8156_p7 = scmp.lt.s32.totalorder %s565_s6, %s8154_s17 }
  0x5a   : > { %p8151_p5 = pnand %p8149_p0, %p8137_p1  ;;  %p8157_p9 = scmp.lt.s32.totalorder %s8155_s30, %s8148_s25 }
  0x5c   : > { %p8152_p3 = pneg %p8151_p5  ;;  %p8158_p10 = por %p8157_p9, %p8156_p7 }
  0x5e   : > { %p8159_p8 = pnand %p8158_p10, %p8152_p3 }
  0x60   : > { %8162 = shalt.err (!%p8159_p8)
}
  0x61   : > { %7847 = dma.hbm_to_vmem [thread:$0]  (!%p8456_p11), %s8454_s2, 16, %s565_s6, %s555_s8  }
  0x62   : > { %p9620_p13 = scmp.ne.s32.totalorder %s9609_s21, 0 }
  0x63   : > { %s8477_s12 = sand.u32 (!%p9620_p13), 1, %s8227_s28   ;;  %p9621_p1 = scmp.ne.s32.totalorder (!%p9620_p13), %s9606_s1, 0 }
  0x64   : > { %573 = sbr.rel (%p9620_p13) target bundleno = 5932 (0x172c), region = 92  ;;  %s576_s29 = scalar_lea.sflag (!%p9620_p13), [#allocation3], %s8477_s12 }
  0x65   : > { %s578_s26 = scalar_lea.vmem (!%p9620_p13), [#allocation2], %s8477_s12 }
  0x69   : > { %8206 = dma.done.wait (%p9621_p1), %s576_s29, 16  }
  0x6a   : > { %8208 = vsyncadd (%p9621_p1), %s576_s29, 4294967280  ;;  %p9622_p8 = scmp.eq.s32.totalorder %s8372_s0, 0 }
  0x6c   : > { %8210 = dma.done.wait (%p9622_p8), [#allocation6], 1024   ;;  %p9623_p10 = pmov %p9622_p8 }
  0x6d   : > { %p9624_p11 = pmov %p9622_p8 }
  0x6e   : > { %8212 = vsyncadd (%p9623_p10), [#allocation6], 4294966272 }
  0x6f   : > { %8214 = dma.done.wait (%p9624_p11), [#allocation9], 512   ;;  %p9625_p2 = pmov %p9622_p8 }
  0x70   : > { %p647_p4 = scmp.lt.s32.totalorder %s8372_s0, 1  ;;  %v8243_v0 = vmov 0.0   ;;  %vm8244_vm0 = vmmov 0   ;;  %s9626_s21 = sld [smem:[#allocation21_spill]]  ;;  %vm682_vm1 = vcmask 261120   ;;  %v7941_v5 = vld [vmem:[%s9566_s4 + $0x8] sm:$0xff]   ;;  %v880_v26 = vlaneseq }
  0x71   : > { %8216 = vsyncadd (%p9625_p2), [#allocation9], 4294966784  ;;  %7618 = vmatprep.subr.bf16.mxu1 %v8243_v0  ;;  %7622 = vmatprep.mubr.msk.bf16.mxu1 %vm8244_vm0, %v8243_v0  ;;  %s9627_s18 = sld [smem:[#allocation23_spill]]  ;;  %v7942_v7 = vld [vmem:[%s9566_s4] sm:$0xff]   ;;  %v7943_v8 = vld [vmem:[#allocation5 + $0x8] sm:$0xff]   ;;  %s8245_s1 = smov 112  }
  0x72   : > { %s648_s6 = scalar_select %p647_p4, %s8372_s0, 1  ;;  %7634 = vmatprep.subr.bf16.mxu0 %v8243_v0  ;;  %7638 = vmatprep.mubr.msk.bf16.mxu0 %vm8244_vm0, %v8243_v0  ;;  %v7944_v9 = vld [vmem:[#allocation5] sm:$0xff]   ;;  %v7417_v14 = vld [vmem:[%s9567_s5] ss:$0 sm:$0xff]  ;;  %v8248_v24 = vmov 1983009808  }
  0x73   : > { %7635 = vmatpush3.bf16.msra.mxu0 %v7943_v8  ;;  %s8247_s2 = smov 104   ;;  %v7413_v21 = vld [vmem:[%s9565_s3] ss:$0 sm:$0xff]  ;;  %v878_v25 = vunpack.c.l.s4 %v8248_v24  ;;  %v8249_v27 = vmov 1934713408   ;;  %v8562_v30 = vshrl.u32 %v880_v26, 7 }
  0x74   : > { %s7544_s8 = sshll.u32 %s648_s6, 4  ;;  %7636 = vmatprep.subr.bf16.mxu0 %v8243_v0  ;;  %v910_v28 = vunpack.c.l.s4 %v8249_v27  ;;  %vm2101_vm2 = vcmask 1043456   ;;  %vm2097_vm3 = vcmask 64512   ;;  %vm2309_vm4 = vcmask 130048   ;;  %s8252_s27 = smov 8  }
  0x75   : > { %v879_v29 = vunpack.c.0.s8 %v878_v25  ;;  %s8253_s29 = smov 24   ;;  %vm3628_vm5 = vcmask 195584   ;;  %vm3872_vm6 = vcmask 523264   ;;  %s7545_s19 = sshll.u32 %s8372_s0, 8 }
  0x76   : > { %s8504_s17 = scalar_lea.vmem %s9626_s21, %s7544_s8  ;;  %s8246_s21 = smov 120   ;;  %v911_v33 = vunpack.c.0.s8 %v910_v28 }
  0x77   : > { %v7939_v1 = vld [vmem:[%s9627_s18 + $0x8] sm:$0xff]   ;;  %v7940_v2 = vld [vmem:[%s9627_s18] sm:$0xff]   ;;  %7637 = vmatpush3.bf16.msra.mxu0 %v7944_v9  ;;  %v8565_v34 = vsub.s32 %v879_v29, %v8562_v30  ;;  %s7409_s8 = sshll.u32 %s8477_s12, 4  ;;  %s7274_s6 = scalar_lea.sflag [#allocation4], %s8477_s12 }
  0x78   : > { %7619 = vmatpush3.bf16.msra.mxu1 %v7939_v1  ;;  %v653_v3 = vld [vmem:[%s8504_s17] sm:$0xff]  ;;  %v654_v4 = vld [vmem:[%s8504_s17 + $0x8] sm:$0xff]  ;;  %7648 = vmatprep.subr.bf16.mxu0 %v8243_v0  ;;  %v8568_v41 = vsub.s32 %v911_v33, %v8562_v30  ;;  %p9631_p12 = scmp.ne.s32.totalorder %s9617_s20, 0 }
  0x79   : > { %7620 = vmatprep.subr.bf16.mxu1 %v8243_v0  ;;  %v658_v6 = vpack.c.bf16 %v654_v4, %v653_v3 }
  0x7b   : > { %7639 = vmatmul.mubr.msk.bf16.vlgmr.msra.gmra.mxu0 %vm682_vm1, %v658_v6 }
  0x7c   : > { %7621 = vmatpush3.bf16.msra.mxu1 %v7940_v2  ;;  %7650 = vmatprep.mubr.msk.bf16.mxu0 %vm8244_vm0, %v8243_v0 }
  0x7d   : > { %7626 = vmatprep.subr.bf16.mxu1 %v8243_v0 }
  0x7f   : > { %7623 = vmatmul.mubr.msk.bf16.vlgmr.msra.gmra.mxu1 %vm682_vm1, %v658_v6 }
  0x80   : > { %7627 = vmatpush3.bf16.msra.mxu1 %v7941_v5  ;;  %7630 = vmatprep.mubr.msk.bf16.mxu1 %vm8244_vm0, %v8243_v0 }
  0x81   : > { %7628 = vmatprep.subr.bf16.mxu1 %v8243_v0 }
  0x84   : > { %7629 = vmatpush3.bf16.msra.mxu1 %v7942_v7 }
  0x85   : > { %7642 = vmatprep.subr.bf16.mxu1 %v8243_v0 }
  0x87   : > { %7631 = vmatmul.mubr.msk.bf16.vlgmr.msra.gmra.mxu1 %vm682_vm1, %v658_v6 }
  0x88   : > { %7644 = vmatprep.mubr.msk.bf16.mxu1 %vm8244_vm0, %v8243_v0 }
 0x13f   : > { %v720_v10 = vpop.f32.mrf.mxu1 }
 0x140   : > { %v8552_v22 = vadd.f32 %v7413_v21, %v720_v10 }
 0x141   : > { %v7624_v11 = vpop.f32.mrf.mxu1 }
 0x143   : > { %v723_v12 = vpop.f32.mrf.mxu1 }
 0x144   : > { %v8554_v23 = vadd.f32 %v7413_v21, %v723_v12 }
 0x145   : > { %v7625_v13 = vpop.f32.mrf.mxu1 }
 0x147   : > { %v784_v15 = vpop.f32.mrf.mxu1 }
 0x148   : > { %v785_v16 = vadd.f32 %v7417_v14, %v784_v15 }
 0x149   : > { %v7632_v17 = vpop.f32.mrf.mxu1 }
 0x14a   : > { %1035 = vrot.lane.b32.xlu1 %v785_v16, %s8245_s1  ;;  %1029 = vrot.lane.b32.xlu0 %v785_v16, %s8246_s21 }
 0x14b   : > { %v787_v18 = vpop.f32.mrf.mxu1 }
 0x14c   : > { %v8540_v19 = vadd.f32 %v7417_v14, %v787_v18 }
 0x14d   : > { %v7633_v20 = vpop.f32.mrf.mxu1 }
 0x14e   : > { %1041 = vrot.lane.b32.xlu0 %v785_v16, %s8247_s2  ;;  %1037 = vrot.lane.b32.xlu1 %v8540_v19, %s8245_s1 }
 0x152   : > { %1043 = vrot.lane.b32.xlu1 %v8540_v19, %s8247_s2  ;;  %1031 = vrot.lane.b32.xlu0 %v8540_v19, %s8246_s21 }
 0x156   : > { %857 = vrot.lane.b32.xlu1 %v8552_v22, %s8246_s21  ;;  %859 = vrot.lane.b32.xlu0 %v8554_v23, %s8246_s21 }
 0x15a   : > { %863 = vrot.lane.b32.xlu1 %v8552_v22, %s8245_s1 }
 0x1bc   : > { %v1036_v31 = vpop.permute.xlu1 %1035  ;;  %v1030_v32 = vpop.permute.xlu0 %1029 }
 0x1bd   : > { %v1047_v35 = vcombine.low %v785_v16, %v1036_v31  ;;  %v1048_v36 = vcombine.high %v785_v16, %v1036_v31 }
 0x1bf   : > { %v1055_v42 = vrot.slane %v1047_v35, %v8565_v34  ;;  %v1062_v43 = vrot.slane %v1048_v36, %v8565_v34 }
 0x1c0   : > { %v1042_v37 = vpop.permute.xlu0 %1041  ;;  %v1038_v38 = vpop.permute.xlu1 %1037 }
 0x1c1   : > { %v1063_v39 = vcombine.low %v1030_v32, %v1042_v37  ;;  %v1064_v40 = vcombine.high %v1030_v32, %v1042_v37  ;;  %v1115_v53 = vcombine.low %v8540_v19, %v1038_v38  ;;  %v1116_v5 = vcombine.high %v8540_v19, %v1038_v38  ;;  %v8600_v37 = vpop.f32.mrf.mxu0 }
 0x1c3   : > { %v1071_v44 = vrot.slane %v1063_v39, %v8565_v34  ;;  %v1078_v45 = vrot.slane %v1064_v40, %v8565_v34  ;;  %v1123_v61 = vrot.slane %v1115_v53, %v8565_v34  ;;  %v1130_v12 = vrot.slane %v1116_v5, %v8565_v34  ;;  %v7640_v38 = vpop.f32.mrf.mxu0 }
 0x1c4   : > { %v1044_v46 = vpop.permute.xlu1 %1043  ;;  %v1032_v47 = vpop.permute.xlu0 %1031 }
 0x1c5   : > { %v1131_v48 = vcombine.low %v1032_v47, %v1044_v46  ;;  %v1095_v49 = vcombine.low %v1062_v43, %v1078_v45  ;;  %v1079_v50 = vcombine.low %v1055_v42, %v1071_v44  ;;  %v1096_v51 = vcombine.high %v1062_v43, %v1078_v45  ;;  %v8604_v39 = vpop.f32.mrf.mxu0 }
 0x1c6   : > { %v1080_v52 = vcombine.high %v1055_v42, %v1071_v44  ;;  %v1132_v62 = vcombine.high %v1032_v47, %v1044_v46 }
 0x1c7   : > { %v1103_v54 = vrot.slane %v1095_v49, %v8568_v41  ;;  %v1087_v55 = vrot.slane %v1079_v50, %v8568_v41  ;;  %v1139_v56 = vrot.slane %v1131_v48, %v8565_v34  ;;  %v1110_v59 = vrot.slane %v1096_v51, %v8568_v41  ;;  %v7641_v40 = vpop.f32.mrf.mxu0 }
 0x1c8   : > { %v1094_v60 = vrot.slane %v1080_v52, %v8568_v41  ;;  %v1146_v6 = vrot.slane %v1132_v62, %v8565_v34  ;;  %v8606_v42 = vpop.permute.xlu1 %857  ;;  %v8608_v43 = vpop.permute.xlu0 %859 }
 0x1c9   : > { %v1187_v57 = vpack.c.bf16 %v1103_v54, %v1103_v54  ;;  %v1183_v58 = vpack.c.bf16 %v1087_v55, %v1087_v55  ;;  %v1111_v63 = vcombine.high %v1087_v55, %v8243_v0  ;;  %v1189_v1 = vpack.c.bf16 %v1110_v59, %v1110_v59 }
 0x1ca   : > { %v1185_v2 = vpack.c.bf16 %v1094_v60, %v1094_v60  ;;  %v1112_v3 = vcombine.high %v1094_v60, %v8243_v0  ;;  %v1147_v4 = vcombine.low %v1123_v61, %v1139_v56  ;;  %v1113_v7 = vcombine.high %v1103_v54, %v8243_v0 }
 0x1cb   : > { %1547 = vxpose.xlu1.c.b16.start.end [1/1] (short) (narrow) %v1187_v57, 16  ;;  %1483 = vxpose.xlu0.c.b16.start.end [1/1] (short) (narrow) %v1183_v58, 16  ;;  %v1184_v8 = vpack.c.bf16 %v1111_v63, %v1111_v63  ;;  %v1148_v11 = vcombine.high %v1123_v61, %v1139_v56  ;;  %v1114_v13 = vcombine.high %v1110_v59, %v8243_v0 }
 0x1cc   : > { %v1186_v9 = vpack.c.bf16 %v1112_v3, %v1112_v3  ;;  %v1155_v10 = vrot.slane %v1147_v4, %v8568_v41  ;;  %v1188_v14 = vpack.c.bf16 %v1113_v7, %v1113_v7  ;;  %v1163_v17 = vcombine.low %v1130_v12, %v1146_v6  ;;  %v8610_v44 = vpop.permute.xlu1 %863 }
 0x1cd   : > { %v1162_v16 = vrot.slane %v1148_v11, %v8568_v41  ;;  %v1190_v18 = vpack.c.bf16 %v1114_v13, %v1114_v13  ;;  %v1164_v24 = vcombine.high %v1130_v12, %v1146_v6 }
 0x1ce   : > { %v1191_v15 = vpack.c.bf16 %v1155_v10, %v1155_v10  ;;  %v1171_v20 = vrot.slane %v1163_v17, %v8568_v41  ;;  %v1179_v21 = vcombine.high %v1155_v10, %v8243_v0 }
 0x1cf   : > { %1579 = vxpose.xlu1.c.b16.start.end [1/1] (short) (narrow) %v1189_v1, 16  ;;  %1515 = vxpose.xlu0.c.b16.start.end [1/1] (short) (narrow) %v1185_v2, 16  ;;  %v1193_v19 = vpack.c.bf16 %v1162_v16, %v1162_v16  ;;  %v1178_v27 = vrot.slane %v1164_v24, %v8568_v41  ;;  %v1180_v28 = vcombine.high %v1162_v16, %v8243_v0 }
 0x1d0   : > { %v1195_v25 = vpack.c.bf16 %v1171_v20, %v1171_v20  ;;  %v1192_v26 = vpack.c.bf16 %v1179_v21, %v1179_v21  ;;  %v1181_v32 = vcombine.high %v1171_v20, %v8243_v0 }
 0x1d1   : > { %v1197_v29 = vpack.c.bf16 %v1178_v27, %v1178_v27  ;;  %v1194_v31 = vpack.c.bf16 %v1180_v28, %v1180_v28  ;;  %v1182_v35 = vcombine.high %v1178_v27, %v8243_v0 }
 0x1d2   : > { %v1196_v33 = vpack.c.bf16 %v1181_v32, %v1181_v32 }
 0x1d3   : > { %1499 = vxpose.xlu1.c.b16.start.end [1/1] (short) (narrow) %v1184_v8, 16  ;;  %1531 = vxpose.xlu0.c.b16.start.end [1/1] (short) (narrow) %v1186_v9, 16  ;;  %v1198_v36 = vpack.c.bf16 %v1182_v35, %v1182_v35 }
 0x1d7   : > { %1563 = vxpose.xlu0.c.b16.start.end [1/1] (short) (narrow) %v1188_v14, 16  ;;  %1611 = vxpose.xlu1.c.b16.start.end [1/1] (short) (narrow) %v1191_v15, 16 }
 0x1db   : > { %1595 = vxpose.xlu0.c.b16.start.end [1/1] (short) (narrow) %v1190_v18, 16  ;;  %1643 = vxpose.xlu1.c.b16.start.end [1/1] (short) (narrow) %v1193_v19, 16 }
 0x1df   : > { %1675 = vxpose.xlu1.c.b16.start.end [1/1] (short) (narrow) %v1195_v25, 16  ;;  %1627 = vxpose.xlu0.c.b16.start.end [1/1] (short) (narrow) %v1192_v26, 16 }
 0x1e3   : > { %1707 = vxpose.xlu1.c.b16.start.end [1/1] (short) (narrow) %v1197_v29, 16  ;;  %1659 = vxpose.xlu0.c.b16.start.end [1/1] (short) (narrow) %v1194_v31, 16 }
 0x1e7   : > { %865 = vrot.lane.b32.xlu1 %v8554_v23, %s8245_s1  ;;  %1691 = vxpose.xlu0.c.b16.start.end [1/1] (short) (narrow) %v1196_v33, 16 }
 0x1eb   : > { %871 = vrot.lane.b32.xlu1 %v8554_v23, %s8247_s2  ;;  %1723 = vxpose.xlu0.c.b16.start.end [1/1] (short) (narrow) %v1198_v36, 16 }
 0x1f4   : > { %869 = vrot.lane.b32.xlu0 %v8552_v22, %s8247_s2 }
 0x22d   : > { %v1555_v45 = vpop.trf.xlu1  ;;  %v1491_v46 = vpop.trf.xlu0 }
 0x22e   : > { %v1739_v63 = vcombine.low %v1491_v46, %v1555_v45 }
 0x230   : > { %v1746_v8 = vrot.slane %v1739_v63, %v8565_v34 }
 0x231   : > { %v1587_v47 = vpop.trf.xlu1  ;;  %v1523_v48 = vpop.trf.xlu0 }
 0x232   : > { %v1747_v60 = vcombine.low %v1523_v48, %v1587_v47 }
 0x234   : > { %v1754_v4 = vrot.slane %v1747_v60, %v8565_v34 }
 0x235   : > { %v1507_v49 = vpop.trf.xlu1  ;;  %v1539_v50 = vpop.trf.xlu0 }
 0x236   : > { %v1771_v14 = vcombine.low %v1746_v8, %v1754_v4  ;;  %v1772_v15 = vcombine.high %v1746_v8, %v1754_v4 }
 0x238   : > { %v1779_v26 = vrot.slane %v1771_v14, %v8568_v41  ;;  %v1786_v27 = vrot.slane %v1772_v15, %v8568_v41 }
 0x239   : > { %v1619_v51 = vpop.trf.xlu1  ;;  %v1571_v52 = vpop.trf.xlu0 }
 0x23a   : > { %v1807_v2 = vcombine.low %v1507_v49, %v1571_v52 }
 0x23c   : > { %v1814_v10 = vrot.slane %v1807_v2, %v8565_v34 }
 0x23d   : > { %v1651_v53 = vpop.trf.xlu1  ;;  %v1603_v54 = vpop.trf.xlu0 }
 0x23e   : > { %v1815_v61 = vcombine.low %v1539_v50, %v1603_v54 }
 0x240   : > { %v1822_v5 = vrot.slane %v1815_v61, %v8565_v34 }
 0x241   : > { %v1683_v55 = vpop.trf.xlu1  ;;  %v1635_v56 = vpop.trf.xlu0 }
 0x242   : > { %v1755_v62 = vcombine.low %v1619_v51, %v1683_v55  ;;  %v1839_v16 = vcombine.low %v1814_v10, %v1822_v5  ;;  %v1840_v17 = vcombine.high %v1814_v10, %v1822_v5  ;;  %v876_v10 = vcombine.high %v8552_v22, %v8610_v44 }
 0x244   : > { %v1762_v6 = vrot.slane %v1755_v62, %v8565_v34  ;;  %v1847_v28 = vrot.slane %v1839_v16, %v8568_v41  ;;  %v1854_v29 = vrot.slane %v1840_v17, %v8568_v41  ;;  %v890_v16 = vrot.slane %v876_v10, %v8565_v34 }
 0x245   : > { %v1715_v57 = vpop.trf.xlu1  ;;  %v1667_v58 = vpop.trf.xlu0 }
 0x246   : > { %v1763_v59 = vcombine.low %v1651_v53, %v1715_v57 }
 0x248   : > { %v1770_v3 = vrot.slane %v1763_v59, %v8565_v34 }
 0x249   : > { %v1699_v1 = vpop.trf.xlu0 }
 0x24a   : > { %v1823_v7 = vcombine.low %v1635_v56, %v1699_v1  ;;  %v1787_v11 = vcombine.low %v1762_v6, %v1770_v3  ;;  %v1788_v12 = vcombine.high %v1762_v6, %v1770_v3  ;;  %v7421_v56 = vld [vmem:[%s9569_s7] ss:$0 sm:$0xff] }
 0x24b   : > { %v8632_v60 = vadd.f32 %v7421_v56, %v8600_v37  ;;  %v8639_v3 = vadd.f32 %v7421_v56, %v8604_v39 }
 0x24c   : > { %v1830_v18 = vrot.slane %v1823_v7, %v8565_v34  ;;  %v1795_v20 = vrot.slane %v1787_v11, %v8568_v41  ;;  %v1802_v21 = vrot.slane %v1788_v12, %v8568_v41 }
 0x24d   : > { %v1731_v9 = vpop.trf.xlu0 }
 0x24e   : > { %v1831_v13 = vcombine.low %v1667_v58, %v1731_v9  ;;  %v1805_v33 = vcombine.low %v1786_v27, %v1802_v21  ;;  %v1803_v36 = vcombine.low %v1779_v26, %v1795_v20  ;;  %v1804_v49 = vcombine.high %v1779_v26, %v1795_v20 }
 0x24f   : > { %v1806_v54 = vcombine.high %v1786_v27, %v1802_v21  ;;  %v875_v9 = vcombine.low %v8552_v22, %v8610_v44 }
 0x250   : > { %v1838_v19 = vrot.slane %v1831_v13, %v8565_v34  ;;  %v1879_v48 = vshrl.u32 %v1803_v36, 16  ;;  %v1887_v55 = vshrl.u32 %v1804_v49, 16  ;;  %v1895_v61 = vshrl.u32 %v1805_v33, 16 }
 0x251   : > { %v1903_v1 = vshrl.u32 %v1806_v54, 16 }
 0x252   : > { %v1855_v24 = vcombine.low %v1830_v18, %v1838_v19  ;;  %v1856_v25 = vcombine.high %v1830_v18, %v1838_v19 }
 0x254   : > { %v1863_v31 = vrot.slane %v1855_v24, %v8568_v41  ;;  %v1870_v32 = vrot.slane %v1856_v25, %v8568_v41 }
 0x256   : > { %v1873_v35 = vcombine.low %v1854_v29, %v1870_v32  ;;  %v1871_v38 = vcombine.low %v1847_v28, %v1863_v31  ;;  %v1872_v47 = vcombine.high %v1847_v28, %v1863_v31  ;;  %v1874_v52 = vcombine.high %v1854_v29, %v1870_v32 }
 0x258   : > { %v1893_v40 = vpack.i.b16 %v1873_v35, %v1805_v33  ;;  %v1877_v45 = vpack.i.b16 %v1871_v38, %v1803_v36  ;;  %v1880_v46 = vshrl.u32 %v1871_v38, 16  ;;  %v1885_v51 = vpack.i.b16 %v1872_v47, %v1804_v49 }
 0x259   : > { %v1888_v53 = vshrl.u32 %v1872_v47, 16  ;;  %v1901_v57 = vpack.i.b16 %v1874_v52, %v1806_v54  ;;  %v1896_v59 = vshrl.u32 %v1873_v35, 16  ;;  %v1904_v63 = vshrl.u32 %v1874_v52, 16  ;;  %v866_v37 = vpop.permute.xlu1 %865 }
 0x25a   : > { %1971 = vxpose.xlu1.c.b16.start.end [1/1] (short) (narrow) %v1893_v40, 16  ;;  %1907 = vxpose.xlu0.c.b16.start.end [1/1] (short) (narrow) %v1877_v45, 16  ;;  %v1881_v50 = vpack.i.b16 %v1880_v46, %v1879_v48  ;;  %v943_v11 = vcombine.low %v8554_v23, %v866_v37  ;;  %v944_v12 = vcombine.high %v8554_v23, %v866_v37 }
 0x25b   : > { %v1889_v58 = vpack.i.b16 %v1888_v53, %v1887_v55  ;;  %v1897_v62 = vpack.i.b16 %v1896_v59, %v1895_v61  ;;  %v1905_v2 = vpack.i.b16 %v1904_v63, %v1903_v1 }
 0x25c   : > { %v951_v17 = vrot.slane %v943_v11, %v8565_v34  ;;  %v958_v22 = vrot.slane %v944_v12, %v8565_v34 }
 0x25d   : > { %v872_v5 = vpop.permute.xlu1 %871 }
 0x25e   : > { %1923 = vxpose.xlu1.c.b16.start.end [1/1] (short) (narrow) %v1881_v50, 16  ;;  %1939 = vxpose.xlu0.c.b16.start.end [1/1] (short) (narrow) %v1885_v51, 16  ;;  %v959_v7 = vcombine.low %v8608_v43, %v872_v5  ;;  %v960_v8 = vcombine.high %v8608_v43, %v872_v5  ;;  %v883_v43 = vrot.slane %v875_v9, %v8565_v34 }
 0x260   : > { %v974_v15 = vrot.slane %v960_v8, %v8565_v34 }
 0x262   : > { %2003 = vxpose.xlu1.c.b16.start.end [1/1] (short) (narrow) %v1901_v57, 16  ;;  %1955 = vxpose.xlu0.c.b16.start.end [1/1] (short) (narrow) %v1889_v58, 16  ;;  %v991_v24 = vcombine.low %v958_v22, %v974_v15  ;;  %v992_v25 = vcombine.high %v958_v22, %v974_v15 }
 0x264   : > { %v999_v33 = vrot.slane %v991_v24, %v8568_v41  ;;  %v1006_v35 = vrot.slane %v992_v25, %v8568_v41 }
 0x266   : > { %1201 = vrot.lane.b32.xlu1 %v8632_v60, %s8246_s21  ;;  %1987 = vxpose.xlu0.c.b16.start.end [1/1] (short) (narrow) %v1897_v62, 16  ;;  %v870_v4 = vpop.permute.xlu0 %869  ;;  %v1009_v50 = vcombine.high %v999_v33, %v8243_v0  ;;  %v1010_v51 = vcombine.high %v1006_v35, %v8243_v0 }
 0x267   : > { %v891_v6 = vcombine.low %v8606_v42, %v870_v4  ;;  %v892_v39 = vcombine.high %v8606_v42, %v870_v4  ;;  %v967_v42 = vrot.slane %v959_v7, %v8565_v34 }
 0x269   : > { %v899_v13 = vrot.slane %v891_v6, %v8565_v34  ;;  %v906_v14 = vrot.slane %v892_v39, %v8565_v34  ;;  %v975_v20 = vcombine.low %v951_v17, %v967_v42  ;;  %v976_v21 = vcombine.high %v951_v17, %v967_v42 }
 0x26a   : > { %1207 = vrot.lane.b32.xlu1 %v8632_v60, %s8245_s1  ;;  %2019 = vxpose.xlu0.c.b16.start.end [1/1] (short) (narrow) %v1905_v2, 16 }
 0x26b   : > { %v907_v44 = vcombine.low %v883_v43, %v899_v13  ;;  %v908_v18 = vcombine.high %v883_v43, %v899_v13  ;;  %v923_v19 = vcombine.low %v890_v16, %v906_v14  ;;  %v924_v23 = vcombine.high %v890_v16, %v906_v14 }
 0x26c   : > { %v983_v31 = vrot.slane %v975_v20, %v8568_v41  ;;  %v990_v32 = vrot.slane %v976_v21, %v8568_v41 }
 0x26d   : > { %v915_v26 = vrot.slane %v907_v44, %v8568_v41  ;;  %v922_v27 = vrot.slane %v908_v18, %v8568_v41  ;;  %v931_v28 = vrot.slane %v923_v19, %v8568_v41  ;;  %v938_v29 = vrot.slane %v924_v23, %v8568_v41 }
 0x26e   : > { %1209 = vrot.lane.b32.xlu1 %v8639_v3, %s8245_s1  ;;  %v1007_v48 = vcombine.high %v983_v31, %v8243_v0  ;;  %v1008_v49 = vcombine.high %v990_v32, %v8243_v0  ;;  %v7427_v2 = vpack.c.bf16 %v999_v33, %v983_v31  ;;  %v7428_v37 = vpack.c.bf16 %v1006_v35, %v990_v32 }
 0x26f   : > { %v939_v40 = vcombine.high %v915_v26, %v8243_v0  ;;  %v940_v45 = vcombine.high %v922_v27, %v8243_v0  ;;  %v941_v46 = vcombine.high %v931_v28, %v8243_v0  ;;  %v942_v47 = vcombine.high %v938_v29, %v8243_v0 }
 0x270   : > { %v7431_v56 = vpack.c.bf16 %v1009_v50, %v1007_v48  ;;  %v7432_v57 = vpack.c.bf16 %v1010_v51, %v1008_v49  ;;  %v7425_v59 = vpack.c.bf16 %v931_v28, %v915_v26  ;;  %v7426_v61 = vpack.c.bf16 %v938_v29, %v922_v27 }
 0x271   : > { %v7429_v54 = vpack.c.bf16 %v941_v46, %v939_v40  ;;  %v7430_v55 = vpack.c.bf16 %v942_v47, %v940_v45  ;;  %v1394_v12 = vrot.slane %v7427_v2, %v8565_v34  ;;  %v1402_v13 = vrot.slane %v7428_v37, %v8565_v34 }
 0x272   : > { %1215 = vrot.lane.b32.xlu1 %v8639_v3, %s8247_s2  ;;  %v1444_v39 = vrot.slane %v7431_v56, %v8565_v34  ;;  %v1452_v7 = vrot.slane %v7432_v57, %v8565_v34  ;;  %v1378_v8 = vrot.slane %v7425_v59, %v8565_v34  ;;  %v1386_v9 = vrot.slane %v7426_v61, %v8565_v34 }
 0x273   : > { %1203 = vrot.lane.b32.xlu0 %v8639_v3, %s8246_s21  ;;  %v1428_v4 = vrot.slane %v7429_v54, %v8565_v34  ;;  %v1436_v5 = vrot.slane %v7430_v55, %v8565_v34  ;;  %v1411_v44 = vcombine.low %v1394_v12, %v1402_v13  ;;  %v8250_v28 = vmov 0  }
 0x274   : > { %v1461_v43 = vcombine.low %v1444_v39, %v1452_v7  ;;  %v1403_v16 = vcombine.low %v1378_v8, %v1386_v9 }
 0x275   : > { %v1453_v14 = vcombine.low %v1428_v4, %v1436_v5  ;;  %v1418_v26 = vrot.slane %v1411_v44, %v8568_v41 }
 0x276   : > { %v1410_v21 = vrot.slane %v1403_v16, %v8568_v41  ;;  %v1468_v24 = vrot.slane %v1461_v43, %v8568_v41 }
 0x277   : > { %1213 = vrot.lane.b32.xlu0 %v8632_v60, %s8247_s2  ;;  %v1460_v19 = vrot.slane %v1453_v14, %v8568_v41 }
 0x278   : > { %v1419_v32 = vcombine.low %v1410_v21, %v1418_v26  ;;  %v1420_v59 = vcombine.high %v1410_v21, %v1418_v26 }
 0x279   : > { %v1469_v27 = vcombine.low %v1460_v19, %v1468_v24  ;;  %v1470_v57 = vcombine.high %v1460_v19, %v1468_v24 }
 0x27b   : > { %v1475_v40 = vshrl.u32 %v1469_v27, 16  ;;  %v1473_v51 = vpack.i.b16 %v1469_v27, %v1419_v32  ;;  %v1481_v61 = vshrl.u32 %v1470_v57, 16 }
 0x2bc   : > { %v1979_v36 = vpop.trf.xlu1  ;;  %v1915_v38 = vpop.trf.xlu0 }
 0x2bd   : > { %v2035_v62 = vcombine.low %v1915_v38, %v1979_v36 }
 0x2bf   : > { %v2042_v10 = vrot.slane %v2035_v62, %v8565_v34 }
 0x2c0   : > { %v1931_v52 = vpop.trf.xlu1  ;;  %v1947_v53 = vpop.trf.xlu0 }
 0x2c4   : > { %v2011_v58 = vpop.trf.xlu1  ;;  %v1963_v1 = vpop.trf.xlu0 }
 0x2c5   : > { %v2043_v63 = vcombine.low %v1947_v53, %v2011_v58 }
 0x2c7   : > { %v2050_v6 = vrot.slane %v2043_v63, %v8565_v34  ;;  %v1479_v63 = vpack.i.b16 %v1470_v57, %v1420_v59 }
 0x2c8   : > { %v1995_v11 = vpop.trf.xlu0 }
 0x2c9   : > { %v2051_v42 = vcombine.low %v2042_v10, %v2050_v6  ;;  %v2060_v15 = vcombine.low %v1931_v52, %v1995_v11  ;;  %v1474_v52 = vshrl.u32 %v1419_v32, 16 }
 0x2cb   : > { %v2058_v18 = vrot.slane %v2051_v42, %v8568_v41  ;;  %v2067_v23 = vrot.slane %v2060_v15, %v8565_v34  ;;  %v1476_v56 = vpack.i.b16 %v1475_v40, %v1474_v52 }
 0x2cc   : > { %v2027_v17 = vpop.trf.xlu0 }
 0x2cd   : > { %v2068_v22 = vcombine.low %v1963_v1, %v2027_v17  ;;  %v2059_v29 = vcombine.high %v2058_v18, %v8250_v28  ;;  %v2088_v35 = vshrl.u32 %v2058_v18, 16  ;;  %v1480_v1 = vshrl.u32 %v1420_v59, 16 }
 0x2cf   : > { %v2075_v20 = vrot.slane %v2068_v22, %v8565_v34  ;;  %v2094_v45 = vshrl.u32 %v2059_v29, 16  ;;  %v1482_v2 = vpack.i.b16 %v1481_v61, %v1480_v1 }
 0x2d1   : > { %v2076_v25 = vcombine.low %v2067_v23, %v2075_v20 }
 0x2d3   : > { %v2083_v31 = vrot.slane %v2076_v25, %v8568_v41 }
 0x2d5   : > { %v2087_v33 = vpack.i.b16 %v2083_v31, %v2058_v18  ;;  %v2089_v36 = vshrl.u32 %v2083_v31, 16  ;;  %v2084_v38 = vcombine.high %v2083_v31, %v8250_v28 }
 0x2d7   : > { %v2103_v46 = vsel %vm2101_vm2, %v2087_v33, 0  ;;  %v2090_v47 = vpack.i.b16 %v2089_v36, %v2088_v35  ;;  %v2093_v48 = vpack.i.b16 %v2084_v38, %v2059_v29  ;;  %v2095_v49 = vshrl.u32 %v2084_v38, 16 }
 0x2d8   : > { %7643 = vmatpush3.bf16.msra.mxu1 %v2103_v46  ;;  %v1202_v54 = vpop.permute.xlu1 %1201 }
 0x2d9   : > { %v2150_v50 = vsel %vm2101_vm2, %v2090_v47, 0  ;;  %7654 = vmatprep.subr.bf16.mxu1 %v8243_v0  ;;  %v2096_v53 = vpack.i.b16 %v2095_v49, %v2094_v45  ;;  %v2197_v55 = vsel %vm2101_vm2, %v2093_v48, 0 }
 0x2da   : > { %7649 = vmatpush3.bf16.msra.mxu0 %v2150_v50 }
 0x2db   : > { %7645 = vmatmul.mubr.msk.bf16.vlgmr.msra.gmra.mxu1 %vm2097_vm3, %v1473_v51  ;;  %7660 = vmatprep.subr.bf16.mxu0 %v8243_v0  ;;  %v2244_v58 = vsel %vm2101_vm2, %v2096_v53, 0  ;;  %v655_v53 = vld [vmem:[%s578_s26] sm:$0x1]  ;;  %s8251_s26 = smov 16  }
 0x2dc   : > { %7655 = vmatpush3.bf16.msra.mxu1 %v2197_v55  ;;  %7656 = vmatprep.mubr.msk.bf16.mxu1 %vm8244_vm0, %v8243_v0  ;;  %v1208_v62 = vpop.permute.xlu1 %1207 }
 0x2dd   : > { %7651 = vmatmul.mubr.msk.bf16.vlgmr.msra.gmra.mxu0 %vm2097_vm3, %v1476_v56  ;;  %7666 = vmatprep.subr.bf16.mxu1 %v8243_v0  ;;  %v1219_v5 = vcombine.low %v8632_v60, %v1208_v62  ;;  %v1220_v6 = vcombine.high %v8632_v60, %v1208_v62  ;;  %v2298_v56 = vsub.s32 0, %v8562_v30 }
 0x2de   : > { %7661 = vmatpush3.bf16.msra.mxu0 %v2244_v58  ;;  %7662 = vmatprep.mubr.msk.bf16.mxu0 %vm8244_vm0, %v8243_v0 }
 0x2df   : > { %7672 = vmatprep.subr.bf16.mxu0 %v8243_v0  ;;  %v1227_v7 = vrot.slane %v1219_v5, %v8565_v34  ;;  %v1234_v8 = vrot.slane %v1220_v6, %v8565_v34 }
 0x2e0   : > { %v8718_v37 = vpop.permute.xlu1 %1209 }
 0x2e1   : > { %v1287_v14 = vcombine.low %v8639_v3, %v8718_v37 }
 0x2e3   : > { %7657 = vmatmul.mubr.msk.bf16.vlgmr.msra.gmra.mxu1 %vm2097_vm3, %v1479_v63  ;;  %v1295_v22 = vrot.slane %v1287_v14, %v8565_v34 }
 0x2e4   : > { %7668 = vmatprep.mubr.msk.bf16.mxu1 %vm8244_vm0, %v8243_v0  ;;  %v8731_v11 = vpop.permute.xlu1 %1215 }
 0x2e5   : > { %7663 = vmatmul.mubr.msk.bf16.vlgmr.msra.gmra.mxu0 %vm2097_vm3, %v1482_v2  ;;  %v8723_v4 = vpop.permute.xlu0 %1203 }
 0x2e6   : > { %7674 = vmatprep.mubr.msk.bf16.mxu0 %vm8244_vm0, %v8243_v0  ;;  %v1303_v60 = vcombine.low %v8723_v4, %v8731_v11 }
 0x2e8   : > { %v1311_v44 = vrot.slane %v1303_v60, %v8565_v34 }
 0x2e9   : > { %v1214_v39 = vpop.permute.xlu0 %1213 }
 0x2ea   : > { %v1235_v9 = vcombine.low %v1202_v54, %v1214_v39  ;;  %v1236_v10 = vcombine.high %v1202_v54, %v1214_v39  ;;  %v1319_v29 = vcombine.low %v1295_v22, %v1311_v44  ;;  %v1320_v36 = vcombine.high %v1295_v22, %v1311_v44 }
 0x2eb   : > { %v7412_v54 = vadd.f32 -1.0, %v655_v53 }
 0x2ec   : > { %v1243_v12 = vrot.slane %v1235_v9, %v8565_v34  ;;  %v1250_v13 = vrot.slane %v1236_v10, %v8565_v34  ;;  %v1327_v35 = vrot.slane %v1319_v29, %v8568_v41  ;;  %v1334_v46 = vrot.slane %v1320_v36, %v8568_v41 }
 0x2ed   : > { %v657_v55 = vmul.f32 1e+09, %v7412_v54  ;;  %v1288_v36 = vcombine.high %v8639_v3, %v8718_v37 }
 0x2ee   : > { %v1251_v42 = vcombine.low %v1227_v7, %v1243_v12  ;;  %v1252_v15 = vcombine.high %v1227_v7, %v1243_v12  ;;  %v1267_v43 = vcombine.low %v1234_v8, %v1250_v13  ;;  %v1268_v20 = vcombine.high %v1234_v8, %v1250_v13 }
 0x2ef   : > { %v1363_v45 = vpack.c.bf16 %v1327_v35, %v1327_v35  ;;  %v1351_v48 = vcombine.high %v1327_v35, %v8243_v0  ;;  %v1365_v49 = vpack.c.bf16 %v1334_v46, %v1334_v46  ;;  %v1352_v51 = vcombine.high %v1334_v46, %v8243_v0 }
 0x2f0   : > { %v1259_v16 = vrot.slane %v1251_v42, %v8568_v41  ;;  %v1266_v17 = vrot.slane %v1252_v15, %v8568_v41  ;;  %v1275_v23 = vrot.slane %v1267_v43, %v8568_v41  ;;  %v1282_v27 = vrot.slane %v1268_v20, %v8568_v41 }
 0x2f1   : > { %v1364_v50 = vpack.c.bf16 %v1351_v48, %v1351_v48  ;;  %v1366_v52 = vpack.c.bf16 %v1352_v51, %v1352_v51  ;;  %v8756_v57 = vrot.slane %v657_v55, %v2298_v56 }
 0x2f2   : > { %v1355_v18 = vpack.c.bf16 %v1259_v16, %v1259_v16  ;;  %v1283_v19 = vcombine.high %v1259_v16, %v8243_v0  ;;  %v1357_v24 = vpack.c.bf16 %v1266_v17, %v1266_v17  ;;  %v1284_v25 = vcombine.high %v1266_v17, %v8243_v0 }
 0x2f3   : > { %v1359_v26 = vpack.c.bf16 %v1275_v23, %v1275_v23  ;;  %v1285_v32 = vcombine.high %v1275_v23, %v8243_v0  ;;  %v1361_v33 = vpack.c.bf16 %v1282_v27, %v1282_v27  ;;  %v1286_v40 = vcombine.high %v1282_v27, %v8243_v0 }
 0x2f4   : > { %2402 = vxpose.xlu0.c.b16.start.end [1/1] (short) (narrow) %v1355_v18, 16  ;;  %v1356_v21 = vpack.c.bf16 %v1283_v19, %v1283_v19  ;;  %v1358_v31 = vpack.c.bf16 %v1284_v25, %v1284_v25 }
 0x2f5   : > { %v1360_v38 = vpack.c.bf16 %v1285_v32, %v1285_v32  ;;  %v1362_v47 = vpack.c.bf16 %v1286_v40, %v1286_v40  ;;  %v1302_v40 = vrot.slane %v1288_v36, %v8565_v34 }
 0x2f6   : > { %2418 = vxpose.xlu1.c.b16.start.end [1/1] (short) (narrow) %v1356_v21, 16 }
 0x2f8   : > { %2434 = vxpose.xlu0.c.b16.start.end [1/1] (short) (narrow) %v1357_v24, 16 }
 0x2fa   : > { %2466 = vxpose.xlu1.c.b16.start.end [1/1] (short) (narrow) %v1359_v26, 16 }
 0x2fc   : > { %2450 = vxpose.xlu0.c.b16.start.end [1/1] (short) (narrow) %v1358_v31, 16 }
 0x2fe   : > { %2498 = vxpose.xlu1.c.b16.start.end [1/1] (short) (narrow) %v1361_v33, 16 }
 0x300   : > { %2482 = vxpose.xlu0.c.b16.start.end [1/1] (short) (narrow) %v1360_v38, 16  ;;  %v1304_v38 = vcombine.high %v8723_v4, %v8731_v11 }
 0x302   : > { %2530 = vxpose.xlu1.c.b16.start.end [1/1] (short) (narrow) %v1363_v45, 16  ;;  %v1318_v45 = vrot.slane %v1304_v38, %v8565_v34 }
 0x304   : > { %2514 = vxpose.xlu0.c.b16.start.end [1/1] (short) (narrow) %v1362_v47, 16  ;;  %v1335_v46 = vcombine.low %v1302_v40, %v1318_v45  ;;  %v1336_v48 = vcombine.high %v1302_v40, %v1318_v45 }
 0x306   : > { %2562 = vxpose.xlu1.c.b16.start.end [1/1] (short) (narrow) %v1365_v49, 16  ;;  %v1343_v47 = vrot.slane %v1335_v46, %v8568_v41 }
 0x308   : > { %2546 = vxpose.xlu0.c.b16.start.end [1/1] (short) (narrow) %v1364_v50, 16  ;;  %v1367_v49 = vpack.c.bf16 %v1343_v47, %v1343_v47  ;;  %v1350_v50 = vrot.slane %v1336_v48, %v8568_v41  ;;  %v1353_v51 = vcombine.high %v1343_v47, %v8243_v0 }
 0x30a   : > { %v1368_v53 = vpack.c.bf16 %v1353_v51, %v1353_v51  ;;  %v1354_v3 = vcombine.high %v1350_v50, %v8243_v0 }
 0x30c   : > { %2578 = vxpose.xlu0.c.b16.start.end [1/1] (short) (narrow) %v1366_v52, 16  ;;  %v1369_v52 = vpack.c.bf16 %v1350_v50, %v1350_v50  ;;  %v1370_v37 = vpack.c.bf16 %v1354_v3, %v1354_v3 }
 0x356   : > { %v2410_v4 = vpop.trf.xlu0 }
 0x358   : > { %v2426_v54 = vpop.trf.xlu1 }
 0x35a   : > { %v2442_v11 = vpop.trf.xlu0 }
 0x35c   : > { %v2474_v56 = vpop.trf.xlu1 }
 0x35e   : > { %v2458_v55 = vpop.trf.xlu0 }
 0x39b   : > { %v2139_v58 = vpop.f32.mrf.mxu1 }
 0x39c   : > { %v2287_v59 = vmul.f32 0.35355338, %v2139_v58  ;;  %v2490_v58 = vpop.trf.xlu0 }
 0x39d   : > { %v7646_v61 = vpop.f32.mrf.mxu1  ;;  %v2186_v62 = vpop.f32.mrf.mxu0 }
 0x39e   : > { %v2289_v63 = vmul.f32 0.35355338, %v2186_v62  ;;  %v8759_v1 = vadd.f32 %v8756_v57, %v2287_v59  ;;  %v2506_v59 = vpop.trf.xlu1 }
 0x39f   : > { %v2142_v2 = vpop.f32.mrf.mxu1  ;;  %v7652_v5 = vpop.f32.mrf.mxu0 }
 0x3a0   : > { %v2288_v6 = vmul.f32 0.35355338, %v2142_v2  ;;  %v2310_v39 = vsel %vm2309_vm4, %v8759_v1, -inf  ;;  %v8764_v7 = vadd.f32 %v8756_v57, %v2289_v63  ;;  %v2522_v61 = vpop.trf.xlu0 }
 0x3a1   : > { %v2189_v30 = vpop.f32.mrf.mxu0  ;;  %2311 = vmax.xlane.f32.xlu1 %v2310_v39  ;;  %v7647_v8 = vpop.f32.mrf.mxu1 }
 0x3a2   : > { %v2290_v9 = vmul.f32 0.35355338, %v2189_v30  ;;  %v8767_v10 = vadd.f32 %v8756_v57, %v2288_v6  ;;  %v2316_v60 = vsel %vm2309_vm4, %v8764_v7, -inf  ;;  %v2538_v62 = vpop.trf.xlu1 }
 0x3a3   : > { %v7653_v12 = vpop.f32.mrf.mxu0  ;;  %v2233_v13 = vpop.f32.mrf.mxu1 }
 0x3a4   : > { %v2291_v14 = vmul.f32 0.35355338, %v2233_v13  ;;  %v2313_v42 = vsel %vm2309_vm4, %v8767_v10, -inf  ;;  %v8774_v15 = vadd.f32 %v8756_v57, %v2290_v9  ;;  %v2554_v63 = vpop.trf.xlu0 }
 0x3a5   : > { %v2280_v43 = vpop.f32.mrf.mxu0  ;;  %2317 = vmax.xlane.f32.xlu1 %v2316_v60  ;;  %2314 = vmax.xlane.f32.xlu0 %v2313_v42  ;;  %v7658_v16 = vpop.f32.mrf.mxu1  ;;  %v2666_v60 = vcombine.low %v2442_v11, %v2506_v59 }
 0x3a6   : > { %v2293_v17 = vmul.f32 0.35355338, %v2280_v43  ;;  %v8777_v22 = vadd.f32 %v8756_v57, %v2291_v14  ;;  %v2319_v23 = vsel %vm2309_vm4, %v8774_v15, -inf  ;;  %v2570_v2 = vpop.trf.xlu1  ;;  %v2658_v14 = vcombine.low %v2410_v4, %v2474_v56 }
 0x3a7   : > { %v2236_v44 = vpop.f32.mrf.mxu1  ;;  %v7664_v18 = vpop.f32.mrf.mxu0  ;;  %v2726_v16 = vcombine.low %v2426_v54, %v2490_v58 }
 0x3a8   : > { %v2292_v19 = vmul.f32 0.35355338, %v2236_v44  ;;  %v2322_v20 = vsel %vm2309_vm4, %v8777_v22, -inf  ;;  %v8784_v21 = vadd.f32 %v8756_v57, %v2293_v17  ;;  %v2586_v5 = vpop.trf.xlu0  ;;  %v2734_v17 = vcombine.low %v2458_v55, %v2522_v61 }
 0x3a9   : > { %v2283_v24 = vpop.f32.mrf.mxu0  ;;  %2320 = vmax.xlane.f32.xlu0 %v2319_v23  ;;  %2323 = vmax.xlane.f32.xlu1 %v2322_v20  ;;  %v7659_v25 = vpop.f32.mrf.mxu1  ;;  %v2665_v18 = vrot.slane %v2658_v14, %v8565_v34 }
 0x3aa   : > { %v2294_v26 = vmul.f32 0.35355338, %v2283_v24  ;;  %v8787_v27 = vadd.f32 %v8756_v57, %v2292_v19  ;;  %v2328_v31 = vsel %vm2309_vm4, %v8784_v21, -inf  ;;  %v2673_v19 = vrot.slane %v2666_v60, %v8565_v34 }
 0x3ab   : > { %v7665_v29 = vpop.f32.mrf.mxu0  ;;  %v2733_v25 = vrot.slane %v2726_v16, %v8565_v34 }
 0x3ac   : > { %v2325_v32 = vsel %vm2309_vm4, %v8787_v27, -inf  ;;  %v8794_v33 = vadd.f32 %v8756_v57, %v2294_v26  ;;  %v2741_v26 = vrot.slane %v2734_v17, %v8565_v34  ;;  %v2690_v38 = vcombine.low %v2665_v18, %v2673_v19 }
 0x3ad   : > { %2329 = vmax.xlane.f32.xlu1 %v2328_v31  ;;  %2326 = vmax.xlane.f32.xlu0 %v2325_v32 }
 0x3ae   : > { %v2331_v35 = vsel %vm2309_vm4, %v8794_v33, -inf  ;;  %v2758_v47 = vcombine.low %v2733_v25, %v2741_v26  ;;  %v2698_v4 = vrot.slane %v2690_v38, %v8568_v41 }
 0x3b0   : > { %v2766_v55 = vrot.slane %v2758_v47, %v8568_v41 }
 0x3b1   : > { %2332 = vmax.xlane.f32.xlu0 %v2331_v35  ;;  %v2691_v35 = vcombine.high %v2665_v18, %v2673_v19 }
 0x3da   : > { %2594 = vxpose.xlu1.c.b16.start.end [1/1] (short) (narrow) %v1367_v49, 16 }
 0x3de   : > { %2626 = vxpose.xlu1.c.b16.start.end [1/1] (short) (narrow) %v1369_v52, 16  ;;  %2610 = vxpose.xlu0.c.b16.start.end [1/1] (short) (narrow) %v1368_v53, 16  ;;  %v2759_v52 = vcombine.high %v2733_v25, %v2741_v26  ;;  %v2705_v53 = vrot.slane %v2691_v35, %v8568_v41 }
 0x3e0   : > { %v2773_v61 = vrot.slane %v2759_v52, %v8568_v41 }
 0x3e2   : > { %2642 = vxpose.xlu0.c.b16.start.end [1/1] (short) (narrow) %v1370_v37, 16 }
 0x42a   : > { %v2312_v6 = vpop.xlane.xlu1 %2311 }
 0x42b   : > { %v2334_v59 = vsub.f32 %v8759_v1, %v2312_v6 }
 0x42d   : > { %v2342_v17 = vmul.f32 1.442695, %v2334_v59 }
 0x42e   : > { %v8808_v39 = vpop.xlane.xlu1 %2317  ;;  %v2315_v30 = vpop.xlane.xlu0 %2314 }
 0x42f   : > { %v2336_v6 = vsub.f32 %v8764_v7, %v8808_v39  ;;  %7967 = vpow2.f32 %v2342_v17 }
 0x432   : > { %v8810_v8 = vpop.xlane.xlu0 %2320  ;;  %v8812_v9 = vpop.xlane.xlu1 %2323 }
 0x436   : > { %v8814_v12 = vpop.xlane.xlu0 %2326  ;;  %v8816_v13 = vpop.xlane.xlu1 %2329 }
 0x43a   : > { %v8818_v42 = vpop.xlane.xlu0 %2332 }
 0x43c   : > { %v2602_v43 = vpop.trf.xlu1 }
 0x43d   : > { %v2674_v44 = vcombine.low %v2538_v62, %v2602_v43 }
 0x43f   : > { %v2681_v29 = vrot.slane %v2674_v44, %v8565_v34 }
 0x440   : > { %v2634_v23 = vpop.trf.xlu1  ;;  %v2618_v20 = vpop.trf.xlu0 }
 0x441   : > { %v2682_v24 = vcombine.low %v2570_v2, %v2634_v23  ;;  %v2742_v32 = vcombine.low %v2554_v63, %v2618_v20  ;;  %v2335_v2 = vsub.f32 %v8767_v10, %v2315_v30 }
 0x443   : > { %v2689_v31 = vrot.slane %v2682_v24, %v8565_v34  ;;  %v2749_v48 = vrot.slane %v2742_v32, %v8565_v34  ;;  %v2344_v23 = vmul.f32 1.442695, %v2335_v2  ;;  %v2337_v24 = vsub.f32 %v8774_v15, %v8810_v8 }
 0x444   : > { %v2650_v36 = vpop.trf.xlu0  ;;  %v2338_v32 = vsub.f32 %v8777_v22, %v8812_v9  ;;  %v2341_v9 = vsub.f32 %v8794_v33, %v8818_v42 }
 0x445   : > { %v2706_v40 = vcombine.low %v2681_v29, %v2689_v31  ;;  %v2707_v45 = vcombine.high %v2681_v29, %v2689_v31  ;;  %v2750_v46 = vcombine.low %v2586_v5, %v2650_v36  ;;  %v2346_v31 = vmul.f32 1.442695, %v2336_v6 }
 0x446   : > { %7969 = vpow2.f32 %v2344_v23  ;;  %v2348_v35 = vmul.f32 1.442695, %v2337_v24  ;;  %v2339_v36 = vsub.f32 %v8787_v27, %v8814_v12  ;;  %v2350_v8 = vmul.f32 1.442695, %v2338_v32  ;;  %v7968_v12 = vpop.eup %7967 }
 0x447   : > { %v2757_v49 = vrot.slane %v2750_v46, %v8565_v34  ;;  %v2714_v50 = vrot.slane %v2706_v40, %v8568_v41  ;;  %v2721_v51 = vrot.slane %v2707_v45, %v8568_v41  ;;  %7971 = vpow2.f32 %v2346_v31 }
 0x448   : > { %v2340_v40 = vsub.f32 %v8784_v21, %v8816_v13  ;;  %7973 = vpow2.f32 %v2348_v35  ;;  %v2352_v22 = vmul.f32 1.442695, %v2339_v36  ;;  %v2356_v27 = vmul.f32 1.442695, %v2341_v9 }
 0x449   : > { %v2774_v3 = vcombine.low %v2749_v48, %v2757_v49  ;;  %v2775_v37 = vcombine.high %v2749_v48, %v2757_v49  ;;  %v8832_v11 = vcombine.high %v2705_v53, %v2721_v51  ;;  %v2722_v54 = vcombine.low %v2698_v4, %v2714_v50 }
 0x44a   : > { %v2723_v16 = vcombine.high %v2698_v4, %v2714_v50  ;;  %v2724_v29 = vcombine.low %v2705_v53, %v2721_v51  ;;  %7975 = vpow2.f32 %v2350_v8  ;;  %v2354_v46 = vmul.f32 1.442695, %v2340_v40 }
 0x44b   : > { %v2782_v56 = vrot.slane %v2774_v3, %v8568_v41  ;;  %v2789_v58 = vrot.slane %v2775_v37, %v8568_v41  ;;  %v2798_v60 = vshrl.u32 %v2722_v54, 16  ;;  %v2822_v18 = vshrl.u32 %v8832_v11, 16 }
 0x44c   : > { %v2806_v26 = vshrl.u32 %v2723_v16, 16  ;;  %v2814_v15 = vshrl.u32 %v2724_v29, 16  ;;  %7977 = vpow2.f32 %v2352_v22  ;;  %v2358_v48 = vsel %vm2309_vm4, %v7968_v12, 0.0 }
 0x44d   : > { %v2790_v62 = vcombine.low %v2766_v55, %v2782_v56  ;;  %v2791_v63 = vcombine.high %v2766_v55, %v2782_v56  ;;  %v8840_v5 = vcombine.high %v2773_v61, %v2789_v58  ;;  %v2792_v30 = vcombine.low %v2773_v61, %v2789_v58 }
 0x44e   : > { %7979 = vpow2.f32 %v2354_v46 }
 0x44f   : > { %v2796_v14 = vpack.i.b16 %v2790_v62, %v2722_v54  ;;  %v2799_v43 = vshrl.u32 %v2790_v62, 16  ;;  %v2820_v44 = vpack.i.b16 %v8840_v5, %v8832_v11  ;;  %v2823_v1 = vshrl.u32 %v8840_v5, 16 }
 0x450   : > { %v2807_v10 = vshrl.u32 %v2791_v63, 16  ;;  %v2804_v25 = vpack.i.b16 %v2791_v63, %v2723_v16  ;;  %v2815_v39 = vshrl.u32 %v2792_v30, 16  ;;  %v2812_v38 = vpack.i.b16 %v2792_v30, %v2724_v29 }
 0x451   : > { %2826 = vxpose.xlu1.c.b16.start.end [1/1] (short) (narrow) %v2796_v14, 16  ;;  %v2800_v19 = vpack.i.b16 %v2799_v43, %v2798_v60  ;;  %v2824_v20 = vpack.i.b16 %v2823_v1, %v2822_v18  ;;  %7981 = vpow2.f32 %v2356_v27 }
 0x452   : > { %v2808_v7 = vpack.i.b16 %v2807_v10, %v2806_v26  ;;  %v2816_v45 = vpack.i.b16 %v2815_v39, %v2814_v15 }
 0x453   : > { %2842 = vxpose.xlu0.c.b16.start.end [1/1] (short) (narrow) %v2800_v19, 16  ;;  %v7970_v47 = vpop.eup %7969 }
 0x454   : > { %v7972_v49 = vpop.eup %7971  ;;  %v2361_v21 = vsel %vm2309_vm4, %v7970_v47, 0.0 }
 0x455   : > { %2858 = vxpose.xlu1.c.b16.start.end [1/1] (short) (narrow) %v2804_v25, 16  ;;  %v7974_v13 = vpop.eup %7973  ;;  %v2364_v50 = vsel %vm2309_vm4, %v7972_v49, 0.0 }
 0x456   : > { %v2367_v42 = vsel %vm2309_vm4, %v7974_v13, 0.0 }
 0x457   : > { %2874 = vxpose.xlu0.c.b16.start.end [1/1] (short) (narrow) %v2808_v7, 16  ;;  %v8861_v33 = vpop.eup %7975 }
 0x458   : > { %v2370_v52 = vsel %vm2309_vm4, %v8861_v33, 0.0 }
 0x459   : > { %2890 = vxpose.xlu1.c.b16.start.end [1/1] (short) (narrow) %v2812_v38, 16  ;;  %v8864_v51 = vpop.eup %7977 }
 0x45a   : > { %v2373_v3 = vsel %vm2309_vm4, %v8864_v51, 0.0 }
 0x45b   : > { %2906 = vxpose.xlu0.c.b16.start.end [1/1] (short) (narrow) %v2816_v45, 16  ;;  %v8868_v53 = vpop.eup %7979 }
 0x45c   : > { %v2376_v4 = vsel %vm2309_vm4, %v8868_v53, 0.0 }
 0x45e   : > { %v8872_v37 = vpop.eup %7981 }
 0x45f   : > { %v2379_v54 = vsel %vm2309_vm4, %v8872_v37, 0.0 }
 0x466   : > { %2359 = vadd.xlane.f32.xlu1 %v2358_v48 }
 0x468   : > { %2362 = vadd.xlane.f32.xlu0 %v2361_v21 }
 0x46a   : > { %2365 = vadd.xlane.f32.xlu1 %v2364_v50 }
 0x46c   : > { %2368 = vadd.xlane.f32.xlu0 %v2367_v42 }
 0x46e   : > { %2371 = vadd.xlane.f32.xlu1 %v2370_v52 }
 0x470   : > { %2374 = vadd.xlane.f32.xlu0 %v2373_v3 }
 0x472   : > { %2377 = vadd.xlane.f32.xlu1 %v2376_v4 }
 0x474   : > { %2380 = vadd.xlane.f32.xlu0 %v2379_v54 }
 0x49f   : > { %2922 = vxpose.xlu1.c.b16.start.end [1/1] (short) (narrow) %v2820_v44, 16 }
 0x4a1   : > { %2938 = vxpose.xlu0.c.b16.start.end [1/1] (short) (narrow) %v2824_v20, 16 }
 0x4b3   : > { %v2834_v55 = vpop.trf.xlu1 }
 0x4b5   : > { %v2850_v56 = vpop.trf.xlu0 }
 0x4b7   : > { %v2866_v58 = vpop.trf.xlu1 }
 0x4b9   : > { %v2882_v59 = vpop.trf.xlu0 }
 0x4bb   : > { %v2898_v61 = vpop.trf.xlu1 }
 0x4bc   : > { %v2954_v18 = vcombine.low %v2834_v55, %v2898_v61 }
 0x4bd   : > { %v2914_v62 = vpop.trf.xlu0 }
 0x4be   : > { %v2979_v30 = vcombine.low %v2850_v56, %v2914_v62  ;;  %v2961_v25 = vrot.slane %v2954_v18, %v8565_v34 }
 0x4c0   : > { %v2986_v36 = vrot.slane %v2979_v30, %v8565_v34 }
 0x4ef   : > { %v2360_v63 = vpop.xlane.xlu1 %2359 }
 0x4f0   : > { %7983 = vrcp.f32 %v2360_v63 }
 0x4f1   : > { %v2363_v2 = vpop.xlane.xlu0 %2362 }
 0x4f2   : > { %7985 = vrcp.f32 %v2363_v2 }
 0x4f3   : > { %v2366_v14 = vpop.xlane.xlu1 %2365 }
 0x4f4   : > { %7987 = vrcp.f32 %v2366_v14 }
 0x4f5   : > { %v2369_v60 = vpop.xlane.xlu0 %2368 }
 0x4f6   : > { %7989 = vrcp.f32 %v2369_v60 }
 0x4f7   : > { %v2372_v43 = vpop.xlane.xlu1 %2371 }
 0x4f8   : > { %7991 = vrcp.f32 %v2372_v43 }
 0x4f9   : > { %v2375_v16 = vpop.xlane.xlu0 %2374 }
 0x4fa   : > { %7993 = vrcp.f32 %v2375_v16 }
 0x4fb   : > { %v2378_v11 = vpop.xlane.xlu1 %2377 }
 0x4fc   : > { %7995 = vrcp.f32 %v2378_v11 }
 0x4fd   : > { %v7984_v5 = vpop.eup %7983  ;;  %v2381_v17 = vpop.xlane.xlu0 %2380 }
 0x4fe   : > { %7997 = vrcp.f32 %v2381_v17  ;;  %v2390_v1 = vmul.f32 %v7984_v5, %v7968_v12 }
 0x4ff   : > { %v7986_v44 = vpop.eup %7985 }
 0x500   : > { %v2391_v6 = vmul.f32 %v7986_v44, %v7970_v47 }
 0x501   : > { %v7988_v19 = vpop.eup %7987  ;;  %v2930_v10 = vpop.trf.xlu1 }
 0x502   : > { %v2962_v23 = vcombine.low %v2866_v58, %v2930_v10  ;;  %v2398_v20 = vpack.c.bf16 %v2391_v6, %v2390_v1  ;;  %v2392_v29 = vmul.f32 %v7988_v19, %v7972_v49 }
 0x503   : > { %v7990_v24 = vpop.eup %7989  ;;  %v2946_v26 = vpop.trf.xlu0 }
 0x504   : > { %v2969_v31 = vrot.slane %v2962_v23, %v8565_v34  ;;  %v2987_v32 = vcombine.low %v2882_v59, %v2946_v26  ;;  %v3020_v7 = vsel %vm2309_vm4, %v2398_v20, 0  ;;  %v2393_v39 = vmul.f32 %v7990_v24, %v7974_v13 }
 0x505   : > { %v7992_v35 = vpop.eup %7991  ;;  %7667 = vmatpush3.bf16.xpose.msra.mxu1 %v3020_v7 }
 0x506   : > { %v2970_v38 = vcombine.low %v2961_v25, %v2969_v31  ;;  %v2994_v15 = vrot.slane %v2987_v32, %v8565_v34  ;;  %v2399_v8 = vpack.c.bf16 %v2393_v39, %v2392_v29  ;;  %7678 = vmatprep.subr.bf16.mxu1 %v8243_v0  ;;  %v2394_v45 = vmul.f32 %v7992_v35, %v8861_v33 }
 0x507   : > { %v7994_v40 = vpop.eup %7993 }
 0x508   : > { %v2977_v22 = vrot.slane %v2970_v38, %v8568_v41  ;;  %v2995_v9 = vcombine.low %v2986_v36, %v2994_v15  ;;  %v3066_v46 = vsel %vm2309_vm4, %v2399_v8, 0  ;;  %v2395_v27 = vmul.f32 %v7994_v40, %v8864_v51 }
 0x509   : > { %7673 = vmatpush3.bf16.xpose.msra.mxu0 %v3066_v46  ;;  %v7996_v12 = vpop.eup %7995 }
 0x50a   : > { %v3002_v47 = vrot.slane %v2995_v9, %v8568_v41  ;;  %v2400_v48 = vpack.c.bf16 %v2395_v27, %v2394_v45  ;;  %7684 = vmatprep.subr.bf16.mxu0 %v8243_v0  ;;  %v3007_v21 = vshrl.u32 %v2977_v22, 16  ;;  %v2396_v42 = vmul.f32 %v7996_v12, %v8868_v53 }
 0x50b   : > { %v7998_v49 = vpop.eup %7997  ;;  %v2978_v54 = vcombine.high %v2977_v22, %v8250_v28 }
 0x50c   : > { %v3008_v13 = vshrl.u32 %v3002_v47, 16  ;;  %v3006_v50 = vpack.i.b16 %v3002_v47, %v2977_v22  ;;  %v3112_v33 = vsel %vm2309_vm4, %v2400_v48, 0  ;;  %v2397_v52 = vmul.f32 %v7998_v49, %v8872_v37 }
 0x50d   : > { %v3003_v3 = vcombine.high %v3002_v47, %v8250_v28  ;;  %v3013_v56 = vshrl.u32 %v2978_v54, 16 }
 0x50e   : > { %7669 = vmatmul.mubr.msk.bf16.vlgmr.msra.gmra.mxu1 %vm2309_vm4, %v3006_v50  ;;  %v3009_v51 = vpack.i.b16 %v3008_v13, %v3007_v21  ;;  %v2401_v4 = vpack.c.bf16 %v2397_v52, %v2396_v42 }
 0x50f   : > { %7679 = vmatpush3.bf16.xpose.msra.mxu1 %v3112_v33  ;;  %7680 = vmatprep.mubr.msk.bf16.mxu1 %vm8244_vm0, %v8243_v0  ;;  %v3014_v37 = vshrl.u32 %v3003_v3, 16  ;;  %v3012_v55 = vpack.i.b16 %v3003_v3, %v2978_v54 }
 0x510   : > { %7675 = vmatmul.mubr.msk.bf16.vlgmr.msra.gmra.mxu0 %vm2309_vm4, %v3009_v51  ;;  %7690 = vmatprep.subr.bf16.mxu1 %v8243_v0  ;;  %v3158_v53 = vsel %vm2309_vm4, %v2401_v4, 0 }
 0x511   : > { %7686 = vmatprep.mubr.msk.bf16.mxu0 %vm8244_vm0, %v8243_v0  ;;  %7685 = vmatpush3.bf16.xpose.msra.mxu0 %v3158_v53  ;;  %v3015_v58 = vpack.i.b16 %v3014_v37, %v3013_v56 }
 0x512   : > { %7698 = vmatprep.subr.bf16.mxu0 %v8243_v0 }
 0x516   : > { %7681 = vmatmul.mubr.msk.bf16.vlgmr.msra.gmra.mxu1 %vm2309_vm4, %v3012_v55 }
 0x517   : > { %7694 = vmatprep.mubr.msk.bf16.mxu1 %vm8244_vm0, %v8243_v0 }
 0x518   : > { %7687 = vmatmul.mubr.msk.bf16.vlgmr.msra.gmra.mxu0 %vm2309_vm4, %v3015_v58 }
 0x519   : > { %7702 = vmatprep.mubr.msk.bf16.mxu0 %vm8244_vm0, %v8243_v0 }
 0x5ce   : > { %v3056_v59 = vpop.f32.mrf.mxu1 }
 0x5cf   : > { %3200 = vxpose.xlu1.b32.start.end [1/1] (short) (narrow) %v3056_v59, 16 }
 0x5d0   : > { %v7670_v61 = vpop.f32.mrf.mxu1  ;;  %v3102_v62 = vpop.f32.mrf.mxu0 }
 0x5d1   : > { %3232 = vxpose.xlu0.b32.start.end [1/1] (short) (narrow) %v3102_v62, 16 }
 0x5d2   : > { %v3059_v63 = vpop.f32.mrf.mxu1  ;;  %v7676_v2 = vpop.f32.mrf.mxu0 }
 0x5d4   : > { %v7671_v14 = vpop.f32.mrf.mxu1  ;;  %v3105_v60 = vpop.f32.mrf.mxu0 }
 0x5d6   : > { %v7677_v43 = vpop.f32.mrf.mxu0  ;;  %v3148_v16 = vpop.f32.mrf.mxu1 }
 0x5d7   : > { %3264 = vxpose.xlu0.b32.start.end [1/1] (short) (narrow) %v3148_v16, 16 }
 0x5d8   : > { %v7682_v11 = vpop.f32.mrf.mxu1  ;;  %v3194_v5 = vpop.f32.mrf.mxu0 }
 0x5d9   : > { %3296 = vxpose.xlu1.b32.start.end [1/1] (short) (narrow) %v3194_v5, 16 }
 0x5da   : > { %v3151_v17 = vpop.f32.mrf.mxu1  ;;  %v7688_v44 = vpop.f32.mrf.mxu0 }
 0x5dc   : > { %v7683_v18 = vpop.f32.mrf.mxu1  ;;  %v3197_v1 = vpop.f32.mrf.mxu0 }
 0x5dd   : > { %v7945_v18 = vld [vmem:[#allocation7 + $0x8] sm:$0xff]  }
 0x5de   : > { %v7689_v6 = vpop.f32.mrf.mxu0  ;;  %7691 = vmatpush3.bf16.msra.mxu1 %v7945_v18 }
 0x5df   : > { %7692 = vmatprep.subr.bf16.mxu1 %v8243_v0 }
 0x64b   : > { %v3216_v19 = vpop.trf.xlu1 }
 0x64d   : > { %v3248_v10 = vpop.trf.xlu0 }
 0x64f   : > { %v3217_v30 = vpop.trf.xlu1 }
 0x651   : > { %v3249_v23 = vpop.trf.xlu0 }
 0x655   : > { %v3280_v20 = vpop.trf.xlu0  ;;  %v3312_v24 = vpop.trf.xlu1 }
 0x656   : > { %v3328_v25 = vcombine.low %v3216_v19, %v3280_v20  ;;  %v3329_v26 = vcombine.high %v3216_v19, %v3280_v20  ;;  %v3344_v29 = vcombine.low %v3248_v10, %v3312_v24  ;;  %v3345_v31 = vcombine.high %v3248_v10, %v3312_v24 }
 0x658   : > { %v3336_v32 = vrot.slane %v3328_v25, %v8565_v34  ;;  %v3343_v7 = vrot.slane %v3329_v26, %v8565_v34  ;;  %v3352_v39 = vrot.slane %v3344_v29, %v8565_v34  ;;  %v3359_v35 = vrot.slane %v3345_v31, %v8565_v34 }
 0x659   : > { %v3281_v36 = vpop.trf.xlu0  ;;  %v3313_v38 = vpop.trf.xlu1 }
 0x65a   : > { %v3396_v15 = vcombine.low %v3217_v30, %v3281_v36  ;;  %v3397_v8 = vcombine.high %v3217_v30, %v3281_v36  ;;  %v3360_v40 = vcombine.low %v3336_v32, %v3352_v39  ;;  %v3361_v45 = vcombine.high %v3336_v32, %v3352_v39 }
 0x65b   : > { %v3376_v22 = vcombine.low %v3343_v7, %v3359_v35  ;;  %v3377_v9 = vcombine.high %v3343_v7, %v3359_v35  ;;  %v3412_v46 = vcombine.low %v3249_v23, %v3313_v38  ;;  %v3413_v27 = vcombine.high %v3249_v23, %v3313_v38  ;;  %v7946_v7 = vld [vmem:[#allocation7] sm:$0xff]  }
 0x65c   : > { %v3404_v12 = vrot.slane %v3396_v15, %v8565_v34  ;;  %v3411_v47 = vrot.slane %v3397_v8, %v8565_v34  ;;  %v3368_v48 = vrot.slane %v3360_v40, %v8568_v41  ;;  %v3375_v49 = vrot.slane %v3361_v45, %v8568_v41  ;;  %7693 = vmatpush3.bf16.msra.mxu1 %v7946_v7 }
 0x65d   : > { %v3384_v21 = vrot.slane %v3376_v22, %v8568_v41  ;;  %v3391_v13 = vrot.slane %v3377_v9, %v8568_v41  ;;  %v3420_v50 = vrot.slane %v3412_v46, %v8565_v34  ;;  %v3427_v33 = vrot.slane %v3413_v27, %v8565_v34  ;;  %7706 = vmatprep.subr.bf16.mxu1 %v8243_v0 }
 0x65e   : > { %v3464_v42 = vcombine.low %v3368_v48, %v3375_v49  ;;  %v7441_v52 = vcombine.high %v3368_v48, %v3375_v49 }
 0x65f   : > { %v3480_v51 = vcombine.low %v3384_v21, %v3391_v13  ;;  %v7442_v3 = vcombine.high %v3384_v21, %v3391_v13  ;;  %v3428_v4 = vcombine.low %v3404_v12, %v3420_v50  ;;  %v3429_v54 = vcombine.high %v3404_v12, %v3420_v50 }
 0x660   : > { %v3444_v53 = vcombine.low %v3411_v47, %v3427_v33  ;;  %v3445_v37 = vcombine.high %v3411_v47, %v3427_v33  ;;  %v3471_v55 = vrot.slane %v3464_v42, %v8565_v34  ;;  %v3479_v56 = vrot.slane %v7441_v52, %v8565_v34 }
 0x661   : > { %v3487_v58 = vrot.slane %v3480_v51, %v8565_v34  ;;  %v3495_v59 = vrot.slane %v7442_v3, %v8565_v34  ;;  %v3436_v61 = vrot.slane %v3428_v4, %v8568_v41  ;;  %v3443_v62 = vrot.slane %v3429_v54, %v8568_v41 }
 0x662   : > { %v3452_v63 = vrot.slane %v3444_v53, %v8568_v41  ;;  %v3459_v2 = vrot.slane %v3445_v37, %v8568_v41  ;;  %v3497_v14 = vcombine.high %v3471_v55, %v3479_v56  ;;  %v3496_v43 = vcombine.low %v3471_v55, %v3479_v56 }
 0x663   : > { %v3513_v60 = vcombine.high %v3487_v58, %v3495_v59  ;;  %v3512_v16 = vcombine.low %v3487_v58, %v3495_v59  ;;  %v3532_v11 = vcombine.low %v3436_v61, %v3443_v62  ;;  %v7443_v5 = vcombine.high %v3436_v61, %v3443_v62  ;;  %v7445_v58 = vld [vmem:[%s9571_s9] ss:$0 sm:$0xff] }
 0x664   : > { %v3548_v17 = vcombine.low %v3452_v63, %v3459_v2  ;;  %v7444_v44 = vcombine.high %v3452_v63, %v3459_v2  ;;  %v3504_v1 = vrot.slane %v3496_v43, %v8568_v41  ;;  %v3511_v20 = vrot.slane %v3497_v14, %v8568_v41  ;;  %v8055_v63 = vld [vmem:[%s8504_s17] sm:$0xff] }
 0x665   : > { %v3520_v6 = vrot.slane %v3512_v16, %v8568_v41  ;;  %v3539_v19 = vrot.slane %v3532_v11, %v8565_v34  ;;  %v3547_v10 = vrot.slane %v7443_v5, %v8565_v34  ;;  %v3527_v24 = vrot.slane %v3513_v60, %v8568_v41  ;;  %v8056_v11 = vld [vmem:[%s8504_s17 + $0x8] sm:$0xff]  ;;  %s9628_s17 = sld [smem:[#allocation27_spill]] }
 0x666   : > { %v3555_v30 = vrot.slane %v3548_v17, %v8565_v34  ;;  %v3563_v23 = vrot.slane %v7444_v44, %v8565_v34 }
 0x667   : > { %v3528_v25 = vcombine.low %v3504_v1, %v3520_v6  ;;  %v3565_v26 = vcombine.high %v3539_v19, %v3547_v10  ;;  %v3564_v31 = vcombine.low %v3539_v19, %v3547_v10  ;;  %v3530_v15 = vcombine.low %v3511_v20, %v3527_v24 }
 0x668   : > { %v3581_v29 = vcombine.high %v3555_v30, %v3563_v23  ;;  %v3580_v32 = vcombine.low %v3555_v30, %v3563_v23  ;;  %v3529_v40 = vcombine.high %v3504_v1, %v3520_v6  ;;  %v3531_v12 = vcombine.high %v3511_v20, %v3527_v24 }
 0x669   : > { %v3579_v39 = vrot.slane %v3565_v26, %v8568_v41  ;;  %v3572_v36 = vrot.slane %v3564_v31, %v8568_v41  ;;  %v7948_v26 = vld [vmem:[#allocation8] sm:$0xff]  }
 0x66a   : > { %v3595_v35 = vrot.slane %v3581_v29, %v8568_v41  ;;  %v3588_v38 = vrot.slane %v3580_v32, %v8568_v41 }
 0x66c   : > { %v3598_v8 = vcombine.low %v3579_v39, %v3595_v35  ;;  %v3597_v45 = vcombine.high %v3572_v36, %v3588_v38  ;;  %v3596_v22 = vcombine.low %v3572_v36, %v3588_v38  ;;  %v3599_v27 = vcombine.high %v3579_v39, %v3595_v35 }
 0x66e   : > { %v7914_v9 = vpack.i.bf16 %v3598_v8, %v3530_v15  ;;  %v7909_v46 = vpack.i.bf16 %v3597_v45, %v3529_v40  ;;  %v7919_v47 = vpack.i.bf16 %v3599_v27, %v3531_v12  ;;  %v7449_v15 = vld [vmem:[%s9572_s10] ss:$0 sm:$0xff] }
 0x670   : > { %7915 = vrot.lane.b32.xlu1 %v7914_v9, %s8251_s26  ;;  %7910 = vrot.lane.b32.xlu0 %v7909_v46, %s8252_s27 }
 0x674   : > { %7920 = vrot.lane.b32.xlu1 %v7919_v47, %s8253_s29  ;;  %v7949_v47 = vld [vmem:[%s9576_s14 + $0x18] sm:$0xff]  }
 0x6e2   : > { %v7916_v48 = vpop.permute.xlu1 %7915  ;;  %v7911_v49 = vpop.permute.xlu0 %7910 }
 0x6e3   : > { %v7913_v21 = vunpack.i.h.bf16 %v7911_v49  ;;  %v7912_v13 = vunpack.i.l.bf16 %v7911_v49  ;;  %v7918_v50 = vunpack.i.h.bf16 %v7916_v48  ;;  %v7917_v33 = vunpack.i.l.bf16 %v7916_v48  ;;  %v7950_v48 = vld [vmem:[%s9576_s14 + $0x10] sm:$0xff]   ;;  %v7951_v49 = vld [vmem:[%s9576_s14 + $0x8] sm:$0xff]  }
 0x6e5   : > { %v3624_v42 = vsel %vm2097_vm3, %v3528_v25, %v7912_v13  ;;  %v3625_v52 = vsel %vm2097_vm3, %v3596_v22, %v7913_v21  ;;  %v7947_v25 = vld [vmem:[#allocation8 + $0x8] sm:$0xff]   ;;  %v7450_v22 = vld [vmem:[%s9573_s11] ss:$0 sm:$0xff] }
 0x6e6   : > { %v7921_v51 = vpop.permute.xlu1 %7920  ;;  %v3626_v54 = vsel %vm2309_vm4, %v3624_v42, %v7917_v33  ;;  %v3627_v53 = vsel %vm2309_vm4, %v3625_v52, %v7918_v50  ;;  %7699 = vmatpush3.bf16.msra.mxu0 %v7947_v25  ;;  %v7952_v21 = vld [vmem:[%s9576_s14] sm:$0xff]  }
 0x6e7   : > { %v7923_v3 = vunpack.i.h.bf16 %v7921_v51  ;;  %v7922_v4 = vunpack.i.l.bf16 %v7921_v51  ;;  %7700 = vmatprep.subr.bf16.mxu0 %v8243_v0  ;;  %v7451_v13 = vld [vmem:[%s9575_s13] ss:$0 sm:$0xff] }
 0x6e9   : > { %v3629_v37 = vsel %vm3628_vm5, %v3626_v54, %v7922_v4  ;;  %v3630_v55 = vsel %vm3628_vm5, %v3627_v53, %v7923_v3 }
 0x6ea   : > { %v3631_v56 = vpack.c.bf16 %v3630_v55, %v3629_v37  ;;  %7701 = vmatpush3.bf16.msra.mxu0 %v7948_v26 }
 0x6eb   : > { %7718 = vmatprep.subr.bf16.mxu0 %v8243_v0 }
 0x6ec   : > { %7695 = vmatmul.mubr.msk.bf16.vlgmr.msra.gmra.mxu1 %vm682_vm1, %v3631_v56 }
 0x6ed   : > { %7714 = vmatprep.mubr.msk.bf16.mxu1 %vm8244_vm0, %v8243_v0  ;;  %7707 = vmatpush3.bf16.msra.mxu1 %v7949_v47 }
 0x6ee   : > { %7708 = vmatprep.subr.bf16.mxu1 %v8243_v0 }
 0x6f1   : > { %7709 = vmatpush3.bf16.msra.mxu1 %v7950_v48 }
 0x6f2   : > { %7710 = vmatprep.subr.bf16.mxu1 %v8243_v0 }
 0x6f5   : > { %7711 = vmatpush3.bf16.msra.mxu1 %v7951_v49 }
 0x6f6   : > { %7712 = vmatprep.subr.bf16.mxu1 %v8243_v0 }
 0x6f9   : > { %7713 = vmatpush3.bf16.msra.mxu1 %v7952_v21 }
 0x6fa   : > { %7734 = vmatprep.subr.bf16.mxu1 %v8243_v0 }
 0x7ac   : > { %v3692_v59 = vpop.f32.mrf.mxu1 }
 0x7ad   : > { %v3693_v61 = vadd.f32 %v7445_v58, %v3692_v59 }
 0x7ae   : > { %v7696_v62 = vpop.f32.mrf.mxu1 }
 0x7af   : > { %v3699_v2 = vadd.f32 %v8055_v63, %v3693_v61 }
 0x7b0   : > { %v3695_v14 = vpop.f32.mrf.mxu1 }
 0x7b1   : > { %v3696_v60 = vadd.f32 %v7445_v58, %v3695_v14  ;;  %v3703_v43 = vsel %vm682_vm1, %v3699_v2, 0.0 }
 0x7b2   : > { %3704 = vadd.xlane.f32.xlu1 %v3703_v43  ;;  %v7697_v16 = vpop.f32.mrf.mxu1 }
 0x7b3   : > { %v3700_v5 = vadd.f32 %v8056_v11, %v3696_v60 }
 0x7b5   : > { %v3706_v17 = vsel %vm682_vm1, %v3700_v5, 0.0 }
 0x7b6   : > { %3707 = vadd.xlane.f32.xlu0 %v3706_v17 }
 0x83b   : > { %v3705_v44 = vpop.xlane.xlu1 %3704 }
 0x83c   : > { %v3710_v18 = vmul.f32 0.03125, %v3705_v44  ;;  %v7455_v44 = vld [vmem:[%s9577_s15] ss:$0 sm:$0xff] }
 0x83e   : > { %v3712_v1 = vsub.f32 %v3699_v2, %v3710_v18 }
 0x83f   : > { %v3708_v6 = vpop.xlane.xlu0 %3707 }
 0x840   : > { %v3711_v19 = vmul.f32 0.03125, %v3708_v6  ;;  %v3714_v10 = vmul.f32 %v3712_v1, %v3712_v1 }
 0x842   : > { %v3713_v30 = vsub.f32 %v3700_v5, %v3711_v19  ;;  %v3716_v23 = vsel %vm682_vm1, %v3714_v10, 0.0 }
 0x843   : > { %3717 = vadd.xlane.f32.xlu0 %v3716_v23 }
 0x844   : > { %v3715_v20 = vmul.f32 %v3713_v30, %v3713_v30 }
 0x846   : > { %v3719_v24 = vsel %vm682_vm1, %v3715_v20, 0.0 }
 0x847   : > { %3720 = vadd.xlane.f32.xlu1 %v3719_v24 }
 0x8cc   : > { %v3718_v29 = vpop.xlane.xlu0 %3717 }
 0x8cd   : > { %v3722_v31 = vmul.f32 0.03125, %v3718_v29 }
 0x8cf   : > { %v3724_v32 = vadd.f32 1e-12, %v3722_v31 }
 0x8d0   : > { %v3721_v7 = vpop.xlane.xlu1 %3720 }
 0x8d1   : > { %7999 = vrsqrt.f32 %v3724_v32  ;;  %v3723_v39 = vmul.f32 0.03125, %v3721_v7 }
 0x8d3   : > { %v3725_v35 = vadd.f32 1e-12, %v3723_v39 }
 0x8d5   : > { %8001 = vrsqrt.f32 %v3725_v35 }
 0x8de   : > { %v8000_v36 = vpop.eup %7999 }
 0x8df   : > { %v3728_v38 = vmul.f32 %v8000_v36, %v3712_v1 }
 0x8e1   : > { %v3736_v45 = vmul.f32 %v7449_v15, %v3728_v38 }
 0x8e2   : > { %v8002_v8 = vpop.eup %8001 }
 0x8e3   : > { %v3729_v40 = vmul.f32 %v8002_v8, %v3713_v30  ;;  %v3744_v46 = vadd.f32 %v7450_v22, %v3736_v45  ;;  %v7953_v8 = vld [vmem:[%s9627_s18 + $0x18] sm:$0xff]   ;;  %v7955_v45 = vld [vmem:[%s9627_s18 + $0x10] sm:$0xff]  }
 0x8e5   : > { %v3737_v9 = vmul.f32 %v7449_v15, %v3729_v40  ;;  %v7954_v40 = vld [vmem:[#allocation5 + $0x18] sm:$0xff]  }
 0x8e7   : > { %v3745_v27 = vadd.f32 %v7450_v22, %v3737_v9  ;;  %v7956_v22 = vld [vmem:[#allocation5 + $0x10] sm:$0xff]  }
 0x8e9   : > { %v3746_v12 = vpack.c.bf16 %v3745_v27, %v3744_v46 }
 0x8eb   : > { %7703 = vmatmul.mubr.msk.bf16.vlgmr.msra.gmra.mxu0 %vm682_vm1, %v3746_v12 }
 0x8ec   : > { %7722 = vmatprep.mubr.msk.bf16.mxu0 %vm8244_vm0, %v8243_v0  ;;  %7719 = vmatpush3.bf16.msra.mxu0 %v7953_v8 }
 0x8ed   : > { %7720 = vmatprep.subr.bf16.mxu0 %v8243_v0 }
 0x8f0   : > { %7721 = vmatpush3.bf16.msra.mxu0 %v7955_v45 }
 0x8f1   : > { %7726 = vmatprep.subr.bf16.mxu0 %v8243_v0 }
 0x9ab   : > { %v3807_v50 = vpop.f32.mrf.mxu0 }
 0x9ac   : > { %v3808_v33 = vadd.f32 %v7451_v13, %v3807_v50 }
 0x9ad   : > { %v7704_v42 = vpop.f32.mrf.mxu0 }
 0x9ae   : > { %v3814_v52 = vmul.f32 %v3808_v33, %v3808_v33 }
 0x9af   : > { %v3810_v51 = vpop.f32.mrf.mxu0 }
 0x9b0   : > { %v3816_v3 = vmul.f32 %v3814_v52, %v3808_v33  ;;  %v3811_v4 = vadd.f32 %v7451_v13, %v3810_v51  ;;  %v7461_v13 = vld [vmem:[%s9578_s16] ss:$0 sm:$0xff] }
 0x9b1   : > { %v7705_v54 = vpop.f32.mrf.mxu0  ;;  %v7462_v52 = vld [vmem:[%s9628_s17] ss:$0 sm:$0xff] }
 0x9b2   : > { %v3818_v53 = vmul.f32 0.044715, %v3816_v3  ;;  %v3815_v37 = vmul.f32 %v3811_v4, %v3811_v4  ;;  %v7957_v54 = vld [vmem:[%s9566_s4 + $0x18] sm:$0xff]  }
 0x9b4   : > { %v3820_v55 = vadd.f32 %v3818_v53, %v3808_v33  ;;  %v3817_v56 = vmul.f32 %v3815_v37, %v3811_v4  ;;  %v7958_v37 = vld [vmem:[%s9566_s4 + $0x10] sm:$0xff]  }
 0x9b6   : > { %v3822_v58 = vmul.f32 0.7978846, %v3820_v55  ;;  %v3819_v59 = vmul.f32 0.044715, %v3817_v56 }
 0x9b8   : > { %8003 = vtanh.f32 %v3822_v58  ;;  %v3821_v61 = vadd.f32 %v3819_v59, %v3811_v4 }
 0x9ba   : > { %v3823_v62 = vmul.f32 0.7978846, %v3821_v61 }
 0x9bc   : > { %8005 = vtanh.f32 %v3823_v62 }
 0x9c5   : > { %v8004_v63 = vpop.eup %8003 }
 0x9c6   : > { %v3826_v2 = vadd.f32 1.0, %v8004_v63 }
 0x9c8   : > { %v3828_v60 = vmul.f32 0.5, %v3826_v2 }
 0x9c9   : > { %v8006_v14 = vpop.eup %8005 }
 0x9ca   : > { %v3827_v43 = vadd.f32 1.0, %v8006_v14  ;;  %v3830_v11 = vmul.f32 %v3828_v60, %v3808_v33  ;;  %v7477_v14 = vld [vmem:[%s9567_s5 + $0x1] ss:$0 sm:$0xff] }
 0x9cc   : > { %v3829_v16 = vmul.f32 0.5, %v3827_v43 }
 0x9ce   : > { %v3831_v5 = vmul.f32 %v3829_v16, %v3811_v4 }
 0x9d0   : > { %v3832_v17 = vpack.c.bf16 %v3831_v5, %v3830_v11 }
 0x9d2   : > { %7715 = vmatmul.mubr.msk.bf16.vlgmr.msra.gmra.mxu1 %vm3872_vm6, %v3832_v17 }
 0x9d3   : > { %7738 = vmatprep.mubr.msk.bf16.mxu1 %vm8244_vm0, %v8243_v0  ;;  %7735 = vmatpush3.bf16.msra.mxu1 %v7954_v40 }
 0x9d4   : > { %7736 = vmatprep.subr.bf16.mxu1 %v8243_v0 }
 0x9d7   : > { %7737 = vmatpush3.bf16.msra.mxu1 %v7956_v22 }
 0x9d8   : > { %7748 = vmatprep.subr.bf16.mxu1 %v8243_v0 }
 0xa92   : > { %v3910_v18 = vpop.f32.mrf.mxu1 }
 0xa93   : > { %v3911_v1 = vadd.f32 %v7455_v44, %v3910_v18 }
 0xa94   : > { %v7716_v6 = vpop.f32.mrf.mxu1 }
 0xa95   : > { %v3917_v19 = vadd.f32 %v3911_v1, %v3744_v46 }
 0xa96   : > { %v3913_v10 = vpop.f32.mrf.mxu1 }
 0xa97   : > { %v3914_v30 = vadd.f32 %v7455_v44, %v3913_v10  ;;  %v3921_v23 = vsel %vm682_vm1, %v3917_v19, 0.0  ;;  %v7468_v44 = vld [vmem:[%s9565_s3 + $0x1] ss:$0 sm:$0xff] }
 0xa98   : > { %3922 = vadd.xlane.f32.xlu0 %v3921_v23  ;;  %v7717_v20 = vpop.f32.mrf.mxu1 }
 0xa99   : > { %v3918_v24 = vadd.f32 %v3914_v30, %v3745_v27 }
 0xa9b   : > { %v3924_v25 = vsel %vm682_vm1, %v3918_v24, 0.0 }
 0xa9c   : > { %3925 = vadd.xlane.f32.xlu1 %v3924_v25 }
 0xb21   : > { %v3923_v26 = vpop.xlane.xlu0 %3922 }
 0xb22   : > { %v3927_v29 = vmul.f32 0.03125, %v3923_v26 }
 0xb24   : > { %v3929_v31 = vsub.f32 %v3917_v19, %v3927_v29 }
 0xb25   : > { %v3926_v32 = vpop.xlane.xlu1 %3925 }
 0xb26   : > { %v3928_v7 = vmul.f32 0.03125, %v3926_v32  ;;  %v3931_v39 = vmul.f32 %v3929_v31, %v3929_v31 }
 0xb28   : > { %v3930_v35 = vsub.f32 %v3918_v24, %v3928_v7  ;;  %v3933_v36 = vsel %vm682_vm1, %v3931_v39, 0.0 }
 0xb29   : > { %3934 = vadd.xlane.f32.xlu0 %v3933_v36 }
 0xb2a   : > { %v3932_v38 = vmul.f32 %v3930_v35, %v3930_v35 }
 0xb2c   : > { %v3936_v15 = vsel %vm682_vm1, %v3932_v38, 0.0 }
 0xb2d   : > { %3937 = vadd.xlane.f32.xlu1 %v3936_v15 }
 0xbb2   : > { %v3935_v9 = vpop.xlane.xlu0 %3934 }
 0xbb3   : > { %v3939_v46 = vmul.f32 0.03125, %v3935_v9 }
 0xbb5   : > { %v3941_v27 = vadd.f32 1e-12, %v3939_v46 }
 0xbb6   : > { %v3938_v12 = vpop.xlane.xlu1 %3937 }
 0xbb7   : > { %8007 = vrsqrt.f32 %v3941_v27  ;;  %v3940_v47 = vmul.f32 0.03125, %v3938_v12 }
 0xbb9   : > { %v3942_v48 = vadd.f32 1e-12, %v3940_v47 }
 0xbbb   : > { %8009 = vrsqrt.f32 %v3942_v48 }
 0xbc4   : > { %v8008_v49 = vpop.eup %8007 }
 0xbc5   : > { %v3945_v21 = vmul.f32 %v8008_v49, %v3929_v31 }
 0xbc7   : > { %v3953_v42 = vmul.f32 %v7461_v13, %v3945_v21 }
 0xbc8   : > { %v8010_v50 = vpop.eup %8009 }
 0xbc9   : > { %v3946_v33 = vmul.f32 %v8010_v50, %v3930_v35  ;;  %v9024_v3 = vadd.f32 %v7462_v52, %v3953_v42 }
 0xbcb   : > { %v3954_v51 = vmul.f32 %v7461_v13, %v3946_v33 }
 0xbcd   : > { %v9026_v4 = vadd.f32 %v7462_v52, %v3954_v51 }
 0xbcf   : > { %v3963_v53 = vpack.c.bf16 %v9026_v4, %v9024_v3 }
 0xbd1   : > { %7723 = vmatmul.mubr.msk.bf16.vlgmr.msra.gmra.mxu0 %vm682_vm1, %v3963_v53  ;;  %7739 = vmatmul.mubr.msk.bf16.vlgmr.msra.gmra.mxu1 %vm682_vm1, %v3963_v53 }
 0xbd2   : > { %7727 = vmatpush3.bf16.msra.mxu0 %v7957_v54  ;;  %7730 = vmatprep.mubr.msk.bf16.mxu0 %vm8244_vm0, %v8243_v0 }
 0xbd3   : > { %7728 = vmatprep.subr.bf16.mxu0 %v8243_v0  ;;  %7750 = vmatprep.mubr.msk.bf16.mxu1 %vm8244_vm0, %v8243_v0 }
 0xbd6   : > { %7729 = vmatpush3.bf16.msra.mxu0 %v7958_v37 }
 0xbd7   : > { %7742 = vmatprep.subr.bf16.mxu0 %v8243_v0 }
 0xbd9   : > { %7731 = vmatmul.mubr.msk.bf16.vlgmr.msra.gmra.mxu0 %vm682_vm1, %v3963_v53 }
 0xbda   : > { %7744 = vmatprep.mubr.msk.bf16.mxu0 %vm8244_vm0, %v8243_v0 }
 0xc91   : > { %v4026_v55 = vpop.f32.mrf.mxu0  ;;  %v9047_v56 = vpop.f32.mrf.mxu1 }
 0xc92   : > { %v9063_v18 = vadd.f32 %v7468_v44, %v4026_v55 }
 0xc93   : > { %v7724_v58 = vpop.f32.mrf.mxu0  ;;  %v7740_v59 = vpop.f32.mrf.mxu1 }
 0xc95   : > { %v4029_v61 = vpop.f32.mrf.mxu0  ;;  %v9049_v62 = vpop.f32.mrf.mxu1 }
 0xc96   : > { %v9065_v1 = vadd.f32 %v7468_v44, %v4029_v61 }
 0xc97   : > { %v7725_v63 = vpop.f32.mrf.mxu0  ;;  %v7741_v2 = vpop.f32.mrf.mxu1 }
 0xc99   : > { %v4092_v60 = vpop.f32.mrf.mxu0 }
 0xc9a   : > { %v4093_v43 = vadd.f32 %v7477_v14, %v4092_v60 }
 0xc9b   : > { %v7732_v16 = vpop.f32.mrf.mxu0 }
 0xc9c   : > { %4345 = vrot.lane.b32.xlu1 %v4093_v43, %s8245_s1  ;;  %4339 = vrot.lane.b32.xlu0 %v4093_v43, %s8246_s21 }
 0xc9d   : > { %v4095_v11 = vpop.f32.mrf.mxu0 }
 0xc9e   : > { %v4096_v5 = vadd.f32 %v7477_v14, %v4095_v11 }
 0xc9f   : > { %v7733_v17 = vpop.f32.mrf.mxu0 }
 0xca0   : > { %4351 = vrot.lane.b32.xlu1 %v4093_v43, %s8247_s2  ;;  %4347 = vrot.lane.b32.xlu0 %v4096_v5, %s8245_s1 }
 0xca4   : > { %4353 = vrot.lane.b32.xlu0 %v4096_v5, %s8247_s2  ;;  %4341 = vrot.lane.b32.xlu1 %v4096_v5, %s8246_s21 }
 0xca8   : > { %4167 = vrot.lane.b32.xlu0 %v9063_v18, %s8246_s21  ;;  %4169 = vrot.lane.b32.xlu1 %v9065_v1, %s8246_s21 }
 0xcac   : > { %4175 = vrot.lane.b32.xlu0 %v9065_v1, %s8245_s1  ;;  %4173 = vrot.lane.b32.xlu1 %v9063_v18, %s8245_s1 }
 0xd0e   : > { %v4346_v6 = vpop.permute.xlu1 %4345  ;;  %v4340_v19 = vpop.permute.xlu0 %4339 }
 0xd0f   : > { %v4357_v10 = vcombine.low %v4093_v43, %v4346_v6  ;;  %v4358_v30 = vcombine.high %v4093_v43, %v4346_v6 }
 0xd11   : > { %v4365_v26 = vrot.slane %v4357_v10, %v8565_v34  ;;  %v4372_v29 = vrot.slane %v4358_v30, %v8565_v34 }
 0xd12   : > { %v4352_v23 = vpop.permute.xlu1 %4351  ;;  %v4348_v20 = vpop.permute.xlu0 %4347 }
 0xd13   : > { %v4373_v24 = vcombine.low %v4340_v19, %v4352_v23  ;;  %v4374_v25 = vcombine.high %v4340_v19, %v4352_v23  ;;  %v4425_v45 = vcombine.low %v4096_v5, %v4348_v20  ;;  %v4426_v52 = vcombine.high %v4096_v5, %v4348_v20 }
 0xd15   : > { %v4381_v31 = vrot.slane %v4373_v24, %v8565_v34  ;;  %v4388_v32 = vrot.slane %v4374_v25, %v8565_v34  ;;  %v4433_v48 = vrot.slane %v4425_v45, %v8565_v34  ;;  %v4440_v61 = vrot.slane %v4426_v52, %v8565_v34 }
 0xd16   : > { %v4354_v7 = vpop.permute.xlu0 %4353  ;;  %v4342_v39 = vpop.permute.xlu1 %4341 }
 0xd17   : > { %v4389_v35 = vcombine.low %v4365_v26, %v4381_v31  ;;  %v4390_v36 = vcombine.high %v4365_v26, %v4381_v31  ;;  %v4405_v38 = vcombine.low %v4372_v29, %v4388_v32  ;;  %v4441_v15 = vcombine.low %v4342_v39, %v4354_v7 }
 0xd18   : > { %v4406_v22 = vcombine.high %v4372_v29, %v4388_v32  ;;  %v4442_v49 = vcombine.high %v4342_v39, %v4354_v7 }
 0xd19   : > { %v4397_v8 = vrot.slane %v4389_v35, %v8568_v41  ;;  %v4404_v40 = vrot.slane %v4390_v36, %v8568_v41  ;;  %v4413_v27 = vrot.slane %v4405_v38, %v8568_v41  ;;  %v4449_v12 = vrot.slane %v4441_v15, %v8565_v34 }
 0xd1a   : > { %v4420_v13 = vrot.slane %v4406_v22, %v8568_v41  ;;  %v4456_v51 = vrot.slane %v4442_v49, %v8565_v34  ;;  %v9103_v29 = vpop.permute.xlu0 %4167  ;;  %v9105_v31 = vpop.permute.xlu1 %4169 }
 0xd1b   : > { %v4495_v9 = vpack.c.bf16 %v4404_v40, %v4404_v40  ;;  %v4493_v46 = vpack.c.bf16 %v4397_v8, %v4397_v8  ;;  %v4422_v47 = vcombine.high %v4404_v40, %v8243_v0  ;;  %v4497_v21 = vpack.c.bf16 %v4413_v27, %v4413_v27 }
 0xd1c   : > { %v4457_v50 = vcombine.low %v4433_v48, %v4449_v12  ;;  %v4423_v42 = vcombine.high %v4413_v27, %v8243_v0  ;;  %v4499_v54 = vpack.c.bf16 %v4420_v13, %v4420_v13  ;;  %v4421_v53 = vcombine.high %v4397_v8, %v8243_v0 }
 0xd1d   : > { %4825 = vxpose.xlu0.c.b16.start.end [1/1] (short) (narrow) %v4495_v9, 16  ;;  %4793 = vxpose.xlu1.c.b16.start.end [1/1] (short) (narrow) %v4493_v46, 16  ;;  %v4496_v33 = vpack.c.bf16 %v4422_v47, %v4422_v47  ;;  %v4458_v37 = vcombine.high %v4433_v48, %v4449_v12  ;;  %v4424_v58 = vcombine.high %v4420_v13, %v8243_v0 }
 0xd1e   : > { %v4498_v55 = vpack.c.bf16 %v4423_v42, %v4423_v42  ;;  %v4465_v59 = vrot.slane %v4457_v50, %v8568_v41  ;;  %v4494_v63 = vpack.c.bf16 %v4421_v53, %v4421_v53  ;;  %v4473_v2 = vcombine.low %v4440_v61, %v4456_v51  ;;  %v9107_v32 = vpop.permute.xlu0 %4175  ;;  %v9109_v7 = vpop.permute.xlu1 %4173 }
 0xd1f   : > { %v4500_v14 = vpack.c.bf16 %v4424_v58, %v4424_v58  ;;  %v4472_v43 = vrot.slane %v4458_v37, %v8568_v41  ;;  %v4474_v11 = vcombine.high %v4440_v61, %v4456_v51 }
 0xd20   : > { %v4489_v60 = vcombine.high %v4465_v59, %v8243_v0  ;;  %v4501_v16 = vpack.c.bf16 %v4465_v59, %v4465_v59  ;;  %v4481_v44 = vrot.slane %v4473_v2, %v8568_v41 }
 0xd21   : > { %4857 = vxpose.xlu0.c.b16.start.end [1/1] (short) (narrow) %v4497_v21, 16  ;;  %4841 = vxpose.xlu1.c.b16.start.end [1/1] (short) (narrow) %v4496_v33, 16  ;;  %v4490_v17 = vcombine.high %v4472_v43, %v8243_v0  ;;  %v4503_v6 = vpack.c.bf16 %v4472_v43, %v4472_v43  ;;  %v4488_v30 = vrot.slane %v4474_v11, %v8568_v41 }
 0xd22   : > { %v4502_v5 = vpack.c.bf16 %v4489_v60, %v4489_v60  ;;  %v4491_v10 = vcombine.high %v4481_v44, %v8243_v0  ;;  %v4505_v23 = vpack.c.bf16 %v4481_v44, %v4481_v44 }
 0xd23   : > { %v4504_v19 = vpack.c.bf16 %v4490_v17, %v4490_v17  ;;  %v4492_v24 = vcombine.high %v4488_v30, %v8243_v0  ;;  %v4507_v25 = vpack.c.bf16 %v4488_v30, %v4488_v30 }
 0xd24   : > { %v4506_v20 = vpack.c.bf16 %v4491_v10, %v4491_v10 }
 0xd25   : > { %4889 = vxpose.xlu0.c.b16.start.end [1/1] (short) (narrow) %v4499_v54, 16  ;;  %4873 = vxpose.xlu1.c.b16.start.end [1/1] (short) (narrow) %v4498_v55, 16  ;;  %v4508_v26 = vpack.c.bf16 %v4492_v24, %v4492_v24 }
 0xd29   : > { %4809 = vxpose.xlu0.c.b16.start.end [1/1] (short) (narrow) %v4494_v63, 16  ;;  %4905 = vxpose.xlu1.c.b16.start.end [1/1] (short) (narrow) %v4500_v14, 16 }
 0xd2d   : > { %4921 = vxpose.xlu0.c.b16.start.end [1/1] (short) (narrow) %v4501_v16, 16  ;;  %4937 = vxpose.xlu1.c.b16.start.end [1/1] (short) (narrow) %v4502_v5, 16 }
 0xd31   : > { %4953 = vxpose.xlu0.c.b16.start.end [1/1] (short) (narrow) %v4503_v6, 16  ;;  %4969 = vxpose.xlu1.c.b16.start.end [1/1] (short) (narrow) %v4504_v19, 16 }
 0xd35   : > { %4985 = vxpose.xlu0.c.b16.start.end [1/1] (short) (narrow) %v4505_v23, 16  ;;  %5001 = vxpose.xlu1.c.b16.start.end [1/1] (short) (narrow) %v4506_v20, 16 }
 0xd39   : > { %5017 = vxpose.xlu0.c.b16.start.end [1/1] (short) (narrow) %v4507_v25, 16  ;;  %5033 = vxpose.xlu1.c.b16.start.end [1/1] (short) (narrow) %v4508_v26, 16 }
 0xd3d   : > { %4179 = vrot.lane.b32.xlu1 %v9063_v18, %s8247_s2 }
 0xd42   : > { %4181 = vrot.lane.b32.xlu0 %v9065_v1, %s8247_s2 }
 0xd7f   : > { %v4833_v39 = vpop.trf.xlu0  ;;  %v4801_v35 = vpop.trf.xlu1 }
 0xd83   : > { %v4865_v36 = vpop.trf.xlu0  ;;  %v4849_v38 = vpop.trf.xlu1 }
 0xd84   : > { %v5049_v21 = vcombine.low %v4801_v35, %v4865_v36 }
 0xd86   : > { %v5056_v53 = vrot.slane %v5049_v21, %v8565_v34 }
 0xd87   : > { %v4897_v15 = vpop.trf.xlu0  ;;  %v4881_v8 = vpop.trf.xlu1 }
 0xd88   : > { %v5057_v12 = vcombine.low %v4833_v39, %v4897_v15 }
 0xd8a   : > { %v5064_v50 = vrot.slane %v5057_v12, %v8565_v34 }
 0xd8b   : > { %v4817_v40 = vpop.trf.xlu0  ;;  %v4913_v45 = vpop.trf.xlu1 }
 0xd8c   : > { %v5117_v47 = vcombine.low %v4817_v40, %v4881_v8  ;;  %v5125_v48 = vcombine.low %v4849_v38, %v4913_v45  ;;  %v5081_v59 = vcombine.low %v5056_v53, %v5064_v50  ;;  %v5082_v43 = vcombine.high %v5056_v53, %v5064_v50 }
 0xd8e   : > { %v5124_v42 = vrot.slane %v5117_v47, %v8565_v34  ;;  %v5132_v52 = vrot.slane %v5125_v48, %v8565_v34  ;;  %v5089_v6 = vrot.slane %v5081_v59, %v8568_v41  ;;  %v5096_v24 = vrot.slane %v5082_v43, %v8568_v41 }
 0xd8f   : > { %v4929_v22 = vpop.trf.xlu0  ;;  %v4945_v9 = vpop.trf.xlu1  ;;  %v4253_v59 = vcombine.low %v9065_v1, %v9107_v32 }
 0xd90   : > { %v5149_v2 = vcombine.low %v5124_v42, %v5132_v52  ;;  %v5150_v16 = vcombine.high %v5124_v42, %v5132_v52 }
 0xd92   : > { %v5157_v30 = vrot.slane %v5149_v2, %v8568_v41  ;;  %v5164_v25 = vrot.slane %v5150_v16, %v8568_v41  ;;  %v4261_v16 = vrot.slane %v4253_v59, %v8565_v34 }
 0xd93   : > { %v4961_v46 = vpop.trf.xlu0  ;;  %v4977_v27 = vpop.trf.xlu1 }
 0xd97   : > { %v4993_v49 = vpop.trf.xlu0  ;;  %v5009_v13 = vpop.trf.xlu1 }
 0xd98   : > { %v5065_v33 = vcombine.low %v4929_v22, %v4993_v49  ;;  %v5133_v51 = vcombine.low %v4945_v9, %v5009_v13 }
 0xd9a   : > { %v5072_v61 = vrot.slane %v5065_v33, %v8565_v34  ;;  %v5140_v14 = vrot.slane %v5133_v51, %v8565_v34 }
 0xd9b   : > { %v5025_v54 = vpop.trf.xlu0  ;;  %v5041_v55 = vpop.trf.xlu1 }
 0xd9c   : > { %v5073_v37 = vcombine.low %v4961_v46, %v5025_v54  ;;  %v5141_v58 = vcombine.low %v4977_v27, %v5041_v55  ;;  %v7482_v54 = vld [vmem:[%s9569_s7 + $0x1] ss:$0 sm:$0xff] }
 0xd9d   : > { %v9131_v53 = vadd.f32 %v7482_v54, %v9049_v62 }
 0xd9e   : > { %v5080_v63 = vrot.slane %v5073_v37, %v8565_v34  ;;  %v5148_v60 = vrot.slane %v5141_v58, %v8565_v34  ;;  %v9136_v37 = vadd.f32 %v7482_v54, %v9047_v56 }
 0xda0   : > { %v5097_v11 = vcombine.low %v5072_v61, %v5080_v63  ;;  %v5098_v5 = vcombine.high %v5072_v61, %v5080_v63  ;;  %v5165_v17 = vcombine.low %v5140_v14, %v5148_v60  ;;  %v5166_v44 = vcombine.high %v5140_v14, %v5148_v60 }
 0xda1   : > { %v4254_v61 = vcombine.high %v9065_v1, %v9107_v32  ;;  %v4185_v14 = vcombine.low %v9063_v18, %v9109_v7  ;;  %v4186_v60 = vcombine.high %v9063_v18, %v9109_v7 }
 0xda2   : > { %v5105_v19 = vrot.slane %v5097_v11, %v8568_v41  ;;  %v5112_v10 = vrot.slane %v5098_v5, %v8568_v41  ;;  %v5173_v23 = vrot.slane %v5165_v17, %v8568_v41  ;;  %v5180_v20 = vrot.slane %v5166_v44, %v8568_v41 }
 0xda3   : > { %v4268_v11 = vrot.slane %v4254_v61, %v8565_v34  ;;  %v4200_v5 = vrot.slane %v4186_v60, %v8565_v34 }
 0xda4   : > { %v5113_v26 = vcombine.low %v5089_v6, %v5105_v19  ;;  %v5114_v39 = vcombine.high %v5089_v6, %v5105_v19  ;;  %v5181_v35 = vcombine.low %v5157_v30, %v5173_v23  ;;  %v5182_v36 = vcombine.high %v5157_v30, %v5173_v23 }
 0xda5   : > { %v5115_v38 = vcombine.low %v5096_v24, %v5112_v10  ;;  %v5183_v15 = vcombine.low %v5164_v25, %v5180_v20  ;;  %v5116_v49 = vcombine.high %v5096_v24, %v5112_v10  ;;  %v5184_v21 = vcombine.high %v5164_v25, %v5180_v20 }
 0xda6   : > { %v5195_v8 = vpack.i.b16 %v5182_v36, %v5114_v39  ;;  %v5187_v40 = vpack.i.b16 %v5181_v35, %v5113_v26  ;;  %v5197_v45 = vshrl.u32 %v5114_v39, 16  ;;  %v5198_v22 = vshrl.u32 %v5182_v36, 16 }
 0xda7   : > { %v5189_v9 = vshrl.u32 %v5113_v26, 16  ;;  %v5205_v46 = vshrl.u32 %v5115_v38, 16  ;;  %v5203_v27 = vpack.i.b16 %v5183_v15, %v5115_v38  ;;  %v5190_v47 = vshrl.u32 %v5181_v35, 16 }
 0xda8   : > { %5249 = vxpose.xlu0.c.b16.start.end [1/1] (short) (narrow) %v5195_v8, 16  ;;  %5217 = vxpose.xlu1.c.b16.start.end [1/1] (short) (narrow) %v5187_v40, 16  ;;  %v5199_v12 = vpack.i.b16 %v5198_v22, %v5197_v45  ;;  %v5206_v48 = vshrl.u32 %v5183_v15, 16  ;;  %v5213_v33 = vshrl.u32 %v5116_v49, 16  ;;  %v5214_v42 = vshrl.u32 %v5184_v21, 16 }
 0xda9   : > { %v5191_v13 = vpack.i.b16 %v5190_v47, %v5189_v9  ;;  %v5211_v52 = vpack.i.b16 %v5184_v21, %v5116_v49 }
 0xdaa   : > { %v5207_v50 = vpack.i.b16 %v5206_v48, %v5205_v46  ;;  %v5215_v51 = vpack.i.b16 %v5214_v42, %v5213_v33 }
 0xdac   : > { %5281 = vxpose.xlu0.c.b16.start.end [1/1] (short) (narrow) %v5203_v27, 16  ;;  %5265 = vxpose.xlu1.c.b16.start.end [1/1] (short) (narrow) %v5199_v12, 16 }
 0xdaf   : > { %v4180_v55 = vpop.permute.xlu1 %4179 }
 0xdb0   : > { %5233 = vxpose.xlu0.c.b16.start.end [1/1] (short) (narrow) %v5191_v13, 16  ;;  %5297 = vxpose.xlu1.c.b16.start.end [1/1] (short) (narrow) %v5207_v50, 16  ;;  %v4201_v63 = vcombine.low %v9103_v29, %v4180_v55  ;;  %v4202_v2 = vcombine.high %v9103_v29, %v4180_v55  ;;  %v4193_v29 = vrot.slane %v4185_v14, %v8565_v34 }
 0xdb2   : > { %v4209_v1 = vrot.slane %v4201_v63, %v8565_v34  ;;  %v4216_v32 = vrot.slane %v4202_v2, %v8565_v34 }
 0xdb4   : > { %5313 = vxpose.xlu0.c.b16.start.end [1/1] (short) (narrow) %v5211_v52, 16  ;;  %5329 = vxpose.xlu1.c.b16.start.end [1/1] (short) (narrow) %v5215_v51, 16  ;;  %v4182_v62 = vpop.permute.xlu0 %4181  ;;  %v4217_v7 = vcombine.low %v4193_v29, %v4209_v1  ;;  %v4218_v19 = vcombine.high %v4193_v29, %v4209_v1  ;;  %v4233_v10 = vcombine.low %v4200_v5, %v4216_v32 }
 0xdb5   : > { %v4269_v56 = vcombine.low %v9105_v31, %v4182_v62  ;;  %v4270_v58 = vcombine.high %v9105_v31, %v4182_v62  ;;  %v4234_v30 = vcombine.high %v4200_v5, %v4216_v32 }
 0xdb6   : > { %v4225_v26 = vrot.slane %v4217_v7, %v8568_v41  ;;  %v4232_v39 = vrot.slane %v4218_v19, %v8568_v41  ;;  %v4241_v35 = vrot.slane %v4233_v10, %v8568_v41 }
 0xdb7   : > { %v4277_v43 = vrot.slane %v4269_v56, %v8565_v34  ;;  %v4284_v31 = vrot.slane %v4270_v58, %v8565_v34  ;;  %v4248_v36 = vrot.slane %v4234_v30, %v8568_v41 }
 0xdb8   : > { %4513 = vrot.lane.b32.xlu1 %v9131_v53, %s8246_s21  ;;  %v4249_v9 = vcombine.high %v4225_v26, %v8243_v0  ;;  %v4250_v46 = vcombine.high %v4232_v39, %v8243_v0  ;;  %v4251_v27 = vcombine.high %v4241_v35, %v8243_v0  ;;  %v7486_v54 = vpack.c.bf16 %v4241_v35, %v4225_v26 }
 0xdb9   : > { %v4285_v17 = vcombine.low %v4261_v16, %v4277_v43  ;;  %v4286_v44 = vcombine.high %v4261_v16, %v4277_v43  ;;  %v4301_v6 = vcombine.low %v4268_v11, %v4284_v31  ;;  %v4302_v18 = vcombine.high %v4268_v11, %v4284_v31 }
 0xdba   : > { %v4252_v12 = vcombine.high %v4248_v36, %v8243_v0  ;;  %v7490_v13 = vpack.c.bf16 %v4251_v27, %v4249_v9  ;;  %v7487_v62 = vpack.c.bf16 %v4248_v36, %v4232_v39  ;;  %v4688_v60 = vrot.slane %v7486_v54, %v8565_v34 }
 0xdbb   : > { %v4293_v23 = vrot.slane %v4285_v17, %v8568_v41  ;;  %v4300_v20 = vrot.slane %v4286_v44, %v8568_v41  ;;  %v4309_v24 = vrot.slane %v4301_v6, %v8568_v41  ;;  %v4316_v25 = vrot.slane %v4302_v18, %v8568_v41 }
 0xdbc   : > { %4517 = vrot.lane.b32.xlu1 %v9136_v37, %s8245_s1  ;;  %v7491_v50 = vpack.c.bf16 %v4252_v12, %v4250_v46  ;;  %v4738_v58 = vrot.slane %v7490_v13, %v8565_v34  ;;  %v4696_v43 = vrot.slane %v7487_v62, %v8565_v34 }
 0xdbd   : > { %4511 = vrot.lane.b32.xlu0 %v9136_v37, %s8246_s21  ;;  %v4317_v38 = vcombine.high %v4293_v23, %v8243_v0  ;;  %v4318_v15 = vcombine.high %v4300_v20, %v8243_v0  ;;  %v4319_v8 = vcombine.high %v4309_v24, %v8243_v0  ;;  %v4320_v40 = vcombine.high %v4316_v25, %v8243_v0 }
 0xdbe   : > { %v7488_v33 = vpack.c.bf16 %v4309_v24, %v4293_v23  ;;  %v7489_v42 = vpack.c.bf16 %v4316_v25, %v4300_v20  ;;  %v4746_v59 = vrot.slane %v7491_v50, %v8565_v34  ;;  %v4713_v18 = vcombine.low %v4688_v60, %v4696_v43 }
 0xdbf   : > { %v7492_v47 = vpack.c.bf16 %v4319_v8, %v4317_v38  ;;  %v7493_v48 = vpack.c.bf16 %v4320_v40, %v4318_v15 }
 0xdc0   : > { %4523 = vrot.lane.b32.xlu1 %v9136_v37, %s8247_s2  ;;  %v4704_v61 = vrot.slane %v7488_v33, %v8565_v34  ;;  %v4712_v63 = vrot.slane %v7489_v42, %v8565_v34  ;;  %v4763_v11 = vcombine.low %v4738_v58, %v4746_v59  ;;  %v4720_v26 = vrot.slane %v4713_v18, %v8568_v41 }
 0xdc1   : > { %4519 = vrot.lane.b32.xlu0 %v9131_v53, %s8245_s1  ;;  %v4754_v52 = vrot.slane %v7492_v47, %v8565_v34  ;;  %v4762_v51 = vrot.slane %v7493_v48, %v8565_v34  ;;  %s646_s1 = scalar_lea.vmem [#allocation10], %s7409_s8  ;;  %s8254_s8 = smov [#allocation10]  }
 0xdc2   : > { %v4721_v29 = vcombine.low %v4704_v61, %v4712_v63  ;;  %v4770_v30 = vrot.slane %v4763_v11, %v8568_v41  ;;  %s7287_s21 = sshll.u32 %s646_s1, 4  ;;  %s8167_s30 = sshll.u32 %s8254_s8, 4  ;;  %s9517_s21 = int_to_ptr.vmem [resolvable:$true] %s7287_s21  ;;  %s8168_s30 = int_to_ptr.vmem [resolvable:$false] %s8167_s30 }
 0xdc3   : > { %v4771_v2 = vcombine.low %v4754_v52, %v4762_v51  ;;  %s8163_s0 = scalar_lea.vmem %s9517_s21, 256  ;;  %s8169_s23 = scalar_lea.vmem %s8168_s30, 512 }
 0xdc4   : > { %v4728_v23 = vrot.slane %v4721_v29, %v8568_v41  ;;  %p8164_p6 = scmp.ne.s32.totalorder %s9517_s21, %s8163_s0  ;;  %p8170_p3 = scmp.lt.s32.totalorder %s9517_s21, %s8168_s30 }
 0xdc5   : > { %4525 = vrot.lane.b32.xlu0 %v9131_v53, %s8247_s2  ;;  %v4778_v6 = vrot.slane %v4771_v2, %v8568_v41  ;;  %p8171_p7 = scmp.lt.s32.totalorder %s8169_s23, %s8163_s0 }
 0xdc6   : > { %v4729_v8 = vcombine.low %v4720_v26, %v4728_v23  ;;  %v4730_v52 = vcombine.high %v4720_v26, %v4728_v23  ;;  %p8165_p0 = pnand %p8164_p6, %p9631_p12 }
 0xdc7   : > { %v4779_v25 = vcombine.low %v4770_v30, %v4778_v6  ;;  %v4780_v33 = vcombine.high %v4770_v30, %v4778_v6  ;;  %p8172_p9 = por %p8171_p7, %p8170_p3 }
 0xdc8   : > { %p8166_p5 = pneg %p8165_p0 }
 0xdc9   : > { %v4783_v48 = vpack.i.b16 %v4779_v25, %v4729_v8  ;;  %v4791_v51 = vshrl.u32 %v4780_v33, 16  ;;  %v4789_v62 = vpack.i.b16 %v4780_v33, %v4730_v52 }
 0xdca   : > { %p8173_p13 = pnand %p8172_p9, %p8166_p5 }
 0xe0a   : > { %v5257_v45 = vpop.trf.xlu0  ;;  %v5225_v22 = vpop.trf.xlu1 }
 0xe0e   : > { %v5289_v49 = vpop.trf.xlu0  ;;  %v5273_v21 = vpop.trf.xlu1 }
 0xe0f   : > { %v5345_v14 = vcombine.low %v5225_v22, %v5289_v49  ;;  %v4784_v49 = vshrl.u32 %v4729_v8, 16 }
 0xe11   : > { %v5352_v17 = vrot.slane %v5345_v14, %v8565_v34 }
 0xe12   : > { %v5241_v55 = vpop.trf.xlu0  ;;  %v5305_v56 = vpop.trf.xlu1 }
 0xe13   : > { %v5370_v31 = vcombine.low %v5241_v55, %v5305_v56  ;;  %v4790_v55 = vshrl.u32 %v4730_v52, 16 }
 0xe15   : > { %v5377_v7 = vrot.slane %v5370_v31, %v8565_v34  ;;  %v4792_v56 = vpack.i.b16 %v4791_v51, %v4790_v55 }
 0xe16   : > { %v5321_v16 = vpop.trf.xlu0  ;;  %v5337_v32 = vpop.trf.xlu1 }
 0xe17   : > { %v5353_v1 = vcombine.low %v5257_v45, %v5321_v16  ;;  %v5378_v5 = vcombine.low %v5273_v21, %v5337_v32  ;;  %v4785_v45 = vshrl.u32 %v4779_v25, 16 }
 0xe19   : > { %v5360_v44 = vrot.slane %v5353_v1, %v8565_v34  ;;  %v5385_v19 = vrot.slane %v5378_v5, %v8565_v34  ;;  %v4786_v50 = vpack.i.b16 %v4785_v45, %v4784_v49 }
 0xe1b   : > { %v5361_v10 = vcombine.low %v5352_v17, %v5360_v44  ;;  %v5386_v20 = vcombine.low %v5377_v7, %v5385_v19 }
 0xe1d   : > { %v5368_v24 = vrot.slane %v5361_v10, %v8568_v41  ;;  %v5393_v39 = vrot.slane %v5386_v20, %v8568_v41 }
 0xe1f   : > { %v5398_v35 = vshrl.u32 %v5368_v24, 16  ;;  %v5369_v36 = vcombine.high %v5368_v24, %v8250_v28  ;;  %v5397_v38 = vpack.i.b16 %v5393_v39, %v5368_v24  ;;  %v5399_v15 = vshrl.u32 %v5393_v39, 16 }
 0xe20   : > { %v5394_v40 = vcombine.high %v5393_v39, %v8250_v28 }
 0xe21   : > { %v5404_v22 = vshrl.u32 %v5369_v36, 16  ;;  %v5411_v9 = vsel %vm2101_vm2, %v5397_v38, 0  ;;  %v5400_v46 = vpack.i.b16 %v5399_v15, %v5398_v35 }
 0xe22   : > { %v5403_v27 = vpack.i.b16 %v5394_v40, %v5369_v36  ;;  %v5405_v12 = vshrl.u32 %v5394_v40, 16  ;;  %7743 = vmatpush3.bf16.msra.mxu0 %v5411_v9 }
 0xe23   : > { %v5458_v47 = vsel %vm2101_vm2, %v5400_v46, 0  ;;  %7754 = vmatprep.subr.bf16.mxu0 %v8243_v0 }
 0xe24   : > { %v5406_v21 = vpack.i.b16 %v5405_v12, %v5404_v22  ;;  %7749 = vmatpush3.bf16.msra.mxu1 %v5458_v47  ;;  %v5505_v13 = vsel %vm2101_vm2, %v5403_v27, 0 }
 0xe25   : > { %7745 = vmatmul.mubr.msk.bf16.vlgmr.msra.gmra.mxu0 %vm2097_vm3, %v4783_v48  ;;  %7760 = vmatprep.subr.bf16.mxu1 %v8243_v0 }
 0xe26   : > { %7755 = vmatpush3.bf16.msra.mxu0 %v5505_v13  ;;  %7756 = vmatprep.mubr.msk.bf16.mxu0 %vm8244_vm0, %v8243_v0  ;;  %v5552_v42 = vsel %vm2101_vm2, %v5406_v21, 0 }
 0xe27   : > { %7751 = vmatmul.mubr.msk.bf16.vlgmr.msra.gmra.mxu1 %vm2097_vm3, %v4786_v50  ;;  %7766 = vmatprep.subr.bf16.mxu0 %v8243_v0 }
 0xe28   : > { %7761 = vmatpush3.bf16.msra.mxu1 %v5552_v42  ;;  %7762 = vmatprep.mubr.msk.bf16.mxu1 %vm8244_vm0, %v8243_v0 }
 0xe29   : > { %7772 = vmatprep.subr.bf16.mxu1 %v8243_v0 }
 0xe2a   : > { %v4514_v54 = vpop.permute.xlu1 %4513 }
 0xe2d   : > { %7757 = vmatmul.mubr.msk.bf16.vlgmr.msra.gmra.mxu0 %vm2097_vm3, %v4789_v62 }
 0xe2e   : > { %v4518_v58 = vpop.permute.xlu1 %4517  ;;  %7768 = vmatprep.mubr.msk.bf16.mxu0 %vm8244_vm0, %v8243_v0 }
 0xe2f   : > { %v4512_v59 = vpop.permute.xlu0 %4511  ;;  %7763 = vmatmul.mubr.msk.bf16.vlgmr.msra.gmra.mxu1 %vm2097_vm3, %v4792_v56  ;;  %v4529_v61 = vcombine.low %v9136_v37, %v4518_v58  ;;  %v4530_v63 = vcombine.high %v9136_v37, %v4518_v58 }
 0xe30   : > { %7774 = vmatprep.mubr.msk.bf16.mxu1 %vm8244_vm0, %v8243_v0 }
 0xe31   : > { %v4537_v31 = vrot.slane %v4529_v61, %v8565_v34  ;;  %v4544_v16 = vrot.slane %v4530_v63, %v8565_v34 }
 0xe32   : > { %v4524_v2 = vpop.permute.xlu1 %4523 }
 0xe33   : > { %v4520_v14 = vpop.permute.xlu0 %4519  ;;  %v4545_v60 = vcombine.low %v4512_v59, %v4524_v2  ;;  %v4546_v43 = vcombine.high %v4512_v59, %v4524_v2 }
 0xe34   : > { %v4598_v32 = vcombine.high %v9131_v53, %v4520_v14  ;;  %v4597_v7 = vcombine.low %v9131_v53, %v4520_v14 }
 0xe35   : > { %v4553_v11 = vrot.slane %v4545_v60, %v8565_v34  ;;  %v4560_v1 = vrot.slane %v4546_v43, %v8565_v34 }
 0xe36   : > { %v9235_v30 = vrot.slane %v4598_v32, %v8565_v34  ;;  %v4605_v36 = vrot.slane %v4597_v7, %v8565_v34 }
 0xe37   : > { %v4526_v29 = vpop.permute.xlu0 %4525  ;;  %v4561_v5 = vcombine.low %v4537_v31, %v4553_v11  ;;  %v4562_v17 = vcombine.high %v4537_v31, %v4553_v11  ;;  %v4577_v44 = vcombine.low %v4544_v16, %v4560_v1  ;;  %v4578_v10 = vcombine.high %v4544_v16, %v4560_v1 }
 0xe38   : > { %v4613_v6 = vcombine.low %v4514_v54, %v4526_v29  ;;  %v4614_v37 = vcombine.high %v4514_v54, %v4526_v29 }
 0xe39   : > { %v4569_v18 = vrot.slane %v4561_v5, %v8568_v41  ;;  %v4576_v19 = vrot.slane %v4562_v17, %v8568_v41  ;;  %v4585_v20 = vrot.slane %v4577_v44, %v8568_v41  ;;  %v4592_v45 = vrot.slane %v4578_v10, %v8568_v41 }
 0xe3a   : > { %v9238_v23 = vrot.slane %v4614_v37, %v8565_v34  ;;  %v4621_v24 = vrot.slane %v4613_v6, %v8565_v34 }
 0xe3b   : > { %v4665_v25 = vpack.c.bf16 %v4569_v18, %v4569_v18  ;;  %v4593_v26 = vcombine.high %v4569_v18, %v8243_v0  ;;  %v4594_v39 = vcombine.high %v4576_v19, %v8243_v0  ;;  %v4595_v40 = vcombine.high %v4585_v20, %v8243_v0 }
 0xe3c   : > { %v4645_v53 = vcombine.low %v9235_v30, %v9238_v23  ;;  %v4646_v35 = vcombine.high %v9235_v30, %v9238_v23  ;;  %v4629_v15 = vcombine.low %v4605_v36, %v4621_v24  ;;  %v4667_v22 = vpack.c.bf16 %v4576_v19, %v4576_v19 }
 0xe3d   : > { %5703 = vxpose.xlu1.c.b16.start.end [1/1] (short) (narrow) %v4665_v25, 16  ;;  %v4666_v38 = vpack.c.bf16 %v4593_v26, %v4593_v26  ;;  %v4668_v8 = vpack.c.bf16 %v4594_v39, %v4594_v39  ;;  %v4630_v9 = vcombine.high %v4605_v36, %v4621_v24  ;;  %v4670_v46 = vpack.c.bf16 %v4595_v40, %v4595_v40 }
 0xe3e   : > { %v4596_v27 = vcombine.high %v4592_v45, %v8243_v0  ;;  %v4637_v12 = vrot.slane %v4629_v15, %v8568_v41  ;;  %v4669_v47 = vpack.c.bf16 %v4585_v20, %v4585_v20  ;;  %v4671_v13 = vpack.c.bf16 %v4592_v45, %v4592_v45 }
 0xe3f   : > { %5719 = vxpose.xlu0.c.b16.start.end [1/1] (short) (narrow) %v4666_v38, 16  ;;  %v4644_v21 = vrot.slane %v4630_v9, %v8568_v41 }
 0xe40   : > { %v4672_v48 = vpack.c.bf16 %v4596_v27, %v4596_v27  ;;  %v4661_v49 = vcombine.high %v4637_v12, %v8243_v0  ;;  %v4673_v42 = vpack.c.bf16 %v4637_v12, %v4637_v12 }
 0xe41   : > { %5751 = vxpose.xlu1.c.b16.start.end [1/1] (short) (narrow) %v4668_v8, 16  ;;  %v4662_v33 = vcombine.high %v4644_v21, %v8243_v0  ;;  %v4675_v51 = vpack.c.bf16 %v4644_v21, %v4644_v21 }
 0xe42   : > { %v4674_v50 = vpack.c.bf16 %v4661_v49, %v4661_v49 }
 0xe43   : > { %5735 = vxpose.xlu0.c.b16.start.end [1/1] (short) (narrow) %v4667_v22, 16  ;;  %v4676_v52 = vpack.c.bf16 %v4662_v33, %v4662_v33 }
 0xe45   : > { %5783 = vxpose.xlu1.c.b16.start.end [1/1] (short) (narrow) %v4670_v46, 16  ;;  %v4653_v46 = vrot.slane %v4645_v53, %v8568_v41 }
 0xe47   : > { %5767 = vxpose.xlu0.c.b16.start.end [1/1] (short) (narrow) %v4669_v47, 16  ;;  %v4677_v27 = vpack.c.bf16 %v4653_v46, %v4653_v46  ;;  %v4663_v12 = vcombine.high %v4653_v46, %v8243_v0 }
 0xe49   : > { %5815 = vxpose.xlu1.c.b16.start.end [1/1] (short) (narrow) %v4672_v48, 16  ;;  %v4678_v48 = vpack.c.bf16 %v4663_v12, %v4663_v12 }
 0xe4b   : > { %5799 = vxpose.xlu0.c.b16.start.end [1/1] (short) (narrow) %v4671_v13, 16 }
 0xe4d   : > { %5847 = vxpose.xlu1.c.b16.start.end [1/1] (short) (narrow) %v4674_v50, 16 }
 0xe4f   : > { %5831 = vxpose.xlu0.c.b16.start.end [1/1] (short) (narrow) %v4673_v42, 16 }
 0xe51   : > { %5879 = vxpose.xlu1.c.b16.start.end [1/1] (short) (narrow) %v4676_v52, 16 }
 0xe53   : > { %5863 = vxpose.xlu0.c.b16.start.end [1/1] (short) (narrow) %v4675_v51, 16 }
 0xe9f   : > { %v5711_v50 = vpop.trf.xlu1 }
 0xea1   : > { %v5727_v13 = vpop.trf.xlu0 }
 0xea3   : > { %v5759_v33 = vpop.trf.xlu1 }
 0xea5   : > { %v5743_v53 = vpop.trf.xlu0 }
 0xea7   : > { %v5791_v52 = vpop.trf.xlu1 }
 0xea9   : > { %v5775_v42 = vpop.trf.xlu0 }
 0xeab   : > { %v5823_v30 = vpop.trf.xlu1 }
 0xead   : > { %v5807_v51 = vpop.trf.xlu0 }
 0xeb1   : > { %v5839_v23 = vpop.trf.xlu0 }
 0xee5   : > { %v5447_v54 = vpop.f32.mrf.mxu0 }
 0xee6   : > { %v5595_v62 = vmul.f32 0.35355338, %v5447_v54  ;;  %v5871_v54 = vpop.trf.xlu0 }
 0xee7   : > { %v7746_v55 = vpop.f32.mrf.mxu0  ;;  %v5494_v56 = vpop.f32.mrf.mxu1 }
 0xee8   : > { %v9257_v58 = vadd.f32 %v5595_v62, %v8756_v57  ;;  %v5597_v59 = vmul.f32 0.35355338, %v5494_v56 }
 0xee9   : > { %v5450_v61 = vpop.f32.mrf.mxu0  ;;  %v7752_v63 = vpop.f32.mrf.mxu1 }
 0xeea   : > { %v9260_v2 = vadd.f32 %v5597_v59, %v8756_v57  ;;  %v5596_v14 = vmul.f32 0.35355338, %v5450_v61  ;;  %v5611_v60 = vsel %vm2309_vm4, %v9257_v58, -inf }
 0xeeb   : > { %v7747_v43 = vpop.f32.mrf.mxu0  ;;  %5612 = vmax.xlane.f32.xlu0 %v5611_v60  ;;  %v5497_v31 = vpop.f32.mrf.mxu1 }
 0xeec   : > { %v9265_v16 = vadd.f32 %v5596_v14, %v8756_v57  ;;  %v5598_v11 = vmul.f32 0.35355338, %v5497_v31  ;;  %v5617_v44 = vsel %vm2309_vm4, %v9260_v2, -inf  ;;  %v5959_v43 = vcombine.low %v5711_v50, %v5775_v42 }
 0xeed   : > { %v7753_v1 = vpop.f32.mrf.mxu1  ;;  %v5541_v32 = vpop.f32.mrf.mxu0  ;;  %v5967_v31 = vcombine.low %v5743_v53, %v5807_v51 }
 0xeee   : > { %v9268_v29 = vadd.f32 %v5598_v11, %v8756_v57  ;;  %v5599_v5 = vmul.f32 0.35355338, %v5541_v32  ;;  %v5614_v17 = vsel %vm2309_vm4, %v9265_v16, -inf  ;;  %v6027_v32 = vcombine.low %v5727_v13, %v5791_v52 }
 0xeef   : > { %v7758_v6 = vpop.f32.mrf.mxu0  ;;  %5615 = vmax.xlane.f32.xlu1 %v5614_v17  ;;  %5618 = vmax.xlane.f32.xlu0 %v5617_v44  ;;  %v5588_v37 = vpop.f32.mrf.mxu1  ;;  %v6035_v17 = vcombine.low %v5759_v33, %v5823_v30  ;;  %v5974_v44 = vrot.slane %v5967_v31, %v8565_v34 }
 0xef0   : > { %v9275_v18 = vadd.f32 %v5599_v5, %v8756_v57  ;;  %v5601_v7 = vmul.f32 0.35355338, %v5588_v37  ;;  %v5620_v26 = vsel %vm2309_vm4, %v9268_v29, -inf  ;;  %v5966_v5 = vrot.slane %v5959_v43, %v8565_v34 }
 0xef1   : > { %v5544_v19 = vpop.f32.mrf.mxu0  ;;  %v7764_v10 = vpop.f32.mrf.mxu1 }
 0xef2   : > { %v9278_v20 = vadd.f32 %v5601_v7, %v8756_v57  ;;  %v5600_v24 = vmul.f32 0.35355338, %v5544_v19  ;;  %v5623_v25 = vsel %vm2309_vm4, %v9275_v18, -inf  ;;  %v6034_v10 = vrot.slane %v6027_v32, %v8565_v34 }
 0xef3   : > { %v7759_v39 = vpop.f32.mrf.mxu0  ;;  %5624 = vmax.xlane.f32.xlu0 %v5623_v25  ;;  %5621 = vmax.xlane.f32.xlu1 %v5620_v26  ;;  %v5591_v36 = vpop.f32.mrf.mxu1  ;;  %v5992_v25 = vcombine.high %v5966_v5, %v5974_v44 }
 0xef4   : > { %v9285_v38 = vadd.f32 %v5600_v24, %v8756_v57  ;;  %v5602_v15 = vmul.f32 0.35355338, %v5591_v36  ;;  %v5629_v22 = vsel %vm2309_vm4, %v9278_v20, -inf  ;;  %v6042_v24 = vrot.slane %v6035_v17, %v8565_v34 }
 0xef5   : > { %v7765_v8 = vpop.f32.mrf.mxu1 }
 0xef6   : > { %v9288_v40 = vadd.f32 %v5602_v15, %v8756_v57  ;;  %v5626_v45 = vsel %vm2309_vm4, %v9285_v38, -inf  ;;  %v4660_v57 = vrot.slane %v4646_v35, %v8568_v41  ;;  %v5855_v35 = vpop.trf.xlu1  ;;  %v5991_v8 = vcombine.low %v5966_v5, %v5974_v44 }
 0xef7   : > { %5627 = vmax.xlane.f32.xlu1 %v5626_v45  ;;  %5630 = vmax.xlane.f32.xlu0 %v5629_v22  ;;  %v6059_v46 = vcombine.low %v6034_v10, %v6042_v24 }
 0xef8   : > { %v5632_v9 = vsel %vm2309_vm4, %v9288_v40, -inf  ;;  %v4679_v47 = vpack.c.bf16 %v4660_v57, %v4660_v57  ;;  %v4664_v49 = vcombine.high %v4660_v57, %v8243_v0  ;;  %v6006_v57 = vrot.slane %v5992_v25, %v8568_v41 }
 0xef9   : > { %v6067_v33 = vrot.slane %v6059_v46, %v8568_v41 }
 0xefa   : > { %v4680_v21 = vpack.c.bf16 %v4664_v49, %v4664_v49  ;;  %v5887_v62 = vpop.trf.xlu1 }
 0xefb   : > { %5633 = vmax.xlane.f32.xlu1 %v5632_v9 }
 0xf24   : > { %5895 = vxpose.xlu0.c.b16.start.end [1/1] (short) (narrow) %v4677_v27, 16  ;;  %v6060_v27 = vcombine.high %v6034_v10, %v6042_v24 }
 0xf26   : > { %v6074_v42 = vrot.slane %v6060_v27, %v8568_v41 }
 0xf28   : > { %5927 = vxpose.xlu0.c.b16.start.end [1/1] (short) (narrow) %v4679_v47, 16  ;;  %5911 = vxpose.xlu1.c.b16.start.end [1/1] (short) (narrow) %v4678_v48, 16 }
 0xf2c   : > { %5943 = vxpose.xlu1.c.b16.start.end [1/1] (short) (narrow) %v4680_v21, 16  ;;  %v5999_v21 = vrot.slane %v5991_v8, %v8568_v41 }
 0xf74   : > { %v5613_v55 = vpop.xlane.xlu0 %5612 }
 0xf78   : > { %v9306_v56 = vpop.xlane.xlu1 %5615  ;;  %v9308_v59 = vpop.xlane.xlu0 %5618 }
 0xf79   : > { %v5636_v43 = vsub.f32 %v9265_v16, %v9306_v56 }
 0xf7b   : > { %v5645_v16 = vmul.f32 1.442695, %v5636_v43 }
 0xf7c   : > { %v9310_v61 = vpop.xlane.xlu0 %5624  ;;  %v9312_v63 = vpop.xlane.xlu1 %5621 }
 0xf7d   : > { %v5638_v10 = vsub.f32 %v9268_v29, %v9312_v63 }
 0xf80   : > { %v9314_v14 = vpop.xlane.xlu1 %5627  ;;  %v9316_v60 = vpop.xlane.xlu0 %5630 }
 0xf81   : > { %v5640_v8 = vsub.f32 %v9285_v38, %v9314_v14 }
 0xf84   : > { %v9318_v11 = vpop.xlane.xlu1 %5633 }
 0xf86   : > { %v5903_v1 = vpop.trf.xlu0 }
 0xf87   : > { %v5975_v6 = vcombine.low %v5839_v23, %v5903_v1  ;;  %v5635_v23 = vsub.f32 %v9257_v58, %v5613_v55  ;;  %v5637_v58 = vsub.f32 %v9260_v2, %v9308_v59 }
 0xf89   : > { %v5982_v26 = vrot.slane %v5975_v6, %v8565_v34  ;;  %v5643_v17 = vmul.f32 1.442695, %v5635_v23 }
 0xf8a   : > { %v5935_v37 = vpop.trf.xlu0  ;;  %v5919_v7 = vpop.trf.xlu1 }
 0xf8b   : > { %v5983_v19 = vcombine.low %v5871_v54, %v5935_v37  ;;  %v6043_v36 = vcombine.low %v5855_v35, %v5919_v7  ;;  %8011 = vpow2.f32 %v5643_v17 }
 0xf8c   : > { %8013 = vpow2.f32 %v5645_v16 }
 0xf8d   : > { %v5990_v39 = vrot.slane %v5983_v19, %v8565_v34  ;;  %v6050_v48 = vrot.slane %v6043_v36, %v8565_v34  ;;  %v5639_v36 = vsub.f32 %v9275_v18, %v9310_v61  ;;  %v5653_v18 = vmul.f32 1.442695, %v5640_v8 }
 0xf8e   : > { %v5951_v15 = vpop.trf.xlu1  ;;  %v5642_v61 = vsub.f32 %v9288_v40, %v9318_v11 }
 0xf8f   : > { %v6007_v45 = vcombine.low %v5982_v26, %v5990_v39  ;;  %v6008_v22 = vcombine.high %v5982_v26, %v5990_v39  ;;  %v6051_v9 = vcombine.low %v5887_v62, %v5951_v15  ;;  %v5647_v39 = vmul.f32 1.442695, %v5637_v58 }
 0xf90   : > { %v5649_v15 = vmul.f32 1.442695, %v5638_v10  ;;  %v5651_v63 = vmul.f32 1.442695, %v5639_v36  ;;  %v5657_v38 = vmul.f32 1.442695, %v5642_v61 }
 0xf91   : > { %v6015_v12 = vrot.slane %v6007_v45, %v8568_v41  ;;  %v6022_v47 = vrot.slane %v6008_v22, %v8568_v41  ;;  %v6058_v49 = vrot.slane %v6051_v9, %v8565_v34  ;;  %8015 = vpow2.f32 %v5647_v39 }
 0xf92   : > { %v5641_v22 = vsub.f32 %v9278_v20, %v9316_v60  ;;  %8017 = vpow2.f32 %v5649_v15 }
 0xf93   : > { %v9332_v13 = vcombine.high %v6006_v57, %v6022_v47  ;;  %v6075_v50 = vcombine.low %v6050_v48, %v6058_v49  ;;  %v6076_v53 = vcombine.high %v6050_v48, %v6058_v49  ;;  %v6023_v30 = vcombine.low %v5999_v21, %v6015_v12 }
 0xf94   : > { %v6024_v5 = vcombine.high %v5999_v21, %v6015_v12  ;;  %v6025_v26 = vcombine.low %v6006_v57, %v6022_v47  ;;  %8019 = vpow2.f32 %v5651_v63  ;;  %v5655_v46 = vmul.f32 1.442695, %v5641_v22 }
 0xf95   : > { %v6083_v52 = vrot.slane %v6075_v50, %v8568_v41  ;;  %v6090_v51 = vrot.slane %v6076_v53, %v8568_v41  ;;  %v6099_v1 = vshrl.u32 %v6023_v30, 16  ;;  %v6123_v6 = vshrl.u32 %v9332_v13, 16 }
 0xf96   : > { %v6107_v25 = vshrl.u32 %v6024_v5, 16  ;;  %v6115_v29 = vshrl.u32 %v6025_v26, 16  ;;  %8021 = vpow2.f32 %v5653_v18 }
 0xf97   : > { %v9339_v35 = vcombine.high %v6074_v42, %v6090_v51  ;;  %v6091_v54 = vcombine.low %v6067_v33, %v6083_v52  ;;  %v6092_v62 = vcombine.high %v6067_v33, %v6083_v52  ;;  %v6093_v19 = vcombine.low %v6074_v42, %v6090_v51 }
 0xf98   : > { %v8012_v14 = vpop.eup %8011  ;;  %8023 = vpow2.f32 %v5655_v46 }
 0xf99   : > { %v6097_v31 = vpack.i.b16 %v6091_v54, %v6023_v30  ;;  %v6100_v32 = vshrl.u32 %v6091_v54, 16  ;;  %v6121_v44 = vpack.i.b16 %v9339_v35, %v9332_v13  ;;  %v6124_v37 = vshrl.u32 %v9339_v35, 16  ;;  %v8014_v27 = vpop.eup %8013 }
 0xf9a   : > { %v6108_v7 = vshrl.u32 %v6092_v62, 16  ;;  %v6105_v24 = vpack.i.b16 %v6092_v62, %v6024_v5  ;;  %v6116_v59 = vshrl.u32 %v6093_v19, 16  ;;  %v6113_v45 = vpack.i.b16 %v6093_v19, %v6025_v26 }
 0xf9b   : > { %6127 = vxpose.xlu0.c.b16.start.end [1/1] (short) (narrow) %v6097_v31, 16  ;;  %v6101_v55 = vpack.i.b16 %v6100_v32, %v6099_v1  ;;  %v6125_v56 = vpack.i.b16 %v6124_v37, %v6123_v6  ;;  %8025 = vpow2.f32 %v5657_v38  ;;  %v5659_v57 = vsel %vm2309_vm4, %v8012_v14, 0.0 }
 0xf9c   : > { %v6109_v2 = vpack.i.b16 %v6108_v7, %v6107_v25  ;;  %v6117_v9 = vpack.i.b16 %v6116_v59, %v6115_v29  ;;  %v5662_v20 = vsel %vm2309_vm4, %v8014_v27, 0.0 }
 0xf9d   : > { %6143 = vxpose.xlu1.c.b16.start.end [1/1] (short) (narrow) %v6101_v55, 16 }
 0xf9e   : > { %v8016_v12 = vpop.eup %8015 }
 0xf9f   : > { %6159 = vxpose.xlu0.c.b16.start.end [1/1] (short) (narrow) %v6105_v24, 16  ;;  %v8018_v60 = vpop.eup %8017  ;;  %v5665_v47 = vsel %vm2309_vm4, %v8016_v12, 0.0 }
 0xfa0   : > { %v5668_v11 = vsel %vm2309_vm4, %v8018_v60, 0.0 }
 0xfa1   : > { %6175 = vxpose.xlu1.c.b16.start.end [1/1] (short) (narrow) %v6109_v2, 16  ;;  %v9362_v40 = vpop.eup %8019 }
 0xfa2   : > { %v5671_v49 = vsel %vm2309_vm4, %v9362_v40, 0.0 }
 0xfa3   : > { %6191 = vxpose.xlu0.c.b16.start.end [1/1] (short) (narrow) %v6113_v45, 16  ;;  %v9365_v48 = vpop.eup %8021 }
 0xfa4   : > { %v5674_v50 = vsel %vm2309_vm4, %v9365_v48, 0.0 }
 0xfa5   : > { %6207 = vxpose.xlu1.c.b16.start.end [1/1] (short) (narrow) %v6117_v9, 16  ;;  %v9369_v21 = vpop.eup %8023 }
 0xfa6   : > { %v5677_v33 = vsel %vm2309_vm4, %v9369_v21, 0.0 }
 0xfa8   : > { %v9373_v53 = vpop.eup %8025 }
 0xfa9   : > { %v5680_v42 = vsel %vm2309_vm4, %v9373_v53, 0.0 }
 0xfb0   : > { %5660 = vadd.xlane.f32.xlu0 %v5659_v57 }
 0xfb2   : > { %5663 = vadd.xlane.f32.xlu1 %v5662_v20 }
 0xfb4   : > { %5666 = vadd.xlane.f32.xlu0 %v5665_v47 }
 0xfb6   : > { %5669 = vadd.xlane.f32.xlu1 %v5668_v11 }
 0xfb8   : > { %5672 = vadd.xlane.f32.xlu0 %v5671_v49 }
 0xfba   : > { %5675 = vadd.xlane.f32.xlu1 %v5674_v50 }
 0xfbc   : > { %5678 = vadd.xlane.f32.xlu0 %v5677_v33 }
 0xfbe   : > { %5681 = vadd.xlane.f32.xlu1 %v5680_v42 }
 0xfe9   : > { %6223 = vxpose.xlu0.c.b16.start.end [1/1] (short) (narrow) %v6121_v44, 16 }
 0xfeb   : > { %6239 = vxpose.xlu1.c.b16.start.end [1/1] (short) (narrow) %v6125_v56, 16 }
 0xffd   : > { %v6135_v52 = vpop.trf.xlu0 }
 0xfff   : > { %v6151_v51 = vpop.trf.xlu1 }
0x1001   : > { %v6167_v30 = vpop.trf.xlu0 }
0x1003   : > { %v6183_v23 = vpop.trf.xlu1 }
0x1005   : > { %v6199_v54 = vpop.trf.xlu0 }
0x1006   : > { %v6255_v37 = vcombine.low %v6135_v52, %v6199_v54 }
0x1007   : > { %v6215_v62 = vpop.trf.xlu1 }
0x1008   : > { %v6280_v16 = vcombine.low %v6151_v51, %v6215_v62  ;;  %v6262_v25 = vrot.slane %v6255_v37, %v8565_v34 }
0x100a   : > { %v6287_v45 = vrot.slane %v6280_v16, %v8565_v34 }
0x1039   : > { %v5661_v43 = vpop.xlane.xlu0 %5660 }
0x103a   : > { %8027 = vrcp.f32 %v5661_v43 }
0x103b   : > { %v5664_v31 = vpop.xlane.xlu1 %5663 }
0x103c   : > { %8029 = vrcp.f32 %v5664_v31 }
0x103d   : > { %v5667_v1 = vpop.xlane.xlu0 %5666 }
0x103e   : > { %8031 = vrcp.f32 %v5667_v1 }
0x103f   : > { %v5670_v32 = vpop.xlane.xlu1 %5669 }
0x1040   : > { %8033 = vrcp.f32 %v5670_v32 }
0x1041   : > { %v5673_v5 = vpop.xlane.xlu0 %5672 }
0x1042   : > { %8035 = vrcp.f32 %v5673_v5 }
0x1043   : > { %v5676_v17 = vpop.xlane.xlu1 %5675 }
0x1044   : > { %8037 = vrcp.f32 %v5676_v17 }
0x1045   : > { %v5679_v13 = vpop.xlane.xlu0 %5678 }
0x1046   : > { %8039 = vrcp.f32 %v5679_v13 }
0x1047   : > { %v8028_v35 = vpop.eup %8027  ;;  %v5682_v44 = vpop.xlane.xlu1 %5681 }
0x1048   : > { %8041 = vrcp.f32 %v5682_v44  ;;  %v5691_v58 = vmul.f32 %v8028_v35, %v8012_v14 }
0x1049   : > { %v8030_v6 = vpop.eup %8029 }
0x104a   : > { %v5692_v55 = vmul.f32 %v8030_v6, %v8014_v27 }
0x104b   : > { %v8032_v7 = vpop.eup %8031  ;;  %v6231_v19 = vpop.trf.xlu0 }
0x104c   : > { %v6263_v56 = vcombine.low %v6167_v30, %v6231_v19  ;;  %v5699_v10 = vpack.c.bf16 %v5692_v55, %v5691_v58  ;;  %v5693_v39 = vmul.f32 %v8032_v7, %v8016_v12 }
0x104d   : > { %v8034_v24 = vpop.eup %8033  ;;  %v6247_v26 = vpop.trf.xlu1 }
0x104e   : > { %v6270_v36 = vrot.slane %v6263_v56, %v8565_v34  ;;  %v6288_v2 = vcombine.low %v6183_v23, %v6247_v26  ;;  %v6321_v59 = vsel %vm2309_vm4, %v5699_v10, 0  ;;  %v5694_v15 = vmul.f32 %v8034_v24, %v8018_v60 }
0x104f   : > { %v8036_v8 = vpop.eup %8035  ;;  %7767 = vmatpush3.bf16.xpose.msra.mxu0 %v6321_v59 }
0x1050   : > { %v6271_v29 = vcombine.low %v6262_v25, %v6270_v36  ;;  %v6295_v63 = vrot.slane %v6288_v2, %v8565_v34  ;;  %v5700_v22 = vpack.c.bf16 %v5694_v15, %v5693_v39  ;;  %7778 = vmatprep.subr.bf16.mxu0 %v8243_v0  ;;  %v5695_v18 = vmul.f32 %v8036_v8, %v9362_v40 }
0x1051   : > { %v8038_v9 = vpop.eup %8037 }
0x1052   : > { %v6278_v61 = vrot.slane %v6271_v29, %v8568_v41  ;;  %v6296_v46 = vcombine.low %v6287_v45, %v6295_v63  ;;  %v6367_v38 = vsel %vm2309_vm4, %v5700_v22, 0  ;;  %v5696_v14 = vmul.f32 %v8038_v9, %v9365_v48 }
0x1053   : > { %7773 = vmatpush3.bf16.xpose.msra.mxu1 %v6367_v38  ;;  %v8040_v27 = vpop.eup %8039 }
0x1054   : > { %v6303_v57 = vrot.slane %v6296_v46, %v8568_v41  ;;  %v5701_v12 = vpack.c.bf16 %v5696_v14, %v5695_v18  ;;  %7784 = vmatprep.subr.bf16.mxu1 %v8243_v0  ;;  %v6308_v60 = vshrl.u32 %v6278_v61, 16  ;;  %v5697_v49 = vmul.f32 %v8040_v27, %v9369_v21 }
0x1055   : > { %v8042_v20 = vpop.eup %8041  ;;  %v6279_v52 = vcombine.high %v6278_v61, %v8250_v28 }
0x1056   : > { %v6307_v47 = vpack.i.b16 %v6303_v57, %v6278_v61  ;;  %v6309_v11 = vshrl.u32 %v6303_v57, 16  ;;  %v6413_v40 = vsel %vm2309_vm4, %v5701_v12, 0  ;;  %v5698_v50 = vmul.f32 %v8042_v20, %v9373_v53 }
0x1057   : > { %v6304_v33 = vcombine.high %v6303_v57, %v8250_v28  ;;  %v6314_v30 = vshrl.u32 %v6279_v52, 16 }
0x1058   : > { %7769 = vmatmul.mubr.msk.bf16.vlgmr.msra.gmra.mxu0 %vm2309_vm4, %v6307_v47  ;;  %v6310_v48 = vpack.i.b16 %v6309_v11, %v6308_v60  ;;  %v5702_v42 = vpack.c.bf16 %v5698_v50, %v5697_v49 }
0x1059   : > { %7779 = vmatpush3.bf16.xpose.msra.mxu0 %v6413_v40  ;;  %7780 = vmatprep.mubr.msk.bf16.mxu0 %vm8244_vm0, %v8243_v0  ;;  %v6315_v53 = vshrl.u32 %v6304_v33, 16  ;;  %v6313_v51 = vpack.i.b16 %v6304_v33, %v6279_v52 }
0x105a   : > { %7775 = vmatmul.mubr.msk.bf16.vlgmr.msra.gmra.mxu1 %vm2309_vm4, %v6310_v48  ;;  %7790 = vmatprep.subr.bf16.mxu0 %v8243_v0  ;;  %v6459_v21 = vsel %vm2309_vm4, %v5702_v42, 0 }
0x105b   : > { %7786 = vmatprep.mubr.msk.bf16.mxu1 %vm8244_vm0, %v8243_v0  ;;  %7785 = vmatpush3.bf16.xpose.msra.mxu1 %v6459_v21  ;;  %v6316_v23 = vpack.i.b16 %v6315_v53, %v6314_v30 }
0x105c   : > { %7798 = vmatprep.subr.bf16.mxu1 %v8243_v0 }
0x1060   : > { %7781 = vmatmul.mubr.msk.bf16.vlgmr.msra.gmra.mxu0 %vm2309_vm4, %v6313_v51 }
0x1061   : > { %7794 = vmatprep.mubr.msk.bf16.mxu0 %vm8244_vm0, %v8243_v0 }
0x1062   : > { %7787 = vmatmul.mubr.msk.bf16.vlgmr.msra.gmra.mxu1 %vm2309_vm4, %v6316_v23 }
0x1063   : > { %7802 = vmatprep.mubr.msk.bf16.mxu1 %vm8244_vm0, %v8243_v0 }
0x1118   : > { %v6357_v28 = vpop.f32.mrf.mxu0 }
0x1119   : > { %6501 = vxpose.xlu0.b32.start.end [1/1] (short) (narrow) %v6357_v28, 16 }
0x111a   : > { %v7770_v54 = vpop.f32.mrf.mxu0  ;;  %v6403_v62 = vpop.f32.mrf.mxu1 }
0x111b   : > { %6533 = vxpose.xlu1.b32.start.end [1/1] (short) (narrow) %v6403_v62, 16 }
0x111c   : > { %v6360_v43 = vpop.f32.mrf.mxu0  ;;  %v7776_v31 = vpop.f32.mrf.mxu1 }
0x111e   : > { %v7771_v1 = vpop.f32.mrf.mxu0  ;;  %v6406_v32 = vpop.f32.mrf.mxu1 }
0x1120   : > { %v7777_v5 = vpop.f32.mrf.mxu1  ;;  %v6449_v17 = vpop.f32.mrf.mxu0 }
0x1121   : > { %6565 = vxpose.xlu0.b32.start.end [1/1] (short) (narrow) %v6449_v17, 16 }
0x1122   : > { %v7782_v13 = vpop.f32.mrf.mxu0  ;;  %v6495_v35 = vpop.f32.mrf.mxu1 }
0x1124   : > { %v6452_v44 = vpop.f32.mrf.mxu0  ;;  %v7788_v6 = vpop.f32.mrf.mxu1 }
0x1126   : > { %v7783_v37 = vpop.f32.mrf.mxu0  ;;  %6597 = vxpose.xlu0.b32.start.end [1/1] (short) (narrow) %v6495_v35, 16  ;;  %v6498_v58 = vpop.f32.mrf.mxu1 }
0x1128   : > { %v7789_v55 = vpop.f32.mrf.mxu1 }
0x1129   : > { %v7959_v55 = vld [vmem:[#allocation7 + $0x18] sm:$0xff]  }
0x112a   : > { %7791 = vmatpush3.bf16.msra.mxu0 %v7959_v55 }
0x112b   : > { %7792 = vmatprep.subr.bf16.mxu0 %v8243_v0 }
0x1195   : > { %v6517_v7 = vpop.trf.xlu0 }
0x1197   : > { %v6549_v10 = vpop.trf.xlu1 }
0x1199   : > { %v6518_v19 = vpop.trf.xlu0 }
0x119b   : > { %v6550_v45 = vpop.trf.xlu1 }
0x119d   : > { %v6581_v16 = vpop.trf.xlu0 }
0x119e   : > { %v6629_v24 = vcombine.low %v6517_v7, %v6581_v16  ;;  %v6630_v25 = vcombine.high %v6517_v7, %v6581_v16 }
0x11a0   : > { %v6637_v2 = vrot.slane %v6629_v24, %v8565_v34  ;;  %v6644_v59 = vrot.slane %v6630_v25, %v8565_v34 }
0x11a1   : > { %v6582_v56 = vpop.trf.xlu0 }
0x11a2   : > { %v6697_v29 = vcombine.low %v6518_v19, %v6582_v56  ;;  %v6698_v63 = vcombine.high %v6518_v19, %v6582_v56 }
0x11a4   : > { %v6705_v60 = vrot.slane %v6697_v29, %v8565_v34  ;;  %v6712_v47 = vrot.slane %v6698_v63, %v8565_v34 }
0x11a5   : > { %v6613_v26 = vpop.trf.xlu0 }
0x11a6   : > { %v6645_v39 = vcombine.low %v6549_v10, %v6613_v26  ;;  %v6646_v36 = vcombine.high %v6549_v10, %v6613_v26 }
0x11a8   : > { %v6653_v15 = vrot.slane %v6645_v39, %v8565_v34  ;;  %v6660_v8 = vrot.slane %v6646_v36, %v8565_v34 }
0x11a9   : > { %v6614_v22 = vpop.trf.xlu0 }
0x11aa   : > { %v6661_v9 = vcombine.low %v6637_v2, %v6653_v15  ;;  %v6662_v18 = vcombine.high %v6637_v2, %v6653_v15  ;;  %v6677_v61 = vcombine.low %v6644_v59, %v6660_v8  ;;  %v6678_v46 = vcombine.high %v6644_v59, %v6660_v8 }
0x11ab   : > { %v6713_v38 = vcombine.low %v6550_v45, %v6614_v22  ;;  %v6714_v14 = vcombine.high %v6550_v45, %v6614_v22  ;;  %v7960_v45 = vld [vmem:[#allocation7 + $0x10] sm:$0xff]  }
0x11ac   : > { %v6669_v27 = vrot.slane %v6661_v9, %v8568_v41  ;;  %v6676_v57 = vrot.slane %v6662_v18, %v8568_v41  ;;  %v6685_v12 = vrot.slane %v6677_v61, %v8568_v41  ;;  %v6692_v20 = vrot.slane %v6678_v46, %v8568_v41  ;;  %7793 = vmatpush3.bf16.msra.mxu0 %v7960_v45 }
0x11ad   : > { %v6721_v11 = vrot.slane %v6713_v38, %v8565_v34  ;;  %v6728_v40 = vrot.slane %v6714_v14, %v8565_v34  ;;  %7806 = vmatprep.subr.bf16.mxu0 %v8243_v0 }
0x11ae   : > { %v6765_v49 = vcombine.low %v6669_v27, %v6676_v57  ;;  %v7502_v50 = vcombine.high %v6669_v27, %v6676_v57  ;;  %v6781_v48 = vcombine.low %v6685_v12, %v6692_v20  ;;  %v7503_v33 = vcombine.high %v6685_v12, %v6692_v20 }
0x11af   : > { %v6729_v42 = vcombine.low %v6705_v60, %v6721_v11  ;;  %v6730_v52 = vcombine.high %v6705_v60, %v6721_v11  ;;  %v6745_v21 = vcombine.low %v6712_v47, %v6728_v40  ;;  %v6746_v53 = vcombine.high %v6712_v47, %v6728_v40 }
0x11b0   : > { %v6772_v51 = vrot.slane %v6765_v49, %v8565_v34  ;;  %v6780_v30 = vrot.slane %v7502_v50, %v8565_v34  ;;  %v6788_v23 = vrot.slane %v6781_v48, %v8565_v34  ;;  %v6796_v28 = vrot.slane %v7503_v33, %v8565_v34 }
0x11b1   : > { %v6737_v54 = vrot.slane %v6729_v42, %v8568_v41  ;;  %v6744_v62 = vrot.slane %v6730_v52, %v8568_v41  ;;  %v6753_v43 = vrot.slane %v6745_v21, %v8568_v41  ;;  %v6760_v31 = vrot.slane %v6746_v53, %v8568_v41 }
0x11b2   : > { %v6798_v1 = vcombine.high %v6772_v51, %v6780_v30  ;;  %v6814_v32 = vcombine.high %v6788_v23, %v6796_v28  ;;  %v6797_v5 = vcombine.low %v6772_v51, %v6780_v30  ;;  %v6813_v17 = vcombine.low %v6788_v23, %v6796_v28  ;;  %v7507_v51 = vld [vmem:[%s9571_s9 + $0x1] ss:$0 sm:$0xff] }
0x11b3   : > { %v6833_v13 = vcombine.low %v6737_v54, %v6744_v62  ;;  %v7504_v35 = vcombine.high %v6737_v54, %v6744_v62  ;;  %v6849_v44 = vcombine.low %v6753_v43, %v6760_v31  ;;  %v7505_v6 = vcombine.high %v6753_v43, %v6760_v31 }
0x11b4   : > { %v6805_v37 = vrot.slane %v6797_v5, %v8568_v41  ;;  %v6821_v58 = vrot.slane %v6813_v17, %v8568_v41  ;;  %v6812_v10 = vrot.slane %v6798_v1, %v8568_v41  ;;  %v6828_v24 = vrot.slane %v6814_v32, %v8568_v41 }
0x11b5   : > { %v6840_v7 = vrot.slane %v6833_v13, %v8565_v34  ;;  %v6848_v19 = vrot.slane %v7504_v35, %v8565_v34  ;;  %v6856_v16 = vrot.slane %v6849_v44, %v8565_v34  ;;  %v6864_v56 = vrot.slane %v7505_v6, %v8565_v34 }
0x11b6   : > { %v6829_v25 = vcombine.low %v6805_v37, %v6821_v58  ;;  %v6831_v29 = vcombine.low %v6812_v10, %v6828_v24  ;;  %v6830_v22 = vcombine.high %v6805_v37, %v6821_v58  ;;  %v6832_v14 = vcombine.high %v6812_v10, %v6828_v24 }
0x11b7   : > { %v6866_v26 = vcombine.high %v6840_v7, %v6848_v19  ;;  %v6882_v39 = vcombine.high %v6856_v16, %v6864_v56  ;;  %v6865_v36 = vcombine.low %v6840_v7, %v6848_v19  ;;  %v6881_v2 = vcombine.low %v6856_v16, %v6864_v56  ;;  %v7961_v19 = vld [vmem:[#allocation8 + $0x18] sm:$0xff]  }
0x11b8   : > { %7799 = vmatpush3.bf16.msra.mxu1 %v7961_v19 }
0x11b9   : > { %v6880_v59 = vrot.slane %v6866_v26, %v8568_v41  ;;  %v6896_v15 = vrot.slane %v6882_v39, %v8568_v41  ;;  %v6873_v8 = vrot.slane %v6865_v36, %v8568_v41  ;;  %v6889_v34 = vrot.slane %v6881_v2, %v8568_v41  ;;  %7800 = vmatprep.subr.bf16.mxu1 %v8243_v0  ;;  %v7513_v2 = vld [vmem:[%s9572_s10 + $0x1] ss:$0 sm:$0xff] }
0x11bb   : > { %v6899_v63 = vcombine.low %v6880_v59, %v6896_v15  ;;  %v6898_v9 = vcombine.high %v6873_v8, %v6889_v34  ;;  %v6897_v18 = vcombine.low %v6873_v8, %v6889_v34  ;;  %v6900_v38 = vcombine.high %v6880_v59, %v6896_v15  ;;  %v7514_v34 = vld [vmem:[%s9573_s11 + $0x1] ss:$0 sm:$0xff] }
0x11bd   : > { %v7929_v61 = vpack.i.bf16 %v6899_v63, %v6831_v29  ;;  %v7924_v46 = vpack.i.bf16 %v6898_v9, %v6830_v22  ;;  %v7934_v27 = vpack.i.bf16 %v6900_v38, %v6832_v14  ;;  %v7963_v9 = vld [vmem:[%s9576_s14 + $0x38] sm:$0xff]   ;;  %v7516_v38 = vld [vmem:[%s9575_s13 + $0x1] ss:$0 sm:$0xff] }
0x11bf   : > { %7930 = vrot.lane.b32.xlu0 %v7929_v61, %s8251_s26  ;;  %7925 = vrot.lane.b32.xlu1 %v7924_v46, %s8252_s27  ;;  %v7965_v61 = vld [vmem:[%s9576_s14 + $0x28] sm:$0xff]   ;;  %v7966_v46 = vld [vmem:[%s9576_s14 + $0x20] sm:$0xff]  }
0x11c3   : > { %7935 = vrot.lane.b32.xlu1 %v7934_v27, %s8253_s29  ;;  %s9629_s29 = sld [smem:[#allocation28_spill]] }
0x11c9   : > { %s9630_s22 = smov %s9629_s29  ;;  %s9515_s25 = scalar_lea.hbm %s9629_s29, %s7545_s19 }
0x1231   : > { %v7931_v41 = vpop.permute.xlu0 %7930  ;;  %v7926_v57 = vpop.permute.xlu1 %7925 }
0x1232   : > { %v7928_v12 = vunpack.i.h.bf16 %v7926_v57  ;;  %v7927_v20 = vunpack.i.l.bf16 %v7926_v57  ;;  %v7933_v60 = vunpack.i.h.bf16 %v7931_v41  ;;  %v7932_v47 = vunpack.i.l.bf16 %v7931_v41 }
0x1234   : > { %v6925_v11 = vsel %vm2097_vm3, %v6829_v25, %v7927_v20  ;;  %v6926_v40 = vsel %vm2097_vm3, %v6897_v18, %v7928_v12  ;;  %v7964_v18 = vld [vmem:[%s9576_s14 + $0x30] sm:$0xff]  }
0x1235   : > { %v7936_v49 = vpop.permute.xlu1 %7935  ;;  %v6927_v33 = vsel %vm2309_vm4, %v6925_v11, %v7932_v47  ;;  %v6928_v42 = vsel %vm2309_vm4, %v6926_v40, %v7933_v60 }
0x1236   : > { %v7938_v50 = vunpack.i.h.bf16 %v7936_v49  ;;  %v7937_v48 = vunpack.i.l.bf16 %v7936_v49 }
0x1238   : > { %v6929_v52 = vsel %vm3628_vm5, %v6927_v33, %v7937_v48  ;;  %v6930_v21 = vsel %vm3628_vm5, %v6928_v42, %v7938_v50 }
0x1239   : > { %v6931_v53 = vpack.c.bf16 %v6930_v21, %v6929_v52 }
0x123b   : > { %7795 = vmatmul.mubr.msk.bf16.vlgmr.msra.gmra.mxu0 %vm682_vm1, %v6931_v53 }
0x123c   : > { %7814 = vmatprep.mubr.msk.bf16.mxu0 %vm8244_vm0, %v8243_v0  ;;  %7807 = vmatpush3.bf16.msra.mxu0 %v7963_v9 }
0x123d   : > { %7808 = vmatprep.subr.bf16.mxu0 %v8243_v0 }
0x1240   : > { %7809 = vmatpush3.bf16.msra.mxu0 %v7964_v18 }
0x1241   : > { %7810 = vmatprep.subr.bf16.mxu0 %v8243_v0 }
0x1244   : > { %7811 = vmatpush3.bf16.msra.mxu0 %v7965_v61 }
0x1245   : > { %7812 = vmatprep.subr.bf16.mxu0 %v8243_v0 }
0x1248   : > { %7813 = vmatpush3.bf16.msra.mxu0 %v7966_v46 }
0x12fb   : > { %v6994_v30 = vpop.f32.mrf.mxu0 }
0x12fc   : > { %v6995_v23 = vadd.f32 %v7507_v51, %v6994_v30 }
0x12fd   : > { %v7796_v28 = vpop.f32.mrf.mxu0 }
0x12fe   : > { %v7001_v54 = vadd.f32 %v6995_v23, %v9024_v3 }
0x12ff   : > { %v6997_v62 = vpop.f32.mrf.mxu0 }
0x1300   : > { %v6998_v43 = vadd.f32 %v7507_v51, %v6997_v62  ;;  %v7007_v31 = vsel %vm682_vm1, %v7001_v54, 0.0 }
0x1301   : > { %7008 = vadd.xlane.f32.xlu1 %v7007_v31  ;;  %v7797_v1 = vpop.f32.mrf.mxu0 }
0x1302   : > { %v7002_v32 = vadd.f32 %v6998_v43, %v9026_v4  ;;  %v7962_v4 = vld [vmem:[#allocation8 + $0x10] sm:$0xff]   ;;  %v7529_v43 = vld [vmem:[%s9577_s15 + $0x1] ss:$0 sm:$0xff] }
0x1303   : > { %7801 = vmatpush3.bf16.msra.mxu1 %v7962_v4 }
0x1304   : > { %v7010_v5 = vsel %vm682_vm1, %v7002_v32, 0.0 }
0x1305   : > { %7011 = vadd.xlane.f32.xlu0 %v7010_v5 }
0x138a   : > { %v7009_v17 = vpop.xlane.xlu1 %7008 }
0x138b   : > { %v7013_v13 = vmul.f32 0.03125, %v7009_v17 }
0x138d   : > { %v7015_v35 = vsub.f32 %v7001_v54, %v7013_v13 }
0x138e   : > { %v7012_v44 = vpop.xlane.xlu0 %7011 }
0x138f   : > { %v7014_v6 = vmul.f32 0.03125, %v7012_v44  ;;  %v7017_v37 = vmul.f32 %v7015_v35, %v7015_v35 }
0x1391   : > { %v7016_v58 = vsub.f32 %v7002_v32, %v7014_v6  ;;  %v7019_v3 = vsel %vm682_vm1, %v7017_v37, 0.0 }
0x1392   : > { %7020 = vadd.xlane.f32.xlu1 %v7019_v3 }
0x1393   : > { %v7018_v55 = vmul.f32 %v7016_v58, %v7016_v58 }
0x1395   : > { %v7022_v7 = vsel %vm682_vm1, %v7018_v55, 0.0 }
0x1396   : > { %7023 = vadd.xlane.f32.xlu1 %v7022_v7 }
0x141b   : > { %v7021_v16 = vpop.xlane.xlu1 %7020 }
0x141c   : > { %v7025_v56 = vmul.f32 0.03125, %v7021_v16 }
0x141e   : > { %v7027_v10 = vadd.f32 1e-12, %v7025_v56 }
0x141f   : > { %v7024_v24 = vpop.xlane.xlu1 %7023 }
0x1420   : > { %8043 = vrsqrt.f32 %v7027_v10  ;;  %v7026_v25 = vmul.f32 0.03125, %v7024_v24 }
0x1422   : > { %v7028_v26 = vadd.f32 1e-12, %v7026_v25 }
0x1424   : > { %8045 = vrsqrt.f32 %v7028_v26 }
0x142d   : > { %v8044_v39 = vpop.eup %8043 }
0x142e   : > { %v7031_v36 = vmul.f32 %v8044_v39, %v7015_v35 }
0x1430   : > { %v7039_v8 = vmul.f32 %v7513_v2, %v7031_v36 }
0x1431   : > { %v8046_v59 = vpop.eup %8045 }
0x1432   : > { %v7032_v15 = vmul.f32 %v8046_v59, %v7016_v58  ;;  %v7047_v29 = vadd.f32 %v7514_v34, %v7039_v8  ;;  %v7537_v8 = vld [vmem:[%s9578_s16 + $0x1] ss:$0 sm:$0xff] }
0x1434   : > { %v7040_v45 = vmul.f32 %v7513_v2, %v7032_v15 }
0x1436   : > { %v7048_v63 = vadd.f32 %v7514_v34, %v7040_v45  ;;  %v7538_v45 = vld [vmem:[%s9628_s17 + $0x1] ss:$0 sm:$0xff] }
0x1438   : > { %v7049_v22 = vpack.c.bf16 %v7048_v63, %v7047_v29 }
0x143a   : > { %7803 = vmatmul.mubr.msk.bf16.vlgmr.msra.gmra.mxu1 %vm682_vm1, %v7049_v22 }
0x14fa   : > { %v7112_v14 = vpop.f32.mrf.mxu1 }
0x14fb   : > { %v7113_v27 = vadd.f32 %v7516_v38, %v7112_v14 }
0x14fc   : > { %v7804_v41 = vpop.f32.mrf.mxu1 }
0x14fd   : > { %v7119_v57 = vmul.f32 %v7113_v27, %v7113_v27 }
0x14fe   : > { %v7115_v12 = vpop.f32.mrf.mxu1 }
0x14ff   : > { %v7121_v20 = vmul.f32 %v7119_v57, %v7113_v27  ;;  %v7116_v60 = vadd.f32 %v7516_v38, %v7115_v12 }
0x1500   : > { %v7805_v47 = vpop.f32.mrf.mxu1 }
0x1501   : > { %v7123_v11 = vmul.f32 0.044715, %v7121_v20  ;;  %v7120_v40 = vmul.f32 %v7116_v60, %v7116_v60 }
0x1503   : > { %v7125_v0 = vadd.f32 %v7123_v11, %v7113_v27  ;;  %v7122_v49 = vmul.f32 %v7120_v40, %v7116_v60 }
0x1505   : > { %v7127_v50 = vmul.f32 0.7978846, %v7125_v0  ;;  %v7124_v48 = vmul.f32 0.044715, %v7122_v49 }
0x1507   : > { %8047 = vtanh.f32 %v7127_v50  ;;  %v7126_v33 = vadd.f32 %v7124_v48, %v7116_v60 }
0x1509   : > { %v7128_v42 = vmul.f32 0.7978846, %v7126_v33 }
0x150b   : > { %8049 = vtanh.f32 %v7128_v42 }
0x1514   : > { %v8048_v52 = vpop.eup %8047 }
0x1515   : > { %v7131_v21 = vadd.f32 1.0, %v8048_v52 }
0x1517   : > { %v7133_v51 = vmul.f32 0.5, %v7131_v21 }
0x1518   : > { %v8050_v53 = vpop.eup %8049 }
0x1519   : > { %v7132_v30 = vadd.f32 1.0, %v8050_v53  ;;  %v7135_v28 = vmul.f32 %v7133_v51, %v7113_v27 }
0x151b   : > { %v7134_v23 = vmul.f32 0.5, %v7132_v30 }
0x151d   : > { %v7136_v54 = vmul.f32 %v7134_v23, %v7116_v60 }
0x151f   : > { %v7137_v62 = vpack.c.bf16 %v7136_v54, %v7135_v28 }
0x1521   : > { %7815 = vmatmul.mubr.msk.bf16.vlgmr.msra.gmra.mxu0 %vm3872_vm6, %v7137_v62 }
0x15e1   : > { %v7216_v31 = vpop.f32.mrf.mxu0 }
0x15e2   : > { %v7217_v1 = vadd.f32 %v7529_v43, %v7216_v31 }
0x15e3   : > { %v7816_v32 = vpop.f32.mrf.mxu0 }
0x15e4   : > { %v7223_v5 = vadd.f32 %v7217_v1, %v7047_v29 }
0x15e5   : > { %v7219_v17 = vpop.f32.mrf.mxu0 }
0x15e6   : > { %v7220_v13 = vadd.f32 %v7529_v43, %v7219_v17  ;;  %v7229_v35 = vsel %vm682_vm1, %v7223_v5, 0.0 }
0x15e7   : > { %7230 = vadd.xlane.f32.xlu0 %v7229_v35  ;;  %v7817_v44 = vpop.f32.mrf.mxu0 }
0x15e8   : > { %v7224_v6 = vadd.f32 %v7220_v13, %v7048_v63 }
0x15ea   : > { %v7232_v37 = vsel %vm682_vm1, %v7224_v6, 0.0 }
0x15eb   : > { %7233 = vadd.xlane.f32.xlu1 %v7232_v37 }
0x1670   : > { %v7231_v58 = vpop.xlane.xlu0 %7230 }
0x1671   : > { %v7235_v3 = vmul.f32 0.03125, %v7231_v58 }
0x1673   : > { %v7237_v55 = vsub.f32 %v7223_v5, %v7235_v3 }
0x1674   : > { %v7234_v7 = vpop.xlane.xlu1 %7233 }
0x1675   : > { %v7236_v19 = vmul.f32 0.03125, %v7234_v7  ;;  %v7239_v4 = vmul.f32 %v7237_v55, %v7237_v55 }
0x1677   : > { %v7238_v16 = vsub.f32 %v7224_v6, %v7236_v19  ;;  %v7241_v56 = vsel %vm682_vm1, %v7239_v4, 0.0 }
0x1678   : > { %7242 = vadd.xlane.f32.xlu0 %v7241_v56 }
0x1679   : > { %v7240_v10 = vmul.f32 %v7238_v16, %v7238_v16 }
0x167b   : > { %v7244_v24 = vsel %vm682_vm1, %v7240_v10, 0.0 }
0x167c   : > { %7245 = vadd.xlane.f32.xlu1 %v7244_v24 }
0x1701   : > { %v7243_v25 = vpop.xlane.xlu0 %7242 }
0x1702   : > { %v7247_v26 = vmul.f32 0.03125, %v7243_v25 }
0x1704   : > { %v7249_v39 = vadd.f32 1e-12, %v7247_v26 }
0x1705   : > { %v7246_v36 = vpop.xlane.xlu1 %7245 }
0x1706   : > { %8051 = vrsqrt.f32 %v7249_v39  ;;  %v7248_v2 = vmul.f32 0.03125, %v7246_v36 }
0x1708   : > { %v7250_v59 = vadd.f32 1e-12, %v7248_v2 }
0x170a   : > { %8053 = vrsqrt.f32 %v7250_v59 }
0x1713   : > { %v8052_v15 = vpop.eup %8051 }
0x1714   : > { %v7253_v34 = vmul.f32 %v8052_v15, %v7237_v55 }
0x1716   : > { %v7261_v29 = vmul.f32 %v7537_v8, %v7253_v34 }
0x1717   : > { %v8054_v63 = vpop.eup %8053 }
0x1718   : > { %v7269_v22 = vadd.f32 %v7538_v45, %v7261_v29  ;;  %v7254_v9 = vmul.f32 %v8054_v63, %v7238_v16 }
0x171a   : > { %v7262_v18 = vmul.f32 %v7537_v8, %v7254_v9  ;;  %7271 = vst.msk [vmem:[%s646_s1] sm:$0xff] %vm682_vm1, %v7269_v22 }
0x171c   : > { %v7270_v61 = vadd.f32 %v7538_v45, %v7262_v18 }
0x171e   : > { %7272 = vst.msk [vmem:[%s646_s1 + $0x8] sm:$0xff] %vm682_vm1, %v7270_v61 }
0x171f   : > { %8176 = shalt.err (!%p8173_p13)
}
0x1720   : > { %s8177_s19 = scalar_lea.hbm %s9515_s25, 256  ;;  %s8181_s26 = scalar_lea.hbm %s9630_s22, 512 }
0x1721   : > { %p8178_p1 = scmp.ne.s32.totalorder %s9515_s25, %s8177_s19  ;;  %p8182_p11 = scmp.lt.s32.totalorder %s9515_s25, %s9630_s22 }
0x1722   : > { %p8183_p2 = scmp.lt.s32.totalorder %s8181_s26, %s8177_s19 }
0x1723   : > { %p8179_p8 = pnand %p8178_p1, %p9631_p12 }
0x1724   : > { %p8184_p4 = por %p8183_p2, %p8182_p11 }
0x1725   : > { %p8180_p10 = pneg %p8179_p8 }
0x1727   : > { %p8185_p6 = pnand %p8184_p4, %p8180_p10 }
0x1729   : > { %8188 = shalt.err (!%p8185_p6)
}
0x172a   : > { %s8255_s0 = smov 128  }
0x172b   : > { %7832 = dma.vmem_to_hbm [thread:$0]  (%p9631_p12), %s9517_s21, 256, %s9515_s25, %s7274_s6, %s8255_s0, %s8255_s0, %s8252_s27  }
0x172c PF: > { %s9632_s30 = sld [smem:[#allocation15_spill]] }
0x172d   : > { %s9633_s23 = sld [smem:[#allocation18_spill]] }
0x172e   : > { %s9634_s1 = sld [smem:[#allocation17_spill]] }
0x1732   : > { %s7302_s2 = sand.u32 1, %s9632_s30  }
0x1733   : > { %p9635_p0 = scmp.ne.s32.totalorder %s9633_s23, 0  ;;  %s7303_s19 = scalar_lea.sflag [#allocation4], %s7302_s2 }
0x1734   : > { %p9636_p5 = scmp.ge.s32.totalorder %s9634_s1, 2 }
0x1736   : > { %p7849_p3 = pnand %p9636_p5, %p9635_p0 }
0x1738   : > { %p7850_p7 = pneg %p7849_p3 }
0x173a   : > { %8218 = dma.done.wait (%p7850_p7), %s7303_s19, 256  }
0x173b   : > { %8220 = vsyncadd (%p7850_p7), %s7303_s19, 4294967040  ;;  %s9637_s30 = sld [smem:[#allocation19_spill]]  ;;  %s9640_s27 = smov %s8227_s28 }
0x173c   : > { %s9638_s20 = sld [smem:[#allocation16_spill]] }
0x173d   : > { %s9639_s29 = sld [smem:[#allocation20_spill]] }
0x1741   : > { %p33_p9 = scmp.ge.s32.totalorder %s9637_s30, 4  }
0x1742   : > { %s9641_s28 = smov %s9638_s20 }
0x1743   :  { %35 = sbr.rel (!%p33_p9) target bundleno = 16 (0x10), region = 168 }
0x1748   :  { %7308 = vsyncpa [#allocation3], 1 }
0x1749   :  { %7310 = vsyncpa [#allocation3 + $0x1], 1 }
0x174a   :  { %7311 = vsyncpa [#allocation6], 1 }
0x174b   :  { %7312 = vsyncpa [#allocation9], 1 }
0x174c   :  { %7313 = vsyncpa [#allocation4], 1 }
0x174d   :  { %7315 = vsyncpa [#allocation4 + $0x1], 1 }

</bundles_post_ra>
